<compile_context>
chip_gen: v5e
topology: v5e:2x2
jax: 0.10.0
libtpu: 0.0.40
codegen_flags: <defaults>
</compile_context>

<pallas_src>
from functools import partial

import numpy as np
import jax
import jax.numpy as jnp
from jax.experimental import pallas as pl
from jax.experimental.pallas import tpu as pltpu

_LN_EPS = 1e-5                      # PyTorch nn.LayerNorm default
_SQRT_2_OVER_PI = 0.7978845608028654


def _layernorm(x, gamma, beta):
    mu = jnp.mean(x, axis=-1, keepdims=True)
    xc = x - mu
    var = jnp.mean(xc * xc, axis=-1, keepdims=True)
    return xc * jax.lax.rsqrt(var + _LN_EPS) * gamma + beta


def _gelu_tanh(x):
    # tanh-GELU: one EUP transcendental instead of an erf polynomial.
    return 0.5 * x * (1.0 + jnp.tanh(_SQRT_2_OVER_PI * (x + 0.044715 * x * x * x)))


def _make_shift_matrix(H, W):
    """(9*N, N) 0/1 f32 matrix.  Block t (tap order kh*3+kw) selects the input
    row at spatial offset (kh-1, kw-1) with zero padding, row-major h*W+w.
    Tap 4 (centre) is the identity."""
    N = H * W
    smat = np.zeros((9 * N, N), dtype=np.float32)
    t = 0
    for dh in (-1, 0, 1):
        for dw in (-1, 0, 1):
            for h in range(H):
                for w in range(W):
                    sh, sw = h + dh, w + dw
                    if 0 <= sh < H and 0 <= sw < W:
                        smat[t * N + h * W + w, sh * W + sw] = 1.0
            t += 1
    return smat


# ---------------------------------------------------------------------------
# Fused kernel: pos-embed conv + attention block + MLP block (Bt images/step)
# ---------------------------------------------------------------------------
def _selfattn_fused_kernel(x_ref, smat_ref, cw_ref, cb_ref,
                           g1_ref, be1_ref, wqkv_ref, wp_ref, bp_ref,
                           g2_ref, be2_ref, w1_ref, bh1_ref, w2_ref, bh2_ref,
                           o_ref, *, num_heads, scale):
    Bt, C, N = x_ref.shape
    hd = C // num_heads
    smat = smat_ref[...]                                # (9N, N) f32 (0/1)
    cw = cw_ref[...]                                    # (9, C)  f32

    # --- 1) depthwise 3x3 pos-embed (+residual) ------------------------------
    # One exact f32 MXU gather-matmul per image yields all 9 zero-padded
    # shifted copies in (N, C) layout; tap 4 is the identity -> x itself,
    # so no in-kernel (or wrapper) transpose of the activations is needed.
    xs = []
    for b in range(Bt):
        gath = jax.lax.dot_general(smat, x_ref[b], (((1,), (1,)), ((), ())),
                                   preferred_element_type=jnp.float32)  # (9N, C)
        conv = jnp.zeros((N, C), jnp.float32)
        for t in range(9):
            conv = conv + gath[t * N:(t + 1) * N, :] * cw[t:t + 1, :]
        xs.append(gath[4 * N:5 * N, :] + conv)          # x + conv (x exact)
    x = jnp.concatenate(xs, axis=0) + cb_ref[...]       # (Bt*N, C) f32

    # --- 2) x = x + GlobalSparseAttn(norm1(x))  (sr_ratio = 1) ---------------
    xn = _layernorm(x, g1_ref[...], be1_ref[...])
    qkv = jnp.dot(xn.astype(jnp.bfloat16), wqkv_ref[...],
                  preferred_element_type=jnp.float32)    # fused (Bt*N, 3C)
    qkvb = qkv.astype(jnp.bfloat16)                      # bf16 q/k/v operands
    wp = wp_ref[...]                                     # (C, C) bf16

    projs = []
    for b in range(Bt):
        r0 = b * N
        acc = jnp.zeros((N, C), jnp.float32)
        for h in range(num_heads):
            lo = h * hd
            qh = qkvb[r0:r0 + N, lo:lo + hd]
            kh = qkvb[r0:r0 + N, C + lo:C + lo + hd]
            vh = qkvb[r0:r0 + N, 2 * C + lo:2 * C + lo + hd]
            sc = jax.lax.dot_general(qh, kh, (((1,), (1,)), ((), ())),
                                     preferred_element_type=jnp.float32) * scale
            sc = sc - jnp.max(sc, axis=-1, keepdims=True)
            p = jnp.exp(sc)
            p = p * pl.reciprocal(jnp.sum(p, axis=-1, keepdims=True), approx=True)
            oh = jnp.dot(p.astype(jnp.bfloat16), vh,
                         preferred_element_type=jnp.float32)             # (N, hd)
            # per-head projection accumulate: no 4-way lane concat
            acc = acc + jnp.dot(oh.astype(jnp.bfloat16), wp[lo:lo + hd, :],
                                preferred_element_type=jnp.float32)
        projs.append(acc)
    x = x + jnp.concatenate(projs, axis=0) + bp_ref[...]

    # --- 3) x = x + Mlp(norm2(x)) --------------------------------------------
    xn2 = _layernorm(x, g2_ref[...], be2_ref[...])
    h1 = jnp.dot(xn2.astype(jnp.bfloat16), w1_ref[...],
                 preferred_element_type=jnp.float32) + bh1_ref[...]
    h1 = _gelu_tanh(h1)
    y = jnp.dot(h1.astype(jnp.bfloat16), w2_ref[...],
                preferred_element_type=jnp.float32) + bh2_ref[...]
    out = x + y                                          # (Bt*N, C)

    for b in range(Bt):
        o_ref[b] = out[b * N:(b + 1) * N, :]


# ---------------------------------------------------------------------------
# Wrapper
# ---------------------------------------------------------------------------
def self_attn_forward(x_nchw, params, num_heads):
    B, C, H, W = x_nchw.shape
    N = H * W
    assert C % num_heads == 0, "dim must be divisible by num_heads"
    # NOTE: C should be a multiple of 128 for lane-dense layouts (C=128 here).
    hd = C // num_heads
    scale = hd ** (-0.5)
    Hid = params["w_fc1"].shape[1]

    # Images per grid step: batch up to 4 to fill MXU rows (v5e/v6e) while
    # keeping >= 2 grid steps whenever possible so both v7x cores have work.
    Bt = 1
    for cand in (4, 3, 2):
        if B % cand == 0 and B // cand >= 2:
            Bt = cand
            break

    # NCHW -> (B, C, N) is a free reshape; no activation transpose in XLA on
    # the input side (the kernel's gather matmul does the layout change).
    x_cn = x_nchw.reshape(B, C, N).astype(jnp.float32)

    smat = jnp.asarray(_make_shift_matrix(H, W))                 # (9N, N) f32
    conv_w = params["conv_w"].reshape(9, C).astype(jnp.float32)  # (9, C)
    wqkv = params["w_qkv"].astype(jnp.bfloat16)                  # fused (C, 3C)
    wproj = params["w_proj"].astype(jnp.bfloat16)
    w1 = params["w_fc1"].astype(jnp.bfloat16)
    w2 = params["w_fc2"].astype(jnp.bfloat16)

    const = lambda r, c: pl.BlockSpec((r, c), lambda g: (0, 0))

    flops = 2 * B * N * C * (9 * N + 3 * C + 2 * N + C + 2 * Hid)
    transcendentals = B * (num_heads * N * N + N * Hid)
    bytes_accessed = (2 * B * N * C * 4
                      + 2 * (3 * C * C + C * C + 2 * C * Hid)
                      + 4 * (9 * N * N + 9 * C + 8 * C + Hid))

    out = pl.pallas_call(
        partial(_selfattn_fused_kernel, num_heads=num_heads, scale=scale),
        out_shape=jax.ShapeDtypeStruct((B, N, C), jnp.float32),
        grid=(B // Bt,),
        in_specs=[
            pl.BlockSpec((Bt, C, N), lambda g: (g, 0, 0)),   # x, raw NCHW layout
            const(9 * N, N),                                 # shift matrix
            const(9, C), const(1, C),                        # conv w, b
            const(1, C), const(1, C),                        # ln1 gamma, beta
            const(C, 3 * C),                                 # fused qkv weight
            const(C, C), const(1, C),                        # proj w, b
            const(1, C), const(1, C),                        # ln2 gamma, beta
            const(C, Hid), const(1, Hid),                    # fc1 w, b
            const(Hid, C), const(1, C),                      # fc2 w, b
        ],
        out_specs=pl.BlockSpec((Bt, N, C), lambda g: (g, 0, 0)),
        compiler_params=pltpu.CompilerParams(
            dimension_semantics=("parallel",)),
        cost_estimate=pl.CostEstimate(flops=flops,
                                      transcendentals=transcendentals,
                                      bytes_accessed=bytes_accessed),
    )(x_cn, smat, conv_w, params["conv_b"], params["ln1_g"], params["ln1_b"],
      wqkv, wproj, params["b_proj"], params["ln2_g"], params["ln2_b"],
      w1, params["b_fc1"], w2, params["b_fc2"])

    # Kernel stores lane-dense (B, N, C); back to NCHW in XLA (per review).
    return jnp.transpose(out.reshape(B, H, W, C), (0, 3, 1, 2))


# ---------------------------------------------------------------------------
# Pure-JAX reference (exact GELU, f32, highest precision) for correctness
# ---------------------------------------------------------------------------
def self_attn_reference(x_nchw, params, num_heads):
    B, C, H, W = x_nchw.shape
    N = H * W
    hd = C // num_heads
    scale = hd ** (-0.5)

    x = jnp.transpose(x_nchw, (0, 2, 3, 1))
    xpad = jnp.pad(x, ((0, 0), (1, 1), (1, 1), (0, 0)))
    conv = jnp.zeros_like(x) + params["conv_b"][0]
    for dh in range(3):
        for dw in range(3):
            conv = conv + xpad[:, dh:dh + H, dw:dw + W, :] * params["conv_w"][dh, dw]
    x = (x + conv).reshape(B, N, C)

    def ln(z, g, b):
        mu = jnp.mean(z, -1, keepdims=True)
        var = jnp.mean((z - mu) ** 2, -1, keepdims=True)
        return (z - mu) / jnp.sqrt(var + _LN_EPS) * g + b

    xn = ln(x, params["ln1_g"][0], params["ln1_b"][0])
    qkv = jnp.einsum("bnc,cd->bnd", xn, params["w_qkv"], precision="highest")
    q, k, v = jnp.split(qkv, 3, axis=-1)
    heads = lambda t: jnp.transpose(t.reshape(B, N, num_heads, hd), (0, 2, 1, 3))
    q, k, v = heads(q), heads(k), heads(v)
    attn = jnp.einsum("bhqd,bhkd->bhqk", q, k, precision="highest") * scale
    attn = jax.nn.softmax(attn, axis=-1)
    ao = jnp.einsum("bhqk,bhkd->bhqd", attn, v, precision="highest")
    ao = jnp.transpose(ao, (0, 2, 1, 3)).reshape(B, N, C)
    x = x + jnp.einsum("bnc,cd->bnd", ao, params["w_proj"],
                       precision="highest") + params["b_proj"][0]

    xn = ln(x, params["ln2_g"][0], params["ln2_b"][0])
    h = jnp.einsum("bnc,ch->bnh", xn, params["w_fc1"],
                   precision="highest") + params["b_fc1"][0]
    h = jax.nn.gelu(h, approximate=False)
    x = x + jnp.einsum("bnh,hc->bnc", h, params["w_fc2"],
                       precision="highest") + params["b_fc2"][0]
    return jnp.transpose(x.reshape(B, H, W, C), (0, 3, 1, 2))


if __name__ == "__main__":
    B, C, H, W = 4, 128, 8, 8
    num_heads = 4
    mlp_hidden = int(C * 4.0)

    key = jax.random.PRNGKey(0)
    ks = jax.random.split(key, 16)
    params = {
        # depthwise conv: PyTorch weight (C,1,3,3) stored here as (3,3,C)
        "conv_w": 0.10 * jax.random.normal(ks[0], (3, 3, C), jnp.float32),
        "conv_b": 0.05 * jax.random.normal(ks[1], (1, C), jnp.float32),
        "ln1_g": 1.0 + 0.05 * jax.random.normal(ks[2], (1, C), jnp.float32),
        "ln1_b": 0.05 * jax.random.normal(ks[3], (1, C), jnp.float32),
        # linear weights stored as (in, out) so x @ W matches PyTorch x @ W.T
        "w_qkv": 0.05 * jax.random.normal(ks[4], (C, 3 * C), jnp.float32),  # qkv_bias=False
        "w_proj": 0.05 * jax.random.normal(ks[5], (C, C), jnp.float32),
        "b_proj": 0.05 * jax.random.normal(ks[6], (1, C), jnp.float32),
        "ln2_g": 1.0 + 0.05 * jax.random.normal(ks[7], (1, C), jnp.float32),
        "ln2_b": 0.05 * jax.random.normal(ks[8], (1, C), jnp.float32),
        "w_fc1": 0.05 * jax.random.normal(ks[9], (C, mlp_hidden), jnp.float32),
        "b_fc1": 0.05 * jax.random.normal(ks[10], (1, mlp_hidden), jnp.float32),
        "w_fc2": 0.05 * jax.random.normal(ks[11], (mlp_hidden, C), jnp.float32),
        "b_fc2": 0.05 * jax.random.normal(ks[12], (1, C), jnp.float32),
    }
    x = jax.random.normal(ks[13], (B, C, H, W), jnp.float32)  # NCHW, like PyTorch

    out = jax.block_until_ready(self_attn_forward(x, params, num_heads))
    ref = jax.block_until_ready(self_attn_reference(x, params, num_heads))

    assert out.shape == (B, C, H, W)
    assert bool(jnp.all(jnp.isfinite(out)))
    max_err = float(jnp.max(jnp.abs(out - ref)))
    assert max_err < 5e-2, f"max abs error too large: {max_err}"
    print("KERNEL_OK")
</pallas_src>

<mosaic_0001>
module attributes {stable_mosaic.version = 11 : i64} {
  func.func @_selfattn_fused_kernel(%arg0: i32, %arg1: memref<2x128x64xf32, #tpu.memory_space<vmem>>, %arg2: memref<576x64xf32, #tpu.memory_space<vmem>>, %arg3: memref<9x128xf32, #tpu.memory_space<vmem>>, %arg4: memref<1x128xf32, #tpu.memory_space<vmem>>, %arg5: memref<1x128xf32, #tpu.memory_space<vmem>>, %arg6: memref<1x128xf32, #tpu.memory_space<vmem>>, %arg7: memref<128x384xbf16, #tpu.memory_space<vmem>>, %arg8: memref<128x128xbf16, #tpu.memory_space<vmem>>, %arg9: memref<1x128xf32, #tpu.memory_space<vmem>>, %arg10: memref<1x128xf32, #tpu.memory_space<vmem>>, %arg11: memref<1x128xf32, #tpu.memory_space<vmem>>, %arg12: memref<128x512xbf16, #tpu.memory_space<vmem>>, %arg13: memref<1x512xf32, #tpu.memory_space<vmem>>, %arg14: memref<512x128xbf16, #tpu.memory_space<vmem>>, %arg15: memref<1x128xf32, #tpu.memory_space<vmem>>, %arg16: memref<2x64x128xf32, #tpu.memory_space<vmem>>) attributes {dimension_semantics = [#tpu.dimension_semantics<parallel>], iteration_bounds = array<i64: 2>, scalar_prefetch = 0 : i64, scratch_operands = 0 : i64, tpu.core_type = #tpu.core_type<tc>, window_params = [{transform_indices = @transform_0, window_bounds = array<i64: 2, 128, 64>}, {pipeline_mode = #tpu.pipeline_mode<synchronous>, transform_indices = @transform_1, window_bounds = array<i64: 576, 64>}, {pipeline_mode = #tpu.pipeline_mode<synchronous>, transform_indices = @transform_2, window_bounds = array<i64: 9, 128>}, {pipeline_mode = #tpu.pipeline_mode<synchronous>, transform_indices = @transform_3, window_bounds = array<i64: 1, 128>}, {pipeline_mode = #tpu.pipeline_mode<synchronous>, transform_indices = @transform_4, window_bounds = array<i64: 1, 128>}, {pipeline_mode = #tpu.pipeline_mode<synchronous>, transform_indices = @transform_5, window_bounds = array<i64: 1, 128>}, {pipeline_mode = #tpu.pipeline_mode<synchronous>, transform_indices = @transform_6, window_bounds = array<i64: 128, 384>}, {pipeline_mode = #tpu.pipeline_mode<synchronous>, transform_indices = @transform_7, window_bounds = array<i64: 128, 128>}, {pipeline_mode = #tpu.pipeline_mode<synchronous>, transform_indices = @transform_8, window_bounds = array<i64: 1, 128>}, {pipeline_mode = #tpu.pipeline_mode<synchronous>, transform_indices = @transform_9, window_bounds = array<i64: 1, 128>}, {pipeline_mode = #tpu.pipeline_mode<synchronous>, transform_indices = @transform_10, window_bounds = array<i64: 1, 128>}, {pipeline_mode = #tpu.pipeline_mode<synchronous>, transform_indices = @transform_11, window_bounds = array<i64: 128, 512>}, {pipeline_mode = #tpu.pipeline_mode<synchronous>, transform_indices = @transform_12, window_bounds = array<i64: 1, 512>}, {pipeline_mode = #tpu.pipeline_mode<synchronous>, transform_indices = @transform_13, window_bounds = array<i64: 512, 128>}, {pipeline_mode = #tpu.pipeline_mode<synchronous>, transform_indices = @transform_14, window_bounds = array<i64: 1, 128>}, {transform_indices = @transform_15, window_bounds = array<i64: 2, 64, 128>}]} {
    %c0 = arith.constant 0 : index
    %c0_0 = arith.constant 0 : index
    %0 = vector.load %arg2[%c0, %c0_0] : memref<576x64xf32, #tpu.memory_space<vmem>>, vector<576x64xf32>
    %c0_1 = arith.constant 0 : index
    %c0_2 = arith.constant 0 : index
    %1 = vector.load %arg3[%c0_1, %c0_2] : memref<9x128xf32, #tpu.memory_space<vmem>>, vector<9x128xf32>
    %c0_3 = arith.constant 0 : index
    %c0_4 = arith.constant 0 : index
    %c0_5 = arith.constant 0 : index
    %2 = vector.load %arg1[%c0_3, %c0_4, %c0_5] : memref<2x128x64xf32, #tpu.memory_space<vmem>>, vector<1x128x64xf32>
    %3 = vector.shape_cast %2 : vector<1x128x64xf32> to vector<128x64xf32>
    %cst = arith.constant dense<0.000000e+00> : vector<576x128xf32>
    %4 = tpu.matmul %0, %3, %cst {dimension_numbers = #tpu.dot_dimension_numbers<[1], [1], [0], [0], [0, 0, 1, 0], [], []>} : vector<576x64xf32>, vector<128x64xf32>, vector<576x128xf32> -> vector<576x128xf32>
    %cst_6 = arith.constant 0.000000e+00 : f32
    %5 = vector.broadcast %cst_6 : f32 to vector<64x128xf32>
    %6 = vector.extract_strided_slice %4 {offsets = [0, 0], sizes = [64, 128], strides = [1, 1]} : vector<576x128xf32> to vector<64x128xf32>
    %7 = vector.extract_strided_slice %1 {offsets = [0, 0], sizes = [1, 128], strides = [1, 1]} : vector<9x128xf32> to vector<1x128xf32>
    %8 = vector.broadcast %7 : vector<1x128xf32> to vector<64x128xf32>
    %9 = arith.mulf %6, %8 : vector<64x128xf32>
    %10 = arith.addf %5, %9 : vector<64x128xf32>
    %11 = vector.extract_strided_slice %4 {offsets = [64, 0], sizes = [64, 128], strides = [1, 1]} : vector<576x128xf32> to vector<64x128xf32>
    %12 = vector.extract_strided_slice %1 {offsets = [1, 0], sizes = [1, 128], strides = [1, 1]} : vector<9x128xf32> to vector<1x128xf32>
    %13 = vector.broadcast %12 : vector<1x128xf32> to vector<64x128xf32>
    %14 = arith.mulf %11, %13 : vector<64x128xf32>
    %15 = arith.addf %10, %14 : vector<64x128xf32>
    %16 = vector.extract_strided_slice %4 {offsets = [128, 0], sizes = [64, 128], strides = [1, 1]} : vector<576x128xf32> to vector<64x128xf32>
    %17 = vector.extract_strided_slice %1 {offsets = [2, 0], sizes = [1, 128], strides = [1, 1]} : vector<9x128xf32> to vector<1x128xf32>
    %18 = vector.broadcast %17 : vector<1x128xf32> to vector<64x128xf32>
    %19 = arith.mulf %16, %18 : vector<64x128xf32>
    %20 = arith.addf %15, %19 : vector<64x128xf32>
    %21 = vector.extract_strided_slice %4 {offsets = [192, 0], sizes = [64, 128], strides = [1, 1]} : vector<576x128xf32> to vector<64x128xf32>
    %22 = vector.extract_strided_slice %1 {offsets = [3, 0], sizes = [1, 128], strides = [1, 1]} : vector<9x128xf32> to vector<1x128xf32>
    %23 = vector.broadcast %22 : vector<1x128xf32> to vector<64x128xf32>
    %24 = arith.mulf %21, %23 : vector<64x128xf32>
    %25 = arith.addf %20, %24 : vector<64x128xf32>
    %26 = vector.extract_strided_slice %4 {offsets = [256, 0], sizes = [64, 128], strides = [1, 1]} : vector<576x128xf32> to vector<64x128xf32>
    %27 = vector.extract_strided_slice %1 {offsets = [4, 0], sizes = [1, 128], strides = [1, 1]} : vector<9x128xf32> to vector<1x128xf32>
    %28 = vector.broadcast %27 : vector<1x128xf32> to vector<64x128xf32>
    %29 = arith.mulf %26, %28 : vector<64x128xf32>
    %30 = arith.addf %25, %29 : vector<64x128xf32>
    %31 = vector.extract_strided_slice %4 {offsets = [320, 0], sizes = [64, 128], strides = [1, 1]} : vector<576x128xf32> to vector<64x128xf32>
    %32 = vector.extract_strided_slice %1 {offsets = [5, 0], sizes = [1, 128], strides = [1, 1]} : vector<9x128xf32> to vector<1x128xf32>
    %33 = vector.broadcast %32 : vector<1x128xf32> to vector<64x128xf32>
    %34 = arith.mulf %31, %33 : vector<64x128xf32>
    %35 = arith.addf %30, %34 : vector<64x128xf32>
    %36 = vector.extract_strided_slice %4 {offsets = [384, 0], sizes = [64, 128], strides = [1, 1]} : vector<576x128xf32> to vector<64x128xf32>
    %37 = vector.extract_strided_slice %1 {offsets = [6, 0], sizes = [1, 128], strides = [1, 1]} : vector<9x128xf32> to vector<1x128xf32>
    %38 = vector.broadcast %37 : vector<1x128xf32> to vector<64x128xf32>
    %39 = arith.mulf %36, %38 : vector<64x128xf32>
    %40 = arith.addf %35, %39 : vector<64x128xf32>
    %41 = vector.extract_strided_slice %4 {offsets = [448, 0], sizes = [64, 128], strides = [1, 1]} : vector<576x128xf32> to vector<64x128xf32>
    %42 = vector.extract_strided_slice %1 {offsets = [7, 0], sizes = [1, 128], strides = [1, 1]} : vector<9x128xf32> to vector<1x128xf32>
    %43 = vector.broadcast %42 : vector<1x128xf32> to vector<64x128xf32>
    %44 = arith.mulf %41, %43 : vector<64x128xf32>
    %45 = arith.addf %40, %44 : vector<64x128xf32>
    %46 = vector.extract_strided_slice %4 {offsets = [512, 0], sizes = [64, 128], strides = [1, 1]} : vector<576x128xf32> to vector<64x128xf32>
    %47 = vector.extract_strided_slice %1 {offsets = [8, 0], sizes = [1, 128], strides = [1, 1]} : vector<9x128xf32> to vector<1x128xf32>
    %48 = vector.broadcast %47 : vector<1x128xf32> to vector<64x128xf32>
    %49 = arith.mulf %46, %48 : vector<64x128xf32>
    %50 = arith.addf %45, %49 : vector<64x128xf32>
    %51 = vector.extract_strided_slice %4 {offsets = [256, 0], sizes = [64, 128], strides = [1, 1]} : vector<576x128xf32> to vector<64x128xf32>
    %52 = arith.addf %51, %50 : vector<64x128xf32>
    %c1 = arith.constant 1 : index
    %c0_7 = arith.constant 0 : index
    %c0_8 = arith.constant 0 : index
    %53 = vector.load %arg1[%c1, %c0_7, %c0_8] : memref<2x128x64xf32, #tpu.memory_space<vmem>>, vector<1x128x64xf32>
    %54 = vector.shape_cast %53 : vector<1x128x64xf32> to vector<128x64xf32>
    %cst_9 = arith.constant dense<0.000000e+00> : vector<576x128xf32>
    %55 = tpu.matmul %0, %54, %cst_9 {dimension_numbers = #tpu.dot_dimension_numbers<[1], [1], [0], [0], [0, 0, 1, 0], [], []>} : vector<576x64xf32>, vector<128x64xf32>, vector<576x128xf32> -> vector<576x128xf32>
    %cst_10 = arith.constant 0.000000e+00 : f32
    %56 = vector.broadcast %cst_10 : f32 to vector<64x128xf32>
    %57 = vector.extract_strided_slice %55 {offsets = [0, 0], sizes = [64, 128], strides = [1, 1]} : vector<576x128xf32> to vector<64x128xf32>
    %58 = vector.extract_strided_slice %1 {offsets = [0, 0], sizes = [1, 128], strides = [1, 1]} : vector<9x128xf32> to vector<1x128xf32>
    %59 = vector.broadcast %58 : vector<1x128xf32> to vector<64x128xf32>
    %60 = arith.mulf %57, %59 : vector<64x128xf32>
    %61 = arith.addf %56, %60 : vector<64x128xf32>
    %62 = vector.extract_strided_slice %55 {offsets = [64, 0], sizes = [64, 128], strides = [1, 1]} : vector<576x128xf32> to vector<64x128xf32>
    %63 = vector.extract_strided_slice %1 {offsets = [1, 0], sizes = [1, 128], strides = [1, 1]} : vector<9x128xf32> to vector<1x128xf32>
    %64 = vector.broadcast %63 : vector<1x128xf32> to vector<64x128xf32>
    %65 = arith.mulf %62, %64 : vector<64x128xf32>
    %66 = arith.addf %61, %65 : vector<64x128xf32>
    %67 = vector.extract_strided_slice %55 {offsets = [128, 0], sizes = [64, 128], strides = [1, 1]} : vector<576x128xf32> to vector<64x128xf32>
    %68 = vector.extract_strided_slice %1 {offsets = [2, 0], sizes = [1, 128], strides = [1, 1]} : vector<9x128xf32> to vector<1x128xf32>
    %69 = vector.broadcast %68 : vector<1x128xf32> to vector<64x128xf32>
    %70 = arith.mulf %67, %69 : vector<64x128xf32>
    %71 = arith.addf %66, %70 : vector<64x128xf32>
    %72 = vector.extract_strided_slice %55 {offsets = [192, 0], sizes = [64, 128], strides = [1, 1]} : vector<576x128xf32> to vector<64x128xf32>
    %73 = vector.extract_strided_slice %1 {offsets = [3, 0], sizes = [1, 128], strides = [1, 1]} : vector<9x128xf32> to vector<1x128xf32>
    %74 = vector.broadcast %73 : vector<1x128xf32> to vector<64x128xf32>
    %75 = arith.mulf %72, %74 : vector<64x128xf32>
    %76 = arith.addf %71, %75 : vector<64x128xf32>
    %77 = vector.extract_strided_slice %55 {offsets = [256, 0], sizes = [64, 128], strides = [1, 1]} : vector<576x128xf32> to vector<64x128xf32>
    %78 = vector.extract_strided_slice %1 {offsets = [4, 0], sizes = [1, 128], strides = [1, 1]} : vector<9x128xf32> to vector<1x128xf32>
    %79 = vector.broadcast %78 : vector<1x128xf32> to vector<64x128xf32>
    %80 = arith.mulf %77, %79 : vector<64x128xf32>
    %81 = arith.addf %76, %80 : vector<64x128xf32>
    %82 = vector.extract_strided_slice %55 {offsets = [320, 0], sizes = [64, 128], strides = [1, 1]} : vector<576x128xf32> to vector<64x128xf32>
    %83 = vector.extract_strided_slice %1 {offsets = [5, 0], sizes = [1, 128], strides = [1, 1]} : vector<9x128xf32> to vector<1x128xf32>
    %84 = vector.broadcast %83 : vector<1x128xf32> to vector<64x128xf32>
    %85 = arith.mulf %82, %84 : vector<64x128xf32>
    %86 = arith.addf %81, %85 : vector<64x128xf32>
    %87 = vector.extract_strided_slice %55 {offsets = [384, 0], sizes = [64, 128], strides = [1, 1]} : vector<576x128xf32> to vector<64x128xf32>
    %88 = vector.extract_strided_slice %1 {offsets = [6, 0], sizes = [1, 128], strides = [1, 1]} : vector<9x128xf32> to vector<1x128xf32>
    %89 = vector.broadcast %88 : vector<1x128xf32> to vector<64x128xf32>
    %90 = arith.mulf %87, %89 : vector<64x128xf32>
    %91 = arith.addf %86, %90 : vector<64x128xf32>
    %92 = vector.extract_strided_slice %55 {offsets = [448, 0], sizes = [64, 128], strides = [1, 1]} : vector<576x128xf32> to vector<64x128xf32>
    %93 = vector.extract_strided_slice %1 {offsets = [7, 0], sizes = [1, 128], strides = [1, 1]} : vector<9x128xf32> to vector<1x128xf32>
    %94 = vector.broadcast %93 : vector<1x128xf32> to vector<64x128xf32>
    %95 = arith.mulf %92, %94 : vector<64x128xf32>
    %96 = arith.addf %91, %95 : vector<64x128xf32>
    %97 = vector.extract_strided_slice %55 {offsets = [512, 0], sizes = [64, 128], strides = [1, 1]} : vector<576x128xf32> to vector<64x128xf32>
    %98 = vector.extract_strided_slice %1 {offsets = [8, 0], sizes = [1, 128], strides = [1, 1]} : vector<9x128xf32> to vector<1x128xf32>
    %99 = vector.broadcast %98 : vector<1x128xf32> to vector<64x128xf32>
    %100 = arith.mulf %97, %99 : vector<64x128xf32>
    %101 = arith.addf %96, %100 : vector<64x128xf32>
    %102 = vector.extract_strided_slice %55 {offsets = [256, 0], sizes = [64, 128], strides = [1, 1]} : vector<576x128xf32> to vector<64x128xf32>
    %103 = arith.addf %102, %101 : vector<64x128xf32>
    %104 = tpu.concatenate %52, %103 in 0 : vector<64x128xf32>, vector<64x128xf32> -> vector<128x128xf32>
    %c0_11 = arith.constant 0 : index
    %c0_12 = arith.constant 0 : index
    %105 = vector.load %arg4[%c0_11, %c0_12] : memref<1x128xf32, #tpu.memory_space<vmem>>, vector<1x128xf32>
    %106 = vector.broadcast %105 : vector<1x128xf32> to vector<128x128xf32>
    %107 = arith.addf %104, %106 : vector<128x128xf32>
    %c0_13 = arith.constant 0 : index
    %c0_14 = arith.constant 0 : index
    %108 = vector.load %arg5[%c0_13, %c0_14] : memref<1x128xf32, #tpu.memory_space<vmem>>, vector<1x128xf32>
    %c0_15 = arith.constant 0 : index
    %c0_16 = arith.constant 0 : index
    %109 = vector.load %arg6[%c0_15, %c0_16] : memref<1x128xf32, #tpu.memory_space<vmem>>, vector<1x128xf32>
    %cst_17 = arith.constant dense<0.000000e+00> : vector<128xf32>
    %110 = vector.multi_reduction <add>, %107, %cst_17 [1] : vector<128x128xf32> to vector<128xf32>
    %111 = vector.shape_cast %110 : vector<128xf32> to vector<128x1xf32>
    %cst_18 = arith.constant 1.280000e+02 : f32
    %112 = vector.broadcast %cst_18 : f32 to vector<128x1xf32>
    %113 = arith.divf %111, %112 : vector<128x1xf32>
    %114 = vector.broadcast %113 : vector<128x1xf32> to vector<128x128xf32>
    %115 = arith.subf %107, %114 : vector<128x128xf32>
    %116 = arith.mulf %115, %115 : vector<128x128xf32>
    %cst_19 = arith.constant dense<0.000000e+00> : vector<128xf32>
    %117 = vector.multi_reduction <add>, %116, %cst_19 [1] : vector<128x128xf32> to vector<128xf32>
    %118 = vector.shape_cast %117 : vector<128xf32> to vector<128x1xf32>
    %cst_20 = arith.constant 1.280000e+02 : f32
    %119 = vector.broadcast %cst_20 : f32 to vector<128x1xf32>
    %120 = arith.divf %118, %119 : vector<128x1xf32>
    %cst_21 = arith.constant 9.99999974E-6 : f32
    %121 = vector.broadcast %cst_21 : f32 to vector<128x1xf32>
    %122 = arith.addf %120, %121 : vector<128x1xf32>
    %123 = math.rsqrt %122 : vector<128x1xf32>
    %124 = vector.broadcast %123 : vector<128x1xf32> to vector<128x128xf32>
    %125 = arith.mulf %115, %124 : vector<128x128xf32>
    %126 = vector.broadcast %108 : vector<1x128xf32> to vector<128x128xf32>
    %127 = arith.mulf %125, %126 : vector<128x128xf32>
    %128 = vector.broadcast %109 : vector<1x128xf32> to vector<128x128xf32>
    %129 = arith.addf %127, %128 : vector<128x128xf32>
    %130 = arith.truncf %129 : vector<128x128xf32> to vector<128x128xbf16>
    %c0_22 = arith.constant 0 : index
    %c0_23 = arith.constant 0 : index
    %131 = vector.load %arg7[%c0_22, %c0_23] : memref<128x384xbf16, #tpu.memory_space<vmem>>, vector<128x384xbf16>
    %cst_24 = arith.constant dense<0.000000e+00> : vector<128x384xf32>
    %132 = tpu.matmul %130, %131, %cst_24 {dimension_numbers = #tpu.dot_dimension_numbers<[1], [0], [0], [1], [0, 0, 1, 1], [], []>} : vector<128x128xbf16>, vector<128x384xbf16>, vector<128x384xf32> -> vector<128x384xf32>
    %133 = arith.truncf %132 : vector<128x384xf32> to vector<128x384xbf16>
    %c0_25 = arith.constant 0 : index
    %c0_26 = arith.constant 0 : index
    %134 = vector.load %arg8[%c0_25, %c0_26] : memref<128x128xbf16, #tpu.memory_space<vmem>>, vector<128x128xbf16>
    %cst_27 = arith.constant 0.000000e+00 : f32
    %135 = vector.broadcast %cst_27 : f32 to vector<64x128xf32>
    %136 = vector.extract_strided_slice %133 {offsets = [0, 0], sizes = [64, 32], strides = [1, 1]} : vector<128x384xbf16> to vector<64x32xbf16>
    %137 = vector.extract_strided_slice %133 {offsets = [0, 128], sizes = [64, 32], strides = [1, 1]} : vector<128x384xbf16> to vector<64x32xbf16>
    %138 = vector.extract_strided_slice %133 {offsets = [0, 256], sizes = [64, 32], strides = [1, 1]} : vector<128x384xbf16> to vector<64x32xbf16>
    %cst_28 = arith.constant dense<0.000000e+00> : vector<64x64xf32>
    %139 = tpu.matmul %136, %137, %cst_28 {dimension_numbers = #tpu.dot_dimension_numbers<[1], [1], [0], [0], [0, 0, 1, 0], [], []>} : vector<64x32xbf16>, vector<64x32xbf16>, vector<64x64xf32> -> vector<64x64xf32>
    %cst_29 = arith.constant 0.176776692 : f32
    %140 = vector.broadcast %cst_29 : f32 to vector<64x64xf32>
    %141 = arith.mulf %139, %140 : vector<64x64xf32>
    %cst_30 = arith.constant dense<0xFF800000> : vector<64xf32>
    %142 = vector.multi_reduction <maximumf>, %141, %cst_30 [1] : vector<64x64xf32> to vector<64xf32>
    %143 = vector.shape_cast %142 : vector<64xf32> to vector<64x1xf32>
    %144 = vector.broadcast %143 : vector<64x1xf32> to vector<64x64xf32>
    %145 = arith.subf %141, %144 : vector<64x64xf32>
    %146 = math.exp %145 : vector<64x64xf32>
    %cst_31 = arith.constant dense<0.000000e+00> : vector<64xf32>
    %147 = vector.multi_reduction <add>, %146, %cst_31 [1] : vector<64x64xf32> to vector<64xf32>
    %148 = vector.shape_cast %147 : vector<64xf32> to vector<64x1xf32>
    %149 = tpu.reciprocal %148 {approx = true} : vector<64x1xf32> -> vector<64x1xf32>
    %150 = vector.broadcast %149 : vector<64x1xf32> to vector<64x64xf32>
    %151 = arith.mulf %146, %150 : vector<64x64xf32>
    %152 = arith.truncf %151 : vector<64x64xf32> to vector<64x64xbf16>
    %cst_32 = arith.constant dense<0.000000e+00> : vector<64x32xf32>
    %153 = tpu.matmul %152, %138, %cst_32 {dimension_numbers = #tpu.dot_dimension_numbers<[1], [0], [0], [1], [0, 0, 1, 1], [], []>} : vector<64x64xbf16>, vector<64x32xbf16>, vector<64x32xf32> -> vector<64x32xf32>
    %154 = arith.truncf %153 : vector<64x32xf32> to vector<64x32xbf16>
    %155 = vector.extract_strided_slice %134 {offsets = [0, 0], sizes = [32, 128], strides = [1, 1]} : vector<128x128xbf16> to vector<32x128xbf16>
    %cst_33 = arith.constant dense<0.000000e+00> : vector<64x128xf32>
    %156 = tpu.matmul %154, %155, %cst_33 {dimension_numbers = #tpu.dot_dimension_numbers<[1], [0], [0], [1], [0, 0, 1, 1], [], []>} : vector<64x32xbf16>, vector<32x128xbf16>, vector<64x128xf32> -> vector<64x128xf32>
    %157 = arith.addf %135, %156 : vector<64x128xf32>
    %158 = vector.extract_strided_slice %133 {offsets = [0, 32], sizes = [64, 32], strides = [1, 1]} : vector<128x384xbf16> to vector<64x32xbf16>
    %159 = vector.extract_strided_slice %133 {offsets = [0, 160], sizes = [64, 32], strides = [1, 1]} : vector<128x384xbf16> to vector<64x32xbf16>
    %160 = vector.extract_strided_slice %133 {offsets = [0, 288], sizes = [64, 32], strides = [1, 1]} : vector<128x384xbf16> to vector<64x32xbf16>
    %cst_34 = arith.constant dense<0.000000e+00> : vector<64x64xf32>
    %161 = tpu.matmul %158, %159, %cst_34 {dimension_numbers = #tpu.dot_dimension_numbers<[1], [1], [0], [0], [0, 0, 1, 0], [], []>} : vector<64x32xbf16>, vector<64x32xbf16>, vector<64x64xf32> -> vector<64x64xf32>
    %cst_35 = arith.constant 0.176776692 : f32
    %162 = vector.broadcast %cst_35 : f32 to vector<64x64xf32>
    %163 = arith.mulf %161, %162 : vector<64x64xf32>
    %cst_36 = arith.constant dense<0xFF800000> : vector<64xf32>
    %164 = vector.multi_reduction <maximumf>, %163, %cst_36 [1] : vector<64x64xf32> to vector<64xf32>
    %165 = vector.shape_cast %164 : vector<64xf32> to vector<64x1xf32>
    %166 = vector.broadcast %165 : vector<64x1xf32> to vector<64x64xf32>
    %167 = arith.subf %163, %166 : vector<64x64xf32>
    %168 = math.exp %167 : vector<64x64xf32>
    %cst_37 = arith.constant dense<0.000000e+00> : vector<64xf32>
    %169 = vector.multi_reduction <add>, %168, %cst_37 [1] : vector<64x64xf32> to vector<64xf32>
    %170 = vector.shape_cast %169 : vector<64xf32> to vector<64x1xf32>
    %171 = tpu.reciprocal %170 {approx = true} : vector<64x1xf32> -> vector<64x1xf32>
    %172 = vector.broadcast %171 : vector<64x1xf32> to vector<64x64xf32>
    %173 = arith.mulf %168, %172 : vector<64x64xf32>
    %174 = arith.truncf %173 : vector<64x64xf32> to vector<64x64xbf16>
    %cst_38 = arith.constant dense<0.000000e+00> : vector<64x32xf32>
    %175 = tpu.matmul %174, %160, %cst_38 {dimension_numbers = #tpu.dot_dimension_numbers<[1], [0], [0], [1], [0, 0, 1, 1], [], []>} : vector<64x64xbf16>, vector<64x32xbf16>, vector<64x32xf32> -> vector<64x32xf32>
    %176 = arith.truncf %175 : vector<64x32xf32> to vector<64x32xbf16>
    %177 = vector.extract_strided_slice %134 {offsets = [32, 0], sizes = [32, 128], strides = [1, 1]} : vector<128x128xbf16> to vector<32x128xbf16>
    %cst_39 = arith.constant dense<0.000000e+00> : vector<64x128xf32>
    %178 = tpu.matmul %176, %177, %cst_39 {dimension_numbers = #tpu.dot_dimension_numbers<[1], [0], [0], [1], [0, 0, 1, 1], [], []>} : vector<64x32xbf16>, vector<32x128xbf16>, vector<64x128xf32> -> vector<64x128xf32>
    %179 = arith.addf %157, %178 : vector<64x128xf32>
    %180 = vector.extract_strided_slice %133 {offsets = [0, 64], sizes = [64, 32], strides = [1, 1]} : vector<128x384xbf16> to vector<64x32xbf16>
    %181 = vector.extract_strided_slice %133 {offsets = [0, 192], sizes = [64, 32], strides = [1, 1]} : vector<128x384xbf16> to vector<64x32xbf16>
    %182 = vector.extract_strided_slice %133 {offsets = [0, 320], sizes = [64, 32], strides = [1, 1]} : vector<128x384xbf16> to vector<64x32xbf16>
    %cst_40 = arith.constant dense<0.000000e+00> : vector<64x64xf32>
    %183 = tpu.matmul %180, %181, %cst_40 {dimension_numbers = #tpu.dot_dimension_numbers<[1], [1], [0], [0], [0, 0, 1, 0], [], []>} : vector<64x32xbf16>, vector<64x32xbf16>, vector<64x64xf32> -> vector<64x64xf32>
    %cst_41 = arith.constant 0.176776692 : f32
    %184 = vector.broadcast %cst_41 : f32 to vector<64x64xf32>
    %185 = arith.mulf %183, %184 : vector<64x64xf32>
    %cst_42 = arith.constant dense<0xFF800000> : vector<64xf32>
    %186 = vector.multi_reduction <maximumf>, %185, %cst_42 [1] : vector<64x64xf32> to vector<64xf32>
    %187 = vector.shape_cast %186 : vector<64xf32> to vector<64x1xf32>
    %188 = vector.broadcast %187 : vector<64x1xf32> to vector<64x64xf32>
    %189 = arith.subf %185, %188 : vector<64x64xf32>
    %190 = math.exp %189 : vector<64x64xf32>
    %cst_43 = arith.constant dense<0.000000e+00> : vector<64xf32>
    %191 = vector.multi_reduction <add>, %190, %cst_43 [1] : vector<64x64xf32> to vector<64xf32>
    %192 = vector.shape_cast %191 : vector<64xf32> to vector<64x1xf32>
    %193 = tpu.reciprocal %192 {approx = true} : vector<64x1xf32> -> vector<64x1xf32>
    %194 = vector.broadcast %193 : vector<64x1xf32> to vector<64x64xf32>
    %195 = arith.mulf %190, %194 : vector<64x64xf32>
    %196 = arith.truncf %195 : vector<64x64xf32> to vector<64x64xbf16>
    %cst_44 = arith.constant dense<0.000000e+00> : vector<64x32xf32>
    %197 = tpu.matmul %196, %182, %cst_44 {dimension_numbers = #tpu.dot_dimension_numbers<[1], [0], [0], [1], [0, 0, 1, 1], [], []>} : vector<64x64xbf16>, vector<64x32xbf16>, vector<64x32xf32> -> vector<64x32xf32>
    %198 = arith.truncf %197 : vector<64x32xf32> to vector<64x32xbf16>
    %199 = vector.extract_strided_slice %134 {offsets = [64, 0], sizes = [32, 128], strides = [1, 1]} : vector<128x128xbf16> to vector<32x128xbf16>
    %cst_45 = arith.constant dense<0.000000e+00> : vector<64x128xf32>
    %200 = tpu.matmul %198, %199, %cst_45 {dimension_numbers = #tpu.dot_dimension_numbers<[1], [0], [0], [1], [0, 0, 1, 1], [], []>} : vector<64x32xbf16>, vector<32x128xbf16>, vector<64x128xf32> -> vector<64x128xf32>
    %201 = arith.addf %179, %200 : vector<64x128xf32>
    %202 = vector.extract_strided_slice %133 {offsets = [0, 96], sizes = [64, 32], strides = [1, 1]} : vector<128x384xbf16> to vector<64x32xbf16>
    %203 = vector.extract_strided_slice %133 {offsets = [0, 224], sizes = [64, 32], strides = [1, 1]} : vector<128x384xbf16> to vector<64x32xbf16>
    %204 = vector.extract_strided_slice %133 {offsets = [0, 352], sizes = [64, 32], strides = [1, 1]} : vector<128x384xbf16> to vector<64x32xbf16>
    %cst_46 = arith.constant dense<0.000000e+00> : vector<64x64xf32>
    %205 = tpu.matmul %202, %203, %cst_46 {dimension_numbers = #tpu.dot_dimension_numbers<[1], [1], [0], [0], [0, 0, 1, 0], [], []>} : vector<64x32xbf16>, vector<64x32xbf16>, vector<64x64xf32> -> vector<64x64xf32>
    %cst_47 = arith.constant 0.176776692 : f32
    %206 = vector.broadcast %cst_47 : f32 to vector<64x64xf32>
    %207 = arith.mulf %205, %206 : vector<64x64xf32>
    %cst_48 = arith.constant dense<0xFF800000> : vector<64xf32>
    %208 = vector.multi_reduction <maximumf>, %207, %cst_48 [1] : vector<64x64xf32> to vector<64xf32>
    %209 = vector.shape_cast %208 : vector<64xf32> to vector<64x1xf32>
    %210 = vector.broadcast %209 : vector<64x1xf32> to vector<64x64xf32>
    %211 = arith.subf %207, %210 : vector<64x64xf32>
    %212 = math.exp %211 : vector<64x64xf32>
    %cst_49 = arith.constant dense<0.000000e+00> : vector<64xf32>
    %213 = vector.multi_reduction <add>, %212, %cst_49 [1] : vector<64x64xf32> to vector<64xf32>
    %214 = vector.shape_cast %213 : vector<64xf32> to vector<64x1xf32>
    %215 = tpu.reciprocal %214 {approx = true} : vector<64x1xf32> -> vector<64x1xf32>
    %216 = vector.broadcast %215 : vector<64x1xf32> to vector<64x64xf32>
    %217 = arith.mulf %212, %216 : vector<64x64xf32>
    %218 = arith.truncf %217 : vector<64x64xf32> to vector<64x64xbf16>
    %cst_50 = arith.constant dense<0.000000e+00> : vector<64x32xf32>
    %219 = tpu.matmul %218, %204, %cst_50 {dimension_numbers = #tpu.dot_dimension_numbers<[1], [0], [0], [1], [0, 0, 1, 1], [], []>} : vector<64x64xbf16>, vector<64x32xbf16>, vector<64x32xf32> -> vector<64x32xf32>
    %220 = arith.truncf %219 : vector<64x32xf32> to vector<64x32xbf16>
    %221 = vector.extract_strided_slice %134 {offsets = [96, 0], sizes = [32, 128], strides = [1, 1]} : vector<128x128xbf16> to vector<32x128xbf16>
    %cst_51 = arith.constant dense<0.000000e+00> : vector<64x128xf32>
    %222 = tpu.matmul %220, %221, %cst_51 {dimension_numbers = #tpu.dot_dimension_numbers<[1], [0], [0], [1], [0, 0, 1, 1], [], []>} : vector<64x32xbf16>, vector<32x128xbf16>, vector<64x128xf32> -> vector<64x128xf32>
    %223 = arith.addf %201, %222 : vector<64x128xf32>
    %cst_52 = arith.constant 0.000000e+00 : f32
    %224 = vector.broadcast %cst_52 : f32 to vector<64x128xf32>
    %225 = vector.extract_strided_slice %133 {offsets = [64, 0], sizes = [64, 32], strides = [1, 1]} : vector<128x384xbf16> to vector<64x32xbf16>
    %226 = vector.extract_strided_slice %133 {offsets = [64, 128], sizes = [64, 32], strides = [1, 1]} : vector<128x384xbf16> to vector<64x32xbf16>
    %227 = vector.extract_strided_slice %133 {offsets = [64, 256], sizes = [64, 32], strides = [1, 1]} : vector<128x384xbf16> to vector<64x32xbf16>
    %cst_53 = arith.constant dense<0.000000e+00> : vector<64x64xf32>
    %228 = tpu.matmul %225, %226, %cst_53 {dimension_numbers = #tpu.dot_dimension_numbers<[1], [1], [0], [0], [0, 0, 1, 0], [], []>} : vector<64x32xbf16>, vector<64x32xbf16>, vector<64x64xf32> -> vector<64x64xf32>
    %cst_54 = arith.constant 0.176776692 : f32
    %229 = vector.broadcast %cst_54 : f32 to vector<64x64xf32>
    %230 = arith.mulf %228, %229 : vector<64x64xf32>
    %cst_55 = arith.constant dense<0xFF800000> : vector<64xf32>
    %231 = vector.multi_reduction <maximumf>, %230, %cst_55 [1] : vector<64x64xf32> to vector<64xf32>
    %232 = vector.shape_cast %231 : vector<64xf32> to vector<64x1xf32>
    %233 = vector.broadcast %232 : vector<64x1xf32> to vector<64x64xf32>
    %234 = arith.subf %230, %233 : vector<64x64xf32>
    %235 = math.exp %234 : vector<64x64xf32>
    %cst_56 = arith.constant dense<0.000000e+00> : vector<64xf32>
    %236 = vector.multi_reduction <add>, %235, %cst_56 [1] : vector<64x64xf32> to vector<64xf32>
    %237 = vector.shape_cast %236 : vector<64xf32> to vector<64x1xf32>
    %238 = tpu.reciprocal %237 {approx = true} : vector<64x1xf32> -> vector<64x1xf32>
    %239 = vector.broadcast %238 : vector<64x1xf32> to vector<64x64xf32>
    %240 = arith.mulf %235, %239 : vector<64x64xf32>
    %241 = arith.truncf %240 : vector<64x64xf32> to vector<64x64xbf16>
    %cst_57 = arith.constant dense<0.000000e+00> : vector<64x32xf32>
    %242 = tpu.matmul %241, %227, %cst_57 {dimension_numbers = #tpu.dot_dimension_numbers<[1], [0], [0], [1], [0, 0, 1, 1], [], []>} : vector<64x64xbf16>, vector<64x32xbf16>, vector<64x32xf32> -> vector<64x32xf32>
    %243 = arith.truncf %242 : vector<64x32xf32> to vector<64x32xbf16>
    %244 = vector.extract_strided_slice %134 {offsets = [0, 0], sizes = [32, 128], strides = [1, 1]} : vector<128x128xbf16> to vector<32x128xbf16>
    %cst_58 = arith.constant dense<0.000000e+00> : vector<64x128xf32>
    %245 = tpu.matmul %243, %244, %cst_58 {dimension_numbers = #tpu.dot_dimension_numbers<[1], [0], [0], [1], [0, 0, 1, 1], [], []>} : vector<64x32xbf16>, vector<32x128xbf16>, vector<64x128xf32> -> vector<64x128xf32>
    %246 = arith.addf %224, %245 : vector<64x128xf32>
    %247 = vector.extract_strided_slice %133 {offsets = [64, 32], sizes = [64, 32], strides = [1, 1]} : vector<128x384xbf16> to vector<64x32xbf16>
    %248 = vector.extract_strided_slice %133 {offsets = [64, 160], sizes = [64, 32], strides = [1, 1]} : vector<128x384xbf16> to vector<64x32xbf16>
    %249 = vector.extract_strided_slice %133 {offsets = [64, 288], sizes = [64, 32], strides = [1, 1]} : vector<128x384xbf16> to vector<64x32xbf16>
    %cst_59 = arith.constant dense<0.000000e+00> : vector<64x64xf32>
    %250 = tpu.matmul %247, %248, %cst_59 {dimension_numbers = #tpu.dot_dimension_numbers<[1], [1], [0], [0], [0, 0, 1, 0], [], []>} : vector<64x32xbf16>, vector<64x32xbf16>, vector<64x64xf32> -> vector<64x64xf32>
    %cst_60 = arith.constant 0.176776692 : f32
    %251 = vector.broadcast %cst_60 : f32 to vector<64x64xf32>
    %252 = arith.mulf %250, %251 : vector<64x64xf32>
    %cst_61 = arith.constant dense<0xFF800000> : vector<64xf32>
    %253 = vector.multi_reduction <maximumf>, %252, %cst_61 [1] : vector<64x64xf32> to vector<64xf32>
    %254 = vector.shape_cast %253 : vector<64xf32> to vector<64x1xf32>
    %255 = vector.broadcast %254 : vector<64x1xf32> to vector<64x64xf32>
    %256 = arith.subf %252, %255 : vector<64x64xf32>
    %257 = math.exp %256 : vector<64x64xf32>
    %cst_62 = arith.constant dense<0.000000e+00> : vector<64xf32>
    %258 = vector.multi_reduction <add>, %257, %cst_62 [1] : vector<64x64xf32> to vector<64xf32>
    %259 = vector.shape_cast %258 : vector<64xf32> to vector<64x1xf32>
    %260 = tpu.reciprocal %259 {approx = true} : vector<64x1xf32> -> vector<64x1xf32>
    %261 = vector.broadcast %260 : vector<64x1xf32> to vector<64x64xf32>
    %262 = arith.mulf %257, %261 : vector<64x64xf32>
    %263 = arith.truncf %262 : vector<64x64xf32> to vector<64x64xbf16>
    %cst_63 = arith.constant dense<0.000000e+00> : vector<64x32xf32>
    %264 = tpu.matmul %263, %249, %cst_63 {dimension_numbers = #tpu.dot_dimension_numbers<[1], [0], [0], [1], [0, 0, 1, 1], [], []>} : vector<64x64xbf16>, vector<64x32xbf16>, vector<64x32xf32> -> vector<64x32xf32>
    %265 = arith.truncf %264 : vector<64x32xf32> to vector<64x32xbf16>
    %266 = vector.extract_strided_slice %134 {offsets = [32, 0], sizes = [32, 128], strides = [1, 1]} : vector<128x128xbf16> to vector<32x128xbf16>
    %cst_64 = arith.constant dense<0.000000e+00> : vector<64x128xf32>
    %267 = tpu.matmul %265, %266, %cst_64 {dimension_numbers = #tpu.dot_dimension_numbers<[1], [0], [0], [1], [0, 0, 1, 1], [], []>} : vector<64x32xbf16>, vector<32x128xbf16>, vector<64x128xf32> -> vector<64x128xf32>
    %268 = arith.addf %246, %267 : vector<64x128xf32>
    %269 = vector.extract_strided_slice %133 {offsets = [64, 64], sizes = [64, 32], strides = [1, 1]} : vector<128x384xbf16> to vector<64x32xbf16>
    %270 = vector.extract_strided_slice %133 {offsets = [64, 192], sizes = [64, 32], strides = [1, 1]} : vector<128x384xbf16> to vector<64x32xbf16>
    %271 = vector.extract_strided_slice %133 {offsets = [64, 320], sizes = [64, 32], strides = [1, 1]} : vector<128x384xbf16> to vector<64x32xbf16>
    %cst_65 = arith.constant dense<0.000000e+00> : vector<64x64xf32>
    %272 = tpu.matmul %269, %270, %cst_65 {dimension_numbers = #tpu.dot_dimension_numbers<[1], [1], [0], [0], [0, 0, 1, 0], [], []>} : vector<64x32xbf16>, vector<64x32xbf16>, vector<64x64xf32> -> vector<64x64xf32>
    %cst_66 = arith.constant 0.176776692 : f32
    %273 = vector.broadcast %cst_66 : f32 to vector<64x64xf32>
    %274 = arith.mulf %272, %273 : vector<64x64xf32>
    %cst_67 = arith.constant dense<0xFF800000> : vector<64xf32>
    %275 = vector.multi_reduction <maximumf>, %274, %cst_67 [1] : vector<64x64xf32> to vector<64xf32>
    %276 = vector.shape_cast %275 : vector<64xf32> to vector<64x1xf32>
    %277 = vector.broadcast %276 : vector<64x1xf32> to vector<64x64xf32>
    %278 = arith.subf %274, %277 : vector<64x64xf32>
    %279 = math.exp %278 : vector<64x64xf32>
    %cst_68 = arith.constant dense<0.000000e+00> : vector<64xf32>
    %280 = vector.multi_reduction <add>, %279, %cst_68 [1] : vector<64x64xf32> to vector<64xf32>
    %281 = vector.shape_cast %280 : vector<64xf32> to vector<64x1xf32>
    %282 = tpu.reciprocal %281 {approx = true} : vector<64x1xf32> -> vector<64x1xf32>
    %283 = vector.broadcast %282 : vector<64x1xf32> to vector<64x64xf32>
    %284 = arith.mulf %279, %283 : vector<64x64xf32>
    %285 = arith.truncf %284 : vector<64x64xf32> to vector<64x64xbf16>
    %cst_69 = arith.constant dense<0.000000e+00> : vector<64x32xf32>
    %286 = tpu.matmul %285, %271, %cst_69 {dimension_numbers = #tpu.dot_dimension_numbers<[1], [0], [0], [1], [0, 0, 1, 1], [], []>} : vector<64x64xbf16>, vector<64x32xbf16>, vector<64x32xf32> -> vector<64x32xf32>
    %287 = arith.truncf %286 : vector<64x32xf32> to vector<64x32xbf16>
    %288 = vector.extract_strided_slice %134 {offsets = [64, 0], sizes = [32, 128], strides = [1, 1]} : vector<128x128xbf16> to vector<32x128xbf16>
    %cst_70 = arith.constant dense<0.000000e+00> : vector<64x128xf32>
    %289 = tpu.matmul %287, %288, %cst_70 {dimension_numbers = #tpu.dot_dimension_numbers<[1], [0], [0], [1], [0, 0, 1, 1], [], []>} : vector<64x32xbf16>, vector<32x128xbf16>, vector<64x128xf32> -> vector<64x128xf32>
    %290 = arith.addf %268, %289 : vector<64x128xf32>
    %291 = vector.extract_strided_slice %133 {offsets = [64, 96], sizes = [64, 32], strides = [1, 1]} : vector<128x384xbf16> to vector<64x32xbf16>
    %292 = vector.extract_strided_slice %133 {offsets = [64, 224], sizes = [64, 32], strides = [1, 1]} : vector<128x384xbf16> to vector<64x32xbf16>
    %293 = vector.extract_strided_slice %133 {offsets = [64, 352], sizes = [64, 32], strides = [1, 1]} : vector<128x384xbf16> to vector<64x32xbf16>
    %cst_71 = arith.constant dense<0.000000e+00> : vector<64x64xf32>
    %294 = tpu.matmul %291, %292, %cst_71 {dimension_numbers = #tpu.dot_dimension_numbers<[1], [1], [0], [0], [0, 0, 1, 0], [], []>} : vector<64x32xbf16>, vector<64x32xbf16>, vector<64x64xf32> -> vector<64x64xf32>
    %cst_72 = arith.constant 0.176776692 : f32
    %295 = vector.broadcast %cst_72 : f32 to vector<64x64xf32>
    %296 = arith.mulf %294, %295 : vector<64x64xf32>
    %cst_73 = arith.constant dense<0xFF800000> : vector<64xf32>
    %297 = vector.multi_reduction <maximumf>, %296, %cst_73 [1] : vector<64x64xf32> to vector<64xf32>
    %298 = vector.shape_cast %297 : vector<64xf32> to vector<64x1xf32>
    %299 = vector.broadcast %298 : vector<64x1xf32> to vector<64x64xf32>
    %300 = arith.subf %296, %299 : vector<64x64xf32>
    %301 = math.exp %300 : vector<64x64xf32>
    %cst_74 = arith.constant dense<0.000000e+00> : vector<64xf32>
    %302 = vector.multi_reduction <add>, %301, %cst_74 [1] : vector<64x64xf32> to vector<64xf32>
    %303 = vector.shape_cast %302 : vector<64xf32> to vector<64x1xf32>
    %304 = tpu.reciprocal %303 {approx = true} : vector<64x1xf32> -> vector<64x1xf32>
    %305 = vector.broadcast %304 : vector<64x1xf32> to vector<64x64xf32>
    %306 = arith.mulf %301, %305 : vector<64x64xf32>
    %307 = arith.truncf %306 : vector<64x64xf32> to vector<64x64xbf16>
    %cst_75 = arith.constant dense<0.000000e+00> : vector<64x32xf32>
    %308 = tpu.matmul %307, %293, %cst_75 {dimension_numbers = #tpu.dot_dimension_numbers<[1], [0], [0], [1], [0, 0, 1, 1], [], []>} : vector<64x64xbf16>, vector<64x32xbf16>, vector<64x32xf32> -> vector<64x32xf32>
    %309 = arith.truncf %308 : vector<64x32xf32> to vector<64x32xbf16>
    %310 = vector.extract_strided_slice %134 {offsets = [96, 0], sizes = [32, 128], strides = [1, 1]} : vector<128x128xbf16> to vector<32x128xbf16>
    %cst_76 = arith.constant dense<0.000000e+00> : vector<64x128xf32>
    %311 = tpu.matmul %309, %310, %cst_76 {dimension_numbers = #tpu.dot_dimension_numbers<[1], [0], [0], [1], [0, 0, 1, 1], [], []>} : vector<64x32xbf16>, vector<32x128xbf16>, vector<64x128xf32> -> vector<64x128xf32>
    %312 = arith.addf %290, %311 : vector<64x128xf32>
    %313 = tpu.concatenate %223, %312 in 0 : vector<64x128xf32>, vector<64x128xf32> -> vector<128x128xf32>
    %314 = arith.addf %107, %313 : vector<128x128xf32>
    %c0_77 = arith.constant 0 : index
    %c0_78 = arith.constant 0 : index
    %315 = vector.load %arg9[%c0_77, %c0_78] : memref<1x128xf32, #tpu.memory_space<vmem>>, vector<1x128xf32>
    %316 = vector.broadcast %315 : vector<1x128xf32> to vector<128x128xf32>
    %317 = arith.addf %314, %316 : vector<128x128xf32>
    %c0_79 = arith.constant 0 : index
    %c0_80 = arith.constant 0 : index
    %318 = vector.load %arg10[%c0_79, %c0_80] : memref<1x128xf32, #tpu.memory_space<vmem>>, vector<1x128xf32>
    %c0_81 = arith.constant 0 : index
    %c0_82 = arith.constant 0 : index
    %319 = vector.load %arg11[%c0_81, %c0_82] : memref<1x128xf32, #tpu.memory_space<vmem>>, vector<1x128xf32>
    %cst_83 = arith.constant dense<0.000000e+00> : vector<128xf32>
    %320 = vector.multi_reduction <add>, %317, %cst_83 [1] : vector<128x128xf32> to vector<128xf32>
    %321 = vector.shape_cast %320 : vector<128xf32> to vector<128x1xf32>
    %cst_84 = arith.constant 1.280000e+02 : f32
    %322 = vector.broadcast %cst_84 : f32 to vector<128x1xf32>
    %323 = arith.divf %321, %322 : vector<128x1xf32>
    %324 = vector.broadcast %323 : vector<128x1xf32> to vector<128x128xf32>
    %325 = arith.subf %317, %324 : vector<128x128xf32>
    %326 = arith.mulf %325, %325 : vector<128x128xf32>
    %cst_85 = arith.constant dense<0.000000e+00> : vector<128xf32>
    %327 = vector.multi_reduction <add>, %326, %cst_85 [1] : vector<128x128xf32> to vector<128xf32>
    %328 = vector.shape_cast %327 : vector<128xf32> to vector<128x1xf32>
    %cst_86 = arith.constant 1.280000e+02 : f32
    %329 = vector.broadcast %cst_86 : f32 to vector<128x1xf32>
    %330 = arith.divf %328, %329 : vector<128x1xf32>
    %cst_87 = arith.constant 9.99999974E-6 : f32
    %331 = vector.broadcast %cst_87 : f32 to vector<128x1xf32>
    %332 = arith.addf %330, %331 : vector<128x1xf32>
    %333 = math.rsqrt %332 : vector<128x1xf32>
    %334 = vector.broadcast %333 : vector<128x1xf32> to vector<128x128xf32>
    %335 = arith.mulf %325, %334 : vector<128x128xf32>
    %336 = vector.broadcast %318 : vector<1x128xf32> to vector<128x128xf32>
    %337 = arith.mulf %335, %336 : vector<128x128xf32>
    %338 = vector.broadcast %319 : vector<1x128xf32> to vector<128x128xf32>
    %339 = arith.addf %337, %338 : vector<128x128xf32>
    %340 = arith.truncf %339 : vector<128x128xf32> to vector<128x128xbf16>
    %c0_88 = arith.constant 0 : index
    %c0_89 = arith.constant 0 : index
    %341 = vector.load %arg12[%c0_88, %c0_89] : memref<128x512xbf16, #tpu.memory_space<vmem>>, vector<128x512xbf16>
    %cst_90 = arith.constant dense<0.000000e+00> : vector<128x512xf32>
    %342 = tpu.matmul %340, %341, %cst_90 {dimension_numbers = #tpu.dot_dimension_numbers<[1], [0], [0], [1], [0, 0, 1, 1], [], []>} : vector<128x128xbf16>, vector<128x512xbf16>, vector<128x512xf32> -> vector<128x512xf32>
    %c0_91 = arith.constant 0 : index
    %c0_92 = arith.constant 0 : index
    %343 = vector.load %arg13[%c0_91, %c0_92] : memref<1x512xf32, #tpu.memory_space<vmem>>, vector<1x512xf32>
    %344 = vector.broadcast %343 : vector<1x512xf32> to vector<128x512xf32>
    %345 = arith.addf %342, %344 : vector<128x512xf32>
    %cst_93 = arith.constant 5.000000e-01 : f32
    %346 = vector.broadcast %cst_93 : f32 to vector<128x512xf32>
    %347 = arith.mulf %346, %345 : vector<128x512xf32>
    %cst_94 = arith.constant 4.471500e-02 : f32
    %348 = vector.broadcast %cst_94 : f32 to vector<128x512xf32>
    %349 = arith.mulf %348, %345 : vector<128x512xf32>
    %350 = arith.mulf %349, %345 : vector<128x512xf32>
    %351 = arith.mulf %350, %345 : vector<128x512xf32>
    %352 = arith.addf %345, %351 : vector<128x512xf32>
    %cst_95 = arith.constant 0.797884583 : f32
    %353 = vector.broadcast %cst_95 : f32 to vector<128x512xf32>
    %354 = arith.mulf %353, %352 : vector<128x512xf32>
    %355 = math.tanh %354 : vector<128x512xf32>
    %cst_96 = arith.constant 1.000000e+00 : f32
    %356 = vector.broadcast %cst_96 : f32 to vector<128x512xf32>
    %357 = arith.addf %356, %355 : vector<128x512xf32>
    %358 = arith.mulf %347, %357 : vector<128x512xf32>
    %359 = arith.truncf %358 : vector<128x512xf32> to vector<128x512xbf16>
    %c0_97 = arith.constant 0 : index
    %c0_98 = arith.constant 0 : index
    %360 = vector.load %arg14[%c0_97, %c0_98] : memref<512x128xbf16, #tpu.memory_space<vmem>>, vector<512x128xbf16>
    %cst_99 = arith.constant dense<0.000000e+00> : vector<128x128xf32>
    %361 = tpu.matmul %359, %360, %cst_99 {dimension_numbers = #tpu.dot_dimension_numbers<[1], [0], [0], [1], [0, 0, 1, 1], [], []>} : vector<128x512xbf16>, vector<512x128xbf16>, vector<128x128xf32> -> vector<128x128xf32>
    %c0_100 = arith.constant 0 : index
    %c0_101 = arith.constant 0 : index
    %362 = vector.load %arg15[%c0_100, %c0_101] : memref<1x128xf32, #tpu.memory_space<vmem>>, vector<1x128xf32>
    %363 = vector.broadcast %362 : vector<1x128xf32> to vector<128x128xf32>
    %364 = arith.addf %361, %363 : vector<128x128xf32>
    %365 = arith.addf %317, %364 : vector<128x128xf32>
    %366 = vector.extract_strided_slice %365 {offsets = [0, 0], sizes = [64, 128], strides = [1, 1]} : vector<128x128xf32> to vector<64x128xf32>
    %c0_102 = arith.constant 0 : index
    %c0_103 = arith.constant 0 : index
    %c0_104 = arith.constant 0 : index
    %367 = vector.load %arg16[%c0_102, %c0_103, %c0_104] : memref<2x64x128xf32, #tpu.memory_space<vmem>>, vector<1x64x128xf32>
    %368 = vector.shape_cast %367 : vector<1x64x128xf32> to vector<64x128xf32>
    %369 = vector.shape_cast %366 : vector<64x128xf32> to vector<1x64x128xf32>
    tpu.vector_store %arg16[%c0_102, %c0_103, %c0_104], %369 {strides = array<i32>} : memref<2x64x128xf32, #tpu.memory_space<vmem>>, vector<1x64x128xf32>,
    %370 = vector.extract_strided_slice %365 {offsets = [64, 0], sizes = [64, 128], strides = [1, 1]} : vector<128x128xf32> to vector<64x128xf32>
    %c1_105 = arith.constant 1 : index
    %c0_106 = arith.constant 0 : index
    %c0_107 = arith.constant 0 : index
    %371 = vector.load %arg16[%c1_105, %c0_106, %c0_107] : memref<2x64x128xf32, #tpu.memory_space<vmem>>, vector<1x64x128xf32>
    %372 = vector.shape_cast %371 : vector<1x64x128xf32> to vector<64x128xf32>
    %373 = vector.shape_cast %370 : vector<64x128xf32> to vector<1x64x128xf32>
    tpu.vector_store %arg16[%c1_105, %c0_106, %c0_107], %373 {strides = array<i32>} : memref<2x64x128xf32, #tpu.memory_space<vmem>>, vector<1x64x128xf32>,
    return
  }
  func.func @transform_0(%arg0: i32) -> (i32, i32, i32) {
    %c0_i32 = arith.constant 0 : i32
    %c0_i32_0 = arith.constant 0 : i32
    %c0_i32_1 = arith.constant 0 : i32
    return %arg0, %c0_i32, %c0_i32_0 : i32, i32, i32
  }
  func.func @transform_1(%arg0: i32) -> (i32, i32) {
    %c0_i32 = arith.constant 0 : i32
    %c0_i32_0 = arith.constant 0 : i32
    %c0_i32_1 = arith.constant 0 : i32
    return %c0_i32, %c0_i32_0 : i32, i32
  }
  func.func @transform_2(%arg0: i32) -> (i32, i32) {
    %c0_i32 = arith.constant 0 : i32
    %c0_i32_0 = arith.constant 0 : i32
    %c0_i32_1 = arith.constant 0 : i32
    return %c0_i32, %c0_i32_0 : i32, i32
  }
  func.func @transform_3(%arg0: i32) -> (i32, i32) {
    %c0_i32 = arith.constant 0 : i32
    %c0_i32_0 = arith.constant 0 : i32
    %c0_i32_1 = arith.constant 0 : i32
    return %c0_i32, %c0_i32_0 : i32, i32
  }
  func.func @transform_4(%arg0: i32) -> (i32, i32) {
    %c0_i32 = arith.constant 0 : i32
    %c0_i32_0 = arith.constant 0 : i32
    %c0_i32_1 = arith.constant 0 : i32
    return %c0_i32, %c0_i32_0 : i32, i32
  }
  func.func @transform_5(%arg0: i32) -> (i32, i32) {
    %c0_i32 = arith.constant 0 : i32
    %c0_i32_0 = arith.constant 0 : i32
    %c0_i32_1 = arith.constant 0 : i32
    return %c0_i32, %c0_i32_0 : i32, i32
  }
  func.func @transform_6(%arg0: i32) -> (i32, i32) {
    %c0_i32 = arith.constant 0 : i32
    %c0_i32_0 = arith.constant 0 : i32
    %c0_i32_1 = arith.constant 0 : i32
    return %c0_i32, %c0_i32_0 : i32, i32
  }
  func.func @transform_7(%arg0: i32) -> (i32, i32) {
    %c0_i32 = arith.constant 0 : i32
    %c0_i32_0 = arith.constant 0 : i32
    %c0_i32_1 = arith.constant 0 : i32
    return %c0_i32, %c0_i32_0 : i32, i32
  }
  func.func @transform_8(%arg0: i32) -> (i32, i32) {
    %c0_i32 = arith.constant 0 : i32
    %c0_i32_0 = arith.constant 0 : i32
    %c0_i32_1 = arith.constant 0 : i32
    return %c0_i32, %c0_i32_0 : i32, i32
  }
  func.func @transform_9(%arg0: i32) -> (i32, i32) {
    %c0_i32 = arith.constant 0 : i32
    %c0_i32_0 = arith.constant 0 : i32
    %c0_i32_1 = arith.constant 0 : i32
    return %c0_i32, %c0_i32_0 : i32, i32
  }
  func.func @transform_10(%arg0: i32) -> (i32, i32) {
    %c0_i32 = arith.constant 0 : i32
    %c0_i32_0 = arith.constant 0 : i32
    %c0_i32_1 = arith.constant 0 : i32
    return %c0_i32, %c0_i32_0 : i32, i32
  }
  func.func @transform_11(%arg0: i32) -> (i32, i32) {
    %c0_i32 = arith.constant 0 : i32
    %c0_i32_0 = arith.constant 0 : i32
    %c0_i32_1 = arith.constant 0 : i32
    return %c0_i32, %c0_i32_0 : i32, i32
  }
  func.func @transform_12(%arg0: i32) -> (i32, i32) {
    %c0_i32 = arith.constant 0 : i32
    %c0_i32_0 = arith.constant 0 : i32
    %c0_i32_1 = arith.constant 0 : i32
    return %c0_i32, %c0_i32_0 : i32, i32
  }
  func.func @transform_13(%arg0: i32) -> (i32, i32) {
    %c0_i32 = arith.constant 0 : i32
    %c0_i32_0 = arith.constant 0 : i32
    %c0_i32_1 = arith.constant 0 : i32
    return %c0_i32, %c0_i32_0 : i32, i32
  }
  func.func @transform_14(%arg0: i32) -> (i32, i32) {
    %c0_i32 = arith.constant 0 : i32
    %c0_i32_0 = arith.constant 0 : i32
    %c0_i32_1 = arith.constant 0 : i32
    return %c0_i32, %c0_i32_0 : i32, i32
  }
  func.func @transform_15(%arg0: i32) -> (i32, i32, i32) {
    %c0_i32 = arith.constant 0 : i32
    %c0_i32_0 = arith.constant 0 : i32
    %c0_i32_1 = arith.constant 0 : i32
    return %arg0, %c0_i32, %c0_i32_0 : i32, i32, i32
  }
}

</mosaic_0001>

<bundles_post_ra>
// kernel: tpu_custom_call.1
= control target key start
LH: loop header
LB: loop body
LE: loop exit
PB: predicated region body
PF: predicated region fallthrough
CT: control target
= control target key end

     0   :  { %s12068_s0 = inlined_call_operand.vmem [shape: f32[4,128,64], index: 0, kind: input, shape index: {}]   ;;  %s12069_s1 = inlined_call_operand.vmem [shape: f32[576,64], index: 1, kind: input, shape index: {}]   ;;  %s12070_s2 = inlined_call_operand.vmem [shape: f32[9,128], index: 2, kind: input, shape index: {}]   ;;  %s12071_s3 = inlined_call_operand.vmem [shape: f32[1,128], index: 3, kind: input, shape index: {}]   ;;  %s12072_s4 = inlined_call_operand.vmem [shape: f32[1,128], index: 4, kind: input, shape index: {}]   ;;  %s12073_s5 = inlined_call_operand.vmem [shape: f32[1,128], index: 5, kind: input, shape index: {}]   ;;  %s12074_s6 = inlined_call_operand.vmem [shape: bf16[128,384], index: 6, kind: input, shape index: {}]   ;;  %s12075_s7 = inlined_call_operand.vmem [shape: bf16[128,128], index: 7, kind: input, shape index: {}]   ;;  %s12076_s8 = inlined_call_operand.vmem [shape: f32[1,128], index: 8, kind: input, shape index: {}]   ;;  %s12077_s9 = inlined_call_operand.vmem [shape: f32[1,128], index: 9, kind: input, shape index: {}]   ;;  %s12078_s10 = inlined_call_operand.vmem [shape: f32[1,128], index: 10, kind: input, shape index: {}]   ;;  %s12079_s11 = inlined_call_operand.vmem [shape: bf16[128,512], index: 11, kind: input, shape index: {}]   ;;  %s12080_s12 = inlined_call_operand.vmem [shape: f32[1,512], index: 12, kind: input, shape index: {}]   ;;  %s12081_s13 = inlined_call_operand.vmem [shape: bf16[512,128], index: 13, kind: input, shape index: {}]   ;;  %s12082_s14 = inlined_call_operand.vmem [shape: f32[1,128], index: 14, kind: input, shape index: {}]   ;;  %s12083_s15 = inlined_call_operand.hbm [shape: f32[4,64,128], index: 15, kind: output, shape index: {}]  }
   0x1   :  { %12120 = sst [smem:[#allocation37_spill]] %s12068_s0 }
   0x2   :  { %12121 = sst [smem:[#allocation38_spill]] %s12069_s1 }
   0x3   :  { %12122 = sst [smem:[#allocation39_spill]] %s12070_s2 }
   0x4   :  { %12123 = sst [smem:[#allocation40_spill]] %s12071_s3 }
   0x5   :  { %12124 = sst [smem:[#allocation41_spill]] %s12072_s4 }
   0x6   :  { %20 = vsyncpa [#allocation3], 0 }
   0x7   :  { %22 = vsyncpa [#allocation3 + $0x1], 0  ;;  %s8162_s18 = smov 0   ;;  %s8164_s19 = smov 0  }
   0x8   :  { %s8166_s20 = smov 0   ;;  %s8168_s21 = smov 0  }
   0x9 LB: > { %s8183_s22 = sadd.s32 4294967295, %s8074_s21   ;;  %s6700_s23 = sadd.s32 4294967294, %s8074_s21   ;;  %s8074_s21 = sphi %s8168_s21, %s12277_s21   ;;  %s8070_s20 = sphi %s8166_s20, %s12276_s20   ;;  %s8066_s19 = sphi %s8164_s19, %s12275_s19   ;;  %s8062_s18 = sphi %s8162_s18, %s12274_s18  }
   0xa   : > { %s8187_s24 = sadd.s32 1, %s8074_s21   ;;  %s355_s25 = sadd.s32 1, %s8070_s20 }
   0xb   : > { %s352_s26 = ssub.s32 %s8074_s21, %s8187_s24  ;;  %p365_p0 = scmp.ne.s32.totalorder %s8070_s20, %s8066_s19 }
   0xc   : > { %p353_p1 = scmp.eq.s32.totalorder %s352_s26, 0  ;;  %p366_p2 = scmp.eq.s32.totalorder %s8183_s22, 1 }
   0xd   : > { %p371_p3 = scmp.ne.s32.totalorder %s8066_s19, %s8062_s18  ;;  %p372_p4 = scmp.eq.s32.totalorder %s6700_s23, 1 }
   0xe   : > { %s8198_s27 = scalar_select %p353_p1, %s8070_s20, %s355_s25  }
   0xf   : > { %p8200_p5 = por %p366_p2, %p365_p0  ;;  %p8204_p6 = por %p372_p4, %p371_p3 }
  0x10   : > { %p6703_p7 = scmp.ge.s32.totalorder %s8074_s21, 1  ;;  %p442_p8 = scmp.lt.s32.totalorder %s8074_s21, 3 }
  0x12   : > { %p443_p9 = pnand %p6703_p7, %p442_p8 }
  0x14   : > { %446 = sbr.rel (%p443_p9) target bundleno = 5346 (0x14e2), region = 80 }
  0x19   : > { %s6705_s30 = sshll.u32 %s8183_s22, 1  ;;  %vm590_vm0 = vcmask 523264   ;;  %s12127_s0 = sld [smem:[#allocation37_spill]] }
  0x1a   : > { %p492_p10 = scmp.lt.s32.totalorder %s6705_s30, 3  ;;  %s12128_s1 = sld [smem:[#allocation38_spill]] }
  0x1b   : > { %s12131_s2 = sld [smem:[#allocation39_spill]]  ;;  %s8078_s23 = smov 64  }
  0x1c   : > { %s12279_s30 = smov (!%p492_p10, %s6705_s30), 3  ;;  %s12160_s3 = sld [smem:[#allocation40_spill]] }
  0x1d   : > { %s7394_s16 = sshll.u32 %s12279_s30, 7  ;;  %s12202_s4 = sld [smem:[#allocation41_spill]] }
  0x1f   : > { %s8214_s25 = scalar_lea.vmem %s12127_s0, %s7394_s16  ;;  %s8032_s16 = scalar_lea.hbm %s12083_s15, 256 }
  0x20   : > { %v589_v0 = vld [vmem:[%s8214_s25 + $0x78] sm:$0xff]  ;;  %v588_v2 = vld [vmem:[%s8214_s25 + $0x70] sm:$0xff]  ;;  %v587_v4 = vld [vmem:[%s8214_s25 + $0x68] sm:$0xff] }
  0x21   : > { %v6811_v1 = vld [vmem:[%s8214_s25 + $0xf8] sm:$0xff]  ;;  %6708 = vmatpush.xpose.msk.msra.mxu0 %vm590_vm0, %v589_v0  ;;  %v6810_v3 = vld [vmem:[%s8214_s25 + $0xf0] sm:$0xff]  ;;  %v6809_v5 = vld [vmem:[%s8214_s25 + $0xe8] sm:$0xff] }
  0x22   : > { %6812 = vmatpush.xpose.msk.msra.mxu1 %vm590_vm0, %v6811_v1  ;;  %v586_v6 = vld [vmem:[%s8214_s25 + $0x60] sm:$0xff]  ;;  %v585_v8 = vld [vmem:[%s8214_s25 + $0x58] sm:$0xff]  ;;  %v584_v10 = vld [vmem:[%s8214_s25 + $0x50] sm:$0xff] }
  0x23   : > { %v6808_v7 = vld [vmem:[%s8214_s25 + $0xe0] sm:$0xff]  ;;  %v6807_v9 = vld [vmem:[%s8214_s25 + $0xd8] sm:$0xff]  ;;  %v6806_v11 = vld [vmem:[%s8214_s25 + $0xd0] sm:$0xff] }
  0x24   : > { %v583_v12 = vld [vmem:[%s8214_s25 + $0x48] sm:$0xff]  ;;  %v582_v14 = vld [vmem:[%s8214_s25 + $0x40] sm:$0xff]  ;;  %v581_v16 = vld [vmem:[%s8214_s25 + $0x38] sm:$0xff] }
  0x25   : > { %6709 = vmatpush.xpose.msk.msra.mxu0 %vm590_vm0, %v588_v2  ;;  %v6805_v13 = vld [vmem:[%s8214_s25 + $0xc8] sm:$0xff]  ;;  %v6804_v15 = vld [vmem:[%s8214_s25 + $0xc0] sm:$0xff]  ;;  %v6803_v17 = vld [vmem:[%s8214_s25 + $0xb8] sm:$0xff] }
  0x26   : > { %6813 = vmatpush.xpose.msk.msra.mxu1 %vm590_vm0, %v6810_v3  ;;  %v580_v18 = vld [vmem:[%s8214_s25 + $0x30] sm:$0xff]  ;;  %v579_v20 = vld [vmem:[%s8214_s25 + $0x28] sm:$0xff]  ;;  %v578_v22 = vld [vmem:[%s8214_s25 + $0x20] sm:$0xff] }
  0x27   : > { %v6802_v19 = vld [vmem:[%s8214_s25 + $0xb0] sm:$0xff]  ;;  %v6801_v21 = vld [vmem:[%s8214_s25 + $0xa8] sm:$0xff]  ;;  %v6800_v23 = vld [vmem:[%s8214_s25 + $0xa0] sm:$0xff] }
  0x28   : > { %v577_v24 = vld [vmem:[%s8214_s25 + $0x18] sm:$0xff]  ;;  %v576_v26 = vld [vmem:[%s8214_s25 + $0x10] sm:$0xff]  ;;  %v575_v28 = vld [vmem:[%s8214_s25 + $0x8] sm:$0xff] }
  0x29   : > { %6710 = vmatpush.xpose.msk.msra.mxu0 %vm590_vm0, %v587_v4  ;;  %v6799_v25 = vld [vmem:[%s8214_s25 + $0x98] sm:$0xff]  ;;  %v6798_v27 = vld [vmem:[%s8214_s25 + $0x90] sm:$0xff]  ;;  %v6797_v29 = vld [vmem:[%s8214_s25 + $0x88] sm:$0xff] }
  0x2a   : > { %6814 = vmatpush.xpose.msk.msra.mxu1 %vm590_vm0, %v6809_v5  ;;  %v574_v30 = vld [vmem:[%s8214_s25] sm:$0xff]  ;;  %v501_v33 = vld [vmem:[%s12128_s1 + $0x8] sm:$0xff]  ;;  %v502_v34 = vld [vmem:[%s12128_s1 + $0x10] sm:$0xff] }
  0x2b   : > { %v6796_v31 = vld [vmem:[%s8214_s25 + $0x80] sm:$0xff]  ;;  %v503_v35 = vld [vmem:[%s12128_s1 + $0x18] sm:$0xff]  ;;  %v505_v37 = vld [vmem:[%s12128_s1 + $0x28] sm:$0xff]  ;;  %s8079_s25 = smov 32  }
  0x2c   : > { %v500_v32 = vld [vmem:[%s12128_s1] sm:$0xff]  ;;  %v506_v38 = vld [vmem:[%s12128_s1 + $0x30] sm:$0xff]  ;;  %v507_v39 = vld [vmem:[%s12128_s1 + $0x38] sm:$0xff] }
  0x2d   : > { %6711 = vmatpush.xpose.msk.msra.mxu0 %vm590_vm0, %v586_v6  ;;  %v504_v36 = vld [vmem:[%s12128_s1 + $0x20] sm:$0xff]  ;;  %v509_v41 = vld [vmem:[%s12128_s1 + $0x48] sm:$0xff]  ;;  %v510_v42 = vld [vmem:[%s12128_s1 + $0x50] sm:$0xff] }
  0x2e   : > { %6815 = vmatpush.xpose.msk.msra.mxu1 %vm590_vm0, %v6808_v7  ;;  %v508_v40 = vld [vmem:[%s12128_s1 + $0x40] sm:$0xff]  ;;  %v511_v43 = vld [vmem:[%s12128_s1 + $0x58] sm:$0xff]  ;;  %v513_v45 = vld [vmem:[%s12128_s1 + $0x68] sm:$0xff] }
  0x2f   : > { %v512_v44 = vld [vmem:[%s12128_s1 + $0x60] sm:$0xff]  ;;  %v514_v46 = vld [vmem:[%s12128_s1 + $0x70] sm:$0xff]  ;;  %v515_v47 = vld [vmem:[%s12128_s1 + $0x78] sm:$0xff] }
  0x30   : > { %v516_v50 = vld [vmem:[%s12128_s1 + $0x80] sm:$0xff]  ;;  %v517_v53 = vld [vmem:[%s12128_s1 + $0x88] sm:$0xff]  ;;  %v518_v56 = vld [vmem:[%s12128_s1 + $0x90] sm:$0xff] }
  0x31   : > { %6712 = vmatpush.xpose.msk.msra.mxu0 %vm590_vm0, %v585_v8  ;;  %v519_v59 = vld [vmem:[%s12128_s1 + $0x98] sm:$0xff]  ;;  %v520_v62 = vld [vmem:[%s12128_s1 + $0xa0] sm:$0xff]  ;;  %v521_v1 = vld [vmem:[%s12128_s1 + $0xa8] sm:$0xff] }
  0x32   : > { %6816 = vmatpush.xpose.msk.msra.mxu1 %vm590_vm0, %v6807_v9  ;;  %v522_v4 = vld [vmem:[%s12128_s1 + $0xb0] sm:$0xff]  ;;  %v523_v7 = vld [vmem:[%s12128_s1 + $0xb8] sm:$0xff]  ;;  %v8419_v8 = vld [vmem:[%s12131_s2] sm:$0xff] }
  0x33   : > { %v8424_v9 = vperm.slane %v8419_v8, 0 }
  0x35   : > { %6713 = vmatpush.xpose.msk.msra.mxu0 %vm590_vm0, %v584_v10 }
  0x36   : > { %6817 = vmatpush.xpose.msk.msra.mxu1 %vm590_vm0, %v6806_v11  ;;  %v8428_v11 = vperm.slane %v8419_v8, 1 }
  0x39   : > { %6714 = vmatpush.xpose.msk.msra.mxu0 %vm590_vm0, %v583_v12 }
  0x3a   : > { %6818 = vmatpush.xpose.msk.msra.mxu1 %vm590_vm0, %v6805_v13 }
  0x3d   : > { %6715 = vmatpush.xpose.msk.msra.mxu0 %vm590_vm0, %v582_v14  ;;  %v524_v14 = vld [vmem:[%s12128_s1 + $0xc0] sm:$0xff] }
  0x3e   : > { %6819 = vmatpush.xpose.msk.msra.mxu1 %vm590_vm0, %v6804_v15 }
  0x41   : > { %6716 = vmatpush.xpose.msk.msra.mxu0 %vm590_vm0, %v581_v16 }
  0x42   : > { %6820 = vmatpush.xpose.msk.msra.mxu1 %vm590_vm0, %v6803_v17 }
  0x45   : > { %6717 = vmatpush.xpose.msk.msra.mxu0 %vm590_vm0, %v580_v18 }
  0x46   : > { %6821 = vmatpush.xpose.msk.msra.mxu1 %vm590_vm0, %v6802_v19 }
  0x49   : > { %6718 = vmatpush.xpose.msk.msra.mxu0 %vm590_vm0, %v579_v20  ;;  %v525_v20 = vld [vmem:[%s12128_s1 + $0xc8] sm:$0xff] }
  0x4a   : > { %6822 = vmatpush.xpose.msk.msra.mxu1 %vm590_vm0, %v6801_v21 }
  0x4d   : > { %6719 = vmatpush.xpose.msk.msra.mxu0 %vm590_vm0, %v578_v22 }
  0x4e   : > { %6823 = vmatpush.xpose.msk.msra.mxu1 %vm590_vm0, %v6800_v23 }
  0x51   : > { %6720 = vmatpush.xpose.msk.msra.mxu0 %vm590_vm0, %v577_v24 }
  0x52   : > { %6824 = vmatpush.xpose.msk.msra.mxu1 %vm590_vm0, %v6799_v25 }
  0x55   : > { %6721 = vmatpush.xpose.msk.msra.mxu0 %vm590_vm0, %v576_v26  ;;  %v526_v26 = vld [vmem:[%s12128_s1 + $0xd0] sm:$0xff] }
  0x56   : > { %6825 = vmatpush.xpose.msk.msra.mxu1 %vm590_vm0, %v6798_v27 }
  0x59   : > { %6722 = vmatpush.xpose.msk.msra.mxu0 %vm590_vm0, %v575_v28 }
  0x5a   : > { %6826 = vmatpush.xpose.msk.msra.mxu1 %vm590_vm0, %v6797_v29 }
  0x5d   : > { %6723 = vmatpush.xpose.msk.msra.mxu0 %vm590_vm0, %v574_v30 }
  0x5e   : > { %6827 = vmatpush.xpose.msk.msra.mxu1 %vm590_vm0, %v6796_v31 }
  0x60   : > { %6724 = vmatmul.msk.f32.vlgmr.msra.gmra.mxu0 %vm590_vm0, %v500_v32 }
  0x61   : > { %6828 = vmatmul.msk.f32.vlgmr.msra.gmra.mxu1 %vm590_vm0, %v500_v32  ;;  %v527_v32 = vld [vmem:[%s12128_s1 + $0xd8] sm:$0xff] }
  0x68   : > { %6725 = vmatmul.msk.f32.gmra.mxu0 %vm590_vm0, %v501_v33 }
  0x69   : > { %6829 = vmatmul.msk.f32.gmra.mxu1 %vm590_vm0, %v501_v33 }
  0x70   : > { %6726 = vmatmul.msk.f32.gmra.mxu0 %vm590_vm0, %v502_v34 }
  0x71   : > { %6830 = vmatmul.msk.f32.gmra.mxu1 %vm590_vm0, %v502_v34 }
  0x78   : > { %6727 = vmatmul.msk.f32.gmra.mxu0 %vm590_vm0, %v503_v35 }
  0x79   : > { %6831 = vmatmul.msk.f32.gmra.mxu1 %vm590_vm0, %v503_v35 }
  0x80   : > { %6728 = vmatmul.msk.f32.gmra.mxu0 %vm590_vm0, %v504_v36 }
  0x81   : > { %6832 = vmatmul.msk.f32.gmra.mxu1 %vm590_vm0, %v504_v36 }
  0x88   : > { %6729 = vmatmul.msk.f32.gmra.mxu0 %vm590_vm0, %v505_v37 }
  0x89   : > { %6833 = vmatmul.msk.f32.gmra.mxu1 %vm590_vm0, %v505_v37 }
  0x90   : > { %6730 = vmatmul.msk.f32.gmra.mxu0 %vm590_vm0, %v506_v38 }
  0x91   : > { %6834 = vmatmul.msk.f32.gmra.mxu1 %vm590_vm0, %v506_v38  ;;  %v528_v38 = vld [vmem:[%s12128_s1 + $0xe0] sm:$0xff] }
  0x98   : > { %6731 = vmatmul.msk.f32.gmra.mxu0 %vm590_vm0, %v507_v39 }
  0x99   : > { %6835 = vmatmul.msk.f32.gmra.mxu1 %vm590_vm0, %v507_v39 }
  0xa0   : > { %6732 = vmatmul.msk.f32.gmra.mxu0 %vm590_vm0, %v508_v40 }
  0xa1   : > { %6836 = vmatmul.msk.f32.gmra.mxu1 %vm590_vm0, %v508_v40 }
  0xa8   : > { %6733 = vmatmul.msk.f32.gmra.mxu0 %vm590_vm0, %v509_v41 }
  0xa9   : > { %6837 = vmatmul.msk.f32.gmra.mxu1 %vm590_vm0, %v509_v41 }
  0xb0   : > { %6734 = vmatmul.msk.f32.gmra.mxu0 %vm590_vm0, %v510_v42 }
  0xb1   : > { %6838 = vmatmul.msk.f32.gmra.mxu1 %vm590_vm0, %v510_v42 }
  0xb8   : > { %6735 = vmatmul.msk.f32.gmra.mxu0 %vm590_vm0, %v511_v43 }
  0xb9   : > { %6839 = vmatmul.msk.f32.gmra.mxu1 %vm590_vm0, %v511_v43 }
  0xc0   : > { %6736 = vmatmul.msk.f32.gmra.mxu0 %vm590_vm0, %v512_v44 }
  0xc1   : > { %6840 = vmatmul.msk.f32.gmra.mxu1 %vm590_vm0, %v512_v44  ;;  %v529_v44 = vld [vmem:[%s12128_s1 + $0xe8] sm:$0xff] }
  0xc8   : > { %6737 = vmatmul.msk.f32.gmra.mxu0 %vm590_vm0, %v513_v45 }
  0xc9   : > { %6841 = vmatmul.msk.f32.gmra.mxu1 %vm590_vm0, %v513_v45 }
  0xd0   : > { %6738 = vmatmul.msk.f32.gmra.mxu0 %vm590_vm0, %v514_v46 }
  0xd1   : > { %6842 = vmatmul.msk.f32.gmra.mxu1 %vm590_vm0, %v514_v46 }
  0xd8   : > { %6739 = vmatmul.msk.f32.gmra.mxu0 %vm590_vm0, %v515_v47 }
  0xd9   : > { %6843 = vmatmul.msk.f32.gmra.mxu1 %vm590_vm0, %v515_v47 }
  0xdd   : > { %v8360_v48 = vpop.f32.mrf.mxu0 }
  0xde   : > { %v1331_v49 = vpop.f32.mrf.mxu1 }
  0xdf   : > { %v1547_v10 = vmul.f32 %v1331_v49, %v8424_v9 }
  0xe0   : > { %6740 = vmatmul.msk.f32.gmra.mxu0 %vm590_vm0, %v516_v50 }
  0xe1   : > { %6844 = vmatmul.msk.f32.gmra.mxu1 %vm590_vm0, %v516_v50 }
  0xe5   : > { %v8367_v51 = vpop.f32.mrf.mxu0 }
  0xe6   : > { %v1334_v52 = vpop.f32.mrf.mxu1 }
  0xe7   : > { %v1548_v17 = vmul.f32 %v1334_v52, %v8424_v9  ;;  %v530_v52 = vld [vmem:[%s12128_s1 + $0xf0] sm:$0xff] }
  0xe8   : > { %6741 = vmatmul.msk.f32.gmra.mxu0 %vm590_vm0, %v517_v53 }
  0xe9   : > { %6845 = vmatmul.msk.f32.gmra.mxu1 %vm590_vm0, %v517_v53 }
  0xed   : > { %v8374_v54 = vpop.f32.mrf.mxu0 }
  0xee   : > { %v1337_v55 = vpop.f32.mrf.mxu1 }
  0xef   : > { %v1549_v23 = vmul.f32 %v1337_v55, %v8424_v9 }
  0xf0   : > { %6742 = vmatmul.msk.f32.gmra.mxu0 %vm590_vm0, %v518_v56 }
  0xf1   : > { %6846 = vmatmul.msk.f32.gmra.mxu1 %vm590_vm0, %v518_v56 }
  0xf5   : > { %v8381_v57 = vpop.f32.mrf.mxu0 }
  0xf6   : > { %v1340_v58 = vpop.f32.mrf.mxu1 }
  0xf7   : > { %v1550_v29 = vmul.f32 %v1340_v58, %v8424_v9 }
  0xf8   : > { %6743 = vmatmul.msk.f32.gmra.mxu0 %vm590_vm0, %v519_v59 }
  0xf9   : > { %6847 = vmatmul.msk.f32.gmra.mxu1 %vm590_vm0, %v519_v59 }
  0xfd   : > { %v8388_v60 = vpop.f32.mrf.mxu0 }
  0xfe   : > { %v1343_v61 = vpop.f32.mrf.mxu1 }
  0xff   : > { %v1551_v35 = vmul.f32 %v1343_v61, %v8424_v9  ;;  %v531_v61 = vld [vmem:[%s12128_s1 + $0xf8] sm:$0xff] }
 0x100   : > { %6744 = vmatmul.msk.f32.gmra.mxu0 %vm590_vm0, %v520_v62 }
 0x101   : > { %6848 = vmatmul.msk.f32.gmra.mxu1 %vm590_vm0, %v520_v62 }
 0x105   : > { %v8395_v63 = vpop.f32.mrf.mxu0 }
 0x106   : > { %12129 = vst [vmem:[#allocation5_spill] sm:$0xff] %v8395_v63  ;;  %v1346_v0 = vpop.f32.mrf.mxu1 }
 0x107   : > { %v1552_v41 = vmul.f32 %v1346_v0, %v8424_v9 }
 0x108   : > { %6745 = vmatmul.msk.f32.gmra.mxu0 %vm590_vm0, %v521_v1 }
 0x109   : > { %6849 = vmatmul.msk.f32.gmra.mxu1 %vm590_vm0, %v521_v1 }
 0x10d   : > { %v8402_v2 = vpop.f32.mrf.mxu0 }
 0x10e   : > { %12130 = vst [vmem:[#allocation6_spill] sm:$0xff] %v8402_v2  ;;  %v1349_v3 = vpop.f32.mrf.mxu1 }
 0x10f   : > { %v1553_v47 = vmul.f32 %v1349_v3, %v8424_v9 }
 0x110   : > { %6746 = vmatmul.msk.f32.gmra.mxu0 %vm590_vm0, %v522_v4 }
 0x111   : > { %6850 = vmatmul.msk.f32.gmra.mxu1 %vm590_vm0, %v522_v4 }
 0x115   : > { %v8409_v5 = vpop.f32.mrf.mxu0 }
 0x116   : > { %v8411_v6 = vpop.f32.mrf.mxu1  ;;  %v1096_v62 = vmul.f32 %v8424_v9, %v8409_v5  ;;  %v532_v5 = vld [vmem:[%s12128_s1 + $0x100] sm:$0xff] }
 0x117   : > { %v1554_v56 = vmul.f32 %v8411_v6, %v8424_v9  ;;  %v8514_v6 = vperm.slane %v8419_v8, 2 }
 0x118   : > { %6747 = vmatmul.msk.f32.gmra.mxu0 %vm590_vm0, %v523_v7 }
 0x119   : > { %6851 = vmatmul.msk.f32.gmra.mxu1 %vm590_vm0, %v523_v7 }
 0x11d   : > { %v8430_v12 = vpop.f32.mrf.mxu0 }
 0x11e   : > { %v1355_v13 = vpop.f32.mrf.mxu1 }
 0x11f   : > { %v1563_v15 = vmul.f32 %v1355_v13, %v8428_v11 }
 0x120   : > { %6748 = vmatmul.msk.f32.gmra.mxu0 %vm590_vm0, %v524_v14 }
 0x121   : > { %v8436_v16 = vadd.f32 %v1563_v15, %v1547_v10  ;;  %6852 = vmatmul.msk.f32.gmra.mxu1 %vm590_vm0, %v524_v14 }
 0x125   : > { %v8441_v18 = vpop.f32.mrf.mxu0 }
 0x126   : > { %v1358_v19 = vpop.f32.mrf.mxu1 }
 0x127   : > { %v1564_v21 = vmul.f32 %v1358_v19, %v8428_v11  ;;  %v533_v19 = vld [vmem:[%s12128_s1 + $0x108] sm:$0xff] }
 0x128   : > { %6749 = vmatmul.msk.f32.gmra.mxu0 %vm590_vm0, %v525_v20 }
 0x129   : > { %v8447_v22 = vadd.f32 %v1564_v21, %v1548_v17  ;;  %6853 = vmatmul.msk.f32.gmra.mxu1 %vm590_vm0, %v525_v20 }
 0x12d   : > { %v8452_v24 = vpop.f32.mrf.mxu0 }
 0x12e   : > { %v1361_v25 = vpop.f32.mrf.mxu1 }
 0x12f   : > { %v1565_v27 = vmul.f32 %v1361_v25, %v8428_v11  ;;  %v534_v25 = vld [vmem:[%s12128_s1 + $0x110] sm:$0xff] }
 0x130   : > { %6750 = vmatmul.msk.f32.gmra.mxu0 %vm590_vm0, %v526_v26 }
 0x131   : > { %v8458_v28 = vadd.f32 %v1565_v27, %v1549_v23  ;;  %6854 = vmatmul.msk.f32.gmra.mxu1 %vm590_vm0, %v526_v26 }
 0x135   : > { %v8463_v30 = vpop.f32.mrf.mxu0 }
 0x136   : > { %v1364_v31 = vpop.f32.mrf.mxu1 }
 0x137   : > { %v1566_v33 = vmul.f32 %v1364_v31, %v8428_v11  ;;  %v535_v31 = vld [vmem:[%s12128_s1 + $0x118] sm:$0xff] }
 0x138   : > { %6751 = vmatmul.msk.f32.gmra.mxu0 %vm590_vm0, %v527_v32 }
 0x139   : > { %v8469_v34 = vadd.f32 %v1566_v33, %v1550_v29  ;;  %6855 = vmatmul.msk.f32.gmra.mxu1 %vm590_vm0, %v527_v32 }
 0x13d   : > { %v8474_v36 = vpop.f32.mrf.mxu0 }
 0x13e   : > { %v1367_v37 = vpop.f32.mrf.mxu1 }
 0x13f   : > { %v1567_v39 = vmul.f32 %v1367_v37, %v8428_v11  ;;  %v536_v37 = vld [vmem:[%s12128_s1 + $0x120] sm:$0xff] }
 0x140   : > { %6752 = vmatmul.msk.f32.gmra.mxu0 %vm590_vm0, %v528_v38 }
 0x141   : > { %v8480_v40 = vadd.f32 %v1567_v39, %v1551_v35  ;;  %6856 = vmatmul.msk.f32.gmra.mxu1 %vm590_vm0, %v528_v38 }
 0x145   : > { %v8485_v42 = vpop.f32.mrf.mxu0 }
 0x146   : > { %12132 = vst [vmem:[#allocation7_spill] sm:$0xff] %v8485_v42  ;;  %v1370_v43 = vpop.f32.mrf.mxu1 }
 0x147   : > { %v1568_v45 = vmul.f32 %v1370_v43, %v8428_v11  ;;  %v537_v43 = vld [vmem:[%s12128_s1 + $0x128] sm:$0xff] }
 0x148   : > { %6753 = vmatmul.msk.f32.gmra.mxu0 %vm590_vm0, %v529_v44 }
 0x149   : > { %v1576_v46 = vadd.f32 %v1568_v45, %v1552_v41  ;;  %6857 = vmatmul.msk.f32.gmra.mxu1 %vm590_vm0, %v529_v44 }
 0x14d   : > { %v8494_v49 = vpop.f32.mrf.mxu0 }
 0x14e   : > { %12133 = vst [vmem:[#allocation8_spill] sm:$0xff] %v8494_v49  ;;  %v1373_v50 = vpop.f32.mrf.mxu1 }
 0x14f   : > { %v1569_v53 = vmul.f32 %v1373_v50, %v8428_v11  ;;  %v538_v50 = vld [vmem:[%s12128_s1 + $0x130] sm:$0xff] }
 0x150   : > { %6754 = vmatmul.msk.f32.gmra.mxu0 %vm590_vm0, %v530_v52 }
 0x151   : > { %v1577_v55 = vadd.f32 %v1569_v53, %v1553_v47  ;;  %6858 = vmatmul.msk.f32.gmra.mxu1 %vm590_vm0, %v530_v52 }
 0x155   : > { %v917_v58 = vpop.f32.mrf.mxu0 }
 0x156   : > { %v1376_v59 = vpop.f32.mrf.mxu1  ;;  %v1113_v0 = vmul.f32 %v8428_v11, %v917_v58  ;;  %v539_v58 = vld [vmem:[%s12128_s1 + $0x138] sm:$0xff] }
 0x157   : > { %v1570_v1 = vmul.f32 %v1376_v59, %v8428_v11 }
 0x158   : > { %v1121_v3 = vadd.f32 %v1113_v0, %v1096_v62  ;;  %6755 = vmatmul.msk.f32.gmra.mxu0 %vm590_vm0, %v531_v61 }
 0x159   : > { %v1578_v4 = vadd.f32 %v1570_v1, %v1554_v56  ;;  %6859 = vmatmul.msk.f32.gmra.mxu1 %vm590_vm0, %v531_v61 }
 0x15d   : > { %v8516_v7 = vpop.f32.mrf.mxu0 }
 0x15e   : > { %v1379_v10 = vpop.f32.mrf.mxu1 }
 0x15f   : > { %v1579_v13 = vmul.f32 %v1379_v10, %v8514_v6 }
 0x160   : > { %6756 = vmatmul.msk.f32.gmra.mxu0 %vm590_vm0, %v532_v5 }
 0x161   : > { %v1587_v14 = vadd.f32 %v1579_v13, %v8436_v16  ;;  %6860 = vmatmul.msk.f32.gmra.mxu1 %vm590_vm0, %v532_v5  ;;  %v540_v5 = vld [vmem:[%s12128_s1 + $0x140] sm:$0xff] }
 0x165   : > { %v8525_v15 = vpop.f32.mrf.mxu0 }
 0x166   : > { %v1382_v17 = vpop.f32.mrf.mxu1 }
 0x167   : > { %v1580_v20 = vmul.f32 %v1382_v17, %v8514_v6 }
 0x168   : > { %6757 = vmatmul.msk.f32.gmra.mxu0 %vm590_vm0, %v533_v19 }
 0x169   : > { %v1588_v21 = vadd.f32 %v1580_v20, %v8447_v22  ;;  %6861 = vmatmul.msk.f32.gmra.mxu1 %vm590_vm0, %v533_v19  ;;  %v541_v19 = vld [vmem:[%s12128_s1 + $0x148] sm:$0xff] }
 0x16d   : > { %v8534_v16 = vpop.f32.mrf.mxu0 }
 0x16e   : > { %v1385_v23 = vpop.f32.mrf.mxu1 }
 0x16f   : > { %v1581_v26 = vmul.f32 %v1385_v23, %v8514_v6 }
 0x170   : > { %6758 = vmatmul.msk.f32.gmra.mxu0 %vm590_vm0, %v534_v25 }
 0x171   : > { %v1589_v27 = vadd.f32 %v1581_v26, %v8458_v28  ;;  %6862 = vmatmul.msk.f32.gmra.mxu1 %vm590_vm0, %v534_v25  ;;  %v542_v26 = vld [vmem:[%s12128_s1 + $0x150] sm:$0xff] }
 0x175   : > { %v8543_v22 = vpop.f32.mrf.mxu0 }
 0x176   : > { %v1388_v29 = vpop.f32.mrf.mxu1 }
 0x177   : > { %v1582_v32 = vmul.f32 %v1388_v29, %v8514_v6 }
 0x178   : > { %6759 = vmatmul.msk.f32.gmra.mxu0 %vm590_vm0, %v535_v31 }
 0x179   : > { %v1590_v33 = vadd.f32 %v1582_v32, %v8469_v34  ;;  %6863 = vmatmul.msk.f32.gmra.mxu1 %vm590_vm0, %v535_v31 }
 0x17d   : > { %v8552_v28 = vpop.f32.mrf.mxu0 }
 0x17e   : > { %12134 = vst [vmem:[#allocation9_spill] sm:$0xff] %v8552_v28  ;;  %v1391_v35 = vpop.f32.mrf.mxu1 }
 0x17f   : > { %v1583_v38 = vmul.f32 %v1391_v35, %v8514_v6  ;;  %v543_v35 = vld [vmem:[%s12128_s1 + $0x158] sm:$0xff] }
 0x180   : > { %6760 = vmatmul.msk.f32.gmra.mxu0 %vm590_vm0, %v536_v37 }
 0x181   : > { %v1591_v39 = vadd.f32 %v1583_v38, %v8480_v40  ;;  %6864 = vmatmul.msk.f32.gmra.mxu1 %vm590_vm0, %v536_v37 }
 0x185   : > { %v8561_v34 = vpop.f32.mrf.mxu0 }
 0x186   : > { %12135 = vst [vmem:[#allocation10_spill] sm:$0xff] %v8561_v34  ;;  %v1394_v41 = vpop.f32.mrf.mxu1 }
 0x187   : > { %v1584_v44 = vmul.f32 %v1394_v41, %v8514_v6 }
 0x188   : > { %6761 = vmatmul.msk.f32.gmra.mxu0 %vm590_vm0, %v537_v43 }
 0x189   : > { %v1592_v45 = vadd.f32 %v1584_v44, %v1576_v46  ;;  %6865 = vmatmul.msk.f32.gmra.mxu1 %vm590_vm0, %v537_v43  ;;  %v544_v43 = vld [vmem:[%s12128_s1 + $0x160] sm:$0xff] }
 0x18d   : > { %v8569_v47 = vpop.f32.mrf.mxu0 }
 0x18e   : > { %12136 = vst [vmem:[#allocation11_spill] sm:$0xff] %v8569_v47  ;;  %v1397_v40 = vpop.f32.mrf.mxu1 }
 0x18f   : > { %v1585_v52 = vmul.f32 %v1397_v40, %v8514_v6 }
 0x190   : > { %6762 = vmatmul.msk.f32.gmra.mxu0 %vm590_vm0, %v538_v50 }
 0x191   : > { %v1593_v53 = vadd.f32 %v1585_v52, %v1577_v55  ;;  %6866 = vmatmul.msk.f32.gmra.mxu1 %vm590_vm0, %v538_v50  ;;  %v8585_v55 = vperm.slane %v8419_v8, 3  ;;  %v545_v52 = vld [vmem:[%s12128_s1 + $0x168] sm:$0xff] }
 0x195   : > { %v941_v56 = vpop.f32.mrf.mxu0 }
 0x196   : > { %v1400_v46 = vpop.f32.mrf.mxu1  ;;  %v1130_v59 = vmul.f32 %v8514_v6, %v941_v56 }
 0x197   : > { %v1586_v61 = vmul.f32 %v1400_v46, %v8514_v6 }
 0x198   : > { %v1138_v62 = vadd.f32 %v1130_v59, %v1121_v3  ;;  %6763 = vmatmul.msk.f32.gmra.mxu0 %vm590_vm0, %v539_v58  ;;  %v546_v59 = vld [vmem:[%s12128_s1 + $0x170] sm:$0xff] }
 0x199   : > { %v1594_v0 = vadd.f32 %v1586_v61, %v1578_v4  ;;  %6867 = vmatmul.msk.f32.gmra.mxu1 %vm590_vm0, %v539_v58 }
 0x19d   : > { %v8587_v1 = vpop.f32.mrf.mxu0 }
 0x19e   : > { %v1403_v10 = vpop.f32.mrf.mxu1 }
 0x19f   : > { %v1595_v13 = vmul.f32 %v1403_v10, %v8585_v55 }
 0x1a0   : > { %6764 = vmatmul.msk.f32.gmra.mxu0 %vm590_vm0, %v540_v5 }
 0x1a1   : > { %v1603_v17 = vadd.f32 %v1595_v13, %v1587_v14  ;;  %6868 = vmatmul.msk.f32.gmra.mxu1 %vm590_vm0, %v540_v5  ;;  %v547_v13 = vld [vmem:[%s12128_s1 + $0x178] sm:$0xff] }
 0x1a5   : > { %v8595_v3 = vpop.f32.mrf.mxu0 }
 0x1a6   : > { %v1406_v4 = vpop.f32.mrf.mxu1 }
 0x1a7   : > { %v1596_v20 = vmul.f32 %v1406_v4, %v8585_v55 }
 0x1a8   : > { %6765 = vmatmul.msk.f32.gmra.mxu0 %vm590_vm0, %v541_v19 }
 0x1a9   : > { %v1604_v23 = vadd.f32 %v1596_v20, %v1588_v21  ;;  %6869 = vmatmul.msk.f32.gmra.mxu1 %vm590_vm0, %v541_v19 }
 0x1ad   : > { %v8603_v25 = vpop.f32.mrf.mxu0 }
 0x1ae   : > { %v1409_v14 = vpop.f32.mrf.mxu1 }
 0x1af   : > { %v1597_v29 = vmul.f32 %v1409_v14, %v8585_v55 }
 0x1b0   : > { %6766 = vmatmul.msk.f32.gmra.mxu0 %vm590_vm0, %v542_v26 }
 0x1b1   : > { %v1605_v31 = vadd.f32 %v1597_v29, %v1589_v27  ;;  %6870 = vmatmul.msk.f32.gmra.mxu1 %vm590_vm0, %v542_v26 }
 0x1b5   : > { %v8611_v32 = vpop.f32.mrf.mxu0 }
 0x1b6   : > { %v1412_v21 = vpop.f32.mrf.mxu1 }
 0x1b7   : > { %v1598_v37 = vmul.f32 %v1412_v21, %v8585_v55  ;;  %v548_v21 = vld [vmem:[%s12128_s1 + $0x180] sm:$0xff] }
 0x1b8   : > { %6767 = vmatmul.msk.f32.gmra.mxu0 %vm590_vm0, %v543_v35 }
 0x1b9   : > { %v1606_v38 = vadd.f32 %v1598_v37, %v1590_v33  ;;  %6871 = vmatmul.msk.f32.gmra.mxu1 %vm590_vm0, %v543_v35 }
 0x1bd   : > { %v8619_v41 = vpop.f32.mrf.mxu0 }
 0x1be   : > { %12137 = vst [vmem:[#allocation12_spill] sm:$0xff] %v8619_v41  ;;  %v1415_v27 = vpop.f32.mrf.mxu1 }
 0x1bf   : > { %v1599_v44 = vmul.f32 %v1415_v27, %v8585_v55  ;;  %v549_v27 = vld [vmem:[%s12128_s1 + $0x188] sm:$0xff] }
 0x1c0   : > { %6768 = vmatmul.msk.f32.gmra.mxu0 %vm590_vm0, %v544_v43 }
 0x1c1   : > { %v1607_v40 = vadd.f32 %v1599_v44, %v1591_v39  ;;  %6872 = vmatmul.msk.f32.gmra.mxu1 %vm590_vm0, %v544_v43 }
 0x1c5   : > { %v8627_v50 = vpop.f32.mrf.mxu0 }
 0x1c6   : > { %12138 = vst [vmem:[#allocation13_spill] sm:$0xff] %v8627_v50  ;;  %v1418_v33 = vpop.f32.mrf.mxu1 }
 0x1c7   : > { %v1600_v56 = vmul.f32 %v1418_v33, %v8585_v55 }
 0x1c8   : > { %6769 = vmatmul.msk.f32.gmra.mxu0 %vm590_vm0, %v545_v52 }
 0x1c9   : > { %v1608_v46 = vadd.f32 %v1600_v56, %v1592_v45  ;;  %6873 = vmatmul.msk.f32.gmra.mxu1 %vm590_vm0, %v545_v52  ;;  %v550_v52 = vld [vmem:[%s12128_s1 + $0x190] sm:$0xff] }
 0x1cd   : > { %v8635_v58 = vpop.f32.mrf.mxu0 }
 0x1ce   : > { %12139 = vst [vmem:[#allocation14_spill] sm:$0xff] %v8635_v58  ;;  %v1421_v39 = vpop.f32.mrf.mxu1 }
 0x1cf   : > { %v1601_v61 = vmul.f32 %v1421_v39, %v8585_v55 }
 0x1d0   : > { %6770 = vmatmul.msk.f32.gmra.mxu0 %vm590_vm0, %v546_v59 }
 0x1d1   : > { %v1609_v10 = vadd.f32 %v1601_v61, %v1593_v53  ;;  %6874 = vmatmul.msk.f32.gmra.mxu1 %vm590_vm0, %v546_v59  ;;  %v8651_v53 = vperm.slane %v8419_v8, 4  ;;  %v551_v61 = vld [vmem:[%s12128_s1 + $0x198] sm:$0xff] }
 0x1d5   : > { %v965_v5 = vpop.f32.mrf.mxu0 }
 0x1d6   : > { %v1424_v45 = vpop.f32.mrf.mxu1  ;;  %v1147_v4 = vmul.f32 %v8585_v55, %v965_v5 }
 0x1d7   : > { %v1602_v19 = vmul.f32 %v1424_v45, %v8585_v55 }
 0x1d8   : > { %v1155_v20 = vadd.f32 %v1147_v4, %v1138_v62  ;;  %6771 = vmatmul.msk.f32.gmra.mxu0 %vm590_vm0, %v547_v13  ;;  %v552_v4 = vld [vmem:[%s12128_s1 + $0x1a0] sm:$0xff] }
 0x1d9   : > { %v1610_v14 = vadd.f32 %v1602_v19, %v1594_v0  ;;  %6875 = vmatmul.msk.f32.gmra.mxu1 %vm590_vm0, %v547_v13 }
 0x1dd   : > { %v8653_v26 = vpop.f32.mrf.mxu0 }
 0x1de   : > { %v8655_v29 = vpop.f32.mrf.mxu1 }
 0x1df   : > { %v1611_v35 = vmul.f32 %v8655_v29, %v8651_v53 }
 0x1e0   : > { %6772 = vmatmul.msk.f32.gmra.mxu0 %vm590_vm0, %v548_v21 }
 0x1e1   : > { %v1619_v62 = vadd.f32 %v1611_v35, %v1603_v17  ;;  %6876 = vmatmul.msk.f32.gmra.mxu1 %vm590_vm0, %v548_v21 }
 0x1e5   : > { %v8664_v0 = vpop.f32.mrf.mxu0 }
 0x1e6   : > { %v8666_v37 = vpop.f32.mrf.mxu1 }
 0x1e7   : > { %v1612_v43 = vmul.f32 %v8666_v37, %v8651_v53 }
 0x1e8   : > { %6773 = vmatmul.msk.f32.gmra.mxu0 %vm590_vm0, %v549_v27 }
 0x1e9   : > { %v1620_v44 = vadd.f32 %v1612_v43, %v1604_v23  ;;  %6877 = vmatmul.msk.f32.gmra.mxu1 %vm590_vm0, %v549_v27  ;;  %v553_v27 = vld [vmem:[%s12128_s1 + $0x1a8] sm:$0xff] }
 0x1ed   : > { %v8675_v17 = vpop.f32.mrf.mxu0 }
 0x1ee   : > { %v8677_v33 = vpop.f32.mrf.mxu1 }
 0x1ef   : > { %12140 = vst [vmem:[#allocation15_spill] sm:$0xff] %v8677_v33  ;;  %v1613_v56 = vmul.f32 %v8677_v33, %v8651_v53 }
 0x1f0   : > { %6774 = vmatmul.msk.f32.gmra.mxu0 %vm590_vm0, %v550_v52 }
 0x1f1   : > { %v1621_v39 = vadd.f32 %v1613_v56, %v1605_v31  ;;  %6878 = vmatmul.msk.f32.gmra.mxu1 %vm590_vm0, %v550_v52 }
 0x1f5   : > { %v8686_v23 = vpop.f32.mrf.mxu0 }
 0x1f6   : > { %v8688_v59 = vpop.f32.mrf.mxu1 }
 0x1f7   : > { %12141 = vst [vmem:[#allocation16_spill] sm:$0xff] %v8688_v59  ;;  %v1614_v5 = vmul.f32 %v8688_v59, %v8651_v53 }
 0x1f8   : > { %6775 = vmatmul.msk.f32.gmra.mxu0 %vm590_vm0, %v551_v61 }
 0x1f9   : > { %v1622_v45 = vadd.f32 %v1614_v5, %v1606_v38  ;;  %6879 = vmatmul.msk.f32.gmra.mxu1 %vm590_vm0, %v551_v61  ;;  %v554_v61 = vld [vmem:[%s12128_s1 + $0x1b0] sm:$0xff] }
 0x1fd   : > { %v8697_v31 = vpop.f32.mrf.mxu0 }
 0x1fe   : > { %12142 = vst [vmem:[#allocation17_spill] sm:$0xff] %v8697_v31  ;;  %v8699_v13 = vpop.f32.mrf.mxu1 }
 0x1ff   : > { %12143 = vst [vmem:[#allocation18_spill] sm:$0xff] %v8699_v13  ;;  %v1615_v19 = vmul.f32 %v8699_v13, %v8651_v53  ;;  %v556_v13 = vld [vmem:[%s12128_s1 + $0x1c0] sm:$0xff] }
 0x200   : > { %6776 = vmatmul.msk.f32.gmra.mxu0 %vm590_vm0, %v552_v4 }
 0x201   : > { %v1623_v21 = vadd.f32 %v1615_v19, %v1607_v40  ;;  %6880 = vmatmul.msk.f32.gmra.mxu1 %vm590_vm0, %v552_v4 }
 0x205   : > { %v8708_v38 = vpop.f32.mrf.mxu0 }
 0x206   : > { %12144 = vst [vmem:[#allocation19_spill] sm:$0xff] %v8708_v38  ;;  %v8710_v35 = vpop.f32.mrf.mxu1 }
 0x207   : > { %12145 = vst [vmem:[#allocation20_spill] sm:$0xff] %v8710_v35  ;;  %v1616_v43 = vmul.f32 %v8710_v35, %v8651_v53 }
 0x208   : > { %6777 = vmatmul.msk.f32.gmra.mxu0 %vm590_vm0, %v553_v27 }
 0x209   : > { %v1624_v52 = vadd.f32 %v1616_v43, %v1608_v46  ;;  %6881 = vmatmul.msk.f32.gmra.mxu1 %vm590_vm0, %v553_v27  ;;  %v555_v27 = vld [vmem:[%s12128_s1 + $0x1b8] sm:$0xff] }
 0x20d   : > { %v8719_v40 = vpop.f32.mrf.mxu0 }
 0x20e   : > { %12146 = vst [vmem:[#allocation21_spill] sm:$0xff] %v8719_v40  ;;  %v8721_v56 = vpop.f32.mrf.mxu1 }
 0x20f   : > { %12147 = vst [vmem:[#allocation22_spill] sm:$0xff] %v8721_v56  ;;  %v1617_v5 = vmul.f32 %v8721_v56, %v8651_v53 }
 0x210   : > { %6778 = vmatmul.msk.f32.gmra.mxu0 %vm590_vm0, %v554_v61 }
 0x211   : > { %v1625_v4 = vadd.f32 %v1617_v5, %v1609_v10  ;;  %6882 = vmatmul.msk.f32.gmra.mxu1 %vm590_vm0, %v554_v61  ;;  %v8744_v61 = vperm.slane %v8419_v8, 5 }
 0x215   : > { %v8730_v46 = vpop.f32.mrf.mxu0 }
 0x216   : > { %12148 = vst [vmem:[#allocation23_spill] sm:$0xff] %v8730_v46  ;;  %v8732_v19 = vpop.f32.mrf.mxu1  ;;  %v1164_v43 = vmul.f32 %v8651_v53, %v8730_v46 }
 0x217   : > { %12149 = vst [vmem:[#allocation24_spill] sm:$0xff] %v8732_v19  ;;  %v1618_v35 = vmul.f32 %v8732_v19, %v8651_v53 }
 0x218   : > { %v1172_v56 = vadd.f32 %v1164_v43, %v1155_v20  ;;  %6779 = vmatmul.msk.f32.gmra.mxu0 %vm590_vm0, %v555_v27 }
 0x219   : > { %v1626_v10 = vadd.f32 %v1618_v35, %v1610_v14  ;;  %6883 = vmatmul.msk.f32.gmra.mxu1 %vm590_vm0, %v555_v27  ;;  %v557_v35 = vld [vmem:[%s12128_s1 + $0x1c8] sm:$0xff] }
 0x21d   : > { %v8746_v5 = vpop.f32.mrf.mxu0 }
 0x21e   : > { %v1451_v40 = vpop.f32.mrf.mxu1 }
 0x21f   : > { %v1627_v46 = vmul.f32 %v1451_v40, %v8744_v61 }
 0x220   : > { %6780 = vmatmul.msk.f32.gmra.mxu0 %vm590_vm0, %v556_v13 }
 0x221   : > { %v1635_v58 = vadd.f32 %v1627_v46, %v1619_v62  ;;  %6884 = vmatmul.msk.f32.gmra.mxu1 %vm590_vm0, %v556_v13  ;;  %v558_v13 = vld [vmem:[%s12128_s1 + $0x1d0] sm:$0xff] }
 0x225   : > { %v8754_v20 = vpop.f32.mrf.mxu0 }
 0x226   : > { %v1454_v14 = vpop.f32.mrf.mxu1 }
 0x227   : > { %v1628_v27 = vmul.f32 %v1454_v14, %v8744_v61 }
 0x228   : > { %6781 = vmatmul.msk.f32.gmra.mxu0 %vm590_vm0, %v557_v35 }
 0x229   : > { %v1636_v43 = vadd.f32 %v1628_v27, %v1620_v44  ;;  %6885 = vmatmul.msk.f32.gmra.mxu1 %vm590_vm0, %v557_v35  ;;  %v559_v35 = vld [vmem:[%s12128_s1 + $0x1d8] sm:$0xff] }
 0x22d   : > { %v8762_v40 = vpop.f32.mrf.mxu0 }
 0x22e   : > { %v1457_v62 = vpop.f32.mrf.mxu1 }
 0x22f   : > { %v1629_v46 = vmul.f32 %v1457_v62, %v8744_v61 }
 0x230   : > { %6782 = vmatmul.msk.f32.gmra.mxu0 %vm590_vm0, %v558_v13 }
 0x231   : > { %v1637_v19 = vadd.f32 %v1629_v46, %v1621_v39  ;;  %6886 = vmatmul.msk.f32.gmra.mxu1 %vm590_vm0, %v558_v13  ;;  %v560_v13 = vld [vmem:[%s12128_s1 + $0x1e0] sm:$0xff] }
 0x235   : > { %v8770_v14 = vpop.f32.mrf.mxu0 }
 0x236   : > { %v1460_v44 = vpop.f32.mrf.mxu1 }
 0x237   : > { %v1630_v27 = vmul.f32 %v1460_v44, %v8744_v61 }
 0x238   : > { %6783 = vmatmul.msk.f32.gmra.mxu0 %vm590_vm0, %v559_v35 }
 0x239   : > { %v1638_v47 = vadd.f32 %v1630_v27, %v1622_v45  ;;  %6887 = vmatmul.msk.f32.gmra.mxu1 %vm590_vm0, %v559_v35  ;;  %v561_v35 = vld [vmem:[%s12128_s1 + $0x1e8] sm:$0xff] }
 0x23d   : > { %v8778_v62 = vpop.f32.mrf.mxu0 }
 0x23e   : > { %12150 = vst [vmem:[#allocation25_spill] sm:$0xff] %v8778_v62  ;;  %v1463_v39 = vpop.f32.mrf.mxu1 }
 0x23f   : > { %v1631_v46 = vmul.f32 %v1463_v39, %v8744_v61 }
 0x240   : > { %6784 = vmatmul.msk.f32.gmra.mxu0 %vm590_vm0, %v560_v13 }
 0x241   : > { %v1639_v2 = vadd.f32 %v1631_v46, %v1623_v21  ;;  %6888 = vmatmul.msk.f32.gmra.mxu1 %vm590_vm0, %v560_v13  ;;  %v562_v13 = vld [vmem:[%s12128_s1 + $0x1f0] sm:$0xff] }
 0x245   : > { %v8786_v44 = vpop.f32.mrf.mxu0 }
 0x246   : > { %12151 = vst [vmem:[#allocation26_spill] sm:$0xff] %v8786_v44  ;;  %v1466_v45 = vpop.f32.mrf.mxu1 }
 0x247   : > { %v1632_v27 = vmul.f32 %v1466_v45, %v8744_v61 }
 0x248   : > { %6785 = vmatmul.msk.f32.gmra.mxu0 %vm590_vm0, %v561_v35 }
 0x249   : > { %v1640_v49 = vadd.f32 %v1632_v27, %v1624_v52  ;;  %6889 = vmatmul.msk.f32.gmra.mxu1 %vm590_vm0, %v561_v35  ;;  %v563_v35 = vld [vmem:[%s12128_s1 + $0x1f8] sm:$0xff] }
 0x24d   : > { %v8794_v39 = vpop.f32.mrf.mxu0 }
 0x24e   : > { %12152 = vst [vmem:[#allocation27_spill] sm:$0xff] %v8794_v39  ;;  %v1469_v21 = vpop.f32.mrf.mxu1 }
 0x24f   : > { %v1633_v46 = vmul.f32 %v1469_v21, %v8744_v61 }
 0x250   : > { %6786 = vmatmul.msk.f32.gmra.mxu0 %vm590_vm0, %v562_v13 }
 0x251   : > { %v1641_v44 = vadd.f32 %v1633_v46, %v1625_v4  ;;  %6890 = vmatmul.msk.f32.gmra.mxu1 %vm590_vm0, %v562_v13  ;;  %v8810_v4 = vperm.slane %v8419_v8, 6  ;;  %v564_v46 = vld [vmem:[%s12128_s1 + $0x200] sm:$0xff] }
 0x255   : > { %v1013_v45 = vpop.f32.mrf.mxu0 }
 0x256   : > { %v1472_v52 = vpop.f32.mrf.mxu1  ;;  %v1181_v27 = vmul.f32 %v8744_v61, %v1013_v45 }
 0x257   : > { %v1634_v39 = vmul.f32 %v1472_v52, %v8744_v61 }
 0x258   : > { %v1189_v38 = vadd.f32 %v1181_v27, %v1172_v56  ;;  %6787 = vmatmul.msk.f32.gmra.mxu0 %vm590_vm0, %v563_v35 }
 0x259   : > { %v1642_v59 = vadd.f32 %v1634_v39, %v1626_v10  ;;  %6891 = vmatmul.msk.f32.gmra.mxu1 %vm590_vm0, %v563_v35  ;;  %v565_v39 = vld [vmem:[%s12128_s1 + $0x208] sm:$0xff] }
 0x25d   : > { %v8812_v21 = vpop.f32.mrf.mxu0 }
 0x25e   : > { %v1475_v13 = vpop.f32.mrf.mxu1 }
 0x25f   : > { %v1643_v45 = vmul.f32 %v1475_v13, %v8810_v4  ;;  %v566_v13 = vld [vmem:[%s12128_s1 + $0x210] sm:$0xff] }
 0x260   : > { %6788 = vmatmul.msk.f32.gmra.mxu0 %vm590_vm0, %v564_v46 }
 0x261   : > { %v1651_v50 = vadd.f32 %v1643_v45, %v1635_v58  ;;  %6892 = vmatmul.msk.f32.gmra.mxu1 %vm590_vm0, %v564_v46 }
 0x265   : > { %v8820_v56 = vpop.f32.mrf.mxu0 }
 0x266   : > { %v1478_v10 = vpop.f32.mrf.mxu1 }
 0x267   : > { %v1644_v52 = vmul.f32 %v1478_v10, %v8810_v4 }
 0x268   : > { %6789 = vmatmul.msk.f32.gmra.mxu0 %vm590_vm0, %v565_v39 }
 0x269   : > { %v1652_v35 = vadd.f32 %v1644_v52, %v1636_v43  ;;  %6893 = vmatmul.msk.f32.gmra.mxu1 %vm590_vm0, %v565_v39  ;;  %v567_v39 = vld [vmem:[%s12128_s1 + $0x218] sm:$0xff] }
 0x26d   : > { %v8828_v27 = vpop.f32.mrf.mxu0 }
 0x26e   : > { %v1481_v58 = vpop.f32.mrf.mxu1 }
 0x26f   : > { %v1645_v46 = vmul.f32 %v1481_v58, %v8810_v4 }
 0x270   : > { %6790 = vmatmul.msk.f32.gmra.mxu0 %vm590_vm0, %v566_v13 }
 0x271   : > { %v1653_v45 = vadd.f32 %v1645_v46, %v1637_v19  ;;  %6894 = vmatmul.msk.f32.gmra.mxu1 %vm590_vm0, %v566_v13  ;;  %v568_v13 = vld [vmem:[%s12128_s1 + $0x220] sm:$0xff] }
 0x275   : > { %v8836_v10 = vpop.f32.mrf.mxu0 }
 0x276   : > { %12153 = vst [vmem:[#allocation28_spill] sm:$0xff] %v8836_v10  ;;  %v1484_v43 = vpop.f32.mrf.mxu1 }
 0x277   : > { %v1646_v52 = vmul.f32 %v1484_v43, %v8810_v4 }
 0x278   : > { %6791 = vmatmul.msk.f32.gmra.mxu0 %vm590_vm0, %v567_v39 }
 0x279   : > { %v1654_v34 = vadd.f32 %v1646_v52, %v1638_v47  ;;  %6895 = vmatmul.msk.f32.gmra.mxu1 %vm590_vm0, %v567_v39  ;;  %v569_v39 = vld [vmem:[%s12128_s1 + $0x228] sm:$0xff] }
 0x27d   : > { %v8844_v58 = vpop.f32.mrf.mxu0 }
 0x27e   : > { %12154 = vst [vmem:[#allocation29_spill] sm:$0xff] %v8844_v58  ;;  %v1487_v19 = vpop.f32.mrf.mxu1 }
 0x27f   : > { %v1647_v46 = vmul.f32 %v1487_v19, %v8810_v4 }
 0x280   : > { %6792 = vmatmul.msk.f32.gmra.mxu0 %vm590_vm0, %v568_v13 }
 0x281   : > { %v1655_v63 = vadd.f32 %v1647_v46, %v1639_v2  ;;  %6896 = vmatmul.msk.f32.gmra.mxu1 %vm590_vm0, %v568_v13  ;;  %v570_v13 = vld [vmem:[%s12128_s1 + $0x230] sm:$0xff] }
 0x285   : > { %v8852_v43 = vpop.f32.mrf.mxu0 }
 0x286   : > { %12155 = vst [vmem:[#allocation30_spill] sm:$0xff] %v8852_v43  ;;  %v1490_v47 = vpop.f32.mrf.mxu1 }
 0x287   : > { %v1648_v52 = vmul.f32 %v1490_v47, %v8810_v4 }
 0x288   : > { %6793 = vmatmul.msk.f32.gmra.mxu0 %vm590_vm0, %v569_v39 }
 0x289   : > { %v1656_v58 = vadd.f32 %v1648_v52, %v1640_v49  ;;  %6897 = vmatmul.msk.f32.gmra.mxu1 %vm590_vm0, %v569_v39  ;;  %v571_v39 = vld [vmem:[%s12128_s1 + $0x238] sm:$0xff] }
 0x28d   : > { %v8860_v19 = vpop.f32.mrf.mxu0 }
 0x28e   : > { %12156 = vst [vmem:[#allocation31_spill] sm:$0xff] %v8860_v19  ;;  %v1493_v2 = vpop.f32.mrf.mxu1 }
 0x28f   : > { %v1649_v46 = vmul.f32 %v1493_v2, %v8810_v4 }
 0x290   : > { %6794 = vmatmul.msk.f32.gmra.mxu0 %vm590_vm0, %v570_v13 }
 0x291   : > { %v1657_v43 = vadd.f32 %v1649_v46, %v1641_v44  ;;  %6898 = vmatmul.msk.f32.gmra.mxu1 %vm590_vm0, %v570_v13  ;;  %v8876_v44 = vperm.slane %v8419_v8, 7 }
 0x295   : > { %v1037_v47 = vpop.f32.mrf.mxu0 }
 0x296   : > { %v1496_v49 = vpop.f32.mrf.mxu1  ;;  %v1198_v52 = vmul.f32 %v8810_v4, %v1037_v47 }
 0x297   : > { %v1650_v19 = vmul.f32 %v1496_v49, %v8810_v4 }
 0x298   : > { %v1206_v62 = vadd.f32 %v1198_v52, %v1189_v38  ;;  %6795 = vmatmul.msk.f32.gmra.mxu0 %vm590_vm0, %v571_v39 }
 0x299   : > { %v1658_v42 = vadd.f32 %v1650_v19, %v1642_v59  ;;  %6899 = vmatmul.msk.f32.gmra.mxu1 %vm590_vm0, %v571_v39 }
 0x29d   : > { %v1040_v2 = vpop.f32.mrf.mxu0 }
 0x29e   : > { %v1499_v13 = vpop.f32.mrf.mxu1 }
 0x29f   : > { %v1659_v46 = vmul.f32 %v1499_v13, %v8876_v44 }
 0x2a1   : > { %v8879_v31 = vadd.f32 %v1659_v46, %v1651_v50 }
 0x2a5   : > { %v8881_v33 = vpop.f32.mrf.mxu0 }
 0x2a6   : > { %v1502_v47 = vpop.f32.mrf.mxu1 }
 0x2a7   : > { %v1660_v49 = vmul.f32 %v1502_v47, %v8876_v44 }
 0x2a9   : > { %v8884_v38 = vadd.f32 %v1660_v49, %v1652_v35 }
 0x2ad   : > { %v8886_v59 = vpop.f32.mrf.mxu0 }
 0x2ae   : > { %v1505_v19 = vpop.f32.mrf.mxu1 }
 0x2af   : > { %v1661_v39 = vmul.f32 %v1505_v19, %v8876_v44 }
 0x2b1   : > { %v8889_v8 = vadd.f32 %v1661_v39, %v1653_v45 }
 0x2b5   : > { %v8891_v52 = vpop.f32.mrf.mxu0 }
 0x2b6   : > { %12157 = vst [vmem:[#allocation32_spill] sm:$0xff] %v8891_v52  ;;  %v1508_v41 = vpop.f32.mrf.mxu1 }
 0x2b7   : > { %v1662_v50 = vmul.f32 %v1508_v41, %v8876_v44 }
 0x2b9   : > { %v8894_v13 = vadd.f32 %v1662_v50, %v1654_v34  ;;  %v1106_v34 = vmul.f32 %v8428_v11, %v8430_v12  ;;  %v1107_v12 = vmul.f32 %v8428_v11, %v8441_v18  ;;  %v1191_v18 = vmul.f32 %v8810_v4, %v8812_v21 }
 0x2ba   : > { %v1158_v21 = vmul.f32 %v8651_v53, %v8664_v0 }
 0x2bd   : > { %v8896_v46 = vpop.f32.mrf.mxu0 }
 0x2be   : > { %v1511_v10 = vpop.f32.mrf.mxu1 }
 0x2bf   : > { %v1663_v35 = vmul.f32 %v1511_v10, %v8876_v44  ;;  %v1089_v10 = vmul.f32 %v8424_v9, %v8360_v48  ;;  %v1174_v48 = vmul.f32 %v8744_v61, %v8746_v5  ;;  %v1141_v5 = vmul.f32 %v8585_v55, %v8595_v3 }
 0x2c0   : > { %v1175_v3 = vmul.f32 %v8744_v61, %v8754_v20  ;;  %v8963_v20 = vld [vmem:[%s12160_s3] ss:$0 sm:$0xff]  ;;  %s488_s3 = sand.u32 1, %s8066_s19  }
 0x2c1   : > { %v8899_v47 = vadd.f32 %v1663_v35, %v1655_v63  ;;  %v1123_v63 = vmul.f32 %v8514_v6, %v8516_v7  ;;  %v1114_v35 = vadd.f32 %v1106_v34, %v1089_v10  ;;  %v1124_v34 = vmul.f32 %v8514_v6, %v8525_v15  ;;  %s6704_s26 = sshll.u32 %s488_s3, 7 }
 0x2c2   : > { %s11983_s30 = scalar_lea.vmem [#allocation2], %s6704_s26 }
 0x2c3   : > { %s6635_s0 = sshll.u32 %s11983_s30, 4  ;;  %s6636_s0 = int_to_ptr.vmem [resolvable:$true] %s6635_s0 }
 0x2c5   : > { %v8901_v49 = vpop.f32.mrf.mxu0 }
 0x2c6   : > { %v1514_v28 = vpop.f32.mrf.mxu1 }
 0x2c7   : > { %v1664_v45 = vmul.f32 %v1514_v28, %v8876_v44  ;;  %v1140_v28 = vmul.f32 %v8585_v55, %v8587_v1  ;;  %v1090_v1 = vmul.f32 %v8424_v9, %v8367_v51  ;;  %v8943_v51 = vld [vmem:[%s12131_s2 + $0x8] ss:$0 sm:$0xff]  ;;  %s8077_s2 = smov 96  }
 0x2c9   : > { %v8904_v19 = vadd.f32 %v1664_v45, %v1656_v58  ;;  %v1131_v58 = vadd.f32 %v1123_v63, %v1114_v35  ;;  %v1157_v45 = vmul.f32 %v8651_v53, %v8653_v26  ;;  %v1115_v35 = vadd.f32 %v1107_v12, %v1090_v1 }
 0x2cb   : > { %12158 = vst [vmem:[#allocation33_spill] sm:$0xff] %v8904_v19  ;;  %v1148_v19 = vadd.f32 %v1140_v28, %v1131_v58  ;;  %v1132_v15 = vadd.f32 %v1124_v34, %v1115_v35 }
 0x2cd   : > { %v8906_v39 = vpop.f32.mrf.mxu0 }
 0x2ce   : > { %12159 = vst [vmem:[#allocation34_spill] sm:$0xff] %v8906_v39  ;;  %v1517_v52 = vpop.f32.mrf.mxu1 }
 0x2cf   : > { %v1665_v41 = vmul.f32 %v1517_v52, %v8876_v44 }
 0x2d1   : > { %v8915_v50 = vadd.f32 %v1665_v41, %v1657_v43  ;;  %v1165_v41 = vadd.f32 %v1157_v45, %v1148_v19  ;;  %v1149_v19 = vadd.f32 %v1141_v5, %v1132_v15 }
 0x2d3   : > { %v1182_v28 = vadd.f32 %v1174_v48, %v1165_v41  ;;  %v1091_v48 = vmul.f32 %v8424_v9, %v8374_v54 }
 0x2d5   : > { %v1061_v52 = vpop.f32.mrf.mxu0 }
 0x2d6   : > { %v1520_v39 = vpop.f32.mrf.mxu1  ;;  %v1215_v7 = vmul.f32 %v8876_v44, %v1061_v52 }
 0x2d7   : > { %v1666_v43 = vmul.f32 %v1520_v39, %v8876_v44  ;;  %v1208_v39 = vmul.f32 %v8876_v44, %v1040_v2 }
 0x2d8   : > { %v8933_v10 = vadd.f32 %v1215_v7, %v1206_v62  ;;  %v1199_v62 = vadd.f32 %v1191_v18, %v1182_v28  ;;  %v1125_v7 = vmul.f32 %v8514_v6, %v8534_v16  ;;  %v1142_v18 = vmul.f32 %v8585_v55, %v8603_v25 }
 0x2d9   : > { %v8935_v63 = vadd.f32 %v1666_v43, %v1658_v42  ;;  %v1108_v42 = vmul.f32 %v8428_v11, %v8452_v24  ;;  %v1166_v43 = vadd.f32 %v1158_v21, %v1149_v19  ;;  %v1192_v24 = vmul.f32 %v8810_v4, %v8820_v56 }
 0x2da   : > { %v1216_v2 = vadd.f32 %v1208_v39, %v1199_v62  ;;  %v1209_v16 = vmul.f32 %v8876_v44, %v8881_v33  ;;  %v1109_v25 = vmul.f32 %v8428_v11, %v8463_v30 }
 0x2db   : > { %v1116_v41 = vadd.f32 %v1108_v42, %v1091_v48  ;;  %v1183_v54 = vadd.f32 %v1175_v3, %v1166_v43  ;;  %v1193_v3 = vmul.f32 %v8810_v4, %v8828_v27 }
 0x2dd   : > { %v1064_v58 = vpop.f32.mrf.mxu0  ;;  %v1133_v5 = vadd.f32 %v1125_v7, %v1116_v41  ;;  %v1200_v28 = vadd.f32 %v1192_v24, %v1183_v54  ;;  %v1210_v7 = vmul.f32 %v8876_v44, %v8886_v59  ;;  %v1160_v24 = vmul.f32 %v8651_v53, %v8686_v23 }
 0x2de   : > { %v1523_v45 = vpop.f32.mrf.mxu1  ;;  %v1225_v12 = vmul.f32 %v8943_v51, %v1064_v58  ;;  %v1092_v58 = vmul.f32 %v8424_v9, %v8381_v57 }
 0x2df   : > { %v1675_v52 = vmul.f32 %v8943_v51, %v1523_v45  ;;  %v1150_v21 = vadd.f32 %v1142_v18, %v1133_v5  ;;  %v1126_v45 = vmul.f32 %v8514_v6, %v8543_v22  ;;  %v12164_v5 = vld [vmem:[#allocation28_spill] sm:$0xff] }
 0x2e0   : > { %v1233_v1 = vadd.f32 %v1225_v12, %v1216_v2  ;;  %v1117_v12 = vadd.f32 %v1109_v25, %v1092_v58 }
 0x2e1   : > { %v1683_v34 = vadd.f32 %v1675_v52, %v8879_v31  ;;  %v1159_v31 = vmul.f32 %v8651_v53, %v8675_v17  ;;  %v1143_v52 = vmul.f32 %v8585_v55, %v8611_v32  ;;  %v1110_v32 = vmul.f32 %v8428_v11, %v8474_v36 }
 0x2e2   : > { %v1241_v35 = vadd.f32 %v1233_v1, %v8653_v26  ;;  %v1176_v26 = vmul.f32 %v8744_v61, %v8762_v40  ;;  %v1134_v22 = vadd.f32 %v1126_v45, %v1117_v12  ;;  %v12168_v45 = vld [vmem:[#allocation17_spill] sm:$0xff] }
 0x2e3   : > { %v1691_v56 = vadd.f32 %v1683_v34, %v8655_v29  ;;  %v1217_v29 = vadd.f32 %v1209_v16, %v1200_v28  ;;  %v1167_v30 = vadd.f32 %v1159_v31, %v1150_v21  ;;  %v1093_v16 = vmul.f32 %v8424_v9, %v8388_v60  ;;  %v12165_v21 = vld [vmem:[#allocation12_spill] sm:$0xff] }
 0x2e4   : > { %v8974_v39 = vadd.f32 %v8963_v20, %v1241_v35  ;;  %v1151_v34 = vadd.f32 %v1143_v52, %v1134_v22  ;;  %v12163_v35 = vld [vmem:[#allocation9_spill] sm:$0xff]  ;;  %v1194_v31 = vmul.f32 %v8810_v4, %v12164_v5  ;;  %v1212_v5 = vmul.f32 %v8876_v44, %v8896_v46 }
 0x2e5   : > { %v8977_v15 = vadd.f32 %v8963_v20, %v1691_v56  ;;  %v1067_v33 = vpop.f32.mrf.mxu0  ;;  %v1184_v48 = vadd.f32 %v1176_v26, %v1167_v30  ;;  %v1127_v56 = vmul.f32 %v8514_v6, %v12163_v35  ;;  %v1118_v25 = vadd.f32 %v1110_v32, %v1093_v16  ;;  %v12166_v26 = vld [vmem:[#allocation32_spill] sm:$0xff]  ;;  %v12175_v35 = vld [vmem:[#allocation13_spill] sm:$0xff] }
 0x2e6   : > { %v1526_v62 = vpop.f32.mrf.mxu1  ;;  %v1226_v42 = vmul.f32 %v8943_v51, %v1067_v33  ;;  %1721 = vadd.xlane.f32.xlu0 %v8974_v39  ;;  %v1168_v36 = vadd.f32 %v1160_v24, %v1151_v34  ;;  %v1144_v33 = vmul.f32 %v8585_v55, %v12165_v21  ;;  %v1161_v30 = vmul.f32 %v8651_v53, %v12168_v45  ;;  %v12173_v34 = vld [vmem:[#allocation10_spill] sm:$0xff]  ;;  %v12177_v21 = vld [vmem:[#allocation19_spill] sm:$0xff] }
 0x2e7   : > { %12161 = vst [vmem:[#allocation35_spill] sm:$0xff] %v8977_v15  ;;  %v1676_v19 = vmul.f32 %v8943_v51, %v1526_v62  ;;  %v1201_v27 = vadd.f32 %v1193_v3, %v1184_v48  ;;  %v1135_v58 = vadd.f32 %v1127_v56, %v1118_v25  ;;  %v1145_v56 = vmul.f32 %v8585_v55, %v12175_v35 }
 0x2e8   : > { %v1234_v2 = vadd.f32 %v1226_v42, %v1217_v29  ;;  %v1211_v29 = vmul.f32 %v8876_v44, %v12166_v26  ;;  %v12167_v42 = vld [vmem:[#allocation15_spill] sm:$0xff] }
 0x2e9   : > { %v1684_v40 = vadd.f32 %v1676_v19, %v8884_v38  ;;  %v1152_v52 = vadd.f32 %v1144_v33, %v1135_v58  ;;  %v1162_v33 = vmul.f32 %v8651_v53, %v12177_v21 }
 0x2ea   : > { %v1242_v57 = vadd.f32 %v1234_v2, %v8664_v0  ;;  %v1177_v0 = vmul.f32 %v8744_v61, %v8770_v14 }
 0x2eb   : > { %v1692_v43 = vadd.f32 %v1684_v40, %v8666_v37  ;;  %v1218_v37 = vadd.f32 %v1210_v7, %v1201_v27  ;;  %v12170_v40 = vld [vmem:[#allocation7_spill] sm:$0xff]  ;;  %v12172_v27 = vld [vmem:[#allocation5_spill] sm:$0xff] }
 0x2ec   : > { %v9002_v1 = vadd.f32 %v8963_v20, %v1242_v57  ;;  %v1185_v62 = vadd.f32 %v1177_v0, %v1168_v36  ;;  %v1111_v12 = vmul.f32 %v8428_v11, %v12170_v40  ;;  %v1094_v32 = vmul.f32 %v8424_v9, %v12172_v27  ;;  %v12174_v0 = vld [vmem:[#allocation29_spill] sm:$0xff]  ;;  %v12184_v27 = vld [vmem:[#allocation14_spill] sm:$0xff] }
 0x2ed   : > { %v9005_v38 = vadd.f32 %v8963_v20, %v1692_v43  ;;  %v1070_v59 = vpop.f32.mrf.mxu0 }
 0x2ee   : > { %v1529_v41 = vpop.f32.mrf.mxu1  ;;  %v1227_v18 = vmul.f32 %v8943_v51, %v1070_v59  ;;  %1723 = vadd.xlane.f32.xlu0 %v9002_v1  ;;  %v1202_v3 = vadd.f32 %v1194_v31, %v1185_v62  ;;  %v1128_v59 = vmul.f32 %v8514_v6, %v12173_v34  ;;  %v1119_v16 = vadd.f32 %v1111_v12, %v1094_v32  ;;  %v12181_v12 = vld [vmem:[#allocation6_spill] sm:$0xff] }
 0x2ef   : > { %12162 = vst [vmem:[#allocation36_spill] sm:$0xff] %v9005_v38  ;;  %v1677_v54 = vmul.f32 %v8943_v51, %v1529_v41  ;;  %v1169_v41 = vadd.f32 %v1161_v30, %v1152_v52  ;;  %v1095_v52 = vmul.f32 %v8424_v9, %v12181_v12  ;;  %v1146_v32 = vmul.f32 %v8585_v55, %v12184_v27 }
 0x2f0   : > { %v1235_v28 = vadd.f32 %v1227_v18, %v1218_v37  ;;  %v1219_v43 = vadd.f32 %v1211_v29, %v1202_v3  ;;  %v1195_v37 = vmul.f32 %v8810_v4, %v12174_v0  ;;  %v1136_v25 = vadd.f32 %v1128_v59, %v1119_v16  ;;  %v12179_v29 = vld [vmem:[#allocation8_spill] sm:$0xff] }
 0x2f1   : > { %v1685_v14 = vadd.f32 %v1677_v54, %v8889_v8  ;;  %v1213_v59 = vmul.f32 %v8876_v44, %v8901_v49 }
 0x2f2   : > { %v1243_v60 = vadd.f32 %v1235_v28, %v8675_v17  ;;  %v12171_v17 = vld [vmem:[#allocation25_spill] sm:$0xff]  ;;  %v12176_v28 = vld [vmem:[#allocation16_spill] sm:$0xff] }
 0x2f3   : > { %v1693_v19 = vadd.f32 %v1685_v14, %v12167_v42  ;;  %v1178_v57 = vmul.f32 %v8744_v61, %v12171_v17  ;;  %v1153_v42 = vadd.f32 %v1145_v56, %v1136_v25  ;;  %v12183_v17 = vld [vmem:[#allocation30_spill] sm:$0xff] }
 0x2f4   : > { %v9030_v2 = vadd.f32 %v8963_v20, %v1243_v60  ;;  %v1112_v60 = vmul.f32 %v8428_v11, %v12179_v29 }
 0x2f5   : > { %v9033_v8 = vadd.f32 %v8963_v20, %v1693_v19  ;;  %v1073_v48 = vpop.f32.mrf.mxu0  ;;  %v1186_v36 = vadd.f32 %v1178_v57, %v1169_v41  ;;  %v1170_v11 = vadd.f32 %v1162_v33, %v1153_v42  ;;  %v1196_v57 = vmul.f32 %v8810_v4, %v12183_v17  ;;  %v12185_v41 = vld [vmem:[#allocation18_spill] sm:$0xff]  ;;  %v12190_v33 = vld [vmem:[#allocation33_spill] sm:$0xff] }
 0x2f6   : > { %v1532_v7 = vpop.f32.mrf.mxu1  ;;  %v1228_v22 = vmul.f32 %v8943_v51, %v1073_v48  ;;  %1725 = vadd.xlane.f32.xlu1 %v9030_v2  ;;  %v12182_v48 = vld [vmem:[#allocation11_spill] sm:$0xff] }
 0x2f7   : > { %12169 = vst [vmem:[#allocation9_spill] sm:$0xff] %v9033_v8  ;;  %v1678_v24 = vmul.f32 %v8943_v51, %v1532_v7  ;;  %v1203_v62 = vadd.f32 %v1195_v37, %v1186_v36  ;;  %v1129_v7 = vmul.f32 %v8514_v6, %v12182_v48  ;;  %v12186_v37 = vld [vmem:[#allocation21_spill] sm:$0xff]  ;;  %v12188_v36 = vld [vmem:[#allocation27_spill] sm:$0xff] }
 0x2f8   : > { %v1236_v18 = vadd.f32 %v1228_v22, %v1219_v43  ;;  %v1180_v49 = vmul.f32 %v8744_v61, %v12188_v36 }
 0x2f9   : > { %v1686_v54 = vadd.f32 %v1678_v24, %v8894_v13  ;;  %v1220_v30 = vadd.f32 %v1212_v5, %v1203_v62  ;;  %v1120_v24 = vadd.f32 %v1112_v60, %v1095_v52  ;;  %v12191_v60 = vld [vmem:[#allocation34_spill] sm:$0xff] }
 0x2fa   : > { %v1244_v31 = vadd.f32 %v1236_v18, %v8686_v23  ;;  %v12180_v23 = vld [vmem:[#allocation26_spill] sm:$0xff]  ;;  %v1163_v18 = vmul.f32 %v8651_v53, %v12186_v37  ;;  %v1214_v42 = vmul.f32 %v8876_v44, %v12191_v60 }
 0x2fb   : > { %v1694_v14 = vadd.f32 %v1686_v54, %v12176_v28  ;;  %v1179_v58 = vmul.f32 %v8744_v61, %v12180_v23  ;;  %v1137_v6 = vadd.f32 %v1129_v7, %v1120_v24  ;;  %v12189_v28 = vld [vmem:[#allocation31_spill] sm:$0xff]  ;;  %v12194_v7 = vld [vmem:[#allocation22_spill] sm:$0xff] }
 0x2fc   : > { %v9058_v26 = vadd.f32 %v8963_v20, %v1244_v31 }
 0x2fd   : > { %v9061_v13 = vadd.f32 %v8963_v20, %v1694_v14  ;;  %v1076_v46 = vpop.f32.mrf.mxu0  ;;  %v1187_v34 = vadd.f32 %v1179_v58, %v1170_v11  ;;  %v1154_v55 = vadd.f32 %v1146_v32, %v1137_v6  ;;  %v1197_v14 = vmul.f32 %v8810_v4, %v12189_v28 }
 0x2fe   : > { %v1535_v19 = vpop.f32.mrf.mxu1  ;;  %v1229_v3 = vmul.f32 %v8943_v51, %v1076_v46  ;;  %1727 = vadd.xlane.f32.xlu1 %v9058_v26  ;;  %v12192_v46 = vld [vmem:[#allocation20_spill] sm:$0xff] }
 0x2ff   : > { %12178 = vst [vmem:[#allocation28_spill] sm:$0xff] %v9061_v13  ;;  %v1679_v40 = vmul.f32 %v8943_v51, %v1535_v19  ;;  %v1204_v54 = vadd.f32 %v1196_v57, %v1187_v34  ;;  %v1171_v53 = vadd.f32 %v1163_v18, %v1154_v55  ;;  %v12197_v34 = vld [vmem:[#allocation23_spill] sm:$0xff] }
 0x300   : > { %v1237_v43 = vadd.f32 %v1229_v3, %v1220_v30 }
 0x301   : > { %v1687_v22 = vadd.f32 %v1679_v40, %v8899_v47  ;;  %v1188_v29 = vadd.f32 %v1180_v49, %v1171_v53 }
 0x302   : > { %v1245_v9 = vadd.f32 %v1237_v43, %v12168_v45  ;;  %v1221_v45 = vadd.f32 %v1213_v59, %v1204_v54 }
 0x303   : > { %v1695_v0 = vadd.f32 %v1687_v22, %v12185_v41  ;;  %v1205_v23 = vadd.f32 %v1197_v14, %v1188_v29 }
 0x304   : > { %v9086_v16 = vadd.f32 %v8963_v20, %v1245_v9  ;;  %v12198_v9 = vld [vmem:[#allocation24_spill] sm:$0xff] }
 0x305   : > { %v9089_v47 = vadd.f32 %v8963_v20, %v1695_v0  ;;  %v1079_v35 = vpop.f32.mrf.mxu0  ;;  %v1222_v40 = vadd.f32 %v1214_v42, %v1205_v23 }
 0x306   : > { %v1538_v56 = vpop.f32.mrf.mxu1  ;;  %v1230_v5 = vmul.f32 %v8943_v51, %v1079_v35  ;;  %1729 = vadd.xlane.f32.xlu2 %v9086_v16 }
 0x307   : > { %12187 = vst [vmem:[#allocation12_spill] sm:$0xff] %v9089_v47  ;;  %v1680_v31 = vmul.f32 %v8943_v51, %v1538_v56 }
 0x308   : > { %v1238_v25 = vadd.f32 %v1230_v5, %v1221_v45 }
 0x309   : > { %v1688_v62 = vadd.f32 %v1680_v31, %v12190_v33 }
 0x30a   : > { %v1246_v61 = vadd.f32 %v1238_v25, %v12177_v21 }
 0x30b   : > { %v1696_v19 = vadd.f32 %v1688_v62, %v12192_v46 }
 0x30c   : > { %v9104_v58 = vadd.f32 %v8963_v20, %v1246_v61 }
 0x30d   : > { %v9107_v30 = vadd.f32 %v8963_v20, %v1696_v19  ;;  %v1082_v3 = vpop.f32.mrf.mxu0 }
 0x30e   : > { %v1541_v4 = vpop.f32.mrf.mxu1  ;;  %v1231_v12 = vmul.f32 %v8943_v51, %v1082_v3  ;;  %1731 = vadd.xlane.f32.xlu2 %v9104_v58 }
 0x30f   : > { %12193 = vst [vmem:[#allocation32_spill] sm:$0xff] %v9107_v30  ;;  %v1681_v52 = vmul.f32 %v8943_v51, %v1541_v4 }
 0x310   : > { %v1239_v44 = vadd.f32 %v1231_v12, %v1222_v40 }
 0x311   : > { %v1689_v21 = vadd.f32 %v1681_v52, %v8915_v50 }
 0x312   : > { %v1247_v48 = vadd.f32 %v1239_v44, %v12186_v37  ;;  %v8076_v37 = vmov 128.0  }
 0x313   : > { %v1697_v11 = vadd.f32 %v1689_v21, %v12194_v7  ;;  %7554 = vrcp.f32 %v8076_v37  ;;  %v7417_v7 = vld [vmem:[%s12074_s6 + $0xb0] sm:$0xf0]  ;;  %v7411_v37 = vld [vmem:[%s12074_s6 + $0x80] sm:$0xf0] }
 0x314   : > { %v9116_v17 = vadd.f32 %v8963_v20, %v1247_v48  ;;  %v6986_v48 = vld [vmem:[%s12074_s6 + $0xa8] sm:$0xf] }
 0x315   : > { %v9119_v57 = vadd.f32 %v8963_v20, %v1697_v11  ;;  %v1085_v43 = vpop.f32.mrf.mxu0  ;;  %v7416_v11 = vld [vmem:[%s12074_s6 + $0xac] sm:$0xf] }
 0x316   : > { %12195 = vst [vmem:[#allocation15_spill] sm:$0xff] %v9116_v17  ;;  %v1544_v22 = vpop.f32.mrf.mxu1  ;;  %v1232_v24 = vmul.f32 %v8943_v51, %v1085_v43  ;;  %1733 = vadd.xlane.f32.xlu2 %v9116_v17  ;;  %v6987_v43 = vor.u32 %v7417_v7, %v6986_v48  ;;  %v6916_v48 = vld [vmem:[%s12074_s6 + $0x24] sm:$0xf0] }
 0x317   : > { %12196 = vst [vmem:[#allocation17_spill] sm:$0xff] %v9119_v57  ;;  %v1682_v27 = vmul.f32 %v8943_v51, %v1544_v22  ;;  %v6988_v22 = vld [vmem:[%s12074_s6 + $0xb4] sm:$0xf0] }
 0x318   : > { %v1240_v50 = vadd.f32 %v1232_v24, %v8933_v10  ;;  %v6991_v24 = vor.u32 %v7416_v11, %v6988_v22  ;;  %2254 = vmatpush.bf16.msra.mxu2 %v6987_v43  ;;  %v6902_v22 = vld [vmem:[%s12074_s6] sm:$0xf] }
 0x319   : > { %v1690_v32 = vadd.f32 %v1682_v27, %v8935_v63  ;;  %v7555_v18 = vpop.eup %7554  ;;  %v6974_v27 = vld [vmem:[%s12074_s6 + $0x90] sm:$0xf] }
 0x31a   : > { %v1248_v59 = vadd.f32 %v1240_v50, %v12197_v34  ;;  %v1754_v51 = vmul.f32 128.0, %v7555_v18  ;;  %vm1758_vm1 = vweird.f32 %v7555_v18  ;;  %2303 = vmatpush.bf16.msra.mxu3 %v6991_v24  ;;  %v7414_v50 = vld [vmem:[%s12074_s6 + $0x98] sm:$0xf0]  ;;  %v7396_v24 = vld [vmem:[%s12074_s6 + $0x8] sm:$0xf0] }
 0x31b   : > { %v1698_v41 = vadd.f32 %v1690_v32, %v12198_v9  ;;  %v7413_v32 = vld [vmem:[%s12074_s6 + $0x94] sm:$0xf]  ;;  %v6975_v34 = vor.u32 %v7414_v50, %v6974_v27  ;;  %v7395_v27 = vld [vmem:[%s12074_s6 + $0x4] sm:$0xf]  ;;  %v6903_v50 = vor.u32 %v7396_v24, %v6902_v22 }
 0x31c   : > { %v9129_v0 = vadd.f32 %v8963_v20, %v1248_v59  ;;  %v1755_v54 = vsub.f32 1.0, %v1754_v51  ;;  %v6976_v59 = vld [vmem:[%s12074_s6 + $0x9c] sm:$0xf0] }
 0x31d   : > { %v9132_v6 = vadd.f32 %v8963_v20, %v1698_v41  ;;  %v6979_v9 = vor.u32 %v7413_v32, %v6976_v59  ;;  %2255 = vmatpush.bf16.msra.mxu2 %v6975_v34  ;;  %v6962_v41 = vld [vmem:[%s12074_s6 + $0x78] sm:$0xf]  ;;  %v6904_v32 = vld [vmem:[%s12074_s6 + $0xc] sm:$0xf0] }
 0x31e   : > { %12199 = vst [vmem:[#allocation7_spill] sm:$0xff] %v9129_v0  ;;  %v1756_v55 = vmul.f32 %v7555_v18, %v1755_v54  ;;  %v6963_v51 = vor.u32 %v7411_v37, %v6962_v41  ;;  %v6964_v54 = vld [vmem:[%s12074_s6 + $0x84] sm:$0xf0]  ;;  %v6907_v59 = vor.u32 %v7395_v27, %v6904_v32 }
 0x31f   : > { %12200 = vst [vmem:[#allocation25_spill] sm:$0xff] %v9132_v6  ;;  %2304 = vmatpush.bf16.msra.mxu3 %v6979_v9 }
 0x320   : > { %v1757_v35 = vadd.f32 %v7555_v18, %v1756_v55 }
 0x321   : > { %2256 = vmatpush.bf16.msra.mxu2 %v6963_v51 }
 0x322   : > { %v9134_v10 = vsel %vm1758_vm1, %v7555_v18, %v1757_v35  ;;  %v7410_v18 = vld [vmem:[%s12074_s6 + $0x7c] sm:$0xf]  ;;  %v6950_v35 = vld [vmem:[%s12074_s6 + $0x60] sm:$0xf] }
 0x323   : > { %12201 = vst [vmem:[#allocation5_spill] sm:$0xff] %v9134_v10  ;;  %v6967_v55 = vor.u32 %v7410_v18, %v6964_v54 }
 0x325   : > { %2305 = vmatpush.bf16.msra.mxu3 %v6967_v55 }
 0x359   : > { %v1722_v63 = vpop.xlane.xlu0 %1721 }
 0x35a   : > { %v1760_v56 = vmul.f32 %v9134_v10, %v1722_v63  ;;  %v7408_v63 = vld [vmem:[%s12074_s6 + $0x68] sm:$0xf0] }
 0x35c   : > { %v9138_v36 = vsub.f32 %v8974_v39, %v1760_v56  ;;  %v7407_v56 = vld [vmem:[%s12074_s6 + $0x64] sm:$0xf] }
 0x35e   : > { %v1792_v20 = vmul.f32 %v9138_v36, %v9138_v36 }
 0x360   : > { %1808 = vadd.xlane.f32.xlu0 %v1792_v20  ;;  %v6951_v20 = vor.u32 %v7408_v63, %v6950_v35 }
 0x361   : > { %v1724_v49 = vpop.xlane.xlu0 %1723 }
 0x362   : > { %v1761_v45 = vmul.f32 %v9134_v10, %v1724_v49  ;;  %v6952_v49 = vld [vmem:[%s12074_s6 + $0x6c] sm:$0xf0]  ;;  %2257 = vmatpush.bf16.msra.mxu2 %v6951_v20 }
 0x364   : > { %v9144_v5 = vsub.f32 %v9002_v1, %v1761_v45  ;;  %v6955_v45 = vor.u32 %v7407_v56, %v6952_v49 }
 0x366   : > { %v1793_v31 = vmul.f32 %v9144_v5, %v9144_v5  ;;  %2306 = vmatpush.bf16.msra.mxu3 %v6955_v45 }
 0x368   : > { %1810 = vadd.xlane.f32.xlu1 %v1793_v31  ;;  %1735 = vadd.xlane.f32.xlu0 %v9129_v0  ;;  %v6938_v31 = vld [vmem:[%s12074_s6 + $0x48] sm:$0xf] }
 0x369   : > { %v1726_v53 = vpop.xlane.xlu1 %1725 }
 0x36a   : > { %v1762_v28 = vmul.f32 %v9134_v10, %v1726_v53  ;;  %v7405_v53 = vld [vmem:[%s12074_s6 + $0x50] sm:$0xf0] }
 0x36c   : > { %v9151_v14 = vsub.f32 %v9030_v2, %v1762_v28  ;;  %v7404_v28 = vld [vmem:[%s12074_s6 + $0x4c] sm:$0xf] }
 0x36e   : > { %v1794_v25 = vmul.f32 %v9151_v14, %v9151_v14 }
 0x370   : > { %1812 = vadd.xlane.f32.xlu1 %v1794_v25  ;;  %v6939_v25 = vor.u32 %v7405_v53, %v6938_v31 }
 0x371   : > { %v1728_v33 = vpop.xlane.xlu1 %1727 }
 0x372   : > { %v1763_v62 = vmul.f32 %v9134_v10, %v1728_v33  ;;  %v6940_v33 = vld [vmem:[%s12074_s6 + $0x54] sm:$0xf0]  ;;  %2258 = vmatpush.bf16.msra.mxu2 %v6939_v25 }
 0x374   : > { %v9157_v29 = vsub.f32 %v9058_v26, %v1763_v62  ;;  %v6943_v62 = vor.u32 %v7404_v28, %v6940_v33 }
 0x376   : > { %v1795_v60 = vmul.f32 %v9157_v29, %v9157_v29  ;;  %2307 = vmatpush.bf16.msra.mxu3 %v6943_v62 }
 0x378   : > { %1814 = vadd.xlane.f32.xlu2 %v1795_v60  ;;  %v6926_v60 = vld [vmem:[%s12074_s6 + $0x30] sm:$0xf] }
 0x379   : > { %v1730_v42 = vpop.xlane.xlu2 %1729 }
 0x37a   : > { %v1764_v61 = vmul.f32 %v9134_v10, %v1730_v42  ;;  %v7402_v42 = vld [vmem:[%s12074_s6 + $0x38] sm:$0xf0] }
 0x37c   : > { %v9163_v46 = vsub.f32 %v9086_v16, %v1764_v61  ;;  %v7401_v61 = vld [vmem:[%s12074_s6 + $0x34] sm:$0xf] }
 0x37e   : > { %v1796_v19 = vmul.f32 %v9163_v46, %v9163_v46 }
 0x380   : > { %1816 = vadd.xlane.f32.xlu0 %v1796_v19  ;;  %v6927_v19 = vor.u32 %v7402_v42, %v6926_v60 }
 0x381   : > { %v1732_v23 = vpop.xlane.xlu2 %1731 }
 0x382   : > { %v1765_v3 = vmul.f32 %v9134_v10, %v1732_v23  ;;  %v6928_v23 = vld [vmem:[%s12074_s6 + $0x3c] sm:$0xf0]  ;;  %2259 = vmatpush.bf16.msra.mxu2 %v6927_v19 }
 0x384   : > { %v9169_v4 = vsub.f32 %v9104_v58, %v1765_v3  ;;  %v6931_v3 = vor.u32 %v7401_v61, %v6928_v23 }
 0x386   : > { %v1797_v40 = vmul.f32 %v9169_v4, %v9169_v4  ;;  %2308 = vmatpush.bf16.msra.mxu3 %v6931_v3 }
 0x388   : > { %1818 = vadd.xlane.f32.xlu1 %v1797_v40  ;;  %v6914_v40 = vld [vmem:[%s12074_s6 + $0x18] sm:$0xf] }
 0x389   : > { %v1734_v12 = vpop.xlane.xlu2 %1733 }
 0x38a   : > { %v1766_v52 = vmul.f32 %v9134_v10, %v1734_v12  ;;  %v7399_v12 = vld [vmem:[%s12074_s6 + $0x20] sm:$0xf0] }
 0x38c   : > { %v9175_v44 = vsub.f32 %v9116_v17, %v1766_v52  ;;  %v7398_v52 = vld [vmem:[%s12074_s6 + $0x1c] sm:$0xf] }
 0x38d   : > { %v6919_v7 = vor.u32 %v7398_v52, %v6916_v48  ;;  %v9294_v52 = vld [vmem:[%s12202_s4] ss:$0 sm:$0xff] }
 0x38e   : > { %v1798_v21 = vmul.f32 %v9175_v44, %v9175_v44 }
 0x38f   : > { %2309 = vmatpush.bf16.msra.mxu3 %v6919_v7 }
 0x390   : > { %1737 = vadd.xlane.f32.xlu1 %v8977_v15  ;;  %1820 = vadd.xlane.f32.xlu2 %v1798_v21  ;;  %v6915_v21 = vor.u32 %v7399_v12, %v6914_v40 }
 0x392   : > { %2260 = vmatpush.bf16.msra.mxu2 %v6915_v21 }
 0x393   : > { %2310 = vmatpush.bf16.msra.mxu3 %v6907_v59 }
 0x396   : > { %2261 = vmatpush.bf16.msra.mxu2 %v6903_v50 }
 0x398   : > { %1743 = vadd.xlane.f32.xlu1 %v9061_v13  ;;  %1739 = vadd.xlane.f32.xlu2 %v9005_v38 }
 0x3a0   : > { %1745 = vadd.xlane.f32.xlu2 %v9089_v47 }
 0x3d3   : > { %v1809_v11 = vpop.xlane.xlu0 %1808 }
 0x3d4   : > { %v1840_v43 = vmul.f32 %v1809_v11, %v9134_v10 }
 0x3d6   : > { %v1856_v34 = vadd.f32 1e-05, %v1840_v43 }
 0x3d8   : > { %7556 = vrsqrt.f32 %v1856_v34  ;;  %vm1878_vm3 = vweird.f32 %v1856_v34 }
 0x3db   : > { %v1811_v9 = vpop.xlane.xlu1 %1810  ;;  %v1736_v41 = vpop.xlane.xlu0 %1735 }
 0x3dc   : > { %v1841_v37 = vmul.f32 %v1811_v9, %v9134_v10  ;;  %v1767_v18 = vmul.f32 %v9134_v10, %v1736_v41 }
 0x3de   : > { %v7557_v51 = vpop.eup %7556  ;;  %v1857_v54 = vadd.f32 1e-05, %v1841_v37  ;;  %v9283_v55 = vsub.f32 %v9129_v0, %v1767_v18 }
 0x3df   : > { %v1873_v35 = vmul.f32 %v7557_v51, %v1856_v34  ;;  %vm1879_vm2 = vweird.f32 %v7557_v51 }
 0x3e0   : > { %7558 = vrsqrt.f32 %v1857_v54  ;;  %v1799_v63 = vmul.f32 %v9283_v55, %v9283_v55  ;;  %vm1880_vm4 = vmor %vm1878_vm3, %vm1879_vm2  ;;  %vm1888_vm6 = vweird.f32 %v1857_v54 }
 0x3e1   : > { %v1874_v56 = vmul.f32 %v7557_v51, %v1873_v35 }
 0x3e2   : > { %1822 = vadd.xlane.f32.xlu0 %v1799_v63 }
 0x3e3   : > { %v1875_v20 = vmul.f32 0.5, %v1874_v56  ;;  %v1813_v49 = vpop.xlane.xlu1 %1812 }
 0x3e4   : > { %v1842_v45 = vmul.f32 %v1813_v49, %v9134_v10 }
 0x3e5   : > { %v1876_v31 = vsub.f32 1.5, %v1875_v20 }
 0x3e6   : > { %v7559_v53 = vpop.eup %7558  ;;  %v1858_v28 = vadd.f32 1e-05, %v1842_v45 }
 0x3e7   : > { %v1877_v25 = vmul.f32 %v7557_v51, %v1876_v31  ;;  %v1883_v33 = vmul.f32 %v7559_v53, %v1857_v54  ;;  %vm1889_vm5 = vweird.f32 %v7559_v53 }
 0x3e8   : > { %7560 = vrsqrt.f32 %v1858_v28  ;;  %vm1890_vm7 = vmor %vm1888_vm6, %vm1889_vm5  ;;  %vm1898_vm9 = vweird.f32 %v1858_v28 }
 0x3e9   : > { %v1884_v62 = vmul.f32 %v7559_v53, %v1883_v33  ;;  %v1881_v60 = vsel %vm1880_vm4, %v7557_v51, %v1877_v25 }
 0x3ea   : > { %1741 = vadd.xlane.f32.xlu0 %v9033_v8  ;;  %v2032_v12 = vmul.f32 %v1881_v60, %v9138_v36  ;;  %v9302_v36 = vld [vmem:[%s12073_s5] ss:$0 sm:$0xff] }
 0x3eb   : > { %v1885_v42 = vmul.f32 0.5, %v1884_v62  ;;  %v1815_v61 = vpop.xlane.xlu2 %1814 }
 0x3ec   : > { %v1843_v19 = vmul.f32 %v1815_v61, %v9134_v10  ;;  %v2051_v22 = vmul.f32 %v9294_v52, %v2032_v12 }
 0x3ed   : > { %v1886_v23 = vsub.f32 1.5, %v1885_v42 }
 0x3ee   : > { %v7561_v3 = vpop.eup %7560  ;;  %v1859_v40 = vadd.f32 1e-05, %v1843_v19  ;;  %v2070_v41 = vadd.f32 %v9302_v36, %v2051_v22 }
 0x3ef   : > { %v1887_v21 = vmul.f32 %v7559_v53, %v1886_v23  ;;  %v1893_v48 = vmul.f32 %v7561_v3, %v1858_v28  ;;  %vm1899_vm8 = vweird.f32 %v7561_v3 }
 0x3f0   : > { %7562 = vrsqrt.f32 %v1859_v40  ;;  %vm1900_vm10 = vmor %vm1898_vm9, %vm1899_vm8  ;;  %vm1908_vm12 = vweird.f32 %v1859_v40 }
 0x3f1   : > { %v1891_v7 = vsel %vm1890_vm7, %v7559_v53, %v1887_v21  ;;  %v1894_v11 = vmul.f32 %v7561_v3, %v1893_v48 }
 0x3f2   : > { %1747 = vadd.xlane.f32.xlu0 %v9107_v30  ;;  %v2033_v43 = vmul.f32 %v1891_v7, %v9144_v5 }
 0x3f3   : > { %v1895_v24 = vmul.f32 0.5, %v1894_v11  ;;  %v1817_v27 = vpop.xlane.xlu0 %1816 }
 0x3f4   : > { %v1844_v50 = vmul.f32 %v1817_v27, %v9134_v10  ;;  %v2052_v32 = vmul.f32 %v9294_v52, %v2033_v43 }
 0x3f5   : > { %v1896_v34 = vsub.f32 1.5, %v1895_v24 }
 0x3f6   : > { %v7563_v59 = vpop.eup %7562  ;;  %v1860_v9 = vadd.f32 1e-05, %v1844_v50  ;;  %v2071_v5 = vadd.f32 %v9302_v36, %v2052_v32 }
 0x3f7   : > { %v1897_v37 = vmul.f32 %v7561_v3, %v1896_v34  ;;  %v1903_v18 = vmul.f32 %v7563_v59, %v1859_v40  ;;  %vm1909_vm11 = vweird.f32 %v7563_v59 }
 0x3f8   : > { %7564 = vrsqrt.f32 %v1860_v9  ;;  %v9308_v51 = vpack.c.bf16 %v2071_v5, %v2070_v41  ;;  %vm1910_vm13 = vmor %vm1908_vm12, %vm1909_vm11  ;;  %vm1918_vm15 = vweird.f32 %v1860_v9 }
 0x3f9   : > { %v1904_v54 = vmul.f32 %v7563_v59, %v1903_v18  ;;  %v1901_v35 = vsel %vm1900_vm10, %v7561_v3, %v1897_v37 }
 0x3fa   : > { %2262 = vmatmul.bf16.vlgmr.msra.gmra.mxu2 %v9308_v51  ;;  %2311 = vmatmul.bf16.vlgmr.msra.gmra.mxu3 %v9308_v51  ;;  %v2034_v53 = vmul.f32 %v1901_v35, %v9151_v14 }
 0x3fb   : > { %v1905_v63 = vmul.f32 0.5, %v1904_v54  ;;  %1749 = vadd.xlane.f32.xlu0 %v9119_v57  ;;  %v1819_v56 = vpop.xlane.xlu1 %1818 }
 0x3fc   : > { %v1845_v20 = vmul.f32 %v1819_v56, %v9134_v10  ;;  %v2053_v42 = vmul.f32 %v9294_v52, %v2034_v53 }
 0x3fd   : > { %v1906_v49 = vsub.f32 1.5, %v1905_v63 }
 0x3fe   : > { %v7565_v45 = vpop.eup %7564  ;;  %v1861_v31 = vadd.f32 1e-05, %v1845_v20  ;;  %v2072_v48 = vadd.f32 %v9302_v36, %v2053_v42 }
 0x3ff   : > { %v1907_v28 = vmul.f32 %v7563_v59, %v1906_v49  ;;  %v1913_v25 = vmul.f32 %v7565_v45, %v1860_v9  ;;  %vm1919_vm14 = vweird.f32 %v7565_v45 }
 0x400   : > { %7566 = vrsqrt.f32 %v1861_v31  ;;  %vm1920_vm1 = vmor %vm1918_vm15, %vm1919_vm14  ;;  %vm1928_vm3 = vweird.f32 %v1861_v31 }
 0x401   : > { %v1911_v33 = vsel %vm1910_vm13, %v7563_v59, %v1907_v28  ;;  %v1914_v62 = vmul.f32 %v7565_v45, %v1913_v25 }
 0x402   : > { %v2035_v60 = vmul.f32 %v1911_v33, %v9157_v29 }
 0x403   : > { %v1915_v61 = vmul.f32 0.5, %v1914_v62  ;;  %v1738_v19 = vpop.xlane.xlu1 %1737  ;;  %v1821_v23 = vpop.xlane.xlu2 %1820 }
 0x404   : > { %v1768_v3 = vmul.f32 %v9134_v10, %v1738_v19  ;;  %v2054_v12 = vmul.f32 %v9294_v52, %v2035_v60 }
 0x405   : > { %v1916_v21 = vsub.f32 1.5, %v1915_v61 }
 0x406   : > { %v7567_v14 = vpop.eup %7566  ;;  %v9320_v40 = vsub.f32 %v8977_v15, %v1768_v3  ;;  %v2073_v7 = vadd.f32 %v9302_v36, %v2054_v12 }
 0x407   : > { %v1917_v11 = vmul.f32 %v7565_v45, %v1916_v21  ;;  %v1923_v29 = vmul.f32 %v7567_v14, %v1861_v31  ;;  %vm1929_vm2 = vweird.f32 %v7567_v14 }
 0x408   : > { %v1800_v43 = vmul.f32 %v9320_v40, %v9320_v40  ;;  %v9326_v22 = vpack.c.bf16 %v2073_v7, %v2072_v48  ;;  %vm1930_vm4 = vmor %vm1928_vm3, %vm1929_vm2 }
 0x409   : > { %v1924_v24 = vmul.f32 %v7567_v14, %v1923_v29  ;;  %v1921_v27 = vsel %vm1920_vm1, %v7565_v45, %v1917_v11 }
 0x40a   : > { %1824 = vadd.xlane.f32.xlu1 %v1800_v43  ;;  %2267 = vmatmul.bf16.gmra.mxu2 %v9326_v22  ;;  %v2036_v18 = vmul.f32 %v1921_v27, %v9163_v46 }
 0x40b   : > { %v1925_v50 = vmul.f32 0.5, %v1924_v24  ;;  %2316 = vmatmul.bf16.gmra.mxu3 %v9326_v22  ;;  %v1744_v32 = vpop.xlane.xlu1 %1743  ;;  %v1740_v34 = vpop.xlane.xlu2 %1739 }
 0x40c   : > { %v1771_v59 = vmul.f32 %v9134_v10, %v1744_v32  ;;  %v1769_v41 = vmul.f32 %v9134_v10, %v1740_v34  ;;  %v2055_v49 = vmul.f32 %v9294_v52, %v2036_v18 }
 0x40d   : > { %v1926_v5 = vsub.f32 1.5, %v1925_v50 }
 0x40e   : > { %v9333_v37 = vsub.f32 %v9005_v38, %v1769_v41  ;;  %v9336_v9 = vsub.f32 %v9061_v13, %v1771_v59  ;;  %v2074_v28 = vadd.f32 %v9302_v36, %v2055_v49 }
 0x40f   : > { %v1927_v54 = vmul.f32 %v7567_v14, %v1926_v5 }
 0x410   : > { %v1801_v35 = vmul.f32 %v9333_v37, %v9333_v37  ;;  %v1803_v63 = vmul.f32 %v9336_v9, %v9336_v9 }
 0x411   : > { %v1931_v56 = vsel %vm1930_vm4, %v7567_v14, %v1927_v54 }
 0x412   : > { %1751 = vadd.xlane.f32.xlu1 %v9132_v6  ;;  %1826 = vadd.xlane.f32.xlu2 %v1801_v35  ;;  %v2037_v20 = vmul.f32 %v1931_v56, %v9169_v4  ;;  %v1846_v4 = vmul.f32 %v1821_v23, %v9134_v10 }
 0x413   : > { %1830 = vadd.xlane.f32.xlu0 %v1803_v63  ;;  %v1746_v45 = vpop.xlane.xlu2 %1745 }
 0x414   : > { %v1772_v46 = vmul.f32 %v9134_v10, %v1746_v45  ;;  %v2056_v31 = vmul.f32 %v9294_v52, %v2037_v20  ;;  %v1862_v60 = vadd.f32 1e-05, %v1846_v4 }
 0x416   : > { %v9349_v53 = vsub.f32 %v9089_v47, %v1772_v46  ;;  %v2075_v25 = vadd.f32 %v9302_v36, %v2056_v31  ;;  %7568 = vrsqrt.f32 %v1862_v60  ;;  %vm1938_vm6 = vweird.f32 %v1862_v60 }
 0x418   : > { %v1804_v33 = vmul.f32 %v9349_v53, %v9349_v53  ;;  %v9355_v62 = vpack.c.bf16 %v2075_v25, %v2074_v28 }
 0x41a   : > { %1832 = vadd.xlane.f32.xlu1 %v1804_v33  ;;  %2272 = vmatmul.bf16.gmra.mxu2 %v9355_v62 }
 0x41b   : > { %2321 = vmatmul.bf16.gmra.mxu3 %v9355_v62 }
 0x41c   : > { %v7569_v42 = vpop.eup %7568 }
 0x41d   : > { %v1933_v61 = vmul.f32 %v7569_v42, %v1862_v60  ;;  %vm1939_vm5 = vweird.f32 %v7569_v42 }
 0x41e   : > { %vm1940_vm7 = vmor %vm1938_vm6, %vm1939_vm5 }
 0x41f   : > { %v1934_v19 = vmul.f32 %v7569_v42, %v1933_v61 }
 0x421   : > { %v1935_v14 = vmul.f32 0.5, %v1934_v19 }
 0x423   : > { %v1936_v48 = vsub.f32 1.5, %v1935_v14 }
 0x425   : > { %v1937_v23 = vmul.f32 %v7569_v42, %v1936_v48 }
 0x427   : > { %v1941_v32 = vsel %vm1940_vm7, %v7569_v42, %v1937_v23 }
 0x428   : > { %v2038_v54 = vmul.f32 %v1941_v32, %v9175_v44 }
 0x42a   : > { %v2057_v49 = vmul.f32 %v9294_v52, %v2038_v54 }
 0x42c   : > { %v2076_v28 = vadd.f32 %v9302_v36, %v2057_v49 }
 0x455   : > { %v1823_v3 = vpop.xlane.xlu0 %1822 }
 0x456   : > { %v1847_v12 = vmul.f32 %v1823_v3, %v9134_v10 }
 0x458   : > { %v1863_v21 = vadd.f32 1e-05, %v1847_v12 }
 0x45a   : > { %7570 = vrsqrt.f32 %v1863_v21  ;;  %vm1948_vm9 = vweird.f32 %v1863_v21 }
 0x45d   : > { %v1742_v7 = vpop.xlane.xlu0 %1741 }
 0x45e   : > { %v1770_v11 = vmul.f32 %v9134_v10, %v1742_v7 }
 0x460   : > { %v7571_v29 = vpop.eup %7570  ;;  %v9363_v43 = vsub.f32 %v9033_v8, %v1770_v11 }
 0x461   : > { %v1943_v24 = vmul.f32 %v7571_v29, %v1863_v21  ;;  %vm1949_vm8 = vweird.f32 %v7571_v29 }
 0x462   : > { %v1802_v27 = vmul.f32 %v9363_v43, %v9363_v43  ;;  %vm1950_vm10 = vmor %vm1948_vm9, %vm1949_vm8 }
 0x463   : > { %v1944_v50 = vmul.f32 %v7571_v29, %v1943_v24 }
 0x464   : > { %1828 = vadd.xlane.f32.xlu2 %v1802_v27 }
 0x465   : > { %v1945_v34 = vmul.f32 0.5, %v1944_v50  ;;  %v1748_v59 = vpop.xlane.xlu0 %1747 }
 0x466   : > { %v1773_v41 = vmul.f32 %v9134_v10, %v1748_v59 }
 0x467   : > { %v1946_v5 = vsub.f32 1.5, %v1945_v34 }
 0x468   : > { %v9369_v18 = vsub.f32 %v9107_v30, %v1773_v41 }
 0x469   : > { %v1947_v35 = vmul.f32 %v7571_v29, %v1946_v5 }
 0x46a   : > { %v1805_v63 = vmul.f32 %v9369_v18, %v9369_v18 }
 0x46b   : > { %v1951_v56 = vsel %vm1950_vm10, %v7571_v29, %v1947_v35 }
 0x46c   : > { %1834 = vadd.xlane.f32.xlu2 %v1805_v63  ;;  %v2039_v20 = vmul.f32 %v1951_v56, %v9283_v55 }
 0x46e   : > { %v1750_v45 = vpop.xlane.xlu0 %1749  ;;  %v2058_v46 = vmul.f32 %v9294_v52, %v2039_v20 }
 0x46f   : > { %v1774_v31 = vmul.f32 %v9134_v10, %v1750_v45 }
 0x470   : > { %v2077_v44 = vadd.f32 %v9302_v36, %v2058_v46 }
 0x471   : > { %v9381_v25 = vsub.f32 %v9119_v57, %v1774_v31 }
 0x472   : > { %v9383_v33 = vpack.c.bf16 %v2077_v44, %v2076_v28 }
 0x473   : > { %v1806_v4 = vmul.f32 %v9381_v25, %v9381_v25 }
 0x474   : > { %2277 = vmatmul.bf16.gmra.mxu2 %v9383_v33  ;;  %2326 = vmatmul.bf16.gmra.mxu3 %v9383_v33 }
 0x475   : > { %1836 = vadd.xlane.f32.xlu0 %v1806_v4 }
 0x47d   : > { %v2263_v55 = vpop.f32.mrf.mxu2  ;;  %v2312_v60 = vpop.f32.mrf.mxu3 }
 0x47e   : > { %v1825_v42 = vpop.xlane.xlu1 %1824  ;;  %v9390_v3 = vpack.c.bf16 %v2312_v60, %v2263_v55 }
 0x47f   : > { %v1848_v61 = vmul.f32 %v1825_v42, %v9134_v10 }
 0x480   : > { %v2469_v23 = vunpack.c.h.b16 %v9390_v3 }
 0x481   : > { %v1864_v19 = vadd.f32 1e-05, %v1848_v61 }
 0x483   : > { %7572 = vrsqrt.f32 %v1864_v19  ;;  %vm1958_vm12 = vweird.f32 %v1864_v19 }
 0x485   : > { %v2265_v12 = vpop.f32.mrf.mxu2  ;;  %v2314_v21 = vpop.f32.mrf.mxu3 }
 0x486   : > { %v9392_v14 = vpack.c.bf16 %v2314_v21, %v2265_v12  ;;  %v1752_v48 = vpop.xlane.xlu1 %1751  ;;  %v1827_v7 = vpop.xlane.xlu2 %1826 }
 0x487   : > { %v1775_v11 = vmul.f32 %v9134_v10, %v1752_v48  ;;  %v1849_v29 = vmul.f32 %v1827_v7, %v9134_v10 }
 0x488   : > { %v2470_v24 = vunpack.c.h.b16 %v9392_v14 }
 0x489   : > { %v7573_v27 = vpop.eup %7572  ;;  %v1865_v50 = vadd.f32 1e-05, %v1849_v29  ;;  %v9399_v32 = vsub.f32 %v9132_v6, %v1775_v11 }
 0x48a   : > { %v1953_v34 = vmul.f32 %v7573_v27, %v1864_v19  ;;  %v9401_v59 = vpack.c.b16 %v2470_v24, %v2469_v23  ;;  %vm1959_vm11 = vweird.f32 %v7573_v27 }
 0x48b   : > { %7574 = vrsqrt.f32 %v1865_v50  ;;  %v1807_v41 = vmul.f32 %v9399_v32, %v9399_v32  ;;  %vm1960_vm13 = vmor %vm1958_vm12, %vm1959_vm11  ;;  %vm1968_vm15 = vweird.f32 %v1865_v50 }
 0x48c   : > { %v1954_v5 = vmul.f32 %v7573_v27, %v1953_v34 }
 0x48d   : > { %1838 = vadd.xlane.f32.xlu1 %v1807_v41  ;;  %v2268_v54 = vpop.f32.mrf.mxu2 }
 0x48e   : > { %v1955_v35 = vmul.f32 0.5, %v1954_v5  ;;  %v2317_v63 = vpop.f32.mrf.mxu3 }
 0x48f   : > { %v2405_v31 = vpack.c.bf16 %v2317_v63, %v2268_v54 }
 0x490   : > { %v1956_v56 = vsub.f32 1.5, %v1955_v35 }
 0x491   : > { %v7575_v20 = vpop.eup %7574  ;;  %v2459_v61 = vunpack.c.l.b16 %v2405_v31 }
 0x492   : > { %v1957_v49 = vmul.f32 %v7573_v27, %v1956_v56  ;;  %v1963_v45 = vmul.f32 %v7575_v20, %v1865_v50  ;;  %vm1969_vm14 = vweird.f32 %v7575_v20 }
 0x493   : > { %vm1970_vm1 = vmor %vm1968_vm15, %vm1969_vm14  ;;  %vm2481_vm14 = vcmask 261120  }
 0x494   : > { %v1964_v46 = vmul.f32 %v7575_v20, %v1963_v45  ;;  %v1961_v44 = vsel %vm1960_vm13, %v7573_v27, %v1957_v49 }
 0x495   : > { %v2270_v28 = vpop.f32.mrf.mxu2  ;;  %v2040_v21 = vmul.f32 %v1961_v44, %v9320_v40  ;;  %v2471_v40 = vunpack.c.h.b16 %v2405_v31  ;;  %v2458_v44 = vunpack.c.l.b16 %v9392_v14  ;;  %v6994_v14 = vld [vmem:[%s12074_s6 + $0xb0] sm:$0xf] }
 0x496   : > { %v1965_v4 = vmul.f32 0.5, %v1964_v46  ;;  %v2319_v55 = vpop.f32.mrf.mxu3 }
 0x497   : > { %v2407_v60 = vpack.c.bf16 %v2319_v55, %v2270_v28  ;;  %v2059_v23 = vmul.f32 %v9294_v52, %v2040_v21  ;;  %v1833_v21 = vpop.xlane.xlu1 %1832 }
 0x498   : > { %v1966_v42 = vsub.f32 1.5, %v1965_v4  ;;  %v2457_v4 = vunpack.c.l.b16 %v9390_v3  ;;  %v7418_v3 = vld [vmem:[%s12074_s6 + $0xb8] sm:$0xf0] }
 0x499   : > { %v2460_v12 = vunpack.c.l.b16 %v2407_v60  ;;  %v2472_v34 = vunpack.c.h.b16 %v2407_v60  ;;  %v2078_v41 = vadd.f32 %v9302_v36, %v2059_v23  ;;  %v1831_v60 = vpop.xlane.xlu0 %1830 }
 0x49a   : > { %v1967_v48 = vmul.f32 %v7575_v20, %v1966_v42  ;;  %v9431_v55 = vpack.c.b16 %v2458_v44, %v2457_v4  ;;  %v1851_v42 = vmul.f32 %v1831_v60, %v9134_v10 }
 0x49b   : > { %v9406_v7 = vpack.c.b16 %v2460_v12, %v2459_v61  ;;  %v9415_v50 = vpack.c.b16 %v2472_v34, %v2471_v40  ;;  %v7415_v40 = vld [vmem:[%s12074_s6 + $0xa0] sm:$0xf0] }
 0x49c   : > { %v1971_v19 = vsel %vm1970_vm1, %v7575_v20, %v1967_v48  ;;  %v1867_v61 = vadd.f32 1e-05, %v1851_v42 }
 0x49d   : > { %v2273_v11 = vpop.f32.mrf.mxu2  ;;  %v2041_v29 = vmul.f32 %v1971_v19, %v9333_v37  ;;  %v1852_v19 = vmul.f32 %v1833_v21, %v9134_v10 }
 0x49e   : > { %v2322_v24 = vpop.f32.mrf.mxu3  ;;  %7576 = vrsqrt.f32 %v1867_v61  ;;  %vm1988_vm3 = vweird.f32 %v1867_v61 }
 0x49f   : > { %v2060_v27 = vmul.f32 %v9294_v52, %v2041_v29  ;;  %v2409_v35 = vpack.c.bf16 %v2322_v24, %v2273_v11  ;;  %v6995_v11 = vor.u32 %v7418_v3, %v6994_v14  ;;  %v9443_v23 = vadd.f32 1e-05, %v1852_v19 }
 0x4a1   : > { %v2079_v5 = vadd.f32 %v9302_v36, %v2060_v27  ;;  %v2461_v20 = vunpack.c.l.b16 %v2409_v35  ;;  %v2473_v49 = vunpack.c.h.b16 %v2409_v35  ;;  %2352 = vmatpush.bf16.msrb.mxu2 %v6995_v11  ;;  %7578 = vrsqrt.f32 %v9443_v23 }
 0x4a2   : > { %vm1998_vm12 = vweird.f32 %v9443_v23 }
 0x4a3   : > { %v9413_v54 = vpack.c.bf16 %v2079_v5, %v2078_v41  ;;  %v6982_v5 = vld [vmem:[%s12074_s6 + $0x98] sm:$0xf] }
 0x4a4   : > { %v7577_v12 = vpop.eup %7576 }
 0x4a5   : > { %2282 = vmatmul.bf16.gmra.mxu2 %v9413_v54  ;;  %2331 = vmatmul.bf16.gmra.mxu3 %v9413_v54  ;;  %v2275_v37 = vpop.f32.mrf.mxu2  ;;  %v1983_v48 = vmul.f32 %v7577_v12, %v1867_v61  ;;  %vm1989_vm2 = vweird.f32 %v7577_v12 }
 0x4a6   : > { %2714 = vrot.lane.b32.xlu1 %v9415_v50, %s8077_s2  ;;  %v2324_v63 = vpop.f32.mrf.mxu3  ;;  %vm1990_vm4 = vmor %vm1988_vm3, %vm1989_vm2 }
 0x4a7   : > { %v2411_v56 = vpack.c.bf16 %v2324_v63, %v2275_v37  ;;  %v1984_v29 = vmul.f32 %v7577_v12, %v1983_v48  ;;  %v6983_v63 = vor.u32 %v7415_v40, %v6982_v5 }
 0x4a9   : > { %v2462_v45 = vunpack.c.l.b16 %v2411_v56  ;;  %v2474_v46 = vunpack.c.h.b16 %v2411_v56  ;;  %v1985_v41 = vmul.f32 0.5, %v1984_v29  ;;  %2353 = vmatpush.bf16.msrb.mxu2 %v6983_v63 }
 0x4ab   : > { %v9421_v31 = vpack.c.b16 %v2462_v45, %v2461_v20  ;;  %v9423_v28 = vpack.c.b16 %v2474_v46, %v2473_v49  ;;  %v1986_v35 = vsub.f32 1.5, %v1985_v41  ;;  %v9454_v20 = vpop.eup %7578 }
 0x4ac   : > { %v1993_v4 = vmul.f32 %v9454_v20, %v9443_v23  ;;  %vm1999_vm9 = vweird.f32 %v9454_v20 }
 0x4ad   : > { %2716 = vrot.lane.b32.xlu0 %v9423_v28, %s8077_s2  ;;  %v1987_v46 = vmul.f32 %v7577_v12, %v1986_v35  ;;  %vm2000_vm13 = vmor %vm1998_vm12, %vm1999_vm9 }
 0x4ae   : > { %2708 = vrot.lane.b32.xlu1 %v9421_v31, %s8077_s2  ;;  %v1994_v48 = vmul.f32 %v9454_v20, %v1993_v4 }
 0x4af   : > { %v1991_v42 = vsel %vm1990_vm4, %v7577_v12, %v1987_v46 }
 0x4b0   : > { %v2043_v11 = vmul.f32 %v1991_v42, %v9336_v9  ;;  %v1995_v41 = vmul.f32 0.5, %v1994_v48  ;;  %v6970_v42 = vld [vmem:[%s12074_s6 + $0x80] sm:$0xf] }
 0x4b2   : > { %v2062_v40 = vmul.f32 %v9294_v52, %v2043_v11  ;;  %v1996_v63 = vsub.f32 1.5, %v1995_v41 }
 0x4b4   : > { %v2081_v46 = vadd.f32 %v9302_v36, %v2062_v40 }
 0x4b5   : > { %2704 = vrot.lane.b32.xlu0 %v9431_v55, %s8077_s2 }
 0x4d7   : > { %v1829_v24 = vpop.xlane.xlu2 %1828 }
 0x4d8   : > { %v1850_v27 = vmul.f32 %v1829_v24, %v9134_v10 }
 0x4da   : > { %v1866_v34 = vadd.f32 1e-05, %v1850_v27 }
 0x4dc   : > { %7580 = vrsqrt.f32 %v1866_v34  ;;  %vm1978_vm6 = vweird.f32 %v1866_v34 }
 0x4df   : > { %v1835_v37 = vpop.xlane.xlu2 %1834 }
 0x4e0   : > { %v1853_v56 = vmul.f32 %v1835_v37, %v9134_v10 }
 0x4e2   : > { %v7581_v49 = vpop.eup %7580  ;;  %v1869_v45 = vadd.f32 1e-05, %v1853_v56 }
 0x4e3   : > { %v1973_v44 = vmul.f32 %v7581_v49, %v1866_v34  ;;  %vm1979_vm5 = vweird.f32 %v7581_v49 }
 0x4e4   : > { %7582 = vrsqrt.f32 %v1869_v45  ;;  %vm1980_vm7 = vmor %vm1978_vm6, %vm1979_vm5  ;;  %vm2008_vm10 = vweird.f32 %v1869_v45 }
 0x4e5   : > { %v1974_v60 = vmul.f32 %v7581_v49, %v1973_v44 }
 0x4e7   : > { %v1975_v21 = vmul.f32 0.5, %v1974_v60 }
 0x4e8   : > { %v1837_v19 = vpop.xlane.xlu0 %1836 }
 0x4e9   : > { %v1976_v14 = vsub.f32 1.5, %v1975_v21  ;;  %v1854_v27 = vmul.f32 %v1837_v19, %v9134_v10  ;;  %v6958_v21 = vld [vmem:[%s12074_s6 + $0x68] sm:$0xf] }
 0x4ea   : > { %v7583_v3 = vpop.eup %7582 }
 0x4eb   : > { %v1977_v29 = vmul.f32 %v7581_v49, %v1976_v14  ;;  %v2003_v24 = vmul.f32 %v7583_v3, %v1869_v45  ;;  %v9463_v37 = vadd.f32 1e-05, %v1854_v27  ;;  %vm2009_vm8 = vweird.f32 %v7583_v3  ;;  %v7412_v45 = vld [vmem:[%s12074_s6 + $0x88] sm:$0xf0]  ;;  %v7409_v14 = vld [vmem:[%s12074_s6 + $0x70] sm:$0xf0] }
 0x4ec   : > { %vm9473_vm11 = vmor %vm2008_vm10, %vm2009_vm8  ;;  %v6971_v19 = vor.u32 %v7412_v45, %v6970_v42 }
 0x4ed   : > { %v1981_v61 = vsel %vm1980_vm7, %v7581_v49, %v1977_v29  ;;  %v2004_v5 = vmul.f32 %v7583_v3, %v2003_v24  ;;  %7584 = vrsqrt.f32 %v9463_v37  ;;  %v1997_v49 = vmul.f32 %v9454_v20, %v1996_v63 }
 0x4ee   : > { %v2042_v12 = vmul.f32 %v1981_v61, %v9363_v43  ;;  %2354 = vmatpush.bf16.msrb.mxu2 %v6971_v19  ;;  %v6959_v24 = vor.u32 %v7409_v14, %v6958_v21  ;;  %vm2018_vm1 = vweird.f32 %v9463_v37 }
 0x4ef   : > { %v2005_v35 = vmul.f32 0.5, %v2004_v5 }
 0x4f0   : > { %v2061_v56 = vmul.f32 %v9294_v52, %v2042_v12 }
 0x4f1   : > { %v2006_v9 = vsub.f32 1.5, %v2005_v35 }
 0x4f2   : > { %v2080_v34 = vadd.f32 %v9302_v36, %v2061_v56  ;;  %2355 = vmatpush.bf16.msrb.mxu2 %v6959_v24 }
 0x4f3   : > { %v2007_v44 = vmul.f32 %v7583_v3, %v2006_v9  ;;  %v9495_v11 = vpop.eup %7584 }
 0x4f4   : > { %v9471_v43 = vpack.c.bf16 %v2081_v46, %v2080_v34  ;;  %v2013_v41 = vmul.f32 %v9495_v11, %v9463_v37  ;;  %vm2019_vm15 = vweird.f32 %v9495_v11 }
 0x4f5   : > { %v2011_v60 = vsel %vm9473_vm11, %v7583_v3, %v2007_v44  ;;  %v2001_v3 = vsel %vm2000_vm13, %v9454_v20, %v1997_v49  ;;  %v6946_v20 = vld [vmem:[%s12074_s6 + $0x50] sm:$0xf]  ;;  %v6934_v44 = vld [vmem:[%s12074_s6 + $0x38] sm:$0xf]  ;;  %v7403_v49 = vld [vmem:[%s12074_s6 + $0x40] sm:$0xf0] }
 0x4f6   : > { %2287 = vmatmul.bf16.gmra.mxu2 %v9471_v43  ;;  %2336 = vmatmul.bf16.gmra.mxu3 %v9471_v43  ;;  %v2045_v29 = vmul.f32 %v2011_v60, %v9369_v18  ;;  %v2044_v27 = vmul.f32 %v2001_v3, %v9349_v53  ;;  %v7406_v18 = vld [vmem:[%s12074_s6 + $0x58] sm:$0xf0]  ;;  %v2014_v53 = vmul.f32 %v9495_v11, %v2013_v41  ;;  %v7400_v41 = vld [vmem:[%s12074_s6 + $0x28] sm:$0xf0]  ;;  %vm2020_vm2 = vmor %vm2018_vm1, %vm2019_vm15 }
 0x4f7   : > { %v2278_v23 = vpop.f32.mrf.mxu2  ;;  %v2327_v48 = vpop.f32.mrf.mxu3  ;;  %v6947_v9 = vor.u32 %v7406_v18, %v6946_v20  ;;  %v6935_v3 = vor.u32 %v7403_v49, %v6934_v44 }
 0x4f8   : > { %v2064_v61 = vmul.f32 %v9294_v52, %v2045_v29  ;;  %v2413_v5 = vpack.c.bf16 %v2327_v48, %v2278_v23  ;;  %v2063_v35 = vmul.f32 %v9294_v52, %v2044_v27  ;;  %v2015_v48 = vmul.f32 0.5, %v2014_v53  ;;  %v6922_v27 = vld [vmem:[%s12074_s6 + $0x20] sm:$0xf] }
 0x4f9   : > { %2356 = vmatpush.bf16.msrb.mxu2 %v6947_v9 }
 0x4fa   : > { %v2083_v46 = vadd.f32 %v9302_v36, %v2064_v61  ;;  %v2463_v4 = vunpack.c.l.b16 %v2413_v5  ;;  %v2475_v60 = vunpack.c.h.b16 %v2413_v5  ;;  %v2082_v23 = vadd.f32 %v9302_v36, %v2063_v35  ;;  %v7397_v35 = vld [vmem:[%s12074_s6 + $0x10] sm:$0xf0] }
 0x4fb   : > { %v2016_v61 = vsub.f32 1.5, %v2015_v48  ;;  %v6923_v5 = vor.u32 %v7400_v41, %v6922_v27 }
 0x4fc   : > { %v9523_v29 = vpack.c.bf16 %v2083_v46, %v2082_v23  ;;  %v2495_v23 = vsel %vm2481_vm14, %v9401_v59, 0 }
 0x4fd   : > { %2357 = vmatpush.bf16.msrb.mxu2 %v6935_v3  ;;  %v2017_v20 = vmul.f32 %v9495_v11, %v2016_v61 }
 0x4ff   : > { %v2280_v12 = vpop.f32.mrf.mxu2  ;;  %v2329_v40 = vpop.f32.mrf.mxu3  ;;  %v2021_v9 = vsel %vm2020_vm2, %v9495_v11, %v2017_v20 }
 0x500   : > { %v1839_v63 = vpop.xlane.xlu1 %1838  ;;  %v2415_v56 = vpack.c.bf16 %v2329_v40, %v2280_v12  ;;  %v6910_v40 = vld [vmem:[%s12074_s6 + $0x8] sm:$0xf]  ;;  %v2046_v44 = vmul.f32 %v2021_v9, %v9381_v25 }
 0x501   : > { %v1855_v34 = vmul.f32 %v1839_v63, %v9134_v10  ;;  %2358 = vmatpush.bf16.msrb.mxu2 %v6923_v5  ;;  %v6911_v53 = vor.u32 %v7397_v35, %v6910_v40 }
 0x502   : > { %v2464_v42 = vunpack.c.l.b16 %v2415_v56  ;;  %v2476_v45 = vunpack.c.h.b16 %v2415_v56  ;;  %v2501_v56 = vsel %vm2481_vm14, %v9423_v28, 0  ;;  %v2065_v11 = vmul.f32 %v9294_v52, %v2046_v44 }
 0x503   : > { %v1871_v21 = vadd.f32 1e-05, %v1855_v34 }
 0x504   : > { %v9519_v19 = vpack.c.b16 %v2464_v42, %v2463_v4  ;;  %v9521_v14 = vpack.c.b16 %v2476_v45, %v2475_v60  ;;  %v2498_v4 = vsel %vm2481_vm14, %v9415_v50, 0  ;;  %v2084_v45 = vadd.f32 %v9302_v36, %v2065_v11 }
 0x505   : > { %7586 = vrsqrt.f32 %v1871_v21  ;;  %2359 = vmatpush.bf16.msrb.mxu2 %v6911_v53  ;;  %vm2028_vm4 = vweird.f32 %v1871_v21 }
 0x506   : > { %2718 = vrot.lane.b32.xlu2 %v9521_v14, %s8077_s2  ;;  %2710 = vrot.lane.b32.xlu0 %v9519_v19, %s8077_s2  ;;  %v2504_v24 = vsel %vm2481_vm14, %v9521_v14, 0 }
 0x507   : > { %2292 = vmatmul.bf16.gmra.mxu2 %v9523_v29  ;;  %2341 = vmatmul.bf16.gmra.mxu3 %v9523_v29 }
 0x508   : > { %2510 = vmatpush.bf16.xpose.msrb.mxu3 %v2504_v24 }
 0x50b   : > { %v7587_v12 = vpop.eup %7586 }
 0x50c   : > { %v2023_v18 = vmul.f32 %v7587_v12, %v1871_v21  ;;  %vm2029_vm3 = vweird.f32 %v7587_v12 }
 0x50d   : > { %vm2030_vm5 = vmor %vm2028_vm4, %vm2029_vm3 }
 0x50e   : > { %v2024_v63 = vmul.f32 %v7587_v12, %v2023_v18  ;;  %2712 = vrot.lane.b32.xlu2 %v9401_v59, %s8077_s2 }
 0x510   : > { %v2025_v34 = vmul.f32 0.5, %v2024_v63  ;;  %2511 = vmatpush.bf16.xpose.msrb.mxu3 %v2501_v56 }
 0x512   : > { %v2026_v46 = vsub.f32 1.5, %v2025_v34 }
 0x514   : > { %v2027_v49 = vmul.f32 %v7587_v12, %v2026_v46 }
 0x516   : > { %v2031_v37 = vsel %vm2030_vm5, %v7587_v12, %v2027_v49  ;;  %2706 = vrot.lane.b32.xlu2 %v9406_v7, %s8077_s2 }
 0x517   : > { %v2047_v60 = vmul.f32 %v2031_v37, %v9399_v32 }
 0x518   : > { %2512 = vmatpush.bf16.xpose.msrb.mxu3 %v2498_v4  ;;  %v2715_v40 = vpop.permute.xlu1 %2714 }
 0x519   : > { %v2066_v42 = vmul.f32 %v9294_v52, %v2047_v60 }
 0x51b   : > { %v2085_v25 = vadd.f32 %v9302_v36, %v2066_v42 }
 0x51d   : > { %v2093_v21 = vpack.c.bf16 %v2085_v25, %v2084_v45 }
 0x51f   : > { %2297 = vmatmul.bf16.gmra.mxu2 %v2093_v21  ;;  %2346 = vmatmul.bf16.gmra.mxu3 %v2093_v21  ;;  %v2717_v12 = vpop.permute.xlu0 %2716 }
 0x520   : > { %2513 = vmatpush.bf16.xpose.msrb.mxu3 %v2495_v23 }
 0x528   : > { %v2283_v48 = vpop.f32.mrf.mxu2  ;;  %v2332_v3 = vpop.f32.mrf.mxu3 }
 0x529   : > { %v9565_v24 = vpack.c.bf16 %v2332_v3, %v2283_v48 }
 0x52b   : > { %v3618_v36 = vunpack.c.l.b16 %v9565_v24 }
 0x52f   : > { %2360 = vmatmul.bf16.vlgmr.msrb.gmra.mxu2 %v9308_v51  ;;  %6996 = vmatmul.msk.bf16.vlgmr.msrb.gmra.mxu3 %vm2481_vm14, %v9431_v55 }
 0x530   : > { %v2285_v52 = vpop.f32.mrf.mxu2  ;;  %v2334_v32 = vpop.f32.mrf.mxu3 }
 0x531   : > { %v9570_v27 = vpack.c.bf16 %v2334_v32, %v2285_v52 }
 0x533   : > { %v3619_v41 = vunpack.c.l.b16 %v9570_v27 }
 0x535   : > { %v9574_v61 = vpack.c.b16 %v3619_v41, %v3618_v36 }
 0x53f   : > { %2365 = vmatmul.bf16.gmra.mxu2 %v9326_v22  ;;  %6997 = vmatmul.msk.bf16.gmra.mxu3 %vm2481_vm14, %v9406_v7  ;;  %v2739_v22 = vsel %vm2481_vm14, %v2717_v12, 0 }
 0x54f   : > { %2370 = vmatmul.bf16.gmra.mxu2 %v9355_v62  ;;  %6998 = vmatmul.msk.bf16.gmra.mxu3 %vm2481_vm14, %v9421_v31  ;;  %v2736_v62 = vsel %vm2481_vm14, %v2715_v40, 0 }
 0x55f   : > { %2375 = vmatmul.bf16.gmra.mxu2 %v9383_v33  ;;  %6999 = vmatmul.msk.bf16.gmra.mxu3 %vm2481_vm14, %v9519_v19 }
 0x560   : > { %v2719_v51 = vpop.permute.xlu2 %2718 }
 0x561   : > { %v2742_v5 = vsel %vm2481_vm14, %v2719_v51, 0 }
 0x562   : > { %2748 = vmatpush.bf16.xpose.msra.mxu2 %v2742_v5 }
 0x568   : > { %v2713_v35 = vpop.permute.xlu2 %2712 }
 0x569   : > { %v2733_v18 = vsel %vm2481_vm14, %v2713_v35, 0 }
 0x56a   : > { %2749 = vmatpush.bf16.xpose.msra.mxu2 %v2739_v22 }
 0x56f   : > { %2380 = vmatmul.bf16.gmra.mxu2 %v9413_v54 }
 0x572   : > { %2750 = vmatpush.bf16.xpose.msra.mxu2 %v2736_v62 }
 0x579   : > { %v2288_v20 = vpop.f32.mrf.mxu2  ;;  %v2337_v33 = vpop.f32.mrf.mxu3 }
 0x57a   : > { %v2421_v53 = vpack.c.bf16 %v2337_v33, %v2288_v20  ;;  %2751 = vmatpush.bf16.xpose.msra.mxu2 %v2733_v18  ;;  %v2705_v20 = vpop.permute.xlu0 %2704 }
 0x57c   : > { %v3620_v34 = vunpack.c.l.b16 %v2421_v53  ;;  %v3632_v46 = vunpack.c.h.b16 %v2421_v53 }
 0x57f   : > { %2385 = vmatmul.bf16.gmra.mxu2 %v9471_v43 }
 0x581   : > { %v2290_v63 = vpop.f32.mrf.mxu2  ;;  %v2339_v56 = vpop.f32.mrf.mxu3 }
 0x582   : > { %v2423_v9 = vpack.c.bf16 %v2339_v56, %v2290_v63 }
 0x584   : > { %v3621_v44 = vunpack.c.l.b16 %v2423_v9  ;;  %v3633_v49 = vunpack.c.h.b16 %v2423_v9 }
 0x586   : > { %v9591_v54 = vpack.c.b16 %v3621_v44, %v3620_v34  ;;  %v9593_v37 = vpack.c.b16 %v3633_v49, %v3632_v46  ;;  %v2707_v49 = vpop.permute.xlu2 %2706 }
 0x58a   : > { %v2293_v4 = vpop.f32.mrf.mxu2  ;;  %v2342_v60 = vpop.f32.mrf.mxu3 }
 0x58b   : > { %v2425_v11 = vpack.c.bf16 %v2342_v60, %v2293_v4 }
 0x58d   : > { %v3622_v43 = vunpack.c.l.b16 %v2425_v11  ;;  %v3634_v23 = vunpack.c.h.b16 %v2425_v11 }
 0x58f   : > { %2390 = vmatmul.bf16.gmra.mxu2 %v9523_v29 }
 0x592   : > { %v2295_v42 = vpop.f32.mrf.mxu2  ;;  %v2344_v45 = vpop.f32.mrf.mxu3 }
 0x593   : > { %v2427_v25 = vpack.c.bf16 %v2344_v45, %v2295_v42 }
 0x595   : > { %v3623_v48 = vunpack.c.l.b16 %v2427_v25  ;;  %v3635_v3 = vunpack.c.h.b16 %v2427_v25 }
 0x597   : > { %v9596_v52 = vpack.c.b16 %v3623_v48, %v3622_v43  ;;  %v9598_v32 = vpack.c.b16 %v3635_v3, %v3634_v23  ;;  %v2709_v48 = vpop.permute.xlu1 %2708 }
 0x59f   : > { %2395 = vmatmul.bf16.gmra.mxu2 %v2093_v21 }
 0x5a2   : > { %v2298_v36 = vpop.f32.mrf.mxu2  ;;  %v2347_v41 = vpop.f32.mrf.mxu3 }
 0x5a3   : > { %v2429_v51 = vpack.c.bf16 %v2347_v41, %v2298_v36 }
 0x5a5   : > { %v3624_v40 = vunpack.c.l.b16 %v2429_v51  ;;  %v3636_v29 = vunpack.c.h.b16 %v2429_v51 }
 0x5aa   : > { %v2300_v5 = vpop.f32.mrf.mxu2  ;;  %v2349_v12 = vpop.f32.mrf.mxu3 }
 0x5ab   : > { %v2431_v22 = vpack.c.bf16 %v2349_v12, %v2300_v5 }
 0x5ad   : > { %v3625_v62 = vunpack.c.l.b16 %v2431_v22  ;;  %v3637_v35 = vunpack.c.h.b16 %v2431_v22 }
 0x5af   : > { %v9600_v33 = vpack.c.b16 %v3625_v62, %v3624_v40  ;;  %v9602_v18 = vpack.c.b16 %v3637_v35, %v3636_v29  ;;  %7004 = vmatmul.msk.bf16.vlgmr.msra.gmra.mxu2 %vm2481_vm14, %v2705_v20  ;;  %v2711_v29 = vpop.permute.xlu0 %2710 }
 0x5b2   : > { %v9605_v53 = vpop.f32.mrf.mxu2  ;;  %v2515_v21 = vpop.f32.mrf.mxu3 }
 0x5b3   : > { %v9607_v63 = vmul.f32 0.17677669, %v2515_v21 }
 0x5b5   : > { %v2543_v56 = vsel %vm590_vm0, %v9607_v63, -inf }
 0x5b6   : > { %2544 = vmax.xlane.f32.xlu2 %v2543_v56 }
 0x5ba   : > { %v2363_v9 = vpop.f32.mrf.mxu2  ;;  %v2517_v34 = vpop.f32.mrf.mxu3 }
 0x5bb   : > { %v9611_v46 = vmul.f32 0.17677669, %v2517_v34 }
 0x5bd   : > { %v2546_v44 = vsel %vm590_vm0, %v9611_v46, -inf }
 0x5be   : > { %2547 = vmax.xlane.f32.xlu1 %v2546_v44 }
 0x5bf   : > { %7005 = vmatmul.msk.bf16.gmra.mxu2 %vm2481_vm14, %v2707_v49 }
 0x5c2   : > { %v2366_v4 = vpop.f32.mrf.mxu2  ;;  %v2520_v60 = vpop.f32.mrf.mxu3 }
 0x5c3   : > { %v9616_v11 = vmul.f32 0.17677669, %v2520_v60 }
 0x5c5   : > { %v2549_v42 = vsel %vm590_vm0, %v9616_v11, -inf }
 0x5c6   : > { %2550 = vmax.xlane.f32.xlu0 %v2549_v42 }
 0x5ca   : > { %v2368_v45 = vpop.f32.mrf.mxu2  ;;  %v2522_v25 = vpop.f32.mrf.mxu3 }
 0x5cb   : > { %v9620_v43 = vmul.f32 0.17677669, %v2522_v25 }
 0x5cd   : > { %v2552_v23 = vsel %vm590_vm0, %v9620_v43, -inf }
 0x5ce   : > { %2553 = vmax.xlane.f32.xlu2 %v2552_v23 }
 0x5cf   : > { %7006 = vmatmul.msk.bf16.gmra.mxu2 %vm2481_vm14, %v2709_v48  ;;  %v2408_v48 = vpack.c.bf16 %v2368_v45, %v2368_v45 }
 0x5d2   : > { %v2371_v3 = vpop.f32.mrf.mxu2  ;;  %v2525_v36 = vpop.f32.mrf.mxu3 }
 0x5d3   : > { %v9625_v41 = vmul.f32 0.17677669, %v2525_v36  ;;  %v2410_v60 = vpack.c.bf16 %v2371_v3, %v2371_v3  ;;  %v2404_v3 = vpack.c.bf16 %v2363_v9, %v2363_v9 }
 0x5d5   : > { %v2555_v51 = vsel %vm590_vm0, %v9625_v41, -inf }
 0x5d6   : > { %2556 = vmax.xlane.f32.xlu1 %v2555_v51 }
 0x5da   : > { %v2373_v5 = vpop.f32.mrf.mxu2  ;;  %v2527_v12 = vpop.f32.mrf.mxu3 }
 0x5db   : > { %v9629_v22 = vmul.f32 0.17677669, %v2527_v12  ;;  %v2412_v34 = vpack.c.bf16 %v2373_v5, %v2373_v5  ;;  %v2406_v12 = vpack.c.bf16 %v2366_v4, %v2366_v4 }
 0x5dd   : > { %v2558_v40 = vsel %vm590_vm0, %v9629_v22, -inf  ;;  %v2648_v36 = vunpack.c.l.b16 %v2412_v34  ;;  %v2645_v45 = vunpack.c.l.b16 %v2406_v12 }
 0x5de   : > { %2559 = vmax.xlane.f32.xlu0 %v2558_v40  ;;  %v2647_v40 = vunpack.c.l.b16 %v2410_v60 }
 0x5df   : > { %7007 = vmatmul.msk.bf16.gmra.mxu2 %vm2481_vm14, %v2711_v29  ;;  %v2646_v29 = vunpack.c.l.b16 %v2408_v48 }
 0x5e1   : > { %v9650_v4 = vpack.c.b16 %v2646_v29, %v2645_v45 }
 0x5e2   : > { %v2376_v62 = vpop.f32.mrf.mxu2  ;;  %v2530_v35 = vpop.f32.mrf.mxu3 }
 0x5e3   : > { %v2414_v20 = vpack.c.bf16 %v2376_v62, %v2376_v62  ;;  %v9645_v62 = vpack.c.b16 %v2648_v36, %v2647_v40 }
 0x5e5   : > { %v2649_v42 = vunpack.c.l.b16 %v2414_v20  ;;  %v2402_v20 = vpack.c.bf16 %v9605_v53, %v9605_v53 }
 0x5ea   : > { %v2378_v21 = vpop.f32.mrf.mxu2  ;;  %v2532_v56 = vpop.f32.mrf.mxu3 }
 0x5eb   : > { %v2416_v44 = vpack.c.bf16 %v2378_v21, %v2378_v21  ;;  %v9634_v49 = vmul.f32 0.17677669, %v2532_v56  ;;  %v2644_v21 = vunpack.c.l.b16 %v2404_v3  ;;  %v2643_v56 = vunpack.c.l.b16 %v2402_v20 }
 0x5ed   : > { %v2650_v25 = vunpack.c.l.b16 %v2416_v44  ;;  %v2564_v23 = vsel %vm590_vm0, %v9634_v49, -inf  ;;  %v9655_v44 = vpack.c.b16 %v2644_v21, %v2643_v56 }
 0x5ee   : > { %2565 = vmax.xlane.f32.xlu1 %v2564_v23 }
 0x5ef   : > { %v9638_v51 = vpack.c.b16 %v2650_v25, %v2649_v42  ;;  %v9664_v42 = vmul.f32 0.17677669, %v2530_v35 }
 0x5f1   : > { %2879 = vrot.lane.b32.xlu2 %v9638_v51, %s8077_s2  ;;  %2675 = vmatpush.bf16.msra.mxu3 %v9638_v51  ;;  %v2561_v25 = vsel %vm590_vm0, %v9664_v42, -inf }
 0x5f2   : > { %v9643_v5 = vpop.f32.mrf.mxu2 }
 0x5f5   : > { %2676 = vmatpush.bf16.msra.mxu3 %v9645_v62 }
 0x5f9   : > { %2677 = vmatpush.bf16.msra.mxu3 %v9650_v4 }
 0x5fa   : > { %v9653_v34 = vpop.f32.mrf.mxu2 }
 0x5fd   : > { %2678 = vmatpush.bf16.msra.mxu3 %v9655_v44 }
 0x602   : > { %v9658_v9 = vpop.f32.mrf.mxu2 }
 0x60a   : > { %v9660_v60 = vpop.f32.mrf.mxu2 }
 0x612   : > { %v9662_v53 = vpop.f32.mrf.mxu2 }
 0x61a   : > { %2562 = vmax.xlane.f32.xlu2 %v2561_v25  ;;  %v9668_v23 = vpop.f32.mrf.mxu2 }
 0x622   : > { %v9670_v48 = vpop.f32.mrf.mxu2 }
 0x629   : > { %v2545_v12 = vpop.xlane.xlu2 %2544 }
 0x62a   : > { %v9672_v36 = vpop.f32.mrf.mxu2  ;;  %v2567_v35 = vsub.f32 %v9607_v63, %v2545_v12 }
 0x62c   : > { %v2575_v56 = vmul.f32 1.442695, %v2567_v35 }
 0x631   : > { %v2548_v40 = vpop.xlane.xlu1 %2547 }
 0x632   : > { %v2568_v3 = vsub.f32 %v9611_v46, %v2548_v40  ;;  %v2753_v29 = vpop.f32.mrf.mxu2 }
 0x633   : > { %v9675_v20 = vmul.f32 0.17677669, %v2753_v29 }
 0x634   : > { %v2577_v45 = vmul.f32 1.442695, %v2568_v3 }
 0x635   : > { %v2781_v21 = vsel %vm590_vm0, %v9675_v20, -inf }
 0x636   : > { %7588 = vpow2.f32 %v2577_v45  ;;  %2782 = vmax.xlane.f32.xlu1 %v2781_v21 }
 0x637   : > { %7590 = vpow2.f32 %v2575_v56 }
 0x639   : > { %v2551_v3 = vpop.xlane.xlu0 %2550 }
 0x63a   : > { %v2755_v25 = vpop.f32.mrf.mxu2  ;;  %v2569_v21 = vsub.f32 %v9616_v11, %v2551_v3 }
 0x63b   : > { %v9680_v6 = vmul.f32 0.17677669, %v2755_v25 }
 0x63c   : > { %v9682_v57 = vpop.eup %7588  ;;  %v2579_v25 = vmul.f32 1.442695, %v2569_v21 }
 0x63d   : > { %v2594_v46 = vsel %vm590_vm0, %v9682_v57, 0.0  ;;  %v2784_v40 = vsel %vm590_vm0, %v9680_v6, -inf  ;;  %v9688_v12 = vpop.eup %7590 }
 0x63e   : > { %2595 = vadd.xlane.f32.xlu2 %v2594_v46  ;;  %2785 = vmax.xlane.f32.xlu0 %v2784_v40  ;;  %v2591_v56 = vsel %vm590_vm0, %v9688_v12, 0.0 }
 0x641   : > { %v2554_v63 = vpop.xlane.xlu2 %2553 }
 0x642   : > { %v2570_v29 = vsub.f32 %v9620_v43, %v2554_v63  ;;  %v2758_v35 = vpop.f32.mrf.mxu2 }
 0x643   : > { %v9694_v30 = vmul.f32 0.17677669, %v2758_v35 }
 0x644   : > { %v2581_v45 = vmul.f32 1.442695, %v2570_v29 }
 0x645   : > { %v2787_v11 = vsel %vm590_vm0, %v9694_v30, -inf }
 0x646   : > { %7592 = vpow2.f32 %v2581_v45  ;;  %2592 = vadd.xlane.f32.xlu0 %v2591_v56 }
 0x647   : > { %7594 = vpow2.f32 %v2579_v25 }
 0x649   : > { %v2557_v3 = vpop.xlane.xlu1 %2556 }
 0x64a   : > { %v2760_v46 = vpop.f32.mrf.mxu2 }
 0x64b   : > { %v9696_v40 = vmul.f32 0.17677669, %v2760_v46  ;;  %v2880_v47 = vpop.permute.xlu2 %2879 }
 0x64c   : > { %v9698_v13 = vpop.eup %7592  ;;  %2901 = vmatpush.bf16.msrb.mxu3 %v2880_v47  ;;  %v2571_v47 = vsub.f32 %v9625_v41, %v2557_v3 }
 0x64d   : > { %v2600_v43 = vsel %vm590_vm0, %v9698_v13, 0.0  ;;  %v2790_v63 = vsel %vm590_vm0, %v9696_v40, -inf  ;;  %v9707_v21 = vpop.eup %7594 }
 0x64e   : > { %2601 = vadd.xlane.f32.xlu1 %v2600_v43  ;;  %2788 = vmax.xlane.f32.xlu0 %v2787_v11  ;;  %v2597_v25 = vsel %vm590_vm0, %v9707_v21, 0.0  ;;  %v2583_v46 = vmul.f32 1.442695, %v2571_v47 }
 0x64f   : > { %2791 = vmax.xlane.f32.xlu2 %v2790_v63 }
 0x651   : > { %v2560_v29 = vpop.xlane.xlu0 %2559 }
 0x652   : > { %v2572_v35 = vsub.f32 %v9629_v22, %v2560_v29  ;;  %v2763_v45 = vpop.f32.mrf.mxu2 }
 0x653   : > { %v9712_v8 = vmul.f32 0.17677669, %v2763_v45 }
 0x654   : > { %v2585_v56 = vmul.f32 1.442695, %v2572_v35 }
 0x655   : > { %v2793_v3 = vsel %vm590_vm0, %v9712_v8, -inf }
 0x656   : > { %7596 = vpow2.f32 %v2585_v56 }
 0x657   : > { %2598 = vadd.xlane.f32.xlu2 %v2597_v25  ;;  %7598 = vpow2.f32 %v2583_v46 }
 0x65a   : > { %v2765_v43 = vpop.f32.mrf.mxu2 }
 0x65b   : > { %v9714_v11 = vmul.f32 0.17677669, %v2765_v43 }
 0x65c   : > { %v9716_v63 = vpop.eup %7596 }
 0x65d   : > { %v2796_v22 = vsel %vm590_vm0, %v9714_v11, -inf  ;;  %v2606_v41 = vsel %vm590_vm0, %v9716_v63, 0.0  ;;  %v9724_v35 = vpop.eup %7598 }
 0x65e   : > { %2797 = vmax.xlane.f32.xlu1 %v2796_v22  ;;  %2607 = vadd.xlane.f32.xlu0 %v2606_v41  ;;  %v2603_v25 = vsel %vm590_vm0, %v9724_v35, 0.0 }
 0x65f   : > { %2794 = vmax.xlane.f32.xlu2 %v2793_v3 }
 0x661   : > { %v2566_v29 = vpop.xlane.xlu1 %2565 }
 0x662   : > { %v2574_v45 = vsub.f32 %v9634_v49, %v2566_v29  ;;  %v2768_v47 = vpop.f32.mrf.mxu2 }
 0x663   : > { %v9729_v46 = vmul.f32 0.17677669, %v2768_v47 }
 0x664   : > { %v2589_v56 = vmul.f32 1.442695, %v2574_v45 }
 0x665   : > { %v2799_v41 = vsel %vm590_vm0, %v9729_v46, -inf }
 0x666   : > { %7600 = vpow2.f32 %v2589_v56  ;;  %2604 = vadd.xlane.f32.xlu1 %v2603_v25 }
 0x66a   : > { %v2770_v43 = vpop.f32.mrf.mxu2 }
 0x66b   : > { %v9731_v22 = vmul.f32 0.17677669, %v2770_v43 }
 0x66c   : > { %v9733_v38 = vpop.eup %7600 }
 0x66d   : > { %v2612_v49 = vsel %vm590_vm0, %v9733_v38, 0.0  ;;  %v2802_v3 = vsel %vm590_vm0, %v9731_v22, -inf }
 0x66e   : > { %2800 = vmax.xlane.f32.xlu1 %v2799_v41  ;;  %2613 = vadd.xlane.f32.xlu2 %v2612_v49 }
 0x66f   : > { %2803 = vmax.xlane.f32.xlu0 %v2802_v3 }
 0x686   : > { %2873 = vrot.lane.b32.xlu2 %v9655_v44, %s8077_s2 }
 0x68d   : > { %v2563_v29 = vpop.xlane.xlu2 %2562 }
 0x68e   : > { %v2573_v45 = vsub.f32 %v9664_v42, %v2563_v29 }
 0x690   : > { %v2587_v47 = vmul.f32 1.442695, %v2573_v45 }
 0x692   : > { %7602 = vpow2.f32 %v2587_v47 }
 0x698   : > { %v9744_v56 = vpop.eup %7602 }
 0x699   : > { %v2609_v25 = vsel %vm590_vm0, %v9744_v56, 0.0 }
 0x69a   : > { %2610 = vadd.xlane.f32.xlu0 %v2609_v25 }
 0x6a9   : > { %v2783_v43 = vpop.xlane.xlu1 %2782 }
 0x6aa   : > { %v2805_v15 = vsub.f32 %v9675_v20, %v2783_v43 }
 0x6ac   : > { %v2813_v41 = vmul.f32 1.442695, %v2805_v15 }
 0x6ae   : > { %7604 = vpow2.f32 %v2813_v41 }
 0x6b1   : > { %v2786_v49 = vpop.xlane.xlu0 %2785  ;;  %v2596_v42 = vpop.xlane.xlu2 %2595 }
 0x6b2   : > { %v2806_v3 = vsub.f32 %v9680_v6, %v2786_v49 }
 0x6b4   : > { %v9750_v0 = vpop.eup %7604  ;;  %v2815_v10 = vmul.f32 1.442695, %v2806_v3 }
 0x6b5   : > { %v2829_v29 = vsel %vm590_vm0, %v9750_v0, 0.0 }
 0x6b6   : > { %7606 = vpow2.f32 %v2815_v10  ;;  %2830 = vadd.xlane.f32.xlu1 %v2829_v29 }
 0x6b7   : > { %7608 = vrcp.f32 %v2596_v42 }
 0x6b9   : > { %v2593_v45 = vpop.xlane.xlu0 %2592 }
 0x6ba   : > { %7610 = vrcp.f32 %v2593_v45 }
 0x6bc   : > { %v9754_v47 = vpop.eup %7606 }
 0x6bd   : > { %v2832_v15 = vsel %vm590_vm0, %v9754_v47, 0.0  ;;  %v7609_v20 = vpop.eup %7608 }
 0x6be   : > { %2833 = vadd.xlane.f32.xlu0 %v2832_v15  ;;  %v2624_v25 = vmul.f32 %v7609_v20, %v9682_v57 }
 0x6c0   : > { %v7611_v6 = vpop.eup %7610 }
 0x6c1   : > { %v2623_v43 = vmul.f32 %v7611_v6, %v9688_v12  ;;  %v2789_v41 = vpop.xlane.xlu0 %2788  ;;  %v2602_v29 = vpop.xlane.xlu1 %2601 }
 0x6c2   : > { %v2792_v49 = vpop.xlane.xlu2 %2791  ;;  %v2807_v10 = vsub.f32 %v9694_v30, %v2789_v41 }
 0x6c3   : > { %v2631_v3 = vpack.c.bf16 %v2624_v25, %v2623_v43 }
 0x6c4   : > { %v2817_v42 = vmul.f32 1.442695, %v2807_v10 }
 0x6c5   : > { %7000 = vmatmul.msk.bf16.vlgmr.msra.gmra.mxu3 %vm590_vm0, %v2631_v3 }
 0x6c6   : > { %7612 = vpow2.f32 %v2817_v42 }
 0x6c7   : > { %7614 = vrcp.f32 %v2602_v29 }
 0x6ca   : > { %v2599_v45 = vpop.xlane.xlu2 %2598 }
 0x6cb   : > { %7616 = vrcp.f32 %v2599_v45 }
 0x6cc   : > { %v9762_v17 = vpop.eup %7612 }
 0x6cd   : > { %v2835_v57 = vsel %vm590_vm0, %v9762_v17, 0.0  ;;  %v7615_v12 = vpop.eup %7614 }
 0x6ce   : > { %2836 = vadd.xlane.f32.xlu2 %v2835_v57  ;;  %v2626_v20 = vmul.f32 %v7615_v12, %v9698_v13 }
 0x6cf   : > { %2877 = vrot.lane.b32.xlu1 %v9645_v62, %s8077_s2 }
 0x6d1   : > { %v7617_v30 = vpop.eup %7616  ;;  %v2798_v15 = vpop.xlane.xlu1 %2797 }
 0x6d2   : > { %v2625_v6 = vmul.f32 %v7617_v30, %v9707_v21  ;;  %v2810_v25 = vsub.f32 %v9714_v11, %v2798_v15  ;;  %2875 = vrot.lane.b32.xlu0 %v9650_v4, %s8077_s2  ;;  %v2608_v10 = vpop.xlane.xlu0 %2607  ;;  %v2795_v12 = vpop.xlane.xlu2 %2794  ;;  %v2808_v15 = vsub.f32 %v9696_v40, %v2792_v49 }
 0x6d3   : > { %v2809_v30 = vsub.f32 %v9712_v8, %v2795_v12 }
 0x6d4   : > { %v2823_v43 = vmul.f32 1.442695, %v2810_v25  ;;  %v2632_v41 = vpack.c.bf16 %v2626_v20, %v2625_v6  ;;  %v2819_v25 = vmul.f32 1.442695, %v2808_v15 }
 0x6d5   : > { %v2821_v20 = vmul.f32 1.442695, %v2809_v30 }
 0x6d6   : > { %7618 = vpow2.f32 %v2823_v43  ;;  %7001 = vmatmul.msk.bf16.gmra.mxu3 %vm590_vm0, %v2632_v41 }
 0x6d7   : > { %7620 = vrcp.f32 %v2608_v10 }
 0x6d9   : > { %v2605_v3 = vpop.xlane.xlu1 %2604 }
 0x6da   : > { %7622 = vrcp.f32 %v2605_v3 }
 0x6db   : > { %7624 = vpow2.f32 %v2821_v20  ;;  %v7421_v20 = vld [vmem:[%s12075_s7 + $0x10] sm:$0xff] }
 0x6dc   : > { %v9774_v42 = vpop.eup %7618  ;;  %7626 = vpow2.f32 %v2819_v25 }
 0x6dd   : > { %v2844_v13 = vsel %vm590_vm0, %v9774_v42, 0.0  ;;  %v7621_v21 = vpop.eup %7620 }
 0x6de   : > { %2845 = vadd.xlane.f32.xlu2 %v2844_v13  ;;  %v2628_v29 = vmul.f32 %v7621_v21, %v9716_v63 }
 0x6e0   : > { %v7623_v11 = vpop.eup %7622 }
 0x6e1   : > { %v2627_v45 = vmul.f32 %v7623_v11, %v9724_v35  ;;  %v2801_v43 = vpop.xlane.xlu1 %2800  ;;  %v9785_v35 = vpop.eup %7624 }
 0x6e2   : > { %v2804_v6 = vpop.xlane.xlu0 %2803  ;;  %v2811_v63 = vsub.f32 %v9729_v46, %v2801_v43  ;;  %v9789_v8 = vpop.eup %7626  ;;  %v2841_v40 = vsel %vm590_vm0, %v9785_v35, 0.0 }
 0x6e3   : > { %v2633_v57 = vpack.c.bf16 %v2628_v29, %v2627_v45  ;;  %v2812_v41 = vsub.f32 %v9731_v22, %v2804_v6  ;;  %v2838_v22 = vsel %vm590_vm0, %v9789_v8, 0.0  ;;  %v2614_v11 = vpop.xlane.xlu2 %2613 }
 0x6e4   : > { %v2825_v3 = vmul.f32 1.442695, %v2811_v63 }
 0x6e5   : > { %v2827_v10 = vmul.f32 1.442695, %v2812_v41 }
 0x6e6   : > { %7002 = vmatmul.msk.bf16.gmra.mxu3 %vm590_vm0, %v2633_v57 }
 0x6e7   : > { %7628 = vpow2.f32 %v2827_v10 }
 0x6e8   : > { %7630 = vpow2.f32 %v2825_v3 }
 0x6e9   : > { %7632 = vrcp.f32 %v2614_v11 }
 0x6eb   : > { %v2874_v25 = vpop.permute.xlu2 %2873 }
 0x6ed   : > { %v9795_v46 = vpop.eup %7628 }
 0x6ee   : > { %v9799_v49 = vpop.eup %7630  ;;  %v2850_v13 = vsel %vm590_vm0, %v9795_v46, 0.0 }
 0x6ef   : > { %v2847_v21 = vsel %vm590_vm0, %v9799_v49, 0.0  ;;  %v7633_v45 = vpop.eup %7632 }
 0x6f0   : > { %v2630_v12 = vmul.f32 %v7633_v45, %v9733_v38  ;;  %v7422_v38 = vld [vmem:[%s12075_s7 + $0x18] sm:$0xff] }
 0x6f1   : > { %2960 = vmatpush.bf16.msrb.mxu2 %v7422_v38 }
 0x6f5   : > { %2961 = vmatpush.bf16.msrb.mxu2 %v7421_v20 }
 0x6f6   : > { %3050 = vrot.lane.b32.xlu2 %v9521_v14, %s8078_s23 }
 0x6f9   : > { %2842 = vadd.xlane.f32.xlu1 %v2841_v40 }
 0x6fc   : > { %2839 = vadd.xlane.f32.xlu0 %v2838_v22 }
 0x6fe   : > { %3036 = vrot.lane.b32.xlu2 %v9431_v55, %s8078_s23 }
 0x701   : > { %2851 = vadd.xlane.f32.xlu1 %v2850_v13 }
 0x704   : > { %2848 = vadd.xlane.f32.xlu0 %v2847_v21  ;;  %v7420_v21 = vld [vmem:[%s12075_s7 + $0x8] sm:$0xff] }
 0x706   : > { %3042 = vrot.lane.b32.xlu2 %v9519_v19, %s8078_s23 }
 0x70d   : > { %v2611_v29 = vpop.xlane.xlu0 %2610 }
 0x70e   : > { %7634 = vrcp.f32 %v2611_v29  ;;  %3211 = vrot.lane.b32.xlu2 %v9638_v51, %s8078_s23  ;;  %v7419_v29 = vld [vmem:[%s12075_s7] sm:$0xff] }
 0x714   : > { %v7635_v57 = vpop.eup %7634 }
 0x715   : > { %v2629_v30 = vmul.f32 %v7635_v57, %v9744_v56 }
 0x717   : > { %v2634_v15 = vpack.c.bf16 %v2630_v12, %v2629_v30 }
 0x718   : > { %3048 = vrot.lane.b32.xlu0 %v9423_v28, %s8078_s23 }
 0x719   : > { %7003 = vmatmul.msk.bf16.gmra.mxu3 %vm590_vm0, %v2634_v15 }
 0x71a   : > { %3046 = vrot.lane.b32.xlu1 %v9415_v50, %s8078_s23 }
 0x720   : > { %3044 = vrot.lane.b32.xlu0 %v9401_v59, %s8078_s23 }
 0x722   : > { %3038 = vrot.lane.b32.xlu1 %v9406_v7, %s8078_s23 }
 0x728   : > { %3040 = vrot.lane.b32.xlu0 %v9421_v31, %s8078_s23 }
 0x729   : > { %v2831_v56 = vpop.xlane.xlu1 %2830 }
 0x731   : > { %v2834_v6 = vpop.xlane.xlu0 %2833 }
 0x732   : > { %7636 = vrcp.f32 %v2834_v6 }
 0x733   : > { %7638 = vrcp.f32 %v2831_v56 }
 0x738   : > { %v7637_v41 = vpop.eup %7636 }
 0x739   : > { %v7639_v10 = vpop.eup %7638  ;;  %v2862_v3 = vmul.f32 %v7637_v41, %v9754_v47 }
 0x73a   : > { %v2861_v40 = vmul.f32 %v7639_v10, %v9750_v0 }
 0x73c   : > { %v2869_v13 = vpack.c.bf16 %v2862_v3, %v2861_v40 }
 0x741   : > { %v2878_v43 = vpop.permute.xlu1 %2877  ;;  %v2837_v22 = vpop.xlane.xlu2 %2836 }
 0x742   : > { %2902 = vmatpush.bf16.msrb.mxu3 %v2878_v43  ;;  %7640 = vrcp.f32 %v2837_v22 }
 0x744   : > { %v2876_v63 = vpop.permute.xlu0 %2875 }
 0x746   : > { %2903 = vmatpush.bf16.msrb.mxu3 %v2876_v63 }
 0x748   : > { %v7641_v15 = vpop.eup %7640  ;;  %v2680_v10 = vpop.f32.mrf.mxu3 }
 0x749   : > { %v2863_v56 = vmul.f32 %v7641_v15, %v9762_v17 }
 0x74a   : > { %2904 = vmatpush.bf16.msrb.mxu3 %v2874_v25 }
 0x74d   : > { %7008 = vmatmul.msk.bf16.vlgmr.msrb.gmra.mxu3 %vm590_vm0, %v2869_v13 }
 0x74e   : > { %3013 = vmatpush.bf16.msra.mxu3 %v7420_v21 }
 0x751   : > { %v2846_v11 = vpop.xlane.xlu2 %2845 }
 0x752   : > { %3014 = vmatpush.bf16.msra.mxu3 %v7419_v29 }
 0x759   : > { %v3051_v45 = vpop.permute.xlu2 %3050 }
 0x75a   : > { %v3074_v47 = vsel %vm2481_vm14, %v3051_v45, 0 }
 0x75b   : > { %3080 = vmatpush.bf16.xpose.msra.mxu2 %v3074_v47 }
 0x761   : > { %v9838_v0 = vpop.permute.xlu2 %3036 }
 0x769   : > { %v9840_v57 = vpop.permute.xlu2 %3042 }
 0x76c   : > { %v2843_v6 = vpop.xlane.xlu1 %2842 }
 0x76f   : > { %v2840_v12 = vpop.xlane.xlu0 %2839 }
 0x770   : > { %7642 = vrcp.f32 %v2840_v12 }
 0x771   : > { %v3212_v30 = vpop.permute.xlu2 %3211  ;;  %7644 = vrcp.f32 %v2843_v6 }
 0x772   : > { %3233 = vmatpush.bf16.msrb.mxu3 %v3212_v30  ;;  %7646 = vrcp.f32 %v2846_v11 }
 0x774   : > { %v2852_v22 = vpop.xlane.xlu1 %2851 }
 0x776   : > { %v7643_v38 = vpop.eup %7642 }
 0x777   : > { %v2864_v20 = vmul.f32 %v7643_v38, %v9789_v8  ;;  %v7645_v43 = vpop.eup %7644  ;;  %v2849_v41 = vpop.xlane.xlu0 %2848 }
 0x778   : > { %v7647_v63 = vpop.eup %7646  ;;  %v2865_v3 = vmul.f32 %v7645_v43, %v9785_v35  ;;  %7648 = vrcp.f32 %v2849_v41  ;;  %v2682_v8 = vpop.f32.mrf.mxu3 }
 0x779   : > { %v2870_v25 = vpack.c.bf16 %v2864_v20, %v2863_v56  ;;  %v2866_v40 = vmul.f32 %v7647_v63, %v9774_v42  ;;  %7650 = vrcp.f32 %v2852_v22  ;;  %v2700_v20 = vpack.c.bf16 %v2682_v8, %v2680_v10 }
 0x77b   : > { %7009 = vmatmul.msk.bf16.gmra.mxu3 %vm590_vm0, %v2870_v25  ;;  %v2871_v13 = vpack.c.bf16 %v2866_v40, %v2865_v3 }
 0x77e   : > { %v7649_v29 = vpop.eup %7648 }
 0x77f   : > { %v7651_v47 = vpop.eup %7650  ;;  %v2867_v35 = vmul.f32 %v7649_v29, %v9799_v49 }
 0x780   : > { %v2868_v42 = vmul.f32 %v7651_v47, %v9795_v46  ;;  %v2685_v12 = vpop.f32.mrf.mxu3 }
 0x782   : > { %v2872_v15 = vpack.c.bf16 %v2868_v42, %v2867_v35 }
 0x788   : > { %v2687_v56 = vpop.f32.mrf.mxu3 }
 0x789   : > { %v2701_v43 = vpack.c.bf16 %v2687_v56, %v2685_v12 }
 0x78a   : > { %v3049_v21 = vpop.permute.xlu0 %3048 }
 0x78b   : > { %7010 = vmatmul.msk.bf16.gmra.mxu3 %vm590_vm0, %v2871_v13  ;;  %v3071_v17 = vsel %vm2481_vm14, %v3049_v21, 0 }
 0x78c   : > { %3081 = vmatpush.bf16.xpose.msra.mxu2 %v3071_v17  ;;  %v3047_v11 = vpop.permute.xlu1 %3046 }
 0x78d   : > { %v3068_v45 = vsel %vm2481_vm14, %v3047_v11, 0 }
 0x790   : > { %v2690_v6 = vpop.f32.mrf.mxu3 }
 0x792   : > { %v3045_v30 = vpop.permute.xlu0 %3044 }
 0x793   : > { %v3065_v38 = vsel %vm2481_vm14, %v3045_v30, 0 }
 0x794   : > { %3082 = vmatpush.bf16.xpose.msra.mxu2 %v3068_v45  ;;  %v3039_v35 = vpop.permute.xlu1 %3038 }
 0x798   : > { %v2692_v25 = vpop.f32.mrf.mxu3 }
 0x799   : > { %v2702_v46 = vpack.c.bf16 %v2692_v25, %v2690_v6 }
 0x79a   : > { %v3041_v42 = vpop.permute.xlu0 %3040 }
 0x79b   : > { %7011 = vmatmul.msk.bf16.gmra.mxu3 %vm590_vm0, %v2872_v15 }
 0x79c   : > { %3083 = vmatpush.bf16.xpose.msra.mxu2 %v3065_v38 }
 0x7a0   : > { %v2695_v49 = vpop.f32.mrf.mxu3 }
 0x7a8   : > { %v2697_v41 = vpop.f32.mrf.mxu3 }
 0x7a9   : > { %v2703_v40 = vpack.c.bf16 %v2697_v41, %v2695_v49 }
 0x7ab   : > { %7032 = vmatmul.msk.bf16.vlgmr.msra.gmra.mxu3 %vm2481_vm14, %v2700_v20 }
 0x7bb   : > { %7033 = vmatmul.msk.bf16.gmra.mxu3 %vm2481_vm14, %v2701_v43 }
 0x7cb   : > { %7034 = vmatmul.msk.bf16.gmra.mxu3 %vm2481_vm14, %v2702_v46 }
 0x7d0   : > { %v2906_v63 = vpop.f32.mrf.mxu3 }
 0x7d8   : > { %v2908_v3 = vpop.f32.mrf.mxu3 }
 0x7d9   : > { %v2926_v22 = vpack.c.bf16 %v2908_v3, %v2906_v63 }
 0x7db   : > { %7020 = vmatmul.msk.bf16.vlgmr.msrb.gmra.mxu2 %vm2481_vm14, %v2926_v22  ;;  %7035 = vmatmul.msk.bf16.gmra.mxu3 %vm2481_vm14, %v2703_v40 }
 0x7fe   : > { %v2911_v10 = vpop.f32.mrf.mxu3 }
 0x806   : > { %v2913_v13 = vpop.f32.mrf.mxu3 }
 0x807   : > { %v2927_v21 = vpack.c.bf16 %v2913_v13, %v2911_v10 }
 0x809   : > { %7021 = vmatmul.msk.bf16.gmra.mxu2 %vm2481_vm14, %v2927_v21 }
 0x80e   : > { %v2916_v17 = vpop.f32.mrf.mxu3 }
 0x816   : > { %v2918_v8 = vpop.f32.mrf.mxu3 }
 0x817   : > { %v2928_v11 = vpack.c.bf16 %v2918_v8, %v2916_v17 }
 0x819   : > { %7022 = vmatmul.msk.bf16.gmra.mxu2 %vm2481_vm14, %v2928_v11 }
 0x81e   : > { %v2921_v29 = vpop.f32.mrf.mxu3 }
 0x826   : > { %v2923_v45 = vpop.f32.mrf.mxu3 }
 0x827   : > { %v2929_v47 = vpack.c.bf16 %v2923_v45, %v2921_v29 }
 0x829   : > { %7023 = vmatmul.msk.bf16.gmra.mxu2 %vm2481_vm14, %v2929_v47 }
 0x82e   : > { %v3016_v12 = vpop.f32.mrf.mxu3 }
 0x839   : > { %7036 = vmatmul.msk.bf16.vlgmr.msra.gmra.mxu2 %vm2481_vm14, %v9838_v0 }
 0x849   : > { %7037 = vmatmul.msk.bf16.gmra.mxu2 %vm2481_vm14, %v3039_v35 }
 0x859   : > { %7038 = vmatmul.msk.bf16.gmra.mxu2 %vm2481_vm14, %v3041_v42 }
 0x85e   : > { %v2963_v30 = vpop.f32.mrf.mxu2 }
 0x85f   : > { %v9866_v15 = vadd.f32 %v3016_v12, %v2963_v30 }
 0x866   : > { %v9870_v38 = vpop.f32.mrf.mxu2 }
 0x869   : > { %7039 = vmatmul.msk.bf16.gmra.mxu2 %vm2481_vm14, %v9840_v57 }
 0x88c   : > { %v9872_v56 = vpop.f32.mrf.mxu2 }
 0x894   : > { %v9874_v20 = vpop.f32.mrf.mxu2 }
 0x89c   : > { %v9876_v0 = vpop.f32.mrf.mxu2 }
 0x8a4   : > { %v9878_v6 = vpop.f32.mrf.mxu2 }
 0x8ac   : > { %v9880_v25 = vpop.f32.mrf.mxu2 }
 0x8b4   : > { %v9882_v43 = vpop.f32.mrf.mxu2 }
 0x8bc   : > { %v3085_v49 = vpop.f32.mrf.mxu2 }
 0x8bd   : > { %v3105_v41 = vmul.f32 0.17677669, %v3085_v49 }
 0x8bf   : > { %v3113_v46 = vsel %vm590_vm0, %v3105_v41, -inf }
 0x8c0   : > { %3114 = vmax.xlane.f32.xlu1 %v3113_v46 }
 0x8c4   : > { %v3087_v57 = vpop.f32.mrf.mxu2 }
 0x8c5   : > { %v3106_v63 = vmul.f32 0.17677669, %v3087_v57 }
 0x8c7   : > { %v3116_v3 = vsel %vm590_vm0, %v3106_v63, -inf }
 0x8c8   : > { %3117 = vmax.xlane.f32.xlu0 %v3116_v3 }
 0x8cc   : > { %v3090_v40 = vpop.f32.mrf.mxu2 }
 0x8cd   : > { %v3107_v22 = vmul.f32 0.17677669, %v3090_v40 }
 0x8cf   : > { %v3119_v10 = vsel %vm590_vm0, %v3107_v22, -inf }
 0x8d0   : > { %3120 = vmax.xlane.f32.xlu2 %v3119_v10 }
 0x8d4   : > { %v3092_v13 = vpop.f32.mrf.mxu2 }
 0x8d5   : > { %v3108_v21 = vmul.f32 0.17677669, %v3092_v13 }
 0x8d7   : > { %v3122_v17 = vsel %vm590_vm0, %v3108_v21, -inf }
 0x8d8   : > { %3123 = vmax.xlane.f32.xlu1 %v3122_v17 }
 0x8dc   : > { %3207 = vrot.lane.b32.xlu0 %v9650_v4, %s8078_s23  ;;  %v3095_v8 = vpop.f32.mrf.mxu2 }
 0x8dd   : > { %v3109_v35 = vmul.f32 0.17677669, %v3095_v8 }
 0x8df   : > { %v3125_v42 = vsel %vm590_vm0, %v3109_v35, -inf }
 0x8e4   : > { %v3097_v11 = vpop.f32.mrf.mxu2 }
 0x8e5   : > { %v3110_v29 = vmul.f32 0.17677669, %v3097_v11 }
 0x8e7   : > { %v3128_v45 = vsel %vm590_vm0, %v3110_v29, -inf }
 0x8e8   : > { %3129 = vmax.xlane.f32.xlu2 %v3128_v45 }
 0x8ec   : > { %v3100_v47 = vpop.f32.mrf.mxu2 }
 0x8ed   : > { %v9897_v46 = vmul.f32 0.17677669, %v3100_v47 }
 0x8ef   : > { %v3131_v57 = vsel %vm590_vm0, %v9897_v46, -inf }
 0x8f1   : > { %3209 = vrot.lane.b32.xlu1 %v9645_v62, %s8078_s23 }
 0x8f4   : > { %v3102_v12 = vpop.f32.mrf.mxu2 }
 0x8f5   : > { %v3112_v30 = vmul.f32 0.17677669, %v3102_v12 }
 0x8f7   : > { %v3134_v49 = vsel %vm590_vm0, %v3112_v30, -inf }
 0x900   : > { %3205 = vrot.lane.b32.xlu2 %v9655_v44, %s8078_s23 }
 0x906   : > { %3126 = vmax.xlane.f32.xlu0 %v3125_v42 }
 0x90e   : > { %3135 = vmax.xlane.f32.xlu0 %v3134_v49 }
 0x91b   : > { %3132 = vmax.xlane.f32.xlu1 %v3131_v57 }
 0x933   : > { %v3115_v3 = vpop.xlane.xlu1 %3114 }
 0x934   : > { %v3137_v40 = vsub.f32 %v3105_v41, %v3115_v3 }
 0x936   : > { %v3145_v10 = vmul.f32 1.442695, %v3137_v40 }
 0x938   : > { %7652 = vpow2.f32 %v3145_v10 }
 0x93b   : > { %v3118_v13 = vpop.xlane.xlu0 %3117 }
 0x93c   : > { %v3138_v17 = vsub.f32 %v3106_v63, %v3118_v13 }
 0x93e   : > { %v9901_v8 = vpop.eup %7652  ;;  %v3147_v11 = vmul.f32 1.442695, %v3138_v17 }
 0x93f   : > { %v3161_v45 = vsel %vm590_vm0, %v9901_v8, 0.0 }
 0x940   : > { %7654 = vpow2.f32 %v3147_v11  ;;  %3162 = vadd.xlane.f32.xlu1 %v3161_v45 }
 0x943   : > { %v3121_v47 = vpop.xlane.xlu2 %3120 }
 0x944   : > { %v3139_v42 = vsub.f32 %v3107_v22, %v3121_v47 }
 0x946   : > { %v9905_v12 = vpop.eup %7654  ;;  %v3149_v49 = vmul.f32 1.442695, %v3139_v42 }
 0x947   : > { %v3164_v41 = vsel %vm590_vm0, %v9905_v12, 0.0 }
 0x948   : > { %7656 = vpow2.f32 %v3149_v49  ;;  %3165 = vadd.xlane.f32.xlu0 %v3164_v41 }
 0x94b   : > { %v3124_v57 = vpop.xlane.xlu1 %3123 }
 0x94c   : > { %v3140_v63 = vsub.f32 %v3108_v21, %v3124_v57 }
 0x94e   : > { %v9909_v3 = vpop.eup %7656  ;;  %v3151_v40 = vmul.f32 1.442695, %v3140_v63  ;;  %v3208_v42 = vpop.permute.xlu0 %3207 }
 0x94f   : > { %v3167_v10 = vsel %vm590_vm0, %v9909_v3, 0.0 }
 0x950   : > { %7658 = vpow2.f32 %v3151_v40  ;;  %3168 = vadd.xlane.f32.xlu2 %v3167_v10 }
 0x956   : > { %v9913_v13 = vpop.eup %7658 }
 0x957   : > { %v3170_v22 = vsel %vm590_vm0, %v9913_v13, 0.0 }
 0x958   : > { %3171 = vadd.xlane.f32.xlu0 %v3170_v22 }
 0x95b   : > { %v3130_v17 = vpop.xlane.xlu2 %3129 }
 0x95c   : > { %v3142_v11 = vsub.f32 %v3110_v29, %v3130_v17 }
 0x95e   : > { %v3155_v45 = vmul.f32 1.442695, %v3142_v11 }
 0x960   : > { %7660 = vpow2.f32 %v3155_v45 }
 0x963   : > { %v3210_v47 = vpop.permute.xlu1 %3209  ;;  %v3206_v41 = vpop.permute.xlu2 %3205 }
 0x964   : > { %3234 = vmatpush.bf16.msrb.mxu3 %v3210_v47 }
 0x966   : > { %v9917_v21 = vpop.eup %7660 }
 0x967   : > { %v3176_v49 = vsel %vm590_vm0, %v9917_v21, 0.0 }
 0x968   : > { %3177 = vadd.xlane.f32.xlu2 %v3176_v49  ;;  %3235 = vmatpush.bf16.msrb.mxu3 %v3208_v42 }
 0x96c   : > { %3337 = vrot.lane.b32.xlu0 %v9521_v14, %s8079_s25  ;;  %3236 = vmatpush.bf16.msrb.mxu3 %v3206_v41 }
 0x974   : > { %3331 = vrot.lane.b32.xlu0 %v9401_v59, %s8079_s25 }
 0x979   : > { %v3127_v29 = vpop.xlane.xlu0 %3126 }
 0x97a   : > { %v3141_v57 = vsub.f32 %v3109_v35, %v3127_v29 }
 0x97c   : > { %v3153_v63 = vmul.f32 1.442695, %v3141_v57  ;;  %3323 = vrot.lane.b32.xlu0 %v9431_v55, %s8079_s25 }
 0x97e   : > { %7662 = vpow2.f32 %v3153_v63 }
 0x981   : > { %v3136_v40 = vpop.xlane.xlu0 %3135 }
 0x982   : > { %v3144_v10 = vsub.f32 %v3112_v30, %v3136_v40 }
 0x984   : > { %v7663_v22 = vpop.eup %7662  ;;  %v3159_v17 = vmul.f32 1.442695, %v3144_v10  ;;  %3325 = vrot.lane.b32.xlu0 %v9406_v7, %s8079_s25 }
 0x985   : > { %v3173_v14 = vsel %vm590_vm0, %v7663_v22, 0.0 }
 0x986   : > { %7664 = vpow2.f32 %v3159_v17  ;;  %3174 = vadd.xlane.f32.xlu1 %v3173_v14 }
 0x98c   : > { %v7665_v11 = vpop.eup %7664 }
 0x98d   : > { %v3182_v59 = vsel %vm590_vm0, %v7665_v11, 0.0 }
 0x98e   : > { %v3133_v35 = vpop.xlane.xlu1 %3132  ;;  %3183 = vadd.xlane.f32.xlu2 %v3182_v59 }
 0x98f   : > { %v3143_v45 = vsub.f32 %v9897_v46, %v3133_v35 }
 0x991   : > { %v3157_v55 = vmul.f32 1.442695, %v3143_v45 }
 0x993   : > { %7666 = vpow2.f32 %v3157_v55 }
 0x999   : > { %v7667_v47 = vpop.eup %7666 }
 0x99a   : > { %v3179_v30 = vsel %vm590_vm0, %v7667_v47, 0.0 }
 0x99b   : > { %3180 = vadd.xlane.f32.xlu1 %v3179_v30 }
 0x9a6   : > { %3333 = vrot.lane.b32.xlu2 %v9415_v50, %s8079_s25 }
 0x9ae   : > { %3327 = vrot.lane.b32.xlu2 %v9421_v31, %s8079_s25 }
 0x9b3   : > { %v3163_v7 = vpop.xlane.xlu1 %3162 }
 0x9b4   : > { %3335 = vrot.lane.b32.xlu1 %v9423_v28, %s8079_s25  ;;  %7668 = vrcp.f32 %v3163_v7 }
 0x9ba   : > { %v7669_v46 = vpop.eup %7668 }
 0x9bb   : > { %v3166_v42 = vpop.xlane.xlu0 %3165  ;;  %v3193_v41 = vmul.f32 %v7669_v46, %v9901_v8 }
 0x9bc   : > { %7670 = vrcp.f32 %v3166_v42  ;;  %3329 = vrot.lane.b32.xlu1 %v9519_v19, %s8079_s25  ;;  %v9959_v42 = vld [vmem:[%s12075_s7 + $0x28] sm:$0xff] }
 0x9bd   : > { %3292 = vmatpush.bf16.msrb.mxu2 %v9959_v42 }
 0x9c2   : > { %v7671_v49 = vpop.eup %7670 }
 0x9c3   : > { %v3194_v29 = vmul.f32 %v7671_v49, %v9905_v12  ;;  %v3169_v31 = vpop.xlane.xlu2 %3168 }
 0x9c4   : > { %3498 = vrot.lane.b32.xlu1 %v9638_v51, %s8079_s25  ;;  %7672 = vrcp.f32 %v3169_v31 }
 0x9c5   : > { %v3201_v50 = vpack.c.bf16 %v3194_v29, %v3193_v41 }
 0x9c7   : > { %7040 = vmatmul.msk.bf16.vlgmr.msrb.gmra.mxu3 %vm590_vm0, %v3201_v50 }
 0x9ca   : > { %v7673_v57 = vpop.eup %7672 }
 0x9cb   : > { %v3172_v28 = vpop.xlane.xlu0 %3171  ;;  %v3195_v19 = vmul.f32 %v7673_v57, %v9909_v3  ;;  %v9952_v3 = vpop.f32.mrf.mxu3 }
 0x9cc   : > { %7674 = vrcp.f32 %v3172_v28 }
 0x9d2   : > { %v7675_v63 = vpop.eup %7674 }
 0x9d3   : > { %v3196_v40 = vmul.f32 %v7675_v63, %v9913_v13  ;;  %v9954_v7 = vpop.f32.mrf.mxu3 }
 0x9d5   : > { %v3202_v10 = vpack.c.bf16 %v3196_v40, %v3195_v19 }
 0x9d7   : > { %7041 = vmatmul.msk.bf16.gmra.mxu3 %vm590_vm0, %v3202_v10  ;;  %v7426_v10 = vld [vmem:[%s12075_s7 + $0x38] sm:$0xff] }
 0x9db   : > { %v3178_v51 = vpop.xlane.xlu2 %3177  ;;  %v9968_v50 = vpop.f32.mrf.mxu3 }
 0x9dc   : > { %7676 = vrcp.f32 %v3178_v51 }
 0x9de   : > { %v3338_v8 = vpop.permute.xlu0 %3337 }
 0x9df   : > { %v3361_v12 = vsel %vm2481_vm14, %v3338_v8, 0  ;;  %v2432_v8 = vpack.c.bf16 %v9672_v36, %v9672_v36  ;;  %v2426_v36 = vpack.c.bf16 %v9662_v53, %v9662_v53  ;;  %v2420_v53 = vpack.c.bf16 %v9653_v34, %v9653_v34 }
 0x9e0   : > { %3367 = vmatpush.bf16.xpose.msra.mxu3 %v3361_v12 }
 0x9e2   : > { %v7677_v14 = vpop.eup %7676 }
 0x9e3   : > { %v3198_v35 = vmul.f32 %v7677_v14, %v9917_v21  ;;  %v9965_v21 = vld [vmem:[%s12075_s7 + $0x20] sm:$0xff]  ;;  %v9971_v31 = vpop.f32.mrf.mxu3 }
 0x9e4   : > { %3293 = vmatpush.bf16.msrb.mxu2 %v9965_v21 }
 0x9eb   : > { %v9974_v19 = vpop.f32.mrf.mxu3 }
 0x9f3   : > { %v9985_v14 = vpop.f32.mrf.mxu3 }
 0x9f9   : > { %v3175_v17 = vpop.xlane.xlu1 %3174 }
 0x9fa   : > { %7678 = vrcp.f32 %v3175_v17  ;;  %v2430_v17 = vpack.c.bf16 %v9670_v48, %v9670_v48  ;;  %v2424_v48 = vpack.c.bf16 %v9660_v60, %v9660_v60  ;;  %v2418_v60 = vpack.c.bf16 %v9643_v5, %v9643_v5 }
 0xa00   : > { %v7679_v59 = vpop.eup %7678 }
 0xa01   : > { %v3197_v45 = vmul.f32 %v7679_v59, %v7663_v22  ;;  %v3184_v13 = vpop.xlane.xlu2 %3183  ;;  %v7425_v59 = vld [vmem:[%s12075_s7 + $0x30] sm:$0xff] }
 0xa02   : > { %7680 = vrcp.f32 %v3184_v13 }
 0xa03   : > { %v3203_v55 = vpack.c.bf16 %v3198_v35, %v3197_v45  ;;  %v2428_v35 = vpack.c.bf16 %v9668_v23, %v9668_v23  ;;  %v3810_v45 = vunpack.c.l.b16 %v2432_v8  ;;  %v3806_v23 = vunpack.c.l.b16 %v2424_v48 }
 0xa05   : > { %7042 = vmatmul.msk.bf16.gmra.mxu3 %vm590_vm0, %v3203_v55  ;;  %v3809_v55 = vunpack.c.l.b16 %v2430_v17  ;;  %v3808_v13 = vunpack.c.l.b16 %v2428_v35 }
 0xa08   : > { %v7681_v22 = vpop.eup %7680 }
 0xa09   : > { %v3200_v49 = vmul.f32 %v7681_v22, %v7665_v11  ;;  %v3334_v63 = vpop.permute.xlu2 %3333 }
 0xa0a   : > { %v3355_v11 = vsel %vm2481_vm14, %v3334_v63, 0 }
 0xa0e   : > { %v3181_v30 = vpop.xlane.xlu1 %3180 }
 0xa0f   : > { %7682 = vrcp.f32 %v3181_v30  ;;  %v9996_v30 = vpack.c.b16 %v3810_v45, %v3809_v55 }
 0xa15   : > { %v7683_v46 = vpop.eup %7682 }
 0xa16   : > { %v3199_v41 = vmul.f32 %v7683_v46, %v7667_v47  ;;  %v3332_v47 = vpop.permute.xlu0 %3331  ;;  %v2422_v46 = vpack.c.bf16 %v9658_v9, %v9658_v9  ;;  %v3803_v9 = vunpack.c.l.b16 %v2418_v60 }
 0xa17   : > { %v3352_v51 = vsel %vm2481_vm14, %v3332_v47, 0 }
 0xa18   : > { %v3204_v29 = vpack.c.bf16 %v3200_v49, %v3199_v41  ;;  %v3807_v49 = vunpack.c.l.b16 %v2426_v36 }
 0xa1a   : > { %7043 = vmatmul.msk.bf16.gmra.mxu3 %vm590_vm0, %v3204_v29  ;;  %v10004_v41 = vpack.c.b16 %v3808_v13, %v3807_v49  ;;  %v10006_v29 = vpop.f32.mrf.mxu3 }
 0xa1e   : > { %v3324_v22 = vpop.permute.xlu0 %3323 }
 0xa26   : > { %v3336_v28 = vpop.permute.xlu1 %3335  ;;  %v3326_v47 = vpop.permute.xlu0 %3325 }
 0xa27   : > { %v3358_v57 = vsel %vm2481_vm14, %v3336_v28, 0  ;;  %v3805_v28 = vunpack.c.l.b16 %v2422_v46 }
 0xa28   : > { %3368 = vmatpush.bf16.xpose.msra.mxu3 %v3358_v57  ;;  %v3804_v57 = vunpack.c.l.b16 %v2420_v53 }
 0xa29   : > { %v10011_v63 = vpack.c.b16 %v3806_v23, %v3805_v28 }
 0xa2e   : > { %v3330_v40 = vpop.permute.xlu1 %3329 }
 0xa30   : > { %3369 = vmatpush.bf16.xpose.msra.mxu3 %v3355_v11  ;;  %v10014_v11 = vpack.c.b16 %v3804_v57, %v3803_v9 }
 0xa36   : > { %v3499_v12 = vpop.permute.xlu1 %3498 }
 0xa37   : > { %3520 = vmatpush.bf16.msra.mxu2 %v3499_v12  ;;  %v3328_v12 = vpop.permute.xlu2 %3327 }
 0xa38   : > { %3370 = vmatpush.bf16.xpose.msra.mxu3 %v3352_v51 }
 0xa3f   : > { %7056 = vmatmul.msk.bf16.vlgmr.msra.gmra.mxu3 %vm2481_vm14, %v3324_v22 }
 0xa40   : > { %3579 = vmatpush.bf16.msrb.mxu3 %v7426_v10 }
 0xa44   : > { %3580 = vmatpush.bf16.msrb.mxu3 %v7425_v59 }
 0xa48   : > { %3835 = vmatpush.bf16.msra.mxu3 %v9996_v30 }
 0xa4a   : > { %v3238_v34 = vpop.f32.mrf.mxu3 }
 0xa4c   : > { %3836 = vmatpush.bf16.msra.mxu3 %v10004_v41 }
 0xa4f   : > { %7057 = vmatmul.msk.bf16.gmra.mxu3 %vm2481_vm14, %v3326_v47 }
 0xa50   : > { %3837 = vmatpush.bf16.msra.mxu3 %v10011_v63 }
 0xa52   : > { %v3240_v10 = vpop.f32.mrf.mxu3 }
 0xa53   : > { %v3258_v8 = vpack.c.bf16 %v3240_v10, %v3238_v34 }
 0xa54   : > { %3838 = vmatpush.bf16.msra.mxu3 %v10014_v11 }
 0xa55   : > { %7052 = vmatmul.msk.bf16.vlgmr.msrb.gmra.mxu2 %vm2481_vm14, %v3258_v8 }
 0xa5a   : > { %v3243_v5 = vpop.f32.mrf.mxu3 }
 0xa5f   : > { %7058 = vmatmul.msk.bf16.gmra.mxu3 %vm2481_vm14, %v3328_v12 }
 0xa62   : > { %v3245_v51 = vpop.f32.mrf.mxu3 }
 0xa63   : > { %v3259_v17 = vpack.c.bf16 %v3245_v51, %v3243_v5 }
 0xa65   : > { %7053 = vmatmul.msk.bf16.gmra.mxu2 %vm2481_vm14, %v3259_v17  ;;  %v3022_v17 = vadd.f32 %v9954_v7, %v9872_v56  ;;  %v3027_v7 = vadd.f32 %v9971_v31, %v9876_v0 }
 0xa6f   : > { %7059 = vmatmul.msk.bf16.gmra.mxu3 %vm2481_vm14, %v3330_v40 }
 0xa88   : > { %v3248_v59 = vpop.f32.mrf.mxu3 }
 0xa90   : > { %v3250_v35 = vpop.f32.mrf.mxu3 }
 0xa91   : > { %v3260_v45 = vpack.c.bf16 %v3250_v35, %v3248_v59 }
 0xa93   : > { %7054 = vmatmul.msk.bf16.gmra.mxu2 %vm2481_vm14, %v3260_v45 }
 0xa9d   : > { %v3253_v36 = vpop.f32.mrf.mxu3 }
 0xaa5   : > { %v3255_v55 = vpop.f32.mrf.mxu3 }
 0xaa6   : > { %v3261_v48 = vpack.c.bf16 %v3255_v55, %v3253_v36 }
 0xaa8   : > { %7055 = vmatmul.msk.bf16.gmra.mxu2 %vm2481_vm14, %v3261_v48 }
 0xac2   : > { %v3372_v13 = vpop.f32.mrf.mxu3 }
 0xac3   : > { %v3392_v22 = vmul.f32 0.17677669, %v3372_v13 }
 0xac5   : > { %v3400_v46 = vsel %vm590_vm0, %v3392_v22, -inf }
 0xac6   : > { %3401 = vmax.xlane.f32.xlu0 %v3400_v46 }
 0xaca   : > { %v3374_v49 = vpop.f32.mrf.mxu3 }
 0xacb   : > { %v3393_v53 = vmul.f32 0.17677669, %v3374_v49 }
 0xacd   : > { %v3403_v23 = vsel %vm590_vm0, %v3393_v53, -inf }
 0xace   : > { %3404 = vmax.xlane.f32.xlu2 %v3403_v23 }
 0xad2   : > { %v3377_v40 = vpop.f32.mrf.mxu3 }
 0xad3   : > { %v3394_v60 = vmul.f32 0.17677669, %v3377_v40 }
 0xad5   : > { %v3406_v28 = vsel %vm590_vm0, %v3394_v60, -inf }
 0xad6   : > { %3407 = vmax.xlane.f32.xlu1 %v3406_v28 }
 0xad8   : > { %v3295_v57 = vpop.f32.mrf.mxu2 }
 0xad9   : > { %v10028_v9 = vadd.f32 %v3295_v57, %v9866_v15 }
 0xada   : > { %v3379_v34 = vpop.f32.mrf.mxu3 }
 0xadb   : > { %v10030_v47 = vmul.f32 0.17677669, %v3379_v34  ;;  %v3032_v34 = vadd.f32 %v9985_v14, %v9880_v25 }
 0xadd   : > { %v3409_v10 = vsel %vm590_vm0, %v10030_v47, -inf }
 0xade   : > { %3410 = vmax.xlane.f32.xlu2 %v3409_v10 }
 0xae0   : > { %v10034_v8 = vpop.f32.mrf.mxu2 }
 0xae2   : > { %v3382_v5 = vpop.f32.mrf.mxu3 }
 0xae3   : > { %v3396_v12 = vmul.f32 0.17677669, %v3382_v5 }
 0xae5   : > { %v3412_v51 = vsel %vm590_vm0, %v3396_v12, -inf }
 0xae6   : > { %3413 = vmax.xlane.f32.xlu0 %v3412_v51 }
 0xae8   : > { %v3300_v59 = vpop.f32.mrf.mxu2 }
 0xae9   : > { %v10039_v15 = vadd.f32 %v3300_v59, %v3022_v17 }
 0xaea   : > { %v3384_v35 = vpop.f32.mrf.mxu3 }
 0xaeb   : > { %v3397_v45 = vmul.f32 0.17677669, %v3384_v35 }
 0xaed   : > { %v3415_v36 = vsel %vm590_vm0, %v3397_v45, -inf }
 0xaee   : > { %3416 = vmax.xlane.f32.xlu1 %v3415_v36 }
 0xaf0   : > { %v10046_v56 = vpop.f32.mrf.mxu2 }
 0xaf2   : > { %v3387_v55 = vpop.f32.mrf.mxu3 }
 0xaf3   : > { %v3398_v48 = vmul.f32 0.17677669, %v3387_v55 }
 0xaf5   : > { %v3418_v13 = vsel %vm590_vm0, %v3398_v48, -inf }
 0xaf6   : > { %3419 = vmax.xlane.f32.xlu2 %v3418_v13 }
 0xafa   : > { %v3389_v46 = vpop.f32.mrf.mxu3 }
 0xafb   : > { %v3399_v49 = vmul.f32 0.17677669, %v3389_v46 }
 0xafd   : > { %v3421_v23 = vsel %vm590_vm0, %v3399_v49, -inf }
 0xafe   : > { %3422 = vmax.xlane.f32.xlu0 %v3421_v23 }
 0xb07   : > { %3492 = vrot.lane.b32.xlu1 %v9655_v44, %s8079_s25 }
 0xb16   : > { %v3305_v40 = vpop.f32.mrf.mxu2 }
 0xb17   : > { %v10050_v28 = vadd.f32 %v3305_v40, %v3027_v7 }
 0xb1e   : > { %v10052_v57 = vpop.f32.mrf.mxu2 }
 0xb2b   : > { %v3310_v10 = vpop.f32.mrf.mxu2 }
 0xb2c   : > { %v10056_v5 = vadd.f32 %v3310_v10, %v3032_v34 }
 0xb39   : > { %v3402_v51 = vpop.xlane.xlu0 %3401 }
 0xb3a   : > { %v3424_v17 = vsub.f32 %v3392_v22, %v3402_v51 }
 0xb3c   : > { %v3432_v59 = vmul.f32 1.442695, %v3424_v17 }
 0xb3e   : > { %7684 = vpow2.f32 %v3432_v59 }
 0xb41   : > { %v3405_v44 = vpop.xlane.xlu2 %3404 }
 0xb42   : > { %v3425_v35 = vsub.f32 %v3393_v53, %v3405_v44 }
 0xb44   : > { %v10058_v36 = vpop.eup %7684  ;;  %v3434_v0 = vmul.f32 1.442695, %v3425_v35 }
 0xb45   : > { %v3448_v31 = vsel %vm590_vm0, %v10058_v36, 0.0 }
 0xb46   : > { %7686 = vpow2.f32 %v3434_v0  ;;  %3449 = vadd.xlane.f32.xlu2 %v3448_v31 }
 0xb49   : > { %v3408_v55 = vpop.xlane.xlu1 %3407 }
 0xb4a   : > { %v3426_v13 = vsub.f32 %v3394_v60, %v3408_v55 }
 0xb4c   : > { %v10062_v25 = vpop.eup %7686  ;;  %v3436_v14 = vmul.f32 1.442695, %v3426_v13 }
 0xb4d   : > { %v3451_v22 = vsel %vm590_vm0, %v10062_v25, 0.0 }
 0xb4e   : > { %7688 = vpow2.f32 %v3436_v14  ;;  %3452 = vadd.xlane.f32.xlu0 %v3451_v22 }
 0xb51   : > { %v3411_v17 = vpop.xlane.xlu2 %3410 }
 0xb52   : > { %v3427_v44 = vsub.f32 %v10030_v47, %v3411_v17 }
 0xb54   : > { %v10066_v46 = vpop.eup %7688  ;;  %v3438_v35 = vmul.f32 1.442695, %v3427_v44 }
 0xb55   : > { %v3454_v53 = vsel %vm590_vm0, %v10066_v46, 0.0 }
 0xb56   : > { %3455 = vadd.xlane.f32.xlu1 %v3454_v53 }
 0xb59   : > { %v3414_v10 = vpop.xlane.xlu0 %3413 }
 0xb5a   : > { %v3428_v51 = vsub.f32 %v3396_v12, %v3414_v10 }
 0xb5c   : > { %v3440_v59 = vmul.f32 1.442695, %v3428_v51 }
 0xb5e   : > { %3496 = vrot.lane.b32.xlu2 %v9645_v62, %s8079_s25 }
 0xb61   : > { %v3417_v23 = vpop.xlane.xlu1 %3416 }
 0xb62   : > { %v3429_v7 = vsub.f32 %v3397_v45, %v3417_v23  ;;  %3494 = vrot.lane.b32.xlu0 %v9650_v4, %s8079_s25  ;;  %v3631_v23 = vunpack.c.h.b16 %v9570_v27 }
 0xb64   : > { %v3442_v60 = vmul.f32 1.442695, %v3429_v7  ;;  %v3630_v7 = vunpack.c.h.b16 %v9565_v24 }
 0xb66   : > { %7690 = vpow2.f32 %v3442_v60  ;;  %v10102_v60 = vpack.c.b16 %v3631_v23, %v3630_v7 }
 0xb67   : > { %7692 = vpow2.f32 %v3440_v59 }
 0xb68   : > { %7694 = vpow2.f32 %v3438_v35 }
 0xb69   : > { %v3420_v0 = vpop.xlane.xlu2 %3419 }
 0xb6a   : > { %v3430_v31 = vsub.f32 %v3398_v48, %v3420_v0  ;;  %v3661_v0 = vsel %vm2481_vm14, %v9598_v32, 0 }
 0xb6c   : > { %v10074_v40 = vpop.eup %7690  ;;  %v3444_v13 = vmul.f32 1.442695, %v3430_v31  ;;  %v3658_v31 = vsel %vm2481_vm14, %v9593_v37, 0 }
 0xb6d   : > { %v3463_v34 = vsel %vm590_vm0, %v10074_v40, 0.0  ;;  %v10079_v55 = vpop.eup %7692 }
 0xb6e   : > { %3464 = vadd.xlane.f32.xlu1 %v3463_v34  ;;  %v3460_v14 = vsel %vm590_vm0, %v10079_v55, 0.0  ;;  %v7695_v47 = vpop.eup %7694 }
 0xb71   : > { %v3423_v62 = vpop.xlane.xlu0 %3422 }
 0xb72   : > { %v3431_v45 = vsub.f32 %v3399_v49, %v3423_v62  ;;  %v3457_v49 = vsel %vm590_vm0, %v7695_v47, 0.0 }
 0xb74   : > { %v3446_v4 = vmul.f32 1.442695, %v3431_v45  ;;  %v3664_v45 = vsel %vm2481_vm14, %v9602_v18, 0 }
 0xb76   : > { %7696 = vpow2.f32 %v3446_v4 }
 0xb77   : > { %7698 = vpow2.f32 %v3444_v13 }
 0xb79   : > { %v3493_v27 = vpop.permute.xlu1 %3492 }
 0xb7c   : > { %v10085_v12 = vpop.eup %7696 }
 0xb7d   : > { %v3469_v48 = vsel %vm590_vm0, %v10085_v12, 0.0  ;;  %v10092_v22 = vpop.eup %7698 }
 0xb7e   : > { %v3466_v53 = vsel %vm590_vm0, %v10092_v22, 0.0 }
 0xb87   : > { %3878 = vrot.lane.b32.xlu1 %v9602_v18, %s8077_s2  ;;  %3461 = vadd.xlane.f32.xlu2 %v3460_v14 }
 0xb8c   : > { %3458 = vadd.xlane.f32.xlu0 %v3457_v49 }
 0xb8f   : > { %3870 = vrot.lane.b32.xlu1 %v9600_v33, %s8077_s2  ;;  %3470 = vadd.xlane.f32.xlu2 %v3469_v48 }
 0xb94   : > { %3467 = vadd.xlane.f32.xlu0 %v3466_v53 }
 0xba7   : > { %3874 = vrot.lane.b32.xlu2 %v9593_v37, %s8077_s2 }
 0xba8   : > { %3876 = vrot.lane.b32.xlu0 %v9598_v32, %s8077_s2 }
 0xbb0   : > { %3872 = vrot.lane.b32.xlu0 %v10102_v60, %s8077_s2 }
 0xbb9   : > { %v3450_v34 = vpop.xlane.xlu2 %3449 }
 0xbc1   : > { %v3497_v10 = vpop.permute.xlu2 %3496  ;;  %v3453_v51 = vpop.xlane.xlu0 %3452 }
 0xbc2   : > { %3521 = vmatpush.bf16.msra.mxu2 %v3497_v10  ;;  %7700 = vrcp.f32 %v3453_v51 }
 0xbc3   : > { %7702 = vrcp.f32 %v3450_v34 }
 0xbc8   : > { %v7701_v17 = vpop.eup %7700 }
 0xbc9   : > { %v7703_v44 = vpop.eup %7702  ;;  %v3481_v62 = vmul.f32 %v7701_v17, %v10062_v25  ;;  %v3456_v4 = vpop.xlane.xlu1 %3455 }
 0xbca   : > { %v3480_v24 = vmul.f32 %v7703_v44, %v10058_v36  ;;  %v3655_v36 = vsel %vm2481_vm14, %v10102_v60, 0  ;;  %7704 = vrcp.f32 %v3456_v4 }
 0xbcc   : > { %v3488_v35 = vpack.c.bf16 %v3481_v62, %v3480_v24 }
 0xbd0   : > { %v7705_v48 = vpop.eup %7704 }
 0xbd1   : > { %v3482_v23 = vmul.f32 %v7705_v48, %v10066_v46 }
 0xbd4   : > { %v3495_v59 = vpop.permute.xlu0 %3494 }
 0xbd5   : > { %3522 = vmatpush.bf16.msra.mxu2 %v3495_v59 }
 0xbd9   : > { %3523 = vmatpush.bf16.msra.mxu2 %v3493_v27 }
 0xbdc   : > { %7060 = vmatmul.msk.bf16.vlgmr.msra.gmra.mxu2 %vm590_vm0, %v3488_v35 }
 0xbdd   : > { %3670 = vmatpush.bf16.xpose.msrb.mxu2 %v3664_v45 }
 0xbe1   : > { %v3465_v25 = vpop.xlane.xlu1 %3464 }
 0xbe5   : > { %3671 = vmatpush.bf16.xpose.msrb.mxu2 %v3661_v0 }
 0xbed   : > { %3672 = vmatpush.bf16.xpose.msrb.mxu2 %v3658_v31 }
 0xbf5   : > { %3673 = vmatpush.bf16.xpose.msrb.mxu2 %v3655_v36 }
 0xbf9   : > { %v3879_v13 = vpop.permute.xlu1 %3878 }
 0xbfa   : > { %v3902_v14 = vsel %vm2481_vm14, %v3879_v13, 0  ;;  %v3462_v34 = vpop.xlane.xlu2 %3461  ;;  %v8004_v13 = vld [vmem:[%s12075_s7 + $0x18] sm:$0xff] }
 0xbfb   : > { %3908 = vmatpush.bf16.xpose.msrb.mxu0 %v3902_v14 }
 0xbfd   : > { %7493 = vmatpush.bf16.xpose.msra.mxu2 %v3902_v14 }
 0xbff   : > { %v3459_v49 = vpop.xlane.xlu0 %3458 }
 0xc00   : > { %7706 = vrcp.f32 %v3459_v49 }
 0xc01   : > { %7708 = vrcp.f32 %v3462_v34 }
 0xc02   : > { %7710 = vrcp.f32 %v3465_v25  ;;  %v3471_v62 = vpop.xlane.xlu2 %3470 }
 0xc06   : > { %v7707_v53 = vpop.eup %7706 }
 0xc07   : > { %v3483_v7 = vmul.f32 %v7707_v53, %v7695_v47  ;;  %v7709_v51 = vpop.eup %7708  ;;  %v3468_v17 = vpop.xlane.xlu0 %3467 }
 0xc08   : > { %v7711_v59 = vpop.eup %7710  ;;  %v3484_v44 = vmul.f32 %v7709_v51, %v10079_v55  ;;  %7712 = vrcp.f32 %v3468_v17  ;;  %v3871_v53 = vpop.permute.xlu1 %3870 }
 0xc09   : > { %v3489_v10 = vpack.c.bf16 %v3483_v7, %v3482_v23  ;;  %v3485_v27 = vmul.f32 %v7711_v59, %v10074_v40  ;;  %7714 = vrcp.f32 %v3471_v62 }
 0xc0a   : > { %v3875_v47 = vpop.permute.xlu2 %3874 }
 0xc0b   : > { %7061 = vmatmul.msk.bf16.gmra.mxu2 %vm590_vm0, %v3489_v10  ;;  %v3490_v24 = vpack.c.bf16 %v3485_v27, %v3484_v44  ;;  %v3896_v0 = vsel %vm2481_vm14, %v3875_v47, 0 }
 0xc0e   : > { %v7713_v35 = vpop.eup %7712 }
 0xc0f   : > { %v7715_v4 = vpop.eup %7714  ;;  %v3486_v55 = vmul.f32 %v7713_v35, %v10092_v22  ;;  %v10139_v22 = vpop.f32.mrf.mxu2 }
 0xc10   : > { %v3487_v40 = vmul.f32 %v7715_v4, %v10085_v12  ;;  %v8005_v12 = vld [vmem:[%s12075_s7 + $0x10] sm:$0xff] }
 0xc12   : > { %v3491_v25 = vpack.c.bf16 %v3487_v40, %v3486_v55 }
 0xc1a   : > { %v3877_v45 = vpop.permute.xlu0 %3876 }
 0xc1b   : > { %7062 = vmatmul.msk.bf16.gmra.mxu2 %vm590_vm0, %v3490_v24  ;;  %v3899_v46 = vsel %vm2481_vm14, %v3877_v45, 0 }
 0xc1c   : > { %3909 = vmatpush.bf16.xpose.msrb.mxu0 %v3899_v46  ;;  %7494 = vmatpush.bf16.xpose.msra.mxu2 %v3899_v46 }
 0xc22   : > { %v3873_v31 = vpop.permute.xlu0 %3872 }
 0xc23   : > { %v3893_v36 = vsel %vm2481_vm14, %v3873_v31, 0 }
 0xc24   : > { %3910 = vmatpush.bf16.xpose.msrb.mxu0 %v3896_v0  ;;  %7495 = vmatpush.bf16.xpose.msra.mxu2 %v3896_v0 }
 0xc2b   : > { %7063 = vmatmul.msk.bf16.gmra.mxu2 %vm590_vm0, %v3491_v25 }
 0xc2c   : > { %3911 = vmatpush.bf16.xpose.msrb.mxu0 %v3893_v36  ;;  %7496 = vmatpush.bf16.xpose.msra.mxu2 %v3893_v36 }
 0xc3b   : > { %7076 = vmatmul.msk.bf16.vlgmr.msrb.gmra.mxu2 %vm2481_vm14, %v9574_v61 }
 0xc3c   : > { %4108 = vmatpush.bf16.msrb.mxu2 %v8004_v13 }
 0xc40   : > { %4109 = vmatpush.bf16.msrb.mxu2 %v8005_v12 }
 0xc4b   : > { %7077 = vmatmul.msk.bf16.gmra.mxu2 %vm2481_vm14, %v9591_v54 }
 0xc5b   : > { %7078 = vmatmul.msk.bf16.gmra.mxu2 %vm2481_vm14, %v9596_v52 }
 0xc5f   : > { %v3525_v14 = vpop.f32.mrf.mxu2 }
 0xc67   : > { %v3527_v49 = vpop.f32.mrf.mxu2 }
 0xc68   : > { %v3545_v48 = vpack.c.bf16 %v3527_v49, %v3525_v14 }
 0xc6a   : > { %7072 = vmatmul.msk.bf16.vlgmr.msrb.gmra.mxu3 %vm2481_vm14, %v3545_v48 }
 0xc6b   : > { %7079 = vmatmul.msk.bf16.gmra.mxu2 %vm2481_vm14, %v9600_v33 }
 0xc7b   : > { %7087 = vmatmul.msk.bf16.vlgmr.msra.gmra.mxu2 %vm2481_vm14, %v3871_v53 }
 0xc7c   : > { %4416 = vmatpush.bf16.msra.mxu2 %v9959_v42 }
 0xc80   : > { %4417 = vmatpush.bf16.msra.mxu2 %v9965_v21 }
 0xc8e   : > { %v3530_v23 = vpop.f32.mrf.mxu2 }
 0xc96   : > { %v3532_v7 = vpop.f32.mrf.mxu2 }
 0xc97   : > { %v3546_v34 = vpack.c.bf16 %v3532_v7, %v3530_v23 }
 0xc99   : > { %7073 = vmatmul.msk.bf16.gmra.mxu3 %vm2481_vm14, %v3546_v34 }
 0xc9e   : > { %v3535_v10 = vpop.f32.mrf.mxu2 }
 0xca6   : > { %v3537_v51 = vpop.f32.mrf.mxu2 }
 0xca7   : > { %v3547_v17 = vpack.c.bf16 %v3537_v51, %v3535_v10 }
 0xca9   : > { %7074 = vmatmul.msk.bf16.gmra.mxu3 %vm2481_vm14, %v3547_v17 }
 0xcae   : > { %v3540_v59 = vpop.f32.mrf.mxu2 }
 0xcb6   : > { %v3542_v44 = vpop.f32.mrf.mxu2 }
 0xcb7   : > { %v3548_v62 = vpack.c.bf16 %v3542_v44, %v3540_v59 }
 0xcb9   : > { %7075 = vmatmul.msk.bf16.gmra.mxu3 %vm2481_vm14, %v3548_v62 }
 0xcbe   : > { %v3675_v27 = vpop.f32.mrf.mxu2 }
 0xcbf   : > { %v3695_v24 = vmul.f32 0.17677669, %v3675_v27 }
 0xcc1   : > { %v3703_v42 = vsel %vm590_vm0, %v3695_v24, -inf }
 0xcc2   : > { %3704 = vmax.xlane.f32.xlu2 %v3703_v42 }
 0xcc6   : > { %v3677_v21 = vpop.f32.mrf.mxu2 }
 0xcc7   : > { %v3696_v45 = vmul.f32 0.17677669, %v3677_v21 }
 0xcc9   : > { %v3706_v46 = vsel %vm590_vm0, %v3696_v45, -inf }
 0xcca   : > { %3707 = vmax.xlane.f32.xlu0 %v3706_v46 }
 0xcce   : > { %v3680_v47 = vpop.f32.mrf.mxu2 }
 0xccf   : > { %v3697_v35 = vmul.f32 0.17677669, %v3680_v47 }
 0xcd1   : > { %v3709_v0 = vsel %vm590_vm0, %v3697_v35, -inf }
 0xcd2   : > { %3710 = vmax.xlane.f32.xlu1 %v3709_v0 }
 0xcd6   : > { %v3682_v4 = vpop.f32.mrf.mxu2 }
 0xcd7   : > { %v3698_v55 = vmul.f32 0.17677669, %v3682_v4 }
 0xcd9   : > { %v3712_v40 = vsel %vm590_vm0, %v3698_v55, -inf }
 0xcda   : > { %3713 = vmax.xlane.f32.xlu2 %v3712_v40 }
 0xcde   : > { %v3685_v31 = vpop.f32.mrf.mxu2 }
 0xcdf   : > { %v3699_v25 = vmul.f32 0.17677669, %v3685_v31 }
 0xce1   : > { %v3715_v36 = vsel %vm590_vm0, %v3699_v25, -inf }
 0xce2   : > { %3716 = vmax.xlane.f32.xlu0 %v3715_v36 }
 0xce6   : > { %v3687_v13 = vpop.f32.mrf.mxu2 }
 0xce7   : > { %v3700_v12 = vmul.f32 0.17677669, %v3687_v13 }
 0xce9   : > { %v3718_v14 = vsel %vm590_vm0, %v3700_v12, -inf }
 0xcea   : > { %3719 = vmax.xlane.f32.xlu1 %v3718_v14 }
 0xced   : > { %v3582_v49 = vpop.f32.mrf.mxu3 }
 0xcee   : > { %v10159_v48 = vadd.f32 %v3582_v49, %v10028_v9  ;;  %v3690_v53 = vpop.f32.mrf.mxu2 }
 0xcef   : > { %v3701_v23 = vmul.f32 0.17677669, %v3690_v53 }
 0xcf1   : > { %v3721_v7 = vsel %vm590_vm0, %v3701_v23, -inf }
 0xcf2   : > { %3722 = vmax.xlane.f32.xlu2 %v3721_v7 }
 0xcf5   : > { %v10166_v17 = vpop.f32.mrf.mxu3 }
 0xcf6   : > { %v3692_v34 = vpop.f32.mrf.mxu2 }
 0xcf7   : > { %v10162_v10 = vmul.f32 0.17677669, %v3692_v34 }
 0xcf9   : > { %v3724_v51 = vsel %vm590_vm0, %v10162_v10, -inf }
 0xcfa   : > { %3725 = vmax.xlane.f32.xlu0 %v3724_v51 }
 0xd1c   : > { %v3587_v59 = vpop.f32.mrf.mxu3 }
 0xd1d   : > { %v10169_v44 = vadd.f32 %v3587_v59, %v10039_v15 }
 0xd24   : > { %v10171_v9 = vpop.f32.mrf.mxu3 }
 0xd2c   : > { %v3592_v62 = vpop.f32.mrf.mxu3 }
 0xd2d   : > { %v10174_v27 = vadd.f32 %v3592_v62, %v10050_v28 }
 0xd34   : > { %v10176_v42 = vpop.f32.mrf.mxu3 }
 0xd35   : > { %v3705_v21 = vpop.xlane.xlu2 %3704 }
 0xd36   : > { %v3727_v46 = vsub.f32 %v3695_v24, %v3705_v21 }
 0xd38   : > { %v3735_v47 = vmul.f32 1.442695, %v3727_v46 }
 0xd3a   : > { %7716 = vpow2.f32 %v3735_v47 }
 0xd3c   : > { %v3597_v0 = vpop.f32.mrf.mxu3 }
 0xd3d   : > { %v10179_v4 = vadd.f32 %v3597_v0, %v10056_v5  ;;  %v3708_v40 = vpop.xlane.xlu0 %3707 }
 0xd3e   : > { %v3728_v31 = vsub.f32 %v3696_v45, %v3708_v40 }
 0xd40   : > { %v10181_v15 = vpop.eup %7716  ;;  %v3737_v36 = vmul.f32 1.442695, %v3728_v31 }
 0xd41   : > { %v3751_v13 = vsel %vm590_vm0, %v10181_v15, 0.0 }
 0xd42   : > { %7718 = vpow2.f32 %v3737_v36  ;;  %3752 = vadd.xlane.f32.xlu1 %v3751_v13 }
 0xd45   : > { %v3711_v28 = vpop.xlane.xlu1 %3710 }
 0xd46   : > { %v3729_v14 = vsub.f32 %v3697_v35, %v3711_v28  ;;  %v3928_v28 = vpop.f32.mrf.mxu2 }
 0xd48   : > { %v10185_v49 = vpop.eup %7718  ;;  %v3739_v24 = vmul.f32 1.442695, %v3729_v14 }
 0xd49   : > { %v3754_v53 = vsel %vm590_vm0, %v10185_v49, 0.0 }
 0xd4a   : > { %7720 = vpow2.f32 %v3739_v24  ;;  %3755 = vadd.xlane.f32.xlu2 %v3754_v53  ;;  %v3939_v53 = vmul.f32 0.17677669, %v3928_v28 }
 0xd4d   : > { %v3714_v5 = vpop.xlane.xlu2 %3713 }
 0xd4e   : > { %v3730_v45 = vsub.f32 %v3698_v55, %v3714_v5 }
 0xd50   : > { %v10189_v7 = vpop.eup %7720  ;;  %v3741_v34 = vmul.f32 1.442695, %v3730_v45 }
 0xd51   : > { %v3757_v51 = vsel %vm590_vm0, %v10189_v7, 0.0 }
 0xd52   : > { %7722 = vpow2.f32 %v3741_v34  ;;  %3758 = vadd.xlane.f32.xlu0 %v3757_v51 }
 0xd55   : > { %v3717_v59 = vpop.xlane.xlu0 %3716 }
 0xd56   : > { %v3731_v35 = vsub.f32 %v3699_v25, %v3717_v59  ;;  %v3959_v59 = vsel %vm590_vm0, %v3939_v53, -inf }
 0xd58   : > { %v10193_v62 = vpop.eup %7722  ;;  %v3743_v21 = vmul.f32 1.442695, %v3731_v35 }
 0xd59   : > { %v3760_v46 = vsel %vm590_vm0, %v10193_v62, 0.0 }
 0xd5a   : > { %7724 = vpow2.f32 %v3743_v21  ;;  %3761 = vadd.xlane.f32.xlu1 %v3760_v46 }
 0xd5d   : > { %v3720_v47 = vpop.xlane.xlu1 %3719 }
 0xd5e   : > { %v3732_v55 = vsub.f32 %v3700_v12, %v3720_v47 }
 0xd60   : > { %v10197_v0 = vpop.eup %7724  ;;  %v3745_v40 = vmul.f32 1.442695, %v3732_v55 }
 0xd61   : > { %v3763_v31 = vsel %vm590_vm0, %v10197_v0, 0.0 }
 0xd62   : > { %7726 = vpow2.f32 %v3745_v40  ;;  %3764 = vadd.xlane.f32.xlu2 %v3763_v31 }
 0xd65   : > { %v3723_v36 = vpop.xlane.xlu2 %3722 }
 0xd66   : > { %v3733_v25 = vsub.f32 %v3701_v23, %v3723_v36  ;;  %v3930_v23 = vpop.f32.mrf.mxu2 }
 0xd67   : > { %v3940_v35 = vmul.f32 0.17677669, %v3930_v23 }
 0xd68   : > { %v7727_v13 = vpop.eup %7726  ;;  %v3747_v14 = vmul.f32 1.442695, %v3733_v25 }
 0xd69   : > { %v3766_v24 = vsel %vm590_vm0, %v7727_v13, 0.0  ;;  %v3962_v46 = vsel %vm590_vm0, %v3940_v35, -inf }
 0xd6a   : > { %7728 = vpow2.f32 %v3747_v14  ;;  %3767 = vadd.xlane.f32.xlu0 %v3766_v24 }
 0xd6d   : > { %v3726_v5 = vpop.xlane.xlu0 %3725 }
 0xd6e   : > { %v3734_v12 = vsub.f32 %v10162_v10, %v3726_v5 }
 0xd70   : > { %v10203_v45 = vpop.eup %7728  ;;  %v3749_v34 = vmul.f32 1.442695, %v3734_v12 }
 0xd71   : > { %v3769_v51 = vsel %vm590_vm0, %v10203_v45, 0.0 }
 0xd72   : > { %7730 = vpow2.f32 %v3749_v34  ;;  %3770 = vadd.xlane.f32.xlu1 %v3769_v51  ;;  %3960 = vmax.xlane.f32.xlu0 %v3959_v59 }
 0xd78   : > { %v7731_v21 = vpop.eup %7730 }
 0xd79   : > { %v3772_v47 = vsel %vm590_vm0, %v7731_v21, 0.0 }
 0xd7a   : > { %3963 = vmax.xlane.f32.xlu1 %v3962_v46  ;;  %3773 = vadd.xlane.f32.xlu2 %v3772_v47 }
 0xd86   : > { %4037 = vrot.lane.b32.xlu0 %v10004_v41, %s8077_s2 }
 0xd92   : > { %4039 = vrot.lane.b32.xlu2 %v9996_v30, %s8077_s2 }
 0xd9a   : > { %4033 = vrot.lane.b32.xlu2 %v10014_v11, %s8077_s2 }
 0xda2   : > { %3866 = vrot.lane.b32.xlu2 %v9591_v54, %s8077_s2 }
 0xdaa   : > { %4461 = vrot.lane.b32.xlu2 %v9602_v18, %s8079_s25 }
 0xdb2   : > { %4182 = vrot.lane.b32.xlu2 %v9593_v37, %s8078_s23 }
 0xdb5   : > { %v3753_v10 = vpop.xlane.xlu1 %3752 }
 0xdb6   : > { %7732 = vrcp.f32 %v3753_v10 }
 0xdba   : > { %4455 = vrot.lane.b32.xlu2 %v10102_v60, %s8079_s25 }
 0xdbc   : > { %v7733_v40 = vpop.eup %7732 }
 0xdbd   : > { %v3756_v55 = vpop.xlane.xlu2 %3755  ;;  %v3783_v36 = vmul.f32 %v7733_v40, %v10181_v15 }
 0xdbe   : > { %7734 = vrcp.f32 %v3756_v55 }
 0xdc2   : > { %4174 = vrot.lane.b32.xlu2 %v9591_v54, %s8078_s23 }
 0xdc4   : > { %v7735_v31 = vpop.eup %7734 }
 0xdc5   : > { %v3784_v25 = vmul.f32 %v7735_v31, %v10185_v49  ;;  %v3759_v14 = vpop.xlane.xlu0 %3758 }
 0xdc6   : > { %7736 = vrcp.f32 %v3759_v14 }
 0xdc7   : > { %v3791_v28 = vpack.c.bf16 %v3784_v25, %v3783_v36 }
 0xdc9   : > { %7080 = vmatmul.msk.bf16.vlgmr.msra.gmra.mxu3 %vm590_vm0, %v3791_v28 }
 0xdca   : > { %4451 = vrot.lane.b32.xlu2 %v9596_v52, %s8079_s25 }
 0xdcc   : > { %v7737_v5 = vpop.eup %7736 }
 0xdcd   : > { %v3762_v24 = vpop.xlane.xlu1 %3761  ;;  %v3785_v34 = vmul.f32 %v7737_v5, %v10189_v7 }
 0xdce   : > { %7738 = vrcp.f32 %v3762_v24 }
 0xdd4   : > { %v7739_v12 = vpop.eup %7738 }
 0xdd5   : > { %v3786_v51 = vmul.f32 %v7739_v12, %v10193_v62  ;;  %v3765_v15 = vpop.xlane.xlu2 %3764 }
 0xdd6   : > { %7740 = vrcp.f32 %v3765_v15 }
 0xdd7   : > { %v3792_v59 = vpack.c.bf16 %v3786_v51, %v3785_v34 }
 0xdd9   : > { %7081 = vmatmul.msk.bf16.gmra.mxu3 %vm590_vm0, %v3792_v59 }
 0xddc   : > { %v7741_v23 = vpop.eup %7740 }
 0xddd   : > { %v3768_v49 = vpop.xlane.xlu0 %3767  ;;  %v3787_v47 = vmul.f32 %v7741_v23, %v10197_v0 }
 0xdde   : > { %7742 = vrcp.f32 %v3768_v49 }
 0xde4   : > { %v7743_v46 = vpop.eup %7742 }
 0xde5   : > { %v3788_v10 = vmul.f32 %v7743_v46, %v7727_v13  ;;  %v3771_v55 = vpop.xlane.xlu1 %3770  ;;  %v3961_v40 = vpop.xlane.xlu0 %3960 }
 0xde6   : > { %v3971_v31 = vsub.f32 %v3939_v53, %v3961_v40 }
 0xde7   : > { %v3793_v36 = vpack.c.bf16 %v3788_v10, %v3787_v47  ;;  %v8006_v10 = vld [vmem:[%s12075_s7 + $0x8] sm:$0xff] }
 0xde8   : > { %v3985_v25 = vmul.f32 1.442695, %v3971_v31 }
 0xde9   : > { %7082 = vmatmul.msk.bf16.gmra.mxu3 %vm590_vm0, %v3793_v36 }
 0xdea   : > { %7744 = vpow2.f32 %v3985_v25 }
 0xdeb   : > { %7746 = vrcp.f32 %v3771_v55 }
 0xded   : > { %v3964_v7 = vpop.xlane.xlu1 %3963  ;;  %v3774_v62 = vpop.xlane.xlu2 %3773 }
 0xdee   : > { %v3972_v28 = vsub.f32 %v3940_v35, %v3964_v7  ;;  %7748 = vrcp.f32 %v3774_v62  ;;  %v8007_v7 = vld [vmem:[%s12075_s7] sm:$0xff] }
 0xdf0   : > { %v7745_v14 = vpop.eup %7744  ;;  %v3987_v24 = vmul.f32 1.442695, %v3972_v28 }
 0xdf1   : > { %v4007_v5 = vsel %vm590_vm0, %v7745_v14, 0.0  ;;  %v7747_v12 = vpop.eup %7746 }
 0xdf2   : > { %7750 = vpow2.f32 %v3987_v24  ;;  %4008 = vadd.xlane.f32.xlu0 %v4007_v5  ;;  %v3789_v13 = vmul.f32 %v7747_v12, %v10203_v45 }
 0xdf4   : > { %v7749_v0 = vpop.eup %7748 }
 0xdf5   : > { %v3790_v53 = vmul.f32 %v7749_v0, %v7731_v21  ;;  %v4040_v34 = vpop.permute.xlu2 %4039 }
 0xdf6   : > { %4061 = vmatpush.bf16.msrb.mxu1 %v4040_v34  ;;  %7497 = vmatpush.bf16.msrb.mxu3 %v4040_v34 }
 0xdf7   : > { %v3794_v51 = vpack.c.bf16 %v3790_v53, %v3789_v13 }
 0xdf8   : > { %v7751_v59 = vpop.eup %7750  ;;  %v4038_v15 = vpop.permute.xlu0 %4037 }
 0xdf9   : > { %7083 = vmatmul.msk.bf16.gmra.mxu3 %vm590_vm0, %v3794_v51  ;;  %v4010_v35 = vsel %vm590_vm0, %v7751_v59, 0.0 }
 0xdfa   : > { %4011 = vadd.xlane.f32.xlu1 %v4010_v35  ;;  %4062 = vmatpush.bf16.msrb.mxu1 %v4038_v15 }
 0xdfb   : > { %7498 = vmatpush.bf16.msrb.mxu3 %v4038_v15 }
 0xe06   : > { %3864 = vrot.lane.b32.xlu0 %v9574_v61, %s8077_s2 }
 0xe0e   : > { %3868 = vrot.lane.b32.xlu0 %v9596_v52, %s8077_s2 }
 0xe13   : > { %4035 = vrot.lane.b32.xlu1 %v10011_v63, %s8077_s2  ;;  %s7492_s2 = sshll.u32 %s8183_s22, 7  ;;  %s6622_s22 = scalar_lea.sflag [#allocation3], %s488_s3 }
 0xe14   : > { %s6634_s17 = scalar_lea.hbm %s12083_s15, %s7492_s2 }
 0xe16   : > { %4184 = vrot.lane.b32.xlu0 %v9598_v32, %s8078_s23 }
 0xe1b   : > { %4186 = vrot.lane.b32.xlu1 %v9602_v18, %s8078_s23 }
 0xe1e   : > { %4457 = vrot.lane.b32.xlu0 %v9593_v37, %s8079_s25 }
 0xe23   : > { %4459 = vrot.lane.b32.xlu1 %v9598_v32, %s8079_s25  ;;  %v4034_v32 = vpop.permute.xlu2 %4033 }
 0xe26   : > { %4172 = vrot.lane.b32.xlu0 %v9574_v61, %s8078_s23 }
 0xe2b   : > { %4180 = vrot.lane.b32.xlu1 %v10102_v60, %s8078_s23  ;;  %v10269_v60 = vpop.f32.mrf.mxu3 }
 0xe2c   : > { %12205 = vst [vmem:[#allocation10_spill] sm:$0xff] %v10269_v60 }
 0xe2e   : > { %4449 = vrot.lane.b32.xlu0 %v9591_v54, %s8079_s25 }
 0xe33   : > { %4447 = vrot.lane.b32.xlu1 %v9574_v61, %s8079_s25  ;;  %v3867_v61 = vpop.permute.xlu2 %3866 }
 0xe36   : > { %4178 = vrot.lane.b32.xlu0 %v9600_v33, %s8078_s23 }
 0xe3b   : > { %4176 = vrot.lane.b32.xlu1 %v9596_v52, %s8078_s23  ;;  %v4462_v55 = vpop.permute.xlu2 %4461 }
 0xe3c   : > { %v4485_v25 = vsel %vm2481_vm14, %v4462_v55, 0 }
 0xe43   : > { %4453 = vrot.lane.b32.xlu1 %v9600_v33, %s8079_s25  ;;  %v4183_v12 = vpop.permute.xlu2 %4182 }
 0xe44   : > { %v4204_v53 = vsel %vm2481_vm14, %v4183_v12, 0 }
 0xe4b   : > { %v4456_v15 = vpop.permute.xlu2 %4455 }
 0xe4c   : > { %v3840_v45 = vpop.f32.mrf.mxu3 }
 0xe54   : > { %v3842_v40 = vpop.f32.mrf.mxu3 }
 0xe55   : > { %v3860_v0 = vpack.c.bf16 %v3842_v40, %v3840_v45 }
 0xe65   : > { %v4009_v37 = vpop.xlane.xlu0 %4008 }
 0xe6d   : > { %v4012_v54 = vpop.xlane.xlu1 %4011 }
 0xe6e   : > { %7752 = vrcp.f32 %v4012_v54 }
 0xe6f   : > { %7754 = vrcp.f32 %v4009_v37  ;;  %v4476_v37 = vsel %vm2481_vm14, %v4456_v15, 0 }
 0xe74   : > { %v7753_v21 = vpop.eup %7752 }
 0xe75   : > { %v7755_v23 = vpop.eup %7754  ;;  %v4028_v52 = vmul.f32 %v7753_v21, %v7751_v59  ;;  %v4175_v21 = vpop.permute.xlu2 %4174 }
 0xe76   : > { %v4027_v33 = vmul.f32 %v7755_v23, %v7745_v14  ;;  %v3845_v14 = vpop.f32.mrf.mxu3 }
 0xe78   : > { %v3865_v18 = vpop.permute.xlu0 %3864  ;;  %v4032_v47 = vpack.c.bf16 %v4028_v52, %v4027_v33 }
 0xe79   : > { %7084 = vmatmul.msk.bf16.vlgmr.msrb.gmra.mxu0 %vm2481_vm14, %v3865_v18 }
 0xe7e   : > { %v3847_v51 = vpop.f32.mrf.mxu3 }
 0xe7f   : > { %v3861_v18 = vpack.c.bf16 %v3847_v51, %v3845_v14 }
 0xe80   : > { %v3869_v46 = vpop.permute.xlu0 %3868 }
 0xe85   : > { %v4036_v49 = vpop.permute.xlu1 %4035 }
 0xe86   : > { %4063 = vmatpush.bf16.msrb.mxu1 %v4036_v49  ;;  %7499 = vmatpush.bf16.msrb.mxu3 %v4036_v49 }
 0xe88   : > { %v4185_v62 = vpop.permute.xlu0 %4184 }
 0xe89   : > { %7085 = vmatmul.msk.bf16.gmra.mxu0 %vm2481_vm14, %v3867_v61  ;;  %v4207_v24 = vsel %vm2481_vm14, %v4185_v62, 0 }
 0xe8a   : > { %4064 = vmatpush.bf16.msrb.mxu1 %v4034_v32  ;;  %7500 = vmatpush.bf16.msrb.mxu3 %v4034_v32  ;;  %v3850_v32 = vpop.f32.mrf.mxu3 }
 0xe8d   : > { %v4187_v31 = vpop.permute.xlu1 %4186  ;;  %7091 = vmatmul.msk.bf16.vlgmr.msrb.gmra.mxu3 %vm590_vm0, %v4032_v47 }
 0xe8e   : > { %4149 = vmatpush.bf16.msra.mxu3 %v8006_v10  ;;  %v4210_v36 = vsel %vm2481_vm14, %v4187_v31, 0 }
 0xe8f   : > { %4216 = vmatpush.bf16.xpose.msra.mxu0 %v4210_v36  ;;  %v4452_v36 = vpop.permute.xlu2 %4451 }
 0xe90   : > { %v4458_v13 = vpop.permute.xlu0 %4457 }
 0xe91   : > { %v4479_v34 = vsel %vm2481_vm14, %v4458_v13, 0 }
 0xe92   : > { %4150 = vmatpush.bf16.msra.mxu3 %v8007_v7  ;;  %v3852_v61 = vpop.f32.mrf.mxu3 }
 0xe93   : > { %v3862_v45 = vpack.c.bf16 %v3852_v61, %v3850_v32 }
 0xe95   : > { %v4460_v28 = vpop.permute.xlu1 %4459 }
 0xe96   : > { %4491 = vmatpush.bf16.xpose.msrb.mxu3 %v4485_v25  ;;  %v4482_v5 = vsel %vm2481_vm14, %v4460_v28, 0 }
 0xe97   : > { %4217 = vmatpush.bf16.xpose.msra.mxu0 %v4207_v24 }
 0xe98   : > { %v4173_v54 = vpop.permute.xlu0 %4172 }
 0xe99   : > { %7086 = vmatmul.msk.bf16.gmra.mxu0 %vm2481_vm14, %v3869_v46 }
 0xe9a   : > { %v3855_v49 = vpop.f32.mrf.mxu3 }
 0xe9d   : > { %7096 = vmatmul.msk.bf16.vlgmr.msra.gmra.mxu3 %vm2481_vm14, %v3860_v0  ;;  %v4181_v59 = vpop.permute.xlu1 %4180 }
 0xe9e   : > { %4492 = vmatpush.bf16.xpose.msrb.mxu3 %v4482_v5  ;;  %v4201_v35 = vsel %vm2481_vm14, %v4181_v59, 0 }
 0xe9f   : > { %4218 = vmatpush.bf16.xpose.msra.mxu0 %v4204_v53 }
 0xea0   : > { %v4450_v47 = vpop.permute.xlu0 %4449 }
 0xea2   : > { %v3857_v52 = vpop.f32.mrf.mxu3 }
 0xea3   : > { %v3863_v46 = vpack.c.bf16 %v3857_v52, %v3855_v49 }
 0xea5   : > { %v4448_v23 = vpop.permute.xlu1 %4447 }
 0xea6   : > { %4493 = vmatpush.bf16.xpose.msrb.mxu3 %v4479_v34 }
 0xea7   : > { %4219 = vmatpush.bf16.xpose.msra.mxu0 %v4201_v35 }
 0xea8   : > { %v4179_v10 = vpop.permute.xlu0 %4178 }
 0xead   : > { %7097 = vmatmul.msk.bf16.gmra.mxu3 %vm2481_vm14, %v3861_v18  ;;  %v4177_v33 = vpop.permute.xlu1 %4176 }
 0xeae   : > { %4494 = vmatpush.bf16.xpose.msrb.mxu3 %v4476_v37  ;;  %7100 = vmatmul.msk.bf16.vlgmr.msra.gmra.mxu0 %vm2481_vm14, %v4173_v54 }
 0xeb5   : > { %v4454_v5 = vpop.permute.xlu1 %4453 }
 0xebd   : > { %7098 = vmatmul.msk.bf16.gmra.mxu3 %vm2481_vm14, %v3862_v45 }
 0xebe   : > { %7101 = vmatmul.msk.bf16.gmra.mxu0 %vm2481_vm14, %v4175_v21 }
 0xecd   : > { %7099 = vmatmul.msk.bf16.gmra.mxu3 %vm2481_vm14, %v3863_v46 }
 0xece   : > { %7102 = vmatmul.msk.bf16.gmra.mxu0 %vm2481_vm14, %v4177_v33 }
 0xedd   : > { %7112 = vmatmul.msk.bf16.vlgmr.msrb.gmra.mxu3 %vm2481_vm14, %v4448_v23 }
 0xede   : > { %7103 = vmatmul.msk.bf16.gmra.mxu0 %vm2481_vm14, %v4179_v10 }
 0xeed   : > { %7113 = vmatmul.msk.bf16.gmra.mxu3 %vm2481_vm14, %v4450_v47 }
 0xef6   : > { %v3913_v55 = vpop.f32.mrf.mxu0 }
 0xef7   : > { %v3933_v40 = vmul.f32 0.17677669, %v3913_v55 }
 0xef9   : > { %v3941_v31 = vsel %vm590_vm0, %v3933_v40, -inf }
 0xefa   : > { %3942 = vmax.xlane.f32.xlu2 %v3941_v31 }
 0xefd   : > { %7114 = vmatmul.msk.bf16.gmra.mxu3 %vm2481_vm14, %v4452_v36 }
 0xefe   : > { %v3915_v25 = vpop.f32.mrf.mxu0 }
 0xeff   : > { %v3934_v7 = vmul.f32 0.17677669, %v3915_v25 }
 0xf01   : > { %v3944_v62 = vsel %vm590_vm0, %v3934_v7, -inf }
 0xf02   : > { %3945 = vmax.xlane.f32.xlu0 %v3944_v62 }
 0xf06   : > { %v3918_v28 = vpop.f32.mrf.mxu0 }
 0xf07   : > { %v3935_v14 = vmul.f32 0.17677669, %v3918_v28 }
 0xf09   : > { %v3947_v24 = vsel %vm590_vm0, %v3935_v14, -inf }
 0xf0a   : > { %3948 = vmax.xlane.f32.xlu1 %v3947_v24 }
 0xf0d   : > { %7115 = vmatmul.msk.bf16.gmra.mxu3 %vm2481_vm14, %v4454_v5 }
 0xf0e   : > { %v3920_v12 = vpop.f32.mrf.mxu0 }
 0xf0f   : > { %v3936_v0 = vmul.f32 0.17677669, %v3920_v12 }
 0xf10   : > { %v10313_v54 = vpop.f32.mrf.mxu3 }
 0xf11   : > { %v3950_v13 = vsel %vm590_vm0, %v3936_v0, -inf }
 0xf12   : > { %3951 = vmax.xlane.f32.xlu2 %v3950_v13 }
 0xf16   : > { %v3923_v53 = vpop.f32.mrf.mxu0 }
 0xf17   : > { %v3937_v34 = vmul.f32 0.17677669, %v3923_v53 }
 0xf18   : > { %v10315_v61 = vpop.f32.mrf.mxu3 }
 0xf19   : > { %v3953_v51 = vsel %vm590_vm0, %v3937_v34, -inf }
 0xf1a   : > { %3954 = vmax.xlane.f32.xlu0 %v3953_v51 }
 0xf1e   : > { %v3925_v59 = vpop.f32.mrf.mxu0 }
 0xf1f   : > { %v10305_v15 = vmul.f32 0.17677669, %v3925_v59 }
 0xf20   : > { %v10317_v45 = vpop.f32.mrf.mxu3 }
 0xf21   : > { %v3956_v35 = vsel %vm590_vm0, %v10305_v15, -inf  ;;  %12206 = vst [vmem:[#allocation29_spill] sm:$0xff] %v10317_v45 }
 0xf22   : > { %3957 = vmax.xlane.f32.xlu1 %v3956_v35 }
 0xf28   : > { %v10319_v21 = vpop.f32.mrf.mxu3 }
 0xf29   : > { %12207 = vst [vmem:[#allocation13_spill] sm:$0xff] %v10319_v21 }
 0xf2b   : > { %v4221_v37 = vpop.f32.mrf.mxu0 }
 0xf2c   : > { %v10309_v32 = vmul.f32 0.17677669, %v4221_v37 }
 0xf2e   : > { %v4249_v18 = vsel %vm590_vm0, %v10309_v32, -inf }
 0xf2f   : > { %4250 = vmax.xlane.f32.xlu1 %v4249_v18 }
 0xf30   : > { %v10321_v23 = vpop.f32.mrf.mxu3 }
 0xf31   : > { %12208 = vst [vmem:[#allocation16_spill] sm:$0xff] %v10321_v23 }
 0xf33   : > { %v4223_v49 = vpop.f32.mrf.mxu0 }
 0xf34   : > { %v10331_v5 = vmul.f32 0.17677669, %v4223_v49 }
 0xf38   : > { %v10323_v10 = vpop.f32.mrf.mxu3 }
 0xf39   : > { %12209 = vst [vmem:[#allocation19_spill] sm:$0xff] %v10323_v10 }
 0xf3b   : > { %v4226_v52 = vpop.f32.mrf.mxu0 }
 0xf40   : > { %v10329_v24 = vpop.f32.mrf.mxu3 }
 0xf41   : > { %12210 = vst [vmem:[#allocation8_spill] sm:$0xff] %v10329_v24 }
 0xf43   : > { %v4228_v55 = vpop.f32.mrf.mxu0 }
 0xf44   : > { %v10339_v35 = vmul.f32 0.17677669, %v4228_v55 }
 0xf48   : > { %v10341_v37 = vpop.f32.mrf.mxu3 }
 0xf49   : > { %12211 = vst [vmem:[#allocation26_spill] sm:$0xff] %v10341_v37 }
 0xf6d   : > { %v3943_v46 = vpop.xlane.xlu2 %3942 }
 0xf6e   : > { %v3965_v33 = vsub.f32 %v3933_v40, %v3943_v46  ;;  %v4231_v40 = vpop.f32.mrf.mxu0 }
 0xf70   : > { %v3973_v47 = vmul.f32 1.442695, %v3965_v33 }
 0xf72   : > { %7756 = vpow2.f32 %v3973_v47  ;;  %v4258_v47 = vsel %vm590_vm0, %v10339_v35, -inf }
 0xf75   : > { %v3946_v31 = vpop.xlane.xlu0 %3945 }
 0xf76   : > { %v3966_v36 = vsub.f32 %v3934_v7, %v3946_v31  ;;  %v4252_v7 = vsel %vm590_vm0, %v10331_v5, -inf  ;;  %v4233_v46 = vpop.f32.mrf.mxu0 }
 0xf78   : > { %v10325_v25 = vpop.eup %7756  ;;  %v3975_v62 = vmul.f32 1.442695, %v3966_v36  ;;  %v10349_v36 = vmul.f32 0.17677669, %v4233_v46 }
 0xf79   : > { %v3989_v28 = vsel %vm590_vm0, %v10325_v25, 0.0 }
 0xf7a   : > { %7758 = vpow2.f32 %v3975_v62  ;;  %3990 = vadd.xlane.f32.xlu2 %v3989_v28  ;;  %v10351_v28 = vpop.f32.mrf.mxu3 }
 0xf7b   : > { %12212 = vst [vmem:[#allocation6_spill] sm:$0xff] %v10351_v28 }
 0xf7d   : > { %v3949_v12 = vpop.xlane.xlu1 %3948 }
 0xf7e   : > { %v3967_v13 = vsub.f32 %v3935_v14, %v3949_v12 }
 0xf80   : > { %v10333_v53 = vpop.eup %7758  ;;  %v3977_v51 = vmul.f32 1.442695, %v3967_v13  ;;  %v4236_v13 = vpop.f32.mrf.mxu0 }
 0xf81   : > { %v3992_v59 = vsel %vm590_vm0, %v10333_v53, 0.0 }
 0xf82   : > { %7760 = vpow2.f32 %v3977_v51  ;;  %4253 = vmax.xlane.f32.xlu2 %v4252_v7  ;;  %3993 = vadd.xlane.f32.xlu0 %v3992_v59  ;;  %v4264_v7 = vsel %vm590_vm0, %v10349_v36, -inf  ;;  %v10359_v59 = vmul.f32 0.17677669, %v4226_v52 }
 0xf85   : > { %v3952_v18 = vpop.xlane.xlu2 %3951 }
 0xf86   : > { %v3968_v49 = vsub.f32 %v3936_v0, %v3952_v18  ;;  %v10361_v18 = vmul.f32 0.17677669, %v4236_v13 }
 0xf88   : > { %v10343_v14 = vpop.eup %7760  ;;  %v3979_v33 = vmul.f32 1.442695, %v3968_v49 }
 0xf89   : > { %v3995_v31 = vsel %vm590_vm0, %v10343_v14, 0.0 }
 0xf8a   : > { %7762 = vpow2.f32 %v3979_v33  ;;  %4259 = vmax.xlane.f32.xlu2 %v4258_v47  ;;  %3996 = vadd.xlane.f32.xlu0 %v3995_v31  ;;  %v10366_v47 = vpop.f32.mrf.mxu3  ;;  %v4255_v31 = vsel %vm590_vm0, %v10359_v59, -inf }
 0xf8b   : > { %12213 = vst [vmem:[#allocation11_spill] sm:$0xff] %v10366_v47 }
 0xf8d   : > { %v3955_v55 = vpop.xlane.xlu0 %3954 }
 0xf8e   : > { %v3969_v62 = vsub.f32 %v3937_v34, %v3955_v55  ;;  %v4267_v55 = vsel %vm590_vm0, %v10361_v18, -inf }
 0xf90   : > { %v10353_v0 = vpop.eup %7762  ;;  %v3981_v12 = vmul.f32 1.442695, %v3969_v62  ;;  %v4238_v62 = vpop.f32.mrf.mxu0 }
 0xf91   : > { %v3998_v51 = vsel %vm590_vm0, %v10353_v0, 0.0 }
 0xf92   : > { %7764 = vpow2.f32 %v3981_v12  ;;  %3999 = vadd.xlane.f32.xlu1 %v3998_v51  ;;  %4265 = vmax.xlane.f32.xlu2 %v4264_v7 }
 0xf95   : > { %v3958_v34 = vpop.xlane.xlu1 %3957 }
 0xf96   : > { %v3970_v49 = vsub.f32 %v10305_v15, %v3958_v34  ;;  %v10374_v15 = vmul.f32 0.17677669, %v4238_v62  ;;  %v4496_v34 = vpop.f32.mrf.mxu3 }
 0xf97   : > { %v10391_v47 = vmul.f32 0.17677669, %v4496_v34 }
 0xf98   : > { %v10364_v46 = vpop.eup %7764  ;;  %v3983_v33 = vmul.f32 1.442695, %v3970_v49  ;;  %v4270_v7 = vsel %vm590_vm0, %v10374_v15, -inf }
 0xf99   : > { %v4001_v52 = vsel %vm590_vm0, %v10364_v46, 0.0 }
 0xf9a   : > { %7766 = vpow2.f32 %v3983_v33  ;;  %4256 = vmax.xlane.f32.xlu1 %v4255_v31  ;;  %4268 = vmax.xlane.f32.xlu2 %v4267_v55  ;;  %v10383_v33 = vmul.f32 0.17677669, %v4231_v40 }
 0xf9b   : > { %4002 = vadd.xlane.f32.xlu0 %v4001_v52 }
 0xf9c   : > { %v4261_v55 = vsel %vm590_vm0, %v10383_v33, -inf }
 0xf9e   : > { %v4498_v62 = vpop.f32.mrf.mxu3 }
 0xfa0   : > { %v10376_v12 = vpop.eup %7766 }
 0xfa1   : > { %v4004_v13 = vsel %vm590_vm0, %v10376_v12, 0.0 }
 0xfa2   : > { %v4251_v51 = vpop.xlane.xlu1 %4250  ;;  %4005 = vadd.xlane.f32.xlu1 %v4004_v13 }
 0xfa3   : > { %v4273_v49 = vsub.f32 %v10309_v32, %v4251_v51  ;;  %4271 = vmax.xlane.f32.xlu0 %v4270_v7  ;;  %v4524_v32 = vsel %vm590_vm0, %v10391_v47, -inf }
 0xfa5   : > { %v4281_v31 = vmul.f32 1.442695, %v4273_v49 }
 0xfa6   : > { %v4501_v40 = vpop.f32.mrf.mxu3 }
 0xfa7   : > { %7768 = vpow2.f32 %v4281_v31  ;;  %v10395_v51 = vmul.f32 0.17677669, %v4501_v40 }
 0xfa9   : > { %v4530_v7 = vsel %vm590_vm0, %v10395_v51, -inf }
 0xfaa   : > { %4262 = vmax.xlane.f32.xlu1 %v4261_v55 }
 0xfad   : > { %v10387_v52 = vpop.eup %7768 }
 0xfae   : > { %v4297_v13 = vsel %vm590_vm0, %v10387_v52, 0.0  ;;  %v4503_v49 = vpop.f32.mrf.mxu3 }
 0xfaf   : > { %4298 = vadd.xlane.f32.xlu2 %v4297_v13 }
 0xfb6   : > { %v4506_v34 = vpop.f32.mrf.mxu3 }
 0xfb7   : > { %4525 = vmax.xlane.f32.xlu2 %v4524_v32 }
 0xfbe   : > { %v4508_v31 = vpop.f32.mrf.mxu3 }
 0xfbf   : > { %4531 = vmax.xlane.f32.xlu2 %v4530_v7  ;;  %v10403_v55 = vmul.f32 0.17677669, %v4508_v31 }
 0xfc1   : > { %v4539_v13 = vsel %vm590_vm0, %v10403_v55, -inf }
 0xfc3   : > { %4347 = vrot.lane.b32.xlu1 %v9996_v30, %s8078_s23 }
 0xfd7   : > { %4345 = vrot.lane.b32.xlu2 %v10004_v41, %s8078_s23 }
 0xfed   : > { %v3991_v32 = vpop.xlane.xlu2 %3990  ;;  %4540 = vmax.xlane.f32.xlu1 %v4539_v13 }
 0xfee   : > { %7770 = vrcp.f32 %v3991_v32 }
 0xff4   : > { %v7771_v24 = vpop.eup %7770 }
 0xff5   : > { %v4254_v40 = vpop.xlane.xlu2 %4253  ;;  %v3994_v28 = vpop.xlane.xlu0 %3993  ;;  %v4021_v23 = vmul.f32 %v7771_v24, %v10325_v25  ;;  %v10423_v25 = vmul.f32 0.17677669, %v4503_v49 }
 0xff6   : > { %v4274_v7 = vsub.f32 %v10331_v5, %v4254_v40  ;;  %7772 = vrcp.f32 %v3994_v28  ;;  %v10415_v5 = vmul.f32 0.17677669, %v4498_v62 }
 0xff8   : > { %v4283_v37 = vmul.f32 1.442695, %v4274_v7  ;;  %v4533_v7 = vsel %vm590_vm0, %v10423_v25, -inf }
 0xffa   : > { %7774 = vpow2.f32 %v4283_v37 }
 0xffc   : > { %v7773_v10 = vpop.eup %7772 }
 0xffd   : > { %v4022_v31 = vmul.f32 %v7773_v10, %v10333_v53  ;;  %v3997_v60 = vpop.xlane.xlu0 %3996  ;;  %v10417_v37 = vpop.xlane.xlu2 %4259 }
 0xffe   : > { %7776 = vrcp.f32 %v3997_v60 }
 0xfff   : > { %v4029_v21 = vpack.c.bf16 %v4022_v31, %v4021_v23  ;;  %v4527_v23 = vsel %vm590_vm0, %v10415_v5, -inf  ;;  %v10430_v31 = vmul.f32 0.17677669, %v4506_v34 }
0x1000   : > { %v10410_v45 = vpop.eup %7774 }
0x1001   : > { %7088 = vmatmul.msk.bf16.vlgmr.msrb.gmra.mxu1 %vm590_vm0, %v4029_v21  ;;  %v4300_v13 = vsel %vm590_vm0, %v10410_v45, 0.0 }
0x1002   : > { %4301 = vadd.xlane.f32.xlu0 %v4300_v13 }
0x1004   : > { %v7777_v10 = vpop.eup %7776 }
0x1005   : > { %v4000_v28 = vpop.xlane.xlu1 %3999  ;;  %v4023_v24 = vmul.f32 %v7777_v10, %v10343_v14  ;;  %v4266_v32 = vpop.xlane.xlu2 %4265  ;;  %v4536_v14 = vsel %vm590_vm0, %v10430_v31, -inf }
0x1006   : > { %7778 = vrcp.f32 %v4000_v28  ;;  %4343 = vrot.lane.b32.xlu1 %v10011_v63, %s8078_s23 }
0x100a   : > { %4528 = vmax.xlane.f32.xlu0 %v4527_v23 }
0x100c   : > { %v7779_v21 = vpop.eup %7778 }
0x100d   : > { %v4024_v60 = vmul.f32 %v7779_v21, %v10353_v0  ;;  %v4257_v53 = vpop.xlane.xlu1 %4256  ;;  %v10434_v0 = vpop.xlane.xlu2 %4268 }
0x100e   : > { %v4003_v40 = vpop.xlane.xlu0 %4002 }
0x100f   : > { %v4030_v62 = vpack.c.bf16 %v4024_v60, %v4023_v24  ;;  %7780 = vrcp.f32 %v4003_v40 }
0x1011   : > { %7089 = vmatmul.msk.bf16.gmra.mxu1 %vm590_vm0, %v4030_v62  ;;  %v4275_v62 = vsub.f32 %v10359_v59, %v4257_v53 }
0x1012   : > { %4534 = vmax.xlane.f32.xlu0 %v4533_v7 }
0x1015   : > { %v4006_v13 = vpop.xlane.xlu1 %4005  ;;  %v7781_v49 = vpop.eup %7780 }
0x1016   : > { %7782 = vrcp.f32 %v4006_v13  ;;  %v4025_v23 = vmul.f32 %v7781_v49, %v10364_v46  ;;  %v4285_v46 = vmul.f32 1.442695, %v4275_v62 }
0x101a   : > { %4537 = vmax.xlane.f32.xlu0 %v4536_v14 }
0x101c   : > { %v7783_v28 = vpop.eup %7782 }
0x101d   : > { %v4026_v10 = vmul.f32 %v7783_v28, %v10376_v12  ;;  %v10443_v40 = vpop.xlane.xlu1 %4262  ;;  %v4278_v28 = vsub.f32 %v10349_v36, %v4266_v32  ;;  %v4272_v32 = vpop.xlane.xlu0 %4271 }
0x101e   : > { %v4280_v62 = vsub.f32 %v10374_v15, %v4272_v32 }
0x101f   : > { %v4031_v21 = vpack.c.bf16 %v4026_v10, %v4025_v23  ;;  %v4291_v23 = vmul.f32 1.442695, %v4278_v28 }
0x1021   : > { %7090 = vmatmul.msk.bf16.gmra.mxu1 %vm590_vm0, %v4031_v21 }
0x1022   : > { %v10439_v24 = vpop.xlane.xlu2 %4298 }
0x102a   : > { %v4526_v34 = vpop.xlane.xlu2 %4525 }
0x102b   : > { %v4548_v60 = vsub.f32 %v10391_v47, %v4526_v34 }
0x102d   : > { %v4556_v7 = vmul.f32 1.442695, %v4548_v60 }
0x102e   : > { %4622 = vrot.lane.b32.xlu0 %v9996_v30, %s8079_s25 }
0x102f   : > { %7784 = vpow2.f32 %v4556_v7 }
0x1030   : > { %7786 = vpow2.f32 %v4285_v46  ;;  %v4511_v46 = vpop.f32.mrf.mxu3 }
0x1032   : > { %v4532_v13 = vpop.xlane.xlu2 %4531 }
0x1033   : > { %v4550_v14 = vsub.f32 %v10395_v51, %v4532_v13 }
0x1035   : > { %v10447_v12 = vpop.eup %7784  ;;  %v4348_v49 = vpop.permute.xlu1 %4347  ;;  %v4560_v47 = vmul.f32 1.442695, %v4550_v14  ;;  %v10475_v14 = vmul.f32 0.17677669, %v4511_v46 }
0x1036   : > { %4369 = vmatpush.bf16.msra.mxu1 %v4348_v49  ;;  %4341 = vrot.lane.b32.xlu0 %v10014_v11, %s8078_s23  ;;  %v4572_v59 = vsel %vm590_vm0, %v10447_v12, 0.0  ;;  %v10454_v30 = vpop.eup %7786  ;;  %s6637_s23 = sshll.u32 %s6634_s17, 4  ;;  %s6638_s23 = int_to_ptr.hbm [resolvable:$true] %s6637_s23 }
0x1037   : > { %4573 = vadd.xlane.f32.xlu2 %v4572_v59  ;;  %7788 = vpow2.f32 %v4560_v47  ;;  %v4303_v51 = vsel %vm590_vm0, %v10454_v30, 0.0  ;;  %v4542_v59 = vsel %vm590_vm0, %v10475_v14, -inf }
0x1038   : > { %7790 = vpow2.f32 %v4291_v23  ;;  %v4513_v47 = vpop.f32.mrf.mxu3 }
0x1039   : > { %v10483_v15 = vmul.f32 0.17677669, %v4513_v47 }
0x103a   : > { %v4346_v53 = vpop.permute.xlu2 %4345 }
0x103b   : > { %4370 = vmatpush.bf16.msra.mxu1 %v4346_v53 }
0x103d   : > { %v10461_v10 = vpop.eup %7788 }
0x103e   : > { %4620 = vrot.lane.b32.xlu0 %v10004_v41, %s8079_s25  ;;  %v4578_v21 = vsel %vm590_vm0, %v10461_v10, 0.0  ;;  %v10467_v36 = vpop.eup %7790 }
0x103f   : > { %4304 = vadd.xlane.f32.xlu2 %v4303_v51  ;;  %v4312_v41 = vsel %vm590_vm0, %v10467_v36, 0.0  ;;  %v4545_v51 = vsel %vm590_vm0, %v10483_v15, -inf }
0x1046   : > { %4618 = vrot.lane.b32.xlu0 %v10011_v63, %s8079_s25  ;;  %v4295_v63 = vmul.f32 1.442695, %v4280_v62 }
0x1047   : > { %4579 = vadd.xlane.f32.xlu2 %v4578_v21 }
0x104f   : > { %4313 = vadd.xlane.f32.xlu2 %v4312_v41 }
0x1060   : > { %v4541_v34 = vpop.xlane.xlu1 %4540 }
0x1061   : > { %v4553_v60 = vsub.f32 %v10403_v55, %v4541_v34  ;;  %v4276_v34 = vsub.f32 %v10339_v35, %v10417_v37 }
0x1063   : > { %v4566_v7 = vmul.f32 1.442695, %v4553_v60  ;;  %v4287_v62 = vmul.f32 1.442695, %v4276_v34  ;;  %v4279_v34 = vsub.f32 %v10361_v18, %v10434_v0 }
0x1065   : > { %7792 = vpow2.f32 %v4566_v7 }
0x1066   : > { %7794 = vpow2.f32 %v4295_v63 }
0x106b   : > { %v10473_v13 = vpop.eup %7792 }
0x106c   : > { %v4587_v49 = vsel %vm590_vm0, %v10473_v13, 0.0  ;;  %v10481_v55 = vpop.eup %7794 }
0x106d   : > { %4588 = vadd.xlane.f32.xlu2 %v4587_v49  ;;  %v4318_v53 = vsel %vm590_vm0, %v10481_v55, 0.0 }
0x1070   : > { %4543 = vmax.xlane.f32.xlu0 %v4542_v59 }
0x1075   : > { %4319 = vadd.xlane.f32.xlu2 %v4318_v53  ;;  %v4302_v28 = vpop.xlane.xlu0 %4301 }
0x1078   : > { %v4344_v23 = vpop.permute.xlu1 %4343  ;;  %4546 = vmax.xlane.f32.xlu0 %v4545_v51 }
0x1079   : > { %4371 = vmatpush.bf16.msra.mxu1 %v4344_v23 }
0x107d   : > { %v4529_v21 = vpop.xlane.xlu0 %4528 }
0x107e   : > { %v4549_v41 = vsub.f32 %v10415_v5, %v4529_v21  ;;  %v4066_v32 = vpop.f32.mrf.mxu1 }
0x1080   : > { %v4558_v60 = vmul.f32 1.442695, %v4549_v41 }
0x1082   : > { %7796 = vpow2.f32 %v4558_v60 }
0x1083   : > { %7798 = vpow2.f32 %v4287_v62 }
0x1085   : > { %v4535_v7 = vpop.xlane.xlu0 %4534 }
0x1086   : > { %v4068_v46 = vpop.f32.mrf.mxu1  ;;  %v4551_v59 = vsub.f32 %v10423_v25, %v4535_v7 }
0x1087   : > { %v4086_v63 = vpack.c.bf16 %v4068_v46, %v4066_v32  ;;  %v4277_v46 = vsub.f32 %v10383_v33, %v10443_v40  ;;  %v8008_v33 = vld [vmem:[%s12075_s7 + $0x38] sm:$0xff] }
0x1088   : > { %v10492_v49 = vpop.eup %7796  ;;  %v4562_v47 = vmul.f32 1.442695, %v4551_v59 }
0x1089   : > { %7092 = vmatmul.msk.bf16.vlgmr.msrb.gmra.mxu2 %vm2481_vm14, %v4086_v63  ;;  %v4575_v5 = vsel %vm590_vm0, %v10492_v49, 0.0  ;;  %v10500_v37 = vpop.eup %7798 }
0x108a   : > { %4576 = vadd.xlane.f32.xlu1 %v4575_v5  ;;  %7800 = vpow2.f32 %v4562_v47  ;;  %v4306_v25 = vsel %vm590_vm0, %v10500_v37, 0.0 }
0x108c   : > { %4616 = vrot.lane.b32.xlu0 %v10014_v11, %s8079_s25  ;;  %s8026_s25 = sshra.s32 %s6638_s23, 4  ;;  %s8027_s25 = int_to_ptr.hbm [resolvable:$true] %s8026_s25 }
0x108d   : > { %v4538_v35 = vpop.xlane.xlu0 %4537  ;;  %s8028_s1 = scalar_lea.hbm %s8027_s25, 128  ;;  %p8033_p0 = scmp.lt.s32.totalorder %s8027_s25, %s12083_s15 }
0x108e   : > { %v4071_v53 = vpop.f32.mrf.mxu1  ;;  %v4552_v51 = vsub.f32 %v10430_v31, %v4538_v35  ;;  %v4293_v31 = vmul.f32 1.442695, %v4279_v34  ;;  %v4289_v35 = vmul.f32 1.442695, %v4277_v46  ;;  %v3019_v46 = vadd.f32 %v9952_v3, %v9870_v38  ;;  %p8029_p11 = scmp.ne.s32.totalorder %s8027_s25, %s8028_s1  ;;  %p8034_p1 = scmp.lt.s32.totalorder %s8032_s16, %s8028_s1 }
0x108f   : > { %v3029_v38 = vadd.f32 %v9974_v19, %v9878_v6  ;;  %v4724_v3 = vadd.f32 %v10169_v44, %v9030_v2  ;;  %v4726_v2 = vadd.f32 %v10174_v27, %v9086_v16 }
0x1090   : > { %v4564_v23 = vmul.f32 1.442695, %v4552_v51  ;;  %v10505_v21 = vpop.eup %7800  ;;  %p8030_p12 = pnand %p8029_p11, %p8200_p5  ;;  %p8035_p2 = por %p8034_p1, %p8033_p0 }
0x1091   : > { %v4581_v11 = vsel %vm590_vm0, %v10505_v21, 0.0 }
0x1092   : > { %4307 = vadd.xlane.f32.xlu1 %v4306_v25  ;;  %7802 = vpow2.f32 %v4564_v23  ;;  %p8031_p13 = pneg %p8030_p12 }
0x1093   : > { %7804 = vrcp.f32 %v4302_v28 }
0x1094   : > { %7806 = vrcp.f32 %v10439_v24  ;;  %p8036_p3 = pnand %p8035_p2, %p8031_p13 }
0x1095   : > { %7808 = vpow2.f32 %v4293_v31 }
0x1096   : > { %v4073_v41 = vpop.f32.mrf.mxu1  ;;  %7810 = vpow2.f32 %v4289_v35 }
0x1097   : > { %v4087_v32 = vpack.c.bf16 %v4073_v41, %v4071_v53 }
0x1098   : > { %v10512_v60 = vpop.eup %7802 }
0x1099   : > { %7093 = vmatmul.msk.bf16.gmra.mxu2 %vm2481_vm14, %v4087_v32  ;;  %v4584_v18 = vsel %vm590_vm0, %v10512_v60, 0.0  ;;  %v7805_v0 = vpop.eup %7804 }
0x109a   : > { %4582 = vadd.xlane.f32.xlu1 %v4581_v11  ;;  %v7807_v63 = vpop.eup %7806  ;;  %v4330_v28 = vmul.f32 %v7805_v0, %v10410_v45  ;;  %v8009_v45 = vld [vmem:[%s12075_s7 + $0x30] sm:$0xff]  ;;  %v4089_v11 = vpack.c.bf16 %v10315_v61, %v10313_v54 }
0x109b   : > { %v10519_v59 = vpop.eup %7808  ;;  %v4329_v24 = vmul.f32 %v7807_v63, %v10387_v52  ;;  %v3024_v52 = vadd.f32 %v9968_v50, %v9874_v20  ;;  %v10548_v20 = vld [vmem:[%s12076_s8] ss:$0 sm:$0xff]  ;;  %v4722_v63 = vadd.f32 %v10159_v48, %v8974_v39 }
0x109c   : > { %v4315_v51 = vsel %vm590_vm0, %v10519_v59, 0.0  ;;  %v10535_v23 = vpop.eup %7810 }
0x109d   : > { %v4337_v25 = vpack.c.bf16 %v4330_v28, %v4329_v24  ;;  %v3318_v41 = vadd.f32 %v10046_v56, %v3024_v52  ;;  %v4309_v34 = vsel %vm590_vm0, %v10535_v23, 0.0  ;;  %v3316_v28 = vadd.f32 %v10034_v8, %v3019_v46 }
0x109e   : > { %v4076_v62 = vpop.f32.mrf.mxu1  ;;  %v3320_v8 = vadd.f32 %v10052_v57, %v3029_v38 }
0x109f   : > { %v3605_v32 = vadd.f32 %v10171_v9, %v3318_v41 }
0x10a0   : > { %v4623_v7 = vpop.permute.xlu0 %4622  ;;  %v3607_v24 = vadd.f32 %v10176_v42, %v3320_v8 }
0x10a1   : > { %4644 = vmatpush.bf16.msrb.mxu0 %v4623_v7  ;;  %v4725_v31 = vadd.f32 %v3605_v32, %v9058_v26 }
0x10a2   : > { %4585 = vadd.xlane.f32.xlu1 %v4584_v18  ;;  %v4727_v6 = vadd.f32 %v3607_v24, %v9104_v58  ;;  %v12218_v58 = vld [vmem:[#allocation15_spill] sm:$0xff] }
0x10a3   : > { %v10551_v50 = vadd.f32 %v10548_v20, %v4725_v31  ;;  %v4728_v27 = vadd.f32 %v10179_v4, %v12218_v58 }
0x10a5   : > { %12214 = vst [vmem:[#allocation30_spill] sm:$0xff] %v10551_v50 }
0x10a6   : > { %v4078_v5 = vpop.f32.mrf.mxu1 }
0x10a7   : > { %v4088_v47 = vpack.c.bf16 %v4078_v5, %v4076_v62 }
0x10a8   : > { %v4342_v53 = vpop.permute.xlu0 %4341 }
0x10a9   : > { %7094 = vmatmul.msk.bf16.gmra.mxu2 %vm2481_vm14, %v4088_v47  ;;  %4372 = vmatpush.bf16.msra.mxu1 %v4342_v53  ;;  %v10569_v47 = vadd.f32 %v10548_v20, %v4722_v63 }
0x10aa   : > { %4316 = vadd.xlane.f32.xlu1 %v4315_v51  ;;  %v10582_v51 = vadd.f32 %v10548_v20, %v4724_v3  ;;  %v12220_v3 = vld [vmem:[#allocation5_spill] sm:$0xff] }
0x10ac   : > { %7104 = vmatmul.msk.bf16.vlgmr.msra.gmra.mxu1 %vm590_vm0, %v4337_v25  ;;  %12215 = vst [vmem:[#allocation14_spill] sm:$0xff] %v10582_v51 }
0x10ad   : > { %4691 = vmatpush.bf16.msrb.mxu1 %v8008_v33  ;;  %v10595_v33 = vadd.f32 %v10548_v20, %v4727_v6 }
0x10af   : > { %12216 = vst [vmem:[#allocation18_spill] sm:$0xff] %v10595_v33 }
0x10b0   : > { %v4621_v40 = vpop.permute.xlu0 %4620 }
0x10b1   : > { %4692 = vmatpush.bf16.msrb.mxu1 %v8009_v45  ;;  %4645 = vmatpush.bf16.msrb.mxu0 %v4621_v40  ;;  %v10598_v45 = vadd.f32 %v10548_v20, %v4726_v2 }
0x10b3   : > { %12217 = vst [vmem:[#allocation21_spill] sm:$0xff] %v10598_v45 }
0x10b6   : > { %4310 = vadd.xlane.f32.xlu0 %v4309_v34  ;;  %v10608_v34 = vadd.f32 %v10548_v20, %v4728_v27 }
0x10b8   : > { %v4619_v62 = vpop.permute.xlu0 %4618  ;;  %12219 = vst [vmem:[#allocation27_spill] sm:$0xff] %v10608_v34 }
0x10b9   : > { %7095 = vmatmul.msk.bf16.gmra.mxu2 %vm2481_vm14, %v4089_v11  ;;  %4646 = vmatpush.bf16.msrb.mxu0 %v4619_v62 }
0x10be   : > { %4766 = vadd.xlane.f32.xlu0 %v10551_v50 }
0x10e3   : > { %v4544_v56 = vpop.xlane.xlu0 %4543 }
0x10e4   : > { %v4554_v9 = vsub.f32 %v10475_v14, %v4544_v56  ;;  %v4574_v14 = vpop.xlane.xlu2 %4573 }
0x10e6   : > { %v4568_v54 = vmul.f32 1.442695, %v4554_v9 }
0x10e8   : > { %7812 = vpow2.f32 %v4568_v54 }
0x10eb   : > { %v4547_v26 = vpop.xlane.xlu0 %4546 }
0x10ec   : > { %v4555_v61 = vsub.f32 %v10483_v15, %v4547_v26  ;;  %v3603_v15 = vadd.f32 %v10166_v17, %v3316_v28  ;;  %v4305_v48 = vpop.xlane.xlu2 %4304 }
0x10ee   : > { %v10556_v7 = vpop.eup %7812  ;;  %v4570_v18 = vmul.f32 1.442695, %v4555_v61  ;;  %v4723_v39 = vadd.f32 %v3603_v15, %v9002_v1 }
0x10ef   : > { %v4590_v0 = vsel %vm590_vm0, %v10556_v7, 0.0 }
0x10f0   : > { %7814 = vpow2.f32 %v4570_v18  ;;  %4591 = vadd.xlane.f32.xlu1 %v4590_v0  ;;  %v10585_v25 = vadd.f32 %v10548_v20, %v4723_v39 }
0x10f1   : > { %7816 = vrcp.f32 %v4574_v14 }
0x10f4   : > { %v4580_v52 = vpop.xlane.xlu2 %4579 }
0x10f6   : > { %v10565_v5 = vpop.eup %7814 }
0x10f7   : > { %v4593_v35 = vsel %vm590_vm0, %v10565_v5, 0.0  ;;  %v7817_v1 = vpop.eup %7816 }
0x10f8   : > { %4760 = vadd.xlane.f32.xlu1 %v10569_v47  ;;  %4594 = vadd.xlane.f32.xlu2 %v4593_v35  ;;  %v4604_v57 = vmul.f32 %v7817_v1, %v10447_v12 }
0x10fc   : > { %v4314_v31 = vpop.xlane.xlu2 %4313 }
0x10fd   : > { %v4577_v17 = vpop.xlane.xlu1 %4576 }
0x10fe   : > { %7818 = vrcp.f32 %v4577_v17  ;;  %v4617_v53 = vpop.permute.xlu0 %4616 }
0x10ff   : > { %4647 = vmatpush.bf16.msrb.mxu0 %v4617_v53  ;;  %7820 = vrcp.f32 %v4305_v48 }
0x1100   : > { %4764 = vadd.xlane.f32.xlu1 %v10582_v51  ;;  %4762 = vadd.xlane.f32.xlu2 %v10585_v25 }
0x1104   : > { %v7819_v19 = vpop.eup %7818 }
0x1105   : > { %v4605_v44 = vmul.f32 %v7819_v19, %v10492_v49  ;;  %v4308_v42 = vpop.xlane.xlu1 %4307  ;;  %v7821_v16 = vpop.eup %7820 }
0x1106   : > { %7822 = vrcp.f32 %v4308_v42  ;;  %v4331_v49 = vmul.f32 %v7821_v16, %v10454_v30 }
0x1107   : > { %v4612_v40 = vpack.c.bf16 %v4605_v44, %v4604_v57  ;;  %7824 = vrcp.f32 %v4580_v52  ;;  %v3034_v44 = vadd.f32 %v10006_v29, %v9882_v43 }
0x1108   : > { %4770 = vadd.xlane.f32.xlu1 %v10595_v33  ;;  %4768 = vadd.xlane.f32.xlu2 %v10598_v45 }
0x1109   : > { %7116 = vmatmul.msk.bf16.vlgmr.msrb.gmra.mxu0 %vm590_vm0, %v4612_v40  ;;  %v3322_v52 = vadd.f32 %v10139_v22, %v3034_v44 }
0x110c   : > { %v7823_v12 = vpop.eup %7822 }
0x110d   : > { %v4332_v41 = vmul.f32 %v7823_v12, %v10500_v37  ;;  %v4583_v32 = vpop.xlane.xlu1 %4582  ;;  %v7825_v62 = vpop.eup %7824 }
0x110e   : > { %7826 = vrcp.f32 %v4583_v32  ;;  %v4606_v4 = vmul.f32 %v7825_v62, %v10461_v10  ;;  %v4589_v37 = vpop.xlane.xlu2 %4588 }
0x110f   : > { %v4338_v11 = vpack.c.bf16 %v4332_v41, %v4331_v49  ;;  %v12222_v49 = vld [vmem:[#allocation7_spill] sm:$0xff] }
0x1110   : > { %4772 = vadd.xlane.f32.xlu1 %v10608_v34 }
0x1111   : > { %7105 = vmatmul.msk.bf16.gmra.mxu1 %vm590_vm0, %v4338_v11 }
0x1114   : > { %v7827_v56 = vpop.eup %7826 }
0x1115   : > { %v4607_v9 = vmul.f32 %v7827_v56, %v10505_v21  ;;  %v4586_v30 = vpop.xlane.xlu1 %4585 }
0x1116   : > { %7828 = vrcp.f32 %v4586_v30  ;;  %v4320_v17 = vpop.xlane.xlu2 %4319 }
0x1117   : > { %v4613_v54 = vpack.c.bf16 %v4607_v9, %v4606_v4  ;;  %7830 = vrcp.f32 %v4589_v37 }
0x1118   : > { %7832 = vrcp.f32 %v4314_v31 }
0x1119   : > { %7117 = vmatmul.msk.bf16.gmra.mxu0 %vm590_vm0, %v4613_v54 }
0x111c   : > { %v7829_v26 = vpop.eup %7828 }
0x111d   : > { %v7831_v61 = vpop.eup %7830  ;;  %v4608_v18 = vmul.f32 %v7829_v26, %v10512_v60  ;;  %v4317_v8 = vpop.xlane.xlu1 %4316 }
0x111e   : > { %v4609_v0 = vmul.f32 %v7831_v61, %v10473_v13  ;;  %v7833_v21 = vpop.eup %7832 }
0x111f   : > { %v4334_v28 = vmul.f32 %v7833_v21, %v10467_v36 }
0x1120   : > { %v4614_v46 = vpack.c.bf16 %v4609_v0, %v4608_v18 }
0x1129   : > { %v4374_v63 = vpop.f32.mrf.mxu1  ;;  %7118 = vmatmul.msk.bf16.gmra.mxu0 %vm590_vm0, %v4614_v46  ;;  %v4311_v10 = vpop.xlane.xlu0 %4310 }
0x112a   : > { %7834 = vrcp.f32 %v4311_v10 }
0x112b   : > { %7836 = vrcp.f32 %v4317_v8 }
0x112c   : > { %7838 = vrcp.f32 %v4320_v17 }
0x1130   : > { %v7835_v14 = vpop.eup %7834 }
0x1131   : > { %v4333_v15 = vmul.f32 %v7835_v14, %v10535_v23  ;;  %v4376_v35 = vpop.f32.mrf.mxu1  ;;  %v4767_v38 = vpop.xlane.xlu0 %4766 }
0x1132   : > { %v4394_v39 = vpack.c.bf16 %v4376_v35, %v4374_v63  ;;  %v4795_v60 = vmul.f32 %v4767_v38, %v12220_v3  ;;  %v7837_v23 = vpop.eup %7836 }
0x1133   : > { %v4339_v13 = vpack.c.bf16 %v4334_v28, %v4333_v15  ;;  %v7839_v24 = vpop.eup %7838  ;;  %v4335_v53 = vmul.f32 %v7837_v23, %v10519_v59 }
0x1134   : > { %v10622_v48 = vsub.f32 %v10551_v50, %v4795_v60  ;;  %7108 = vmatmul.msk.bf16.vlgmr.msra.gmra.mxu2 %vm2481_vm14, %v4394_v39  ;;  %v4336_v1 = vmul.f32 %v7839_v24, %v10481_v55  ;;  %v12221_v55 = vld [vmem:[#allocation10_spill] sm:$0xff]  ;;  %v10671_v39 = vpop.f32.mrf.mxu2  ;;  %v7238_v24 = vld [vmem:[%s12079_s11 + $0xe0] sm:$0xf] }
0x1135   : > { %7106 = vmatmul.msk.bf16.gmra.mxu1 %vm590_vm0, %v4339_v13  ;;  %v3609_v16 = vadd.f32 %v12221_v55, %v3322_v52  ;;  %v7248_v55 = vld [vmem:[%s12079_s11 + $0xf8] sm:$0xf0] }
0x1136   : > { %v4827_v36 = vmul.f32 %v10622_v48, %v10622_v48  ;;  %v4340_v2 = vpack.c.bf16 %v4336_v1, %v4335_v53  ;;  %v7457_v53 = vld [vmem:[%s12079_s11 + $0xec] sm:$0xf0]  ;;  %v7455_v1 = vld [vmem:[%s12079_s11 + $0xe4] sm:$0xf] }
0x1137   : > { %v4729_v41 = vadd.f32 %v3609_v16, %v12222_v49  ;;  %v7230_v49 = vld [vmem:[%s12079_s11 + $0xc8] sm:$0xf] }
0x1138   : > { %4846 = vadd.xlane.f32.xlu1 %v4827_v36 }
0x1139   : > { %v10651_v56 = vadd.f32 %v10548_v20, %v4729_v41  ;;  %v7454_v41 = vld [vmem:[%s12079_s11 + $0xd4] sm:$0xf0] }
0x113b   : > { %12223 = vst [vmem:[#allocation31_spill] sm:$0xff] %v10651_v56 }
0x113c   : > { %v10674_v17 = vpop.f32.mrf.mxu2 }
0x1144   : > { %v10695_v44 = vpop.f32.mrf.mxu2 }
0x1145   : > { %7107 = vmatmul.msk.bf16.gmra.mxu1 %vm590_vm0, %v4340_v2  ;;  %v7239_v2 = vor.u32 %v7457_v53, %v7238_v24  ;;  %v7444_v53 = vld [vmem:[%s12079_s11 + $0x8c] sm:$0xf] }
0x1147   : > { %5328 = vmatpush.bf16.msrb.mxu2 %v7239_v2 }
0x1163   : > { %v4592_v6 = vpop.xlane.xlu1 %4591 }
0x1164   : > { %7840 = vrcp.f32 %v4592_v6  ;;  %v7240_v6 = vld [vmem:[%s12079_s11 + $0xf0] sm:$0xf0] }
0x116a   : > { %v7841_v59 = vpop.eup %7840 }
0x116b   : > { %v4761_v19 = vpop.xlane.xlu1 %4760  ;;  %v4595_v57 = vpop.xlane.xlu2 %4594  ;;  %v4610_v12 = vmul.f32 %v7841_v59, %v10556_v7  ;;  %v7456_v59 = vld [vmem:[%s12079_s11 + $0xec] sm:$0xf] }
0x116c   : > { %v4792_v42 = vmul.f32 %v4761_v19, %v12220_v3  ;;  %7842 = vrcp.f32 %v4595_v57  ;;  %v7246_v19 = vld [vmem:[%s12079_s11 + $0xe8] sm:$0xf]  ;;  %v7458_v57 = vld [vmem:[%s12079_s11 + $0xf4] sm:$0xf0]  ;;  %v7251_v16 = vor.u32 %v7456_v59, %v7248_v55  ;;  %v7176_v59 = vld [vmem:[%s12079_s11 + $0x70] sm:$0xf0] }
0x116d   : > { %v7247_v52 = vor.u32 %v7458_v57, %v7246_v19  ;;  %v7441_v19 = vld [vmem:[%s12079_s11 + $0x6c] sm:$0xf0]  ;;  %v7439_v57 = vld [vmem:[%s12079_s11 + $0x64] sm:$0xf]  ;;  %v7182_v55 = vld [vmem:[%s12079_s11 + $0x68] sm:$0xf] }
0x116e   : > { %v10636_v40 = vsub.f32 %v10569_v47, %v4792_v42  ;;  %v7243_v42 = vor.u32 %v7455_v1, %v7240_v6  ;;  %5475 = vmatpush.bf16.msra.mxu1 %v7251_v16  ;;  %v7200_v1 = vld [vmem:[%s12079_s11 + $0x98] sm:$0xf0]  ;;  %v7174_v6 = vld [vmem:[%s12079_s11 + $0x60] sm:$0xf]  ;;  %v7442_v16 = vld [vmem:[%s12079_s11 + $0x74] sm:$0xf0] }
0x116f   : > { %5426 = vmatpush.bf16.msra.mxu0 %v7247_v52  ;;  %v7203_v2 = vor.u32 %v7444_v53, %v7200_v1  ;;  %v7175_v52 = vor.u32 %v7441_v19, %v7174_v6  ;;  %v7429_v6 = vld [vmem:[%s12079_s11 + $0xc] sm:$0xf0] }
0x1170   : > { %v4824_v58 = vmul.f32 %v10636_v40, %v10636_v40  ;;  %5377 = vmatpush.bf16.msra.mxu3 %v7243_v42 }
0x1172   : > { %v7843_v27 = vpop.eup %7842  ;;  %4840 = vadd.xlane.f32.xlu0 %v4824_v58  ;;  %v7222_v58 = vld [vmem:[%s12079_s11 + $0xc0] sm:$0xf] }
0x1173   : > { %v4611_v43 = vmul.f32 %v7843_v27, %v10565_v5  ;;  %v4763_v29 = vpop.xlane.xlu2 %4762  ;;  %v4765_v32 = vpop.xlane.xlu1 %4764  ;;  %v7453_v27 = vld [vmem:[%s12079_s11 + $0xcc] sm:$0xf0] }
0x1174   : > { %v4793_v22 = vmul.f32 %v4763_v29, %v12220_v3  ;;  %v4794_v62 = vmul.f32 %v4765_v32, %v12220_v3  ;;  %v7224_v29 = vld [vmem:[%s12079_s11 + $0xd0] sm:$0xf0]  ;;  %v7231_v32 = vor.u32 %v7454_v41, %v7230_v49  ;;  %v7158_v49 = vld [vmem:[%s12079_s11 + $0x40] sm:$0xf]  ;;  %v7437_v41 = vld [vmem:[%s12079_s11 + $0x4c] sm:$0xf0] }
0x1175   : > { %v4615_v11 = vpack.c.bf16 %v4611_v43, %v4610_v12  ;;  %v7451_v12 = vld [vmem:[%s12079_s11 + $0xc4] sm:$0xf]  ;;  %v7223_v43 = vor.u32 %v7453_v27, %v7222_v58  ;;  %v7179_v58 = vor.u32 %v7439_v57, %v7176_v59  ;;  %v7183_v27 = vor.u32 %v7442_v16, %v7182_v55  ;;  %v7134_v59 = vld [vmem:[%s12079_s11 + $0x8] sm:$0xf]  ;;  %v7430_v16 = vld [vmem:[%s12079_s11 + $0x14] sm:$0xf0] }
0x1176   : > { %v10646_v31 = vsub.f32 %v10585_v25, %v4793_v22  ;;  %v10657_v4 = vsub.f32 %v10582_v51, %v4794_v62  ;;  %v7227_v22 = vor.u32 %v7451_v12, %v7224_v29  ;;  %v7452_v62 = vld [vmem:[%s12079_s11 + $0xcc] sm:$0xf]  ;;  %5427 = vmatpush.bf16.msra.mxu0 %v7231_v32  ;;  %v7159_v32 = vor.u32 %v7437_v41, %v7158_v49  ;;  %v7427_v57 = vld [vmem:[%s12079_s11 + $0x4] sm:$0xf] }
0x1177   : > { %7119 = vmatmul.msk.bf16.gmra.mxu0 %vm590_vm0, %v4615_v11  ;;  %5329 = vmatpush.bf16.msrb.mxu2 %v7223_v43  ;;  %v7440_v12 = vld [vmem:[%s12079_s11 + $0x6c] sm:$0xf]  ;;  %v7184_v43 = vld [vmem:[%s12079_s11 + $0x78] sm:$0xf0] }
0x1178   : > { %v4825_v7 = vmul.f32 %v10646_v31, %v10646_v31  ;;  %v4826_v54 = vmul.f32 %v10657_v4, %v10657_v4  ;;  %5378 = vmatpush.bf16.msra.mxu3 %v7227_v22  ;;  %v7187_v29 = vor.u32 %v7440_v12, %v7184_v43  ;;  %v7435_v22 = vld [vmem:[%s12079_s11 + $0x44] sm:$0xf]  ;;  %v7136_v12 = vld [vmem:[%s12079_s11 + $0x18] sm:$0xf0] }
0x117a   : > { %4774 = vadd.xlane.f32.xlu0 %v10651_v56  ;;  %4842 = vadd.xlane.f32.xlu2 %v4825_v7  ;;  %v7232_v7 = vld [vmem:[%s12079_s11 + $0xd8] sm:$0xf0] }
0x117b   : > { %v4769_v5 = vpop.xlane.xlu2 %4768  ;;  %v10721_v11 = vpop.xlane.xlu1 %4770 }
0x117c   : > { %v4796_v9 = vmul.f32 %v4769_v5, %v12220_v3  ;;  %v7235_v5 = vor.u32 %v7452_v62, %v7232_v7  ;;  %v7160_v62 = vld [vmem:[%s12079_s11 + $0x50] sm:$0xf0]  ;;  %v7166_v7 = vld [vmem:[%s12079_s11 + $0x48] sm:$0xf] }
0x117e   : > { %v10661_v30 = vsub.f32 %v10598_v45, %v4796_v9  ;;  %v7206_v9 = vld [vmem:[%s12079_s11 + $0xa0] sm:$0xf]  ;;  %5476 = vmatpush.bf16.msra.mxu1 %v7235_v5  ;;  %v7438_v5 = vld [vmem:[%s12079_s11 + $0x54] sm:$0xf0] }
0x1180   : > { %v4828_v37 = vmul.f32 %v10661_v30, %v10661_v30 }
0x1182   : > { %4844 = vadd.xlane.f32.xlu2 %v4826_v54  ;;  %4848 = vadd.xlane.f32.xlu1 %v4828_v37  ;;  %v7449_v54 = vld [vmem:[%s12079_s11 + $0xac] sm:$0xf0]  ;;  %v7447_v37 = vld [vmem:[%s12079_s11 + $0xa4] sm:$0xf] }
0x1183   : > { %v10788_v42 = vpop.xlane.xlu1 %4772 }
0x1186   : > { %v4649_v26 = vpop.f32.mrf.mxu0 }
0x118e   : > { %v4379_v61 = vpop.f32.mrf.mxu1  ;;  %v4651_v18 = vpop.f32.mrf.mxu0 }
0x118f   : > { %v4669_v0 = vpack.c.bf16 %v4651_v18, %v4649_v26  ;;  %v7207_v26 = vor.u32 %v7449_v54, %v7206_v9  ;;  %v7214_v18 = vld [vmem:[%s12079_s11 + $0xa8] sm:$0xf]  ;;  %v7163_v54 = vor.u32 %v7435_v22, %v7160_v62 }
0x1191   : > { %7120 = vmatmul.msk.bf16.vlgmr.msrb.gmra.mxu1 %vm2481_vm14, %v4669_v0  ;;  %v7450_v0 = vld [vmem:[%s12079_s11 + $0xb4] sm:$0xf0]  ;;  %5330 = vmatpush.bf16.msrb.mxu2 %v7207_v26  ;;  %v7436_v26 = vld [vmem:[%s12079_s11 + $0x4c] sm:$0xf] }
0x1196   : > { %v4381_v46 = vpop.f32.mrf.mxu1  ;;  %v4654_v63 = vpop.f32.mrf.mxu0 }
0x1197   : > { %v4395_v10 = vpack.c.bf16 %v4381_v46, %v4379_v61  ;;  %v7208_v61 = vld [vmem:[%s12079_s11 + $0xb0] sm:$0xf0] }
0x1198   : > { %v7211_v46 = vor.u32 %v7447_v37, %v7208_v61  ;;  %v7167_v37 = vor.u32 %v7438_v5, %v7166_v7  ;;  %v7168_v61 = vld [vmem:[%s12079_s11 + $0x58] sm:$0xf0] }
0x1199   : > { %7109 = vmatmul.msk.bf16.gmra.mxu2 %vm2481_vm14, %v4395_v10  ;;  %v7448_v10 = vld [vmem:[%s12079_s11 + $0xac] sm:$0xf] }
0x119a   : > { %5379 = vmatpush.bf16.msra.mxu3 %v7211_v46  ;;  %v7433_v46 = vld [vmem:[%s12079_s11 + $0x2c] sm:$0xf0] }
0x119e   : > { %v4656_v21 = vpop.f32.mrf.mxu0 }
0x119f   : > { %v4670_v14 = vpack.c.bf16 %v4656_v21, %v4654_v63  ;;  %v7215_v63 = vor.u32 %v7450_v0, %v7214_v18  ;;  %v7216_v21 = vld [vmem:[%s12079_s11 + $0xb8] sm:$0xf0]  ;;  %v7171_v18 = vor.u32 %v7436_v26, %v7168_v61  ;;  %v7142_v0 = vld [vmem:[%s12079_s11 + $0x20] sm:$0xf] }
0x11a1   : > { %7121 = vmatmul.msk.bf16.gmra.mxu1 %vm2481_vm14, %v4670_v14  ;;  %v10753_v14 = vpop.f32.mrf.mxu2  ;;  %5428 = vmatpush.bf16.msra.mxu0 %v7215_v63  ;;  %v7431_v63 = vld [vmem:[%s12079_s11 + $0x24] sm:$0xf] }
0x11a6   : > { %v4659_v28 = vpop.f32.mrf.mxu0 }
0x11a9   : > { %v10823_v9 = vpop.f32.mrf.mxu2 }
0x11ae   : > { %v4661_v15 = vpop.f32.mrf.mxu0 }
0x11af   : > { %v4671_v35 = vpack.c.bf16 %v4661_v15, %v4659_v28  ;;  %v7219_v28 = vor.u32 %v7448_v10, %v7216_v21  ;;  %v7190_v15 = vld [vmem:[%s12079_s11 + $0x80] sm:$0xf]  ;;  %v4847_v10 = vpop.xlane.xlu1 %4846 }
0x11b1   : > { %7122 = vmatmul.msk.bf16.gmra.mxu1 %vm2481_vm14, %v4671_v35  ;;  %v7445_v35 = vld [vmem:[%s12079_s11 + $0x8c] sm:$0xf0]  ;;  %v10881_v43 = vpop.f32.mrf.mxu2 }
0x11b2   : > { %v4384_v38 = vpop.f32.mrf.mxu1  ;;  %5477 = vmatpush.bf16.msra.mxu1 %v7219_v28  ;;  %v7143_v28 = vor.u32 %v7433_v46, %v7142_v0 }
0x11b6   : > { %5478 = vmatpush.bf16.msra.mxu1 %v7203_v2  ;;  %v7126_v2 = vld [vmem:[%s12079_s11] sm:$0xf] }
0x11b7   : > { %v7127_v19 = vor.u32 %v7429_v6, %v7126_v2 }
0x11ba   : > { %v4386_v60 = vpop.f32.mrf.mxu1  ;;  %5479 = vmatpush.bf16.msra.mxu1 %v7187_v29 }
0x11bb   : > { %v4396_v8 = vpack.c.bf16 %v4386_v60, %v4384_v38  ;;  %v7443_v38 = vld [vmem:[%s12079_s11 + $0x84] sm:$0xf]  ;;  %v7191_v60 = vor.u32 %v7445_v35, %v7190_v15  ;;  %v7144_v15 = vld [vmem:[%s12079_s11 + $0x30] sm:$0xf0]  ;;  %v7150_v35 = vld [vmem:[%s12079_s11 + $0x28] sm:$0xf] }
0x11bd   : > { %7110 = vmatmul.msk.bf16.gmra.mxu2 %vm2481_vm14, %v4396_v8  ;;  %v7192_v8 = vld [vmem:[%s12079_s11 + $0x90] sm:$0xf0] }
0x11be   : > { %5331 = vmatpush.bf16.msrb.mxu2 %v7191_v60  ;;  %5480 = vmatpush.bf16.msra.mxu1 %v7171_v18  ;;  %v10889_v18 = vpop.f32.mrf.mxu2 }
0x11c2   : > { %v4389_v13 = vpop.f32.mrf.mxu1  ;;  %5332 = vmatpush.bf16.msrb.mxu2 %v7175_v52  ;;  %v7128_v52 = vld [vmem:[%s12079_s11 + $0x10] sm:$0xf0] }
0x11c3   : > { %v7131_v55 = vor.u32 %v7427_v57, %v7128_v52  ;;  %v10902_v57 = vld [vmem:[%s12077_s9] ss:$0 sm:$0xff] }
0x11c6   : > { %5333 = vmatpush.bf16.msrb.mxu2 %v7159_v32 }
0x11ca   : > { %v4391_v36 = vpop.f32.mrf.mxu1  ;;  %5334 = vmatpush.bf16.msrb.mxu2 %v7143_v28 }
0x11cb   : > { %v4397_v23 = vpack.c.bf16 %v4391_v36, %v4389_v13  ;;  %v7198_v13 = vld [vmem:[%s12079_s11 + $0x88] sm:$0xf]  ;;  %v7446_v36 = vld [vmem:[%s12079_s11 + $0x94] sm:$0xf0] }
0x11cc   : > { %v7199_v24 = vor.u32 %v7446_v36, %v7198_v13  ;;  %v7432_v36 = vld [vmem:[%s12079_s11 + $0x2c] sm:$0xf] }
0x11cd   : > { %7111 = vmatmul.msk.bf16.gmra.mxu2 %vm2481_vm14, %v4397_v23  ;;  %v7195_v23 = vor.u32 %v7443_v38, %v7192_v8  ;;  %v7434_v38 = vld [vmem:[%s12079_s11 + $0x34] sm:$0xf0]  ;;  %v7147_v8 = vor.u32 %v7431_v63, %v7144_v15 }
0x11ce   : > { %5429 = vmatpush.bf16.msra.mxu0 %v7199_v24  ;;  %v7151_v13 = vor.u32 %v7434_v38, %v7150_v35  ;;  %v4875_v24 = vmul.f32 %v4847_v10, %v12220_v3  ;;  %5335 = vmatpush.bf16.msrb.mxu2 %v7127_v19 }
0x11cf   : > { %5380 = vmatpush.bf16.msra.mxu3 %v7195_v23  ;;  %v7152_v23 = vld [vmem:[%s12079_s11 + $0x38] sm:$0xf0] }
0x11d0   : > { %v7155_v1 = vor.u32 %v7432_v36, %v7152_v23  ;;  %v10883_v29 = vadd.f32 1e-05, %v4875_v24 }
0x11d2   : > { %5430 = vmatpush.bf16.msra.mxu0 %v7183_v27  ;;  %5481 = vmatpush.bf16.msra.mxu1 %v7155_v1  ;;  %v7428_v27 = vld [vmem:[%s12079_s11 + $0xc] sm:$0xf]  ;;  %v10896_v1 = vpop.f32.mrf.mxu2  ;;  %vm4940_vm15 = vweird.f32 %v10883_v29 }
0x11d3   : > { %5381 = vmatpush.bf16.msra.mxu3 %v7179_v58  ;;  %v7135_v58 = vor.u32 %v7430_v16, %v7134_v59  ;;  %v7139_v49 = vor.u32 %v7428_v27, %v7136_v12 }
0x11d6   : > { %5431 = vmatpush.bf16.msra.mxu0 %v7167_v37  ;;  %5482 = vmatpush.bf16.msra.mxu1 %v7139_v49 }
0x11d7   : > { %5382 = vmatpush.bf16.msra.mxu3 %v7163_v54 }
0x11da   : > { %5432 = vmatpush.bf16.msra.mxu0 %v7151_v13 }
0x11db   : > { %5383 = vmatpush.bf16.msra.mxu3 %v7147_v8 }
0x11de   : > { %5433 = vmatpush.bf16.msra.mxu0 %v7135_v58 }
0x11df   : > { %5384 = vmatpush.bf16.msra.mxu3 %v7131_v55 }
0x11e5   : > { %v4841_v21 = vpop.xlane.xlu0 %4840 }
0x11e6   : > { %v4872_v60 = vmul.f32 %v4841_v21, %v12220_v3 }
0x11e8   : > { %v4888_v53 = vadd.f32 1e-05, %v4872_v60 }
0x11ea   : > { %7844 = vrsqrt.f32 %v4888_v53  ;;  %vm4910_vm6 = vweird.f32 %v4888_v53 }
0x11eb   : > { %7846 = vrsqrt.f32 %v10883_v29 }
0x11ed   : > { %v4843_v41 = vpop.xlane.xlu2 %4842 }
0x11ee   : > { %v4873_v22 = vmul.f32 %v4843_v41, %v12220_v3  ;;  %v4419_v41 = vpop.f32.mrf.mxu2 }
0x11f0   : > { %v7845_v32 = vpop.eup %7844  ;;  %v4889_v62 = vadd.f32 1e-05, %v4873_v22 }
0x11f1   : > { %v4905_v7 = vmul.f32 %v7845_v32, %v4888_v53  ;;  %v10887_v61 = vpop.eup %7846  ;;  %vm4911_vm0 = vweird.f32 %v7845_v32 }
0x11f2   : > { %7848 = vrsqrt.f32 %v4889_v62  ;;  %v4935_v21 = vmul.f32 %v10887_v61, %v10883_v29  ;;  %vm4912_vm7 = vmor %vm4910_vm6, %vm4911_vm0  ;;  %vm4920_vm9 = vweird.f32 %v4889_v62  ;;  %vm4941_vm12 = vweird.f32 %v10887_v61 }
0x11f3   : > { %v4906_v5 = vmul.f32 %v7845_v32, %v4905_v7  ;;  %vm4942_vm1 = vmor %vm4940_vm15, %vm4941_vm12 }
0x11f4   : > { %v4664_v54 = vpop.f32.mrf.mxu0  ;;  %v4936_v60 = vmul.f32 %v10887_v61, %v4935_v21 }
0x11f5   : > { %v4907_v37 = vmul.f32 0.5, %v4906_v5  ;;  %v4845_v26 = vpop.xlane.xlu2 %4844  ;;  %v12224_v5 = vld [vmem:[#allocation29_spill] sm:$0xff] }
0x11f6   : > { %v4874_v0 = vmul.f32 %v4845_v26, %v12220_v3  ;;  %v4937_v6 = vmul.f32 0.5, %v4936_v60 }
0x11f7   : > { %v4908_v46 = vsub.f32 1.5, %v4907_v37 }
0x11f8   : > { %v7849_v63 = vpop.eup %7848  ;;  %v4890_v10 = vadd.f32 1e-05, %v4874_v0  ;;  %v4938_v58 = vsub.f32 1.5, %v4937_v6  ;;  %v12229_v6 = vld [vmem:[#allocation16_spill] sm:$0xff] }
0x11f9   : > { %v4909_v28 = vmul.f32 %v7845_v32, %v4908_v46  ;;  %v4915_v15 = vmul.f32 %v7849_v63, %v4889_v62  ;;  %vm4921_vm8 = vweird.f32 %v7849_v63 }
0x11fa   : > { %7850 = vrsqrt.f32 %v4890_v10  ;;  %vm4922_vm10 = vmor %vm4920_vm9, %vm4921_vm8  ;;  %v4939_v62 = vmul.f32 %v10887_v61, %v4938_v58  ;;  %vm4930_vm13 = vweird.f32 %v4890_v10 }
0x11fb   : > { %v4916_v35 = vmul.f32 %v7849_v63, %v4915_v15  ;;  %v4913_v8 = vsel %vm4912_vm7, %v7845_v32, %v4909_v28  ;;  %v12225_v28 = vld [vmem:[#allocation35_spill] sm:$0xff] }
0x11fc   : > { %v4666_v38 = vpop.f32.mrf.mxu0  ;;  %v5064_v2 = vmul.f32 %v4913_v8, %v10636_v40  ;;  %v10909_v40 = vld [vmem:[%s12078_s10] ss:$0 sm:$0xff]  ;;  %v4943_v26 = vsel %vm4942_vm1, %v10887_v61, %v4939_v62  ;;  %v4797_v61 = vmul.f32 %v10721_v11, %v12220_v3 }
0x11fd   : > { %v4917_v13 = vmul.f32 0.5, %v4916_v35  ;;  %v4672_v36 = vpack.c.bf16 %v4666_v38, %v4664_v54  ;;  %v4153_v54 = vadd.f32 %v12224_v5, %v10671_v39  ;;  %v4421_v39 = vpop.f32.mrf.mxu2  ;;  %v12226_v35 = vld [vmem:[#allocation13_spill] sm:$0xff] }
0x11fe   : > { %v5083_v55 = vmul.f32 %v10902_v57, %v5064_v2  ;;  %v4155_v38 = vadd.f32 %v12226_v35, %v10674_v17  ;;  %v12237_v35 = vld [vmem:[#allocation12_spill] sm:$0xff] }
0x11ff   : > { %v4918_v23 = vsub.f32 1.5, %v4917_v13  ;;  %7123 = vmatmul.msk.bf16.gmra.mxu1 %vm2481_vm14, %v4672_v36  ;;  %v4439_v0 = vadd.f32 %v4419_v41, %v4153_v54  ;;  %v10935_v36 = vsub.f32 %v10595_v33, %v4797_v61  ;;  %v12232_v41 = vld [vmem:[#allocation19_spill] sm:$0xff]  ;;  %v12238_v61 = vld [vmem:[#allocation26_spill] sm:$0xff] }
0x1200   : > { %v7851_v24 = vpop.eup %7850  ;;  %v5102_v22 = vadd.f32 %v10909_v40, %v5083_v55  ;;  %v4440_v8 = vadd.f32 %v4421_v39, %v4155_v38 }
0x1201   : > { %v4919_v19 = vmul.f32 %v7849_v63, %v4918_v23  ;;  %v4925_v53 = vmul.f32 %v7851_v24, %v4890_v10  ;;  %vm4931_vm11 = vweird.f32 %v7851_v24  ;;  %v5067_v10 = vmul.f32 %v4943_v26, %v10622_v48 }
0x1202   : > { %vm4932_vm14 = vmor %vm4930_vm13, %vm4931_vm11 }
0x1203   : > { %v4923_v52 = vsel %vm4922_vm10, %v7849_v63, %v4919_v19  ;;  %v4926_v59 = vmul.f32 %v7851_v24, %v4925_v53  ;;  %v4158_v19 = vadd.f32 %v12229_v6, %v10695_v44  ;;  %v4798_v53 = vmul.f32 %v10788_v42, %v12220_v3  ;;  %v4775_v42 = vpop.xlane.xlu0 %4774  ;;  %v12242_v6 = vld [vmem:[#allocation6_spill] sm:$0xff] }
0x1204   : > { %v5065_v16 = vmul.f32 %v4923_v52, %v10646_v31  ;;  %v4829_v52 = vmul.f32 %v10935_v36, %v10935_v36 }
0x1205   : > { %v4927_v27 = vmul.f32 0.5, %v4926_v59  ;;  %v10950_v44 = vsub.f32 %v10608_v34, %v4798_v53  ;;  %v4849_v53 = vpop.xlane.xlu1 %4848 }
0x1206   : > { %v5084_v12 = vmul.f32 %v10902_v57, %v5065_v16 }
0x1207   : > { %v4928_v49 = vsub.f32 1.5, %v4927_v27 }
0x1208   : > { %v5103_v32 = vadd.f32 %v10909_v40, %v5084_v12  ;;  %v12231_v12 = vld [vmem:[#allocation9_spill] sm:$0xff] }
0x1209   : > { %v4929_v31 = vmul.f32 %v7851_v24, %v4928_v49 }
0x120a   : > { %v5118_v7 = vpack.c.bf16 %v5103_v32, %v5102_v22  ;;  %v4160_v22 = vadd.f32 %v12232_v41, %v10753_v14  ;;  %v4830_v32 = vmul.f32 %v10950_v44, %v10950_v44 }
0x120b   : > { %v4933_v37 = vsel %vm4932_vm14, %v7851_v24, %v4929_v31  ;;  %v12228_v24 = vld [vmem:[#allocation36_spill] sm:$0xff]  ;;  %v4799_v31 = vmul.f32 %v4775_v42, %v12220_v3 }
0x120c   : > { %5336 = vmatmul.bf16.vlgmr.msrb.gmra.mxu2 %v5118_v7  ;;  %5385 = vmatmul.bf16.vlgmr.msra.gmra.mxu3 %v5118_v7  ;;  %v5066_v46 = vmul.f32 %v4933_v37, %v10657_v4  ;;  %v5086_v4 = vmul.f32 %v10902_v57, %v5067_v10 }
0x120d   : > { %5434 = vmatmul.bf16.vlgmr.msra.gmra.mxu0 %v5118_v7  ;;  %v10963_v26 = vsub.f32 %v10651_v56, %v4799_v31 }
0x120e   : > { %v4694_v63 = vpop.f32.mrf.mxu1  ;;  %v5085_v29 = vmul.f32 %v10902_v57, %v5066_v46  ;;  %v5105_v17 = vadd.f32 %v10909_v40, %v5086_v4  ;;  %v4165_v4 = vadd.f32 %v12238_v61, %v10881_v43  ;;  %v4168_v43 = vadd.f32 %v12242_v6, %v10889_v18 }
0x120f   : > { %v4714_v21 = vadd.f32 %v4694_v63, %v4439_v0  ;;  %5483 = vmatmul.bf16.vlgmr.msra.gmra.mxu1 %v5118_v7  ;;  %v12234_v0 = vld [vmem:[#allocation28_spill] sm:$0xff]  ;;  %v4831_v63 = vmul.f32 %v10963_v26, %v10963_v26 }
0x1210   : > { %v5104_v13 = vadd.f32 %v10909_v40, %v5085_v29 }
0x1211   : > { %v4730_v15 = vadd.f32 %v4714_v21, %v12225_v28  ;;  %v12236_v21 = vld [vmem:[#allocation8_spill] sm:$0xff] }
0x1212   : > { %v5119_v11 = vpack.c.bf16 %v5105_v17, %v5104_v13  ;;  %v4163_v10 = vadd.f32 %v12236_v21, %v10823_v9  ;;  %v12246_v21 = vld [vmem:[#allocation25_spill] sm:$0xff] }
0x1213   : > { %v10929_v60 = vadd.f32 %v10548_v20, %v4730_v15 }
0x1215   : > { %12227 = vst [vmem:[#allocation33_spill] sm:$0xff] %v10929_v60  ;;  %4776 = vadd.xlane.f32.xlu0 %v10929_v60 }
0x1216   : > { %v4696_v48 = vpop.f32.mrf.mxu1 }
0x1217   : > { %v4715_v23 = vadd.f32 %v4696_v48, %v4440_v8 }
0x1219   : > { %v4731_v2 = vadd.f32 %v4715_v23, %v12228_v24  ;;  %v12240_v24 = vld [vmem:[#allocation32_spill] sm:$0xff] }
0x121b   : > { %v10946_v59 = vadd.f32 %v10548_v20, %v4731_v2 }
0x121c   : > { %v4424_v55 = vpop.f32.mrf.mxu2  ;;  %5341 = vmatmul.bf16.gmra.mxu2 %v5119_v11  ;;  %5390 = vmatmul.bf16.gmra.mxu3 %v5119_v11 }
0x121d   : > { %12230 = vst [vmem:[#allocation34_spill] sm:$0xff] %v10946_v59  ;;  %v4441_v16 = vadd.f32 %v4424_v55, %v4158_v19  ;;  %5439 = vmatmul.bf16.gmra.mxu0 %v5119_v11  ;;  %4850 = vadd.xlane.f32.xlu0 %v4829_v52 }
0x121e   : > { %4778 = vadd.xlane.f32.xlu2 %v10946_v59  ;;  %v4699_v58 = vpop.f32.mrf.mxu1 }
0x121f   : > { %v4716_v27 = vadd.f32 %v4699_v58, %v4441_v16  ;;  %5488 = vmatmul.bf16.gmra.mxu1 %v5119_v11  ;;  %v4876_v16 = vmul.f32 %v4849_v53, %v12220_v3  ;;  %v12243_v58 = vld [vmem:[#allocation17_spill] sm:$0xff] }
0x1221   : > { %v4732_v49 = vadd.f32 %v4716_v27, %v12231_v12  ;;  %v4892_v12 = vadd.f32 1e-05, %v4876_v16 }
0x1223   : > { %v10958_v62 = vadd.f32 %v10548_v20, %v4732_v49  ;;  %7852 = vrsqrt.f32 %v4892_v12  ;;  %vm4950_vm3 = vweird.f32 %v4892_v12 }
0x1224   : > { %v4426_v7 = vpop.f32.mrf.mxu2 }
0x1225   : > { %12233 = vst [vmem:[#allocation20_spill] sm:$0xff] %v10958_v62  ;;  %v4442_v5 = vadd.f32 %v4426_v7, %v4160_v22  ;;  %4852 = vadd.xlane.f32.xlu0 %v4830_v32  ;;  %v12245_v22 = vld [vmem:[#allocation11_spill] sm:$0xff] }
0x1226   : > { %4780 = vadd.xlane.f32.xlu2 %v10958_v62  ;;  %v4701_v54 = vpop.f32.mrf.mxu1  ;;  %v4170_v18 = vadd.f32 %v12245_v22, %v10896_v1 }
0x1227   : > { %v4717_v37 = vadd.f32 %v4701_v54, %v4442_v5 }
0x1229   : > { %v4733_v14 = vadd.f32 %v4717_v37, %v12234_v0  ;;  %v7853_v54 = vpop.eup %7852 }
0x122a   : > { %vm4951_vm2 = vweird.f32 %v7853_v54 }
0x122b   : > { %v10967_v46 = vadd.f32 %v10548_v20, %v4733_v14  ;;  %v4945_v14 = vmul.f32 %v7853_v54, %v4892_v12  ;;  %vm4952_vm5 = vmor %vm4950_vm3, %vm4951_vm2 }
0x122d   : > { %12235 = vst [vmem:[#allocation22_spill] sm:$0xff] %v10967_v46  ;;  %4782 = vadd.xlane.f32.xlu1 %v10967_v46 }
0x122e   : > { %4854 = vadd.xlane.f32.xlu2 %v4831_v63  ;;  %v4704_v28 = vpop.f32.mrf.mxu1 }
0x1236   : > { %v4706_v23 = vpop.f32.mrf.mxu1 }
0x1240   : > { %v4429_v15 = vpop.f32.mrf.mxu2 }
0x1241   : > { %v4443_v39 = vadd.f32 %v4429_v15, %v4163_v10 }
0x1243   : > { %v4718_v29 = vadd.f32 %v4704_v28, %v4443_v39 }
0x1245   : > { %v4734_v38 = vadd.f32 %v4718_v29, %v12237_v35  ;;  %v4946_v29 = vmul.f32 %v7853_v54, %v4945_v14 }
0x1247   : > { %v10978_v8 = vadd.f32 %v10548_v20, %v4734_v38  ;;  %v4947_v61 = vmul.f32 0.5, %v4946_v29 }
0x1248   : > { %v4431_v48 = vpop.f32.mrf.mxu2 }
0x1249   : > { %12239 = vst [vmem:[#allocation23_spill] sm:$0xff] %v10978_v8  ;;  %v4444_v13 = vadd.f32 %v4431_v48, %v4165_v4  ;;  %4784 = vadd.xlane.f32.xlu1 %v10978_v8 }
0x124b   : > { %v4719_v17 = vadd.f32 %v4706_v23, %v4444_v13  ;;  %v4948_v23 = vsub.f32 1.5, %v4947_v61 }
0x124d   : > { %v4735_v9 = vadd.f32 %v4719_v17, %v12240_v24 }
0x124f   : > { %v10983_v2 = vadd.f32 %v10548_v20, %v4735_v9 }
0x1250   : > { %v4434_v11 = vpop.f32.mrf.mxu2 }
0x1251   : > { %12241 = vst [vmem:[#allocation24_spill] sm:$0xff] %v10983_v2  ;;  %4786 = vadd.xlane.f32.xlu0 %v10983_v2  ;;  %v4445_v19 = vadd.f32 %v4434_v11, %v4168_v43  ;;  %v4949_v43 = vmul.f32 %v7853_v54, %v4948_v23 }
0x1258   : > { %v4436_v49 = vpop.f32.mrf.mxu2 }
0x1259   : > { %v4446_v7 = vadd.f32 %v4436_v49, %v4170_v18 }
0x127c   : > { %v4709_v52 = vpop.f32.mrf.mxu1 }
0x127d   : > { %v4720_v55 = vadd.f32 %v4709_v52, %v4445_v19 }
0x127f   : > { %v4736_v27 = vadd.f32 %v4720_v55, %v12243_v58  ;;  %v4953_v55 = vsel %vm4952_vm5, %v7853_v54, %v4949_v43 }
0x1280   : > { %v5068_v22 = vmul.f32 %v4953_v55, %v10661_v30 }
0x1281   : > { %v10991_v42 = vadd.f32 %v10548_v20, %v4736_v27 }
0x1283   : > { %12244 = vst [vmem:[#allocation15_spill] sm:$0xff] %v10991_v42  ;;  %4788 = vadd.xlane.f32.xlu0 %v10991_v42 }
0x1284   : > { %v4711_v31 = vpop.f32.mrf.mxu1 }
0x1285   : > { %v4721_v37 = vadd.f32 %v4711_v31, %v4446_v7 }
0x1287   : > { %v4737_v10 = vadd.f32 %v4721_v37, %v12246_v21 }
0x1288   : > { %v4777_v41 = vpop.xlane.xlu0 %4776 }
0x1289   : > { %v4800_v32 = vmul.f32 %v4777_v41, %v12220_v3  ;;  %v11009_v38 = vadd.f32 %v10548_v20, %v4737_v10 }
0x128b   : > { %v10998_v5 = vsub.f32 %v10929_v60, %v4800_v32  ;;  %12247 = vst [vmem:[#allocation5_spill] sm:$0xff] %v11009_v38 }
0x128d   : > { %v4832_v0 = vmul.f32 %v10998_v5, %v10998_v5 }
0x128f   : > { %4856 = vadd.xlane.f32.xlu2 %v4832_v0  ;;  %v5087_v0 = vmul.f32 %v10902_v57, %v5068_v22 }
0x1290   : > { %v4851_v63 = vpop.xlane.xlu0 %4850 }
0x1291   : > { %v4779_v28 = vpop.xlane.xlu2 %4778  ;;  %v4877_v1 = vmul.f32 %v4851_v63, %v12220_v3  ;;  %v5106_v10 = vadd.f32 %v10909_v40, %v5087_v0 }
0x1292   : > { %v4801_v15 = vmul.f32 %v4779_v28, %v12220_v3 }
0x1293   : > { %v4893_v39 = vadd.f32 1e-05, %v4877_v1 }
0x1294   : > { %v11006_v35 = vsub.f32 %v10946_v59, %v4801_v15 }
0x1295   : > { %7854 = vrsqrt.f32 %v4893_v39  ;;  %vm4960_vm0 = vweird.f32 %v4893_v39 }
0x1296   : > { %v4833_v4 = vmul.f32 %v11006_v35, %v11006_v35 }
0x1297   : > { %4790 = vadd.xlane.f32.xlu2 %v11009_v38 }
0x1298   : > { %4858 = vadd.xlane.f32.xlu1 %v4833_v4  ;;  %v4853_v24 = vpop.xlane.xlu0 %4852 }
0x1299   : > { %v4781_v48 = vpop.xlane.xlu2 %4780  ;;  %v4878_v6 = vmul.f32 %v4853_v24, %v12220_v3 }
0x129a   : > { %v4802_v9 = vmul.f32 %v4781_v48, %v12220_v3 }
0x129b   : > { %v7855_v13 = vpop.eup %7854  ;;  %v4894_v53 = vadd.f32 1e-05, %v4878_v6 }
0x129c   : > { %v4955_v17 = vmul.f32 %v7855_v13, %v4893_v39  ;;  %v11017_v19 = vsub.f32 %v10958_v62, %v4802_v9  ;;  %vm4961_vm4 = vweird.f32 %v7855_v13 }
0x129d   : > { %7856 = vrsqrt.f32 %v4894_v53  ;;  %vm4962_vm6 = vmor %vm4960_vm0, %vm4961_vm4  ;;  %vm4970_vm8 = vweird.f32 %v4894_v53 }
0x129e   : > { %v4956_v11 = vmul.f32 %v7855_v13, %v4955_v17  ;;  %v4834_v49 = vmul.f32 %v11017_v19, %v11017_v19 }
0x12a0   : > { %v4957_v20 = vmul.f32 0.5, %v4956_v11  ;;  %v4783_v58 = vpop.xlane.xlu1 %4782  ;;  %4860 = vadd.xlane.f32.xlu1 %v4834_v49 }
0x12a1   : > { %v4855_v27 = vpop.xlane.xlu2 %4854  ;;  %v4803_v18 = vmul.f32 %v4783_v58, %v12220_v3 }
0x12a2   : > { %v4958_v52 = vsub.f32 1.5, %v4957_v20  ;;  %v4879_v12 = vmul.f32 %v4855_v27, %v12220_v3 }
0x12a3   : > { %v11026_v31 = vsub.f32 %v10967_v46, %v4803_v18  ;;  %v7857_v54 = vpop.eup %7856 }
0x12a4   : > { %v4959_v16 = vmul.f32 %v7855_v13, %v4958_v52  ;;  %v4895_v7 = vadd.f32 1e-05, %v4879_v12  ;;  %v4965_v37 = vmul.f32 %v7857_v54, %v4894_v53  ;;  %vm4971_vm7 = vweird.f32 %v7857_v54 }
0x12a5   : > { %v4835_v14 = vmul.f32 %v11026_v31, %v11026_v31  ;;  %vm4972_vm9 = vmor %vm4970_vm8, %vm4971_vm7 }
0x12a6   : > { %v4963_v41 = vsel %vm4962_vm6, %v7855_v13, %v4959_v16  ;;  %7858 = vrsqrt.f32 %v4895_v7  ;;  %v4966_v30 = vmul.f32 %v7857_v54, %v4965_v37  ;;  %vm4980_vm11 = vweird.f32 %v4895_v7 }
0x12a7   : > { %v5069_v32 = vmul.f32 %v4963_v41, %v10935_v36  ;;  %4862 = vadd.xlane.f32.xlu0 %v4835_v14 }
0x12a8   : > { %v4967_v21 = vmul.f32 0.5, %v4966_v30 }
0x12a9   : > { %v5088_v63 = vmul.f32 %v10902_v57, %v5069_v32 }
0x12aa   : > { %v4968_v1 = vsub.f32 1.5, %v4967_v21 }
0x12ab   : > { %v5107_v36 = vadd.f32 %v10909_v40, %v5088_v63 }
0x12ac   : > { %v7859_v28 = vpop.eup %7858  ;;  %v4969_v29 = vmul.f32 %v7857_v54, %v4968_v1 }
0x12ad   : > { %v5120_v15 = vpack.c.bf16 %v5107_v36, %v5106_v10  ;;  %v4975_v39 = vmul.f32 %v7859_v28, %v4895_v7  ;;  %vm4981_vm10 = vweird.f32 %v7859_v28 }
0x12ae   : > { %v4973_v4 = vsel %vm4972_vm9, %v7857_v54, %v4969_v29  ;;  %vm4982_vm12 = vmor %vm4980_vm11, %vm4981_vm10 }
0x12af   : > { %5346 = vmatmul.bf16.gmra.mxu2 %v5120_v15  ;;  %5395 = vmatmul.bf16.gmra.mxu3 %v5120_v15  ;;  %v4976_v61 = vmul.f32 %v7859_v28, %v4975_v39  ;;  %v5070_v23 = vmul.f32 %v4973_v4, %v10950_v44 }
0x12b0   : > { %5444 = vmatmul.bf16.gmra.mxu0 %v5120_v15  ;;  %5493 = vmatmul.bf16.gmra.mxu1 %v5120_v15 }
0x12b1   : > { %v4977_v48 = vmul.f32 0.5, %v4976_v61  ;;  %v5089_v43 = vmul.f32 %v10902_v57, %v5070_v23 }
0x12b3   : > { %v4978_v13 = vsub.f32 1.5, %v4977_v48  ;;  %v5108_v52 = vadd.f32 %v10909_v40, %v5089_v43 }
0x12b5   : > { %v4979_v17 = vmul.f32 %v7859_v28, %v4978_v13 }
0x12b7   : > { %v4983_v24 = vsel %vm4982_vm12, %v7859_v28, %v4979_v17 }
0x12b8   : > { %v5071_v11 = vmul.f32 %v4983_v24, %v10963_v26 }
0x12ba   : > { %v5090_v53 = vmul.f32 %v10902_v57, %v5071_v11 }
0x12bc   : > { %v4785_v9 = vpop.xlane.xlu1 %4784  ;;  %v5109_v44 = vadd.f32 %v10909_v40, %v5090_v53 }
0x12bd   : > { %v4804_v6 = vmul.f32 %v4785_v9, %v12220_v3 }
0x12be   : > { %v5121_v16 = vpack.c.bf16 %v5109_v44, %v5108_v52 }
0x12bf   : > { %v11039_v20 = vsub.f32 %v10978_v8, %v4804_v6 }
0x12c0   : > { %5351 = vmatmul.bf16.gmra.mxu2 %v5121_v16  ;;  %5400 = vmatmul.bf16.gmra.mxu3 %v5121_v16 }
0x12c1   : > { %v4836_v55 = vmul.f32 %v11039_v20, %v11039_v20  ;;  %5449 = vmatmul.bf16.gmra.mxu0 %v5121_v16  ;;  %5498 = vmatmul.bf16.gmra.mxu1 %v5121_v16 }
0x12c3   : > { %4864 = vadd.xlane.f32.xlu2 %v4836_v55 }
0x12c4   : > { %v4787_v58 = vpop.xlane.xlu0 %4786 }
0x12c5   : > { %v4805_v26 = vmul.f32 %v4787_v58, %v12220_v3 }
0x12c7   : > { %v11048_v27 = vsub.f32 %v10983_v2, %v4805_v26 }
0x12c9   : > { %v4837_v49 = vmul.f32 %v11048_v27, %v11048_v27 }
0x12cb   : > { %4866 = vadd.xlane.f32.xlu1 %v4837_v49 }
0x12f6   : > { %v4789_v41 = vpop.xlane.xlu0 %4788 }
0x12f7   : > { %v4806_v22 = vmul.f32 %v4789_v41, %v12220_v3 }
0x12f9   : > { %v11054_v18 = vsub.f32 %v10991_v42, %v4806_v22 }
0x12fb   : > { %v4838_v12 = vmul.f32 %v11054_v18, %v11054_v18 }
0x12fd   : > { %4868 = vadd.xlane.f32.xlu0 %v4838_v12 }
0x1302   : > { %v4857_v32 = vpop.xlane.xlu2 %4856 }
0x1303   : > { %v4880_v7 = vmul.f32 %v4857_v32, %v12220_v3 }
0x1305   : > { %v4896_v54 = vadd.f32 1e-05, %v4880_v7 }
0x1307   : > { %7860 = vrsqrt.f32 %v4896_v54  ;;  %vm4990_vm14 = vweird.f32 %v4896_v54 }
0x130a   : > { %v4791_v37 = vpop.xlane.xlu2 %4790 }
0x130b   : > { %v4807_v0 = vmul.f32 %v4791_v37, %v12220_v3  ;;  %v4859_v30 = vpop.xlane.xlu1 %4858 }
0x130c   : > { %v4881_v10 = vmul.f32 %v4859_v30, %v12220_v3 }
0x130d   : > { %v7861_v14 = vpop.eup %7860  ;;  %v11061_v63 = vsub.f32 %v11009_v38, %v4807_v0 }
0x130e   : > { %v4985_v21 = vmul.f32 %v7861_v14, %v4896_v54  ;;  %v4897_v1 = vadd.f32 1e-05, %v4881_v10  ;;  %vm4991_vm13 = vweird.f32 %v7861_v14 }
0x130f   : > { %v4839_v36 = vmul.f32 %v11061_v63, %v11061_v63  ;;  %vm4992_vm15 = vmor %vm4990_vm14, %vm4991_vm13 }
0x1310   : > { %v4986_v28 = vmul.f32 %v7861_v14, %v4985_v21  ;;  %7862 = vrsqrt.f32 %v4897_v1  ;;  %vm5000_vm2 = vweird.f32 %v4897_v1 }
0x1311   : > { %4870 = vadd.xlane.f32.xlu2 %v4839_v36 }
0x1312   : > { %v4987_v15 = vmul.f32 0.5, %v4986_v28 }
0x1313   : > { %v4861_v48 = vpop.xlane.xlu1 %4860 }
0x1314   : > { %v4988_v39 = vsub.f32 1.5, %v4987_v15  ;;  %v4882_v23 = vmul.f32 %v4861_v48, %v12220_v3 }
0x1316   : > { %v7863_v29 = vpop.eup %7862  ;;  %v4989_v4 = vmul.f32 %v7861_v14, %v4988_v39  ;;  %v4898_v24 = vadd.f32 1e-05, %v4882_v23 }
0x1317   : > { %v4995_v61 = vmul.f32 %v7863_v29, %v4897_v1  ;;  %vm5001_vm1 = vweird.f32 %v7863_v29 }
0x1318   : > { %v4993_v9 = vsel %vm4992_vm15, %v7861_v14, %v4989_v4  ;;  %7864 = vrsqrt.f32 %v4898_v24  ;;  %vm5002_vm3 = vmor %vm5000_vm2, %vm5001_vm1  ;;  %vm5010_vm5 = vweird.f32 %v4898_v24 }
0x1319   : > { %v4996_v13 = vmul.f32 %v7863_v29, %v4995_v61  ;;  %v5072_v6 = vmul.f32 %v4993_v9, %v10998_v5 }
0x131a   : > { %v4863_v53 = vpop.xlane.xlu0 %4862 }
0x131b   : > { %v4997_v17 = vmul.f32 0.5, %v4996_v13  ;;  %v4883_v52 = vmul.f32 %v4863_v53, %v12220_v3  ;;  %v5091_v26 = vmul.f32 %v10902_v57, %v5072_v6 }
0x131d   : > { %v4998_v11 = vsub.f32 1.5, %v4997_v17  ;;  %v4899_v16 = vadd.f32 1e-05, %v4883_v52  ;;  %v5110_v5 = vadd.f32 %v10909_v40, %v5091_v26 }
0x131e   : > { %v7865_v58 = vpop.eup %7864 }
0x131f   : > { %v4999_v43 = vmul.f32 %v7863_v29, %v4998_v11  ;;  %v5005_v49 = vmul.f32 %v7865_v58, %v4898_v24  ;;  %7866 = vrsqrt.f32 %v4899_v16  ;;  %vm5011_vm4 = vweird.f32 %v7865_v58 }
0x1320   : > { %vm5012_vm0 = vmor %vm5010_vm5, %vm5011_vm4  ;;  %vm5020_vm7 = vweird.f32 %v4899_v16 }
0x1321   : > { %v5003_v44 = vsel %vm5002_vm3, %v7863_v29, %v4999_v43  ;;  %v5006_v22 = vmul.f32 %v7865_v58, %v5005_v49 }
0x1322   : > { %v5073_v55 = vmul.f32 %v5003_v44, %v11006_v35 }
0x1323   : > { %v5007_v32 = vmul.f32 0.5, %v5006_v22 }
0x1324   : > { %v5092_v41 = vmul.f32 %v10902_v57, %v5073_v55 }
0x1325   : > { %v7867_v54 = vpop.eup %7866  ;;  %v5008_v37 = vsub.f32 1.5, %v5007_v32 }
0x1326   : > { %v5111_v12 = vadd.f32 %v10909_v40, %v5092_v41  ;;  %v5015_v0 = vmul.f32 %v7867_v54, %v4899_v16  ;;  %vm5021_vm6 = vweird.f32 %v7867_v54 }
0x1327   : > { %v5009_v35 = vmul.f32 %v7865_v58, %v5008_v37  ;;  %vm5022_vm8 = vmor %vm5020_vm7, %vm5021_vm6  ;;  %v5435_v37 = vpop.f32.mrf.mxu0 }
0x1328   : > { %v5122_v7 = vpack.c.bf16 %v5111_v12, %v5110_v5  ;;  %v5016_v14 = vmul.f32 %v7867_v54, %v5015_v0  ;;  %v5337_v5 = vpop.f32.mrf.mxu2  ;;  %v5158_v0 = vld [vmem:[%s12080_s12] sm:$0xf] }
0x1329   : > { %v5013_v21 = vsel %vm5012_vm0, %v7865_v58, %v5009_v35  ;;  %v5386_v35 = vpop.f32.mrf.mxu3 }
0x132a   : > { %5356 = vmatmul.bf16.gmra.mxu2 %v5122_v7  ;;  %5405 = vmatmul.bf16.gmra.mxu3 %v5122_v7  ;;  %v5017_v30 = vmul.f32 0.5, %v5016_v14  ;;  %v5074_v36 = vmul.f32 %v5013_v21, %v11017_v19 }
0x132b   : > { %5454 = vmatmul.bf16.gmra.mxu0 %v5122_v7  ;;  %5503 = vmatmul.bf16.gmra.mxu1 %v5122_v7 }
0x132c   : > { %v5018_v10 = vsub.f32 1.5, %v5017_v30  ;;  %v5093_v61 = vmul.f32 %v10902_v57, %v5074_v36  ;;  %v5484_v30 = vpop.f32.mrf.mxu1 }
0x132e   : > { %v5019_v28 = vmul.f32 %v7867_v54, %v5018_v10  ;;  %v5112_v13 = vadd.f32 %v10909_v40, %v5093_v61  ;;  %v11091_v10 = vperm.slane %v5158_v0, 2 }
0x1330   : > { %v5023_v1 = vsel %vm5022_vm8, %v7867_v54, %v5019_v28  ;;  %v5339_v36 = vpop.f32.mrf.mxu2  ;;  %v11098_v28 = vadd.f32 %v5435_v37, %v11091_v10 }
0x1331   : > { %v5075_v39 = vmul.f32 %v5023_v1, %v11026_v31  ;;  %v11100_v1 = vperm.slane %v5158_v0, 1  ;;  %v5388_v61 = vpop.f32.mrf.mxu3 }
0x1333   : > { %v5094_v48 = vmul.f32 %v10902_v57, %v5075_v39  ;;  %v5437_v39 = vpop.f32.mrf.mxu0 }
0x1335   : > { %v5113_v23 = vadd.f32 %v10909_v40, %v5094_v48  ;;  %v11113_v48 = vadd.f32 %v5386_v35, %v11100_v1 }
0x1336   : > { %v4865_v15 = vpop.xlane.xlu2 %4864 }
0x1337   : > { %v4884_v29 = vmul.f32 %v4865_v15, %v12220_v3  ;;  %v5123_v19 = vpack.c.bf16 %v5113_v23, %v5112_v13  ;;  %v11116_v13 = vadd.f32 %v5437_v39, %v11091_v10  ;;  %v5486_v23 = vpop.f32.mrf.mxu1 }
0x1339   : > { %v4900_v4 = vadd.f32 1e-05, %v4884_v29 }
0x133a   : > { %5361 = vmatmul.bf16.gmra.mxu2 %v5123_v19  ;;  %5410 = vmatmul.bf16.gmra.mxu3 %v5123_v19 }
0x133b   : > { %7868 = vrsqrt.f32 %v4900_v4  ;;  %5459 = vmatmul.bf16.gmra.mxu0 %v5123_v19  ;;  %5508 = vmatmul.bf16.gmra.mxu1 %v5123_v19  ;;  %vm5030_vm10 = vweird.f32 %v4900_v4 }
0x133e   : > { %v4867_v17 = vpop.xlane.xlu1 %4866 }
0x133f   : > { %v4885_v24 = vmul.f32 %v4867_v17, %v12220_v3 }
0x1341   : > { %v7869_v9 = vpop.eup %7868  ;;  %v4901_v31 = vadd.f32 1e-05, %v4885_v24  ;;  %v11121_v24 = vadd.f32 %v5388_v61, %v11100_v1 }
0x1342   : > { %v5025_v11 = vmul.f32 %v7869_v9, %v4900_v4  ;;  %vm5031_vm9 = vweird.f32 %v7869_v9  ;;  %v5590_v4 = vmul.f32 0.044715, %v11098_v28 }
0x1343   : > { %7870 = vrsqrt.f32 %v4901_v31  ;;  %vm5032_vm11 = vmor %vm5030_vm10, %vm5031_vm9  ;;  %vm5040_vm13 = vweird.f32 %v4901_v31 }
0x1344   : > { %v5026_v6 = vmul.f32 %v7869_v9, %v5025_v11  ;;  %v5589_v11 = vmul.f32 0.044715, %v11113_v48 }
0x1346   : > { %v5027_v43 = vmul.f32 0.5, %v5026_v6 }
0x1348   : > { %v5028_v53 = vsub.f32 1.5, %v5027_v43  ;;  %v5594_v43 = vmul.f32 0.044715, %v11116_v13 }
0x1349   : > { %v7871_v52 = vpop.eup %7870 }
0x134a   : > { %v5029_v44 = vmul.f32 %v7869_v9, %v5028_v53  ;;  %v5035_v55 = vmul.f32 %v7871_v52, %v4901_v31  ;;  %vm5041_vm12 = vweird.f32 %v7871_v52  ;;  %v5654_v31 = vmul.f32 %v5590_v4, %v11098_v28 }
0x134b   : > { %vm5042_vm14 = vmor %vm5040_vm13, %vm5041_vm12 }
0x134c   : > { %v5036_v16 = vmul.f32 %v7871_v52, %v5035_v55  ;;  %v5033_v58 = vsel %vm5032_vm11, %v7869_v9, %v5029_v44  ;;  %v5593_v44 = vmul.f32 0.044715, %v11121_v24 }
0x134d   : > { %v5076_v41 = vmul.f32 %v5033_v58, %v11039_v20  ;;  %v5653_v58 = vmul.f32 %v5589_v11, %v11113_v48 }
0x134e   : > { %v5037_v26 = vmul.f32 0.5, %v5036_v16  ;;  %v5718_v16 = vmul.f32 %v5654_v31, %v11098_v28 }
0x134f   : > { %v5095_v7 = vmul.f32 %v10902_v57, %v5076_v41  ;;  %v5658_v41 = vmul.f32 %v5594_v43, %v11116_v13 }
0x1350   : > { %v5038_v49 = vsub.f32 1.5, %v5037_v26  ;;  %v5782_v37 = vadd.f32 %v5718_v16, %v11098_v28 }
0x1351   : > { %v5114_v14 = vadd.f32 %v10909_v40, %v5095_v7  ;;  %v5391_v7 = vpop.f32.mrf.mxu3 }
0x1352   : > { %v5039_v22 = vmul.f32 %v7871_v52, %v5038_v49  ;;  %v5342_v49 = vpop.f32.mrf.mxu2 }
0x1354   : > { %v5043_v12 = vsel %vm5042_vm14, %v7871_v52, %v5039_v22 }
0x1355   : > { %v5077_v32 = vmul.f32 %v5043_v12, %v11048_v27  ;;  %v11093_v27 = vperm.slane %v5158_v0, 3  ;;  %v5657_v12 = vmul.f32 %v5593_v44, %v11121_v24 }
0x1357   : > { %v5096_v54 = vmul.f32 %v10902_v57, %v5077_v32  ;;  %v11095_v57 = vperm.slane %v5158_v0, 0  ;;  %v11106_v15 = vadd.f32 %v5484_v30, %v11093_v27  ;;  %v11127_v6 = vadd.f32 %v5486_v23, %v11093_v27  ;;  %v5489_v23 = vpop.f32.mrf.mxu1 }
0x1358   : > { %v5717_v0 = vmul.f32 %v5653_v58, %v11113_v48  ;;  %v5722_v30 = vmul.f32 %v5658_v41, %v11116_v13  ;;  %v5721_v39 = vmul.f32 %v5657_v12, %v11121_v24  ;;  %v11166_v12 = vadd.f32 %v5391_v7, %v11100_v1 }
0x1359   : > { %v5115_v20 = vadd.f32 %v10909_v40, %v5096_v54  ;;  %v11103_v40 = vadd.f32 %v5339_v36, %v11095_v57  ;;  %v11109_v29 = vadd.f32 %v5337_v5, %v11095_v57  ;;  %v5591_v17 = vmul.f32 0.044715, %v11106_v15 }
0x135a   : > { %v5595_v26 = vmul.f32 0.044715, %v11127_v6  ;;  %v5786_v31 = vadd.f32 %v5722_v30, %v11116_v13 }
0x135b   : > { %v5124_v21 = vpack.c.bf16 %v5115_v20, %v5114_v14  ;;  %v5592_v19 = vmul.f32 0.044715, %v11103_v40  ;;  %v5588_v9 = vmul.f32 0.044715, %v11109_v29  ;;  %v5655_v52 = vmul.f32 %v5591_v17, %v11106_v15  ;;  %v5440_v14 = vpop.f32.mrf.mxu0 }
0x135c   : > { %v5659_v35 = vmul.f32 %v5595_v26, %v11127_v6  ;;  %v5781_v17 = vadd.f32 %v5717_v0, %v11113_v48  ;;  %v5850_v26 = vmul.f32 0.7978846, %v5786_v31  ;;  %v11178_v0 = vmul.f32 0.5, %v11098_v28  ;;  %v7489_v31 = vld [vmem:[%s12081_s13 + $0xf0] sm:$0xff] }
0x135d   : > { %5366 = vmatmul.bf16.gmra.mxu2 %v5124_v21  ;;  %5415 = vmatmul.bf16.gmra.mxu3 %v5124_v21  ;;  %v5656_v53 = vmul.f32 %v5592_v19, %v11103_v40  ;;  %v5652_v55 = vmul.f32 %v5588_v9, %v11109_v29  ;;  %v5719_v5 = vmul.f32 %v5655_v52, %v11106_v15  ;;  %v5846_v19 = vmul.f32 0.7978846, %v5782_v37  ;;  %v5344_v52 = vpop.f32.mrf.mxu2  ;;  %v7482_v37 = vld [vmem:[%s12081_s13 + $0xb8] sm:$0xff] }
0x135e   : > { %5464 = vmatmul.bf16.gmra.mxu0 %v5124_v21  ;;  %5513 = vmatmul.bf16.gmra.mxu1 %v5124_v21  ;;  %v5723_v9 = vmul.f32 %v5659_v35, %v11127_v6  ;;  %v5845_v16 = vmul.f32 0.7978846, %v5781_v17  ;;  %v11163_v41 = vadd.f32 %v5344_v52, %v11095_v57  ;;  %v11181_v35 = vmul.f32 0.5, %v11106_v15 }
0x135f   : > { %v5720_v22 = vmul.f32 %v5656_v53, %v11103_v40  ;;  %v5716_v32 = vmul.f32 %v5652_v55, %v11109_v29  ;;  %v5783_v36 = vadd.f32 %v5719_v5, %v11106_v15  ;;  %v5785_v53 = vadd.f32 %v5721_v39, %v11121_v24  ;;  %v7465_v15 = vld [vmem:[%s12081_s13 + $0x30] sm:$0xff]  ;;  %6490 = vmatpush.bf16.msrb.mxu0 %v7482_v37  ;;  %v7480_v37 = vld [vmem:[%s12081_s13 + $0xa8] sm:$0xff] }
0x1360   : > { %v11159_v55 = vadd.f32 %v5342_v49, %v11095_v57  ;;  %v5787_v58 = vadd.f32 %v5723_v9, %v11127_v6  ;;  %v7466_v49 = vld [vmem:[%s12081_s13 + $0x38] sm:$0xff]  ;;  %v7473_v39 = vld [vmem:[%s12081_s13 + $0x70] sm:$0xff]  ;;  %v5600_v17 = vmul.f32 0.044715, %v11163_v41  ;;  %v11222_v52 = vmul.f32 0.5, %v11116_v13  ;;  %v7464_v13 = vld [vmem:[%s12081_s13 + $0x28] sm:$0xff] }
0x1361   : > { %v5784_v21 = vadd.f32 %v5720_v22, %v11103_v40  ;;  %v5780_v4 = vadd.f32 %v5716_v32, %v11109_v29  ;;  %v5847_v43 = vmul.f32 0.7978846, %v5783_v36  ;;  %v5393_v22 = vpop.f32.mrf.mxu3  ;;  %v5849_v5 = vmul.f32 0.7978846, %v5785_v53  ;;  %6392 = vmatpush.bf16.msra.mxu2 %v7466_v49  ;;  %v7481_v9 = vld [vmem:[%s12081_s13 + $0xb0] sm:$0xff] }
0x1362   : > { %v5596_v7 = vmul.f32 0.044715, %v11159_v55  ;;  %v5851_v36 = vmul.f32 0.7978846, %v5787_v58  ;;  %v11193_v28 = vadd.f32 %v5393_v22, %v11100_v1 }
0x1363   : > { %v5848_v11 = vmul.f32 0.7978846, %v5784_v21  ;;  %v5844_v44 = vmul.f32 0.7978846, %v5780_v4  ;;  %v5442_v32 = vpop.f32.mrf.mxu0  ;;  %v11190_v21 = vmul.f32 0.5, %v11109_v29  ;;  %v11202_v4 = vadd.f32 %v5440_v14, %v11091_v10  ;;  %6491 = vmatpush.bf16.msrb.mxu0 %v7481_v9 }
0x1364   : > { %v11205_v29 = vadd.f32 %v5489_v23, %v11093_v27  ;;  %v11215_v14 = vmul.f32 0.5, %v11113_v48  ;;  %v5597_v23 = vmul.f32 0.044715, %v11166_v12 }
0x1365   : > { %6393 = vmatpush.bf16.msra.mxu2 %v7465_v15  ;;  %v5598_v49 = vmul.f32 0.044715, %v11202_v4 }
0x1366   : > { %v5661_v15 = vmul.f32 %v5597_v23, %v11166_v12 }
0x1367   : > { %6492 = vmatpush.bf16.msrb.mxu0 %v7480_v37 }
0x1368   : > { %v5725_v37 = vmul.f32 %v5661_v15, %v11166_v12  ;;  %v7470_v15 = vld [vmem:[%s12081_s13 + $0x58] sm:$0xff] }
0x1369   : > { %6394 = vmatpush.bf16.msra.mxu2 %v7464_v13 }
0x1370   : > { %v4869_v54 = vpop.xlane.xlu0 %4868 }
0x1371   : > { %v4886_v20 = vmul.f32 %v4869_v54, %v12220_v3  ;;  %v7474_v54 = vld [vmem:[%s12081_s13 + $0x78] sm:$0xff] }
0x1372   : > { %6441 = vmatpush.bf16.msrb.mxu3 %v7474_v54  ;;  %v5664_v54 = vmul.f32 %v5600_v17, %v11163_v41 }
0x1373   : > { %v11150_v61 = vadd.f32 1e-05, %v4886_v20  ;;  %v7490_v20 = vld [vmem:[%s12081_s13 + $0xf8] sm:$0xff] }
0x1374   : > { %6539 = vmatpush.bf16.msrb.mxu1 %v7490_v20 }
0x1375   : > { %7872 = vrsqrt.f32 %v11150_v61  ;;  %vm5050_vm1 = vweird.f32 %v11150_v61 }
0x1376   : > { %7874 = vtanh.f32 %v5846_v19  ;;  %v5491_v19 = vpop.f32.mrf.mxu1  ;;  %6442 = vmatpush.bf16.msrb.mxu3 %v7473_v39 }
0x1377   : > { %7876 = vtanh.f32 %v5848_v11  ;;  %v11232_v22 = vadd.f32 %v5491_v19, %v11093_v27  ;;  %v11253_v19 = vpop.f32.mrf.mxu0 }
0x1378   : > { %7878 = vtanh.f32 %v5847_v43  ;;  %v11219_v43 = vadd.f32 %v5442_v32, %v11091_v10  ;;  %6540 = vmatpush.bf16.msrb.mxu1 %v7489_v31 }
0x1379   : > { %7880 = vtanh.f32 %v5844_v44  ;;  %v11225_v44 = vmul.f32 0.5, %v11127_v6  ;;  %v7472_v6 = vld [vmem:[%s12081_s13 + $0x68] sm:$0xff]  ;;  %v5603_v59 = vmul.f32 0.044715, %v11232_v22 }
0x137a   : > { %7882 = vtanh.f32 %v5845_v16  ;;  %v5660_v16 = vmul.f32 %v5596_v7, %v11159_v55  ;;  %v7488_v7 = vld [vmem:[%s12081_s13 + $0xe8] sm:$0xff]  ;;  %v5602_v39 = vmul.f32 0.044715, %v11219_v43  ;;  %6443 = vmatpush.bf16.msrb.mxu3 %v7472_v6 }
0x137b   : > { %v11187_v30 = vpop.eup %7872  ;;  %7884 = vtanh.f32 %v5850_v26  ;;  %v5528_v26 = vmul.f32 0.5, %v11103_v40  ;;  %v5599_v40 = vmul.f32 0.044715, %v11205_v29 }
0x137c   : > { %v7875_v11 = vpop.eup %7874  ;;  %7886 = vtanh.f32 %v5849_v5  ;;  %v5045_v58 = vmul.f32 %v11187_v30, %v11150_v61  ;;  %v5601_v5 = vmul.f32 0.044715, %v11193_v28  ;;  %v5724_v8 = vmul.f32 %v5660_v16, %v11159_v55  ;;  %6541 = vmatpush.bf16.msrb.mxu1 %v7488_v7  ;;  %v11283_v7 = vpop.f32.mrf.mxu3 }
0x137d   : > { %v7877_v53 = vpop.eup %7876  ;;  %7888 = vtanh.f32 %v5851_v36  ;;  %v5529_v36 = vmul.f32 0.5, %v11121_v24  ;;  %v5974_v31 = vadd.f32 1.0, %v7875_v11  ;;  %v7463_v11 = vld [vmem:[%s12081_s13 + $0x20] sm:$0xff]  ;;  %v5662_v16 = vmul.f32 %v5598_v49, %v11202_v4 }
0x137e   : > { %v7879_v48 = vpop.eup %7878  ;;  %v5976_v17 = vadd.f32 1.0, %v7877_v53  ;;  %v5046_v42 = vmul.f32 %v11187_v30, %v5045_v58  ;;  %v5665_v24 = vmul.f32 %v5601_v5, %v11193_v28  ;;  %v7471_v53 = vld [vmem:[%s12081_s13 + $0x60] sm:$0xff]  ;;  %v5728_v5 = vmul.f32 %v5664_v54, %v11163_v41  ;;  %6395 = vmatpush.bf16.msra.mxu2 %v7463_v11 }
0x137f   : > { %v7881_v32 = vpop.eup %7880  ;;  %v5975_v38 = vadd.f32 1.0, %v7879_v48  ;;  %v5663_v48 = vmul.f32 %v5599_v40, %v11205_v29  ;;  %v5666_v6 = vmul.f32 %v5602_v39, %v11219_v43  ;;  %v5788_v34 = vadd.f32 %v5724_v8, %v11159_v55  ;;  %6444 = vmatpush.bf16.msrb.mxu3 %v7471_v53  ;;  %v7486_v8 = vld [vmem:[%s12081_s13 + $0xd8] sm:$0xff] }
0x1380   : > { %v7883_v20 = vpop.eup %7882  ;;  %v5972_v62 = vadd.f32 1.0, %v7881_v32  ;;  %v11276_v32 = vpop.f32.mrf.mxu2  ;;  %v11280_v40 = vmul.f32 %v5976_v17, %v5528_v26  ;;  %v5667_v54 = vmul.f32 %v5603_v59, %v11232_v22  ;;  %v7462_v26 = vld [vmem:[%s12081_s13 + $0x18] sm:$0xff]  ;;  %v11308_v17 = vmul.f32 %v5974_v31, %v11178_v0 }
0x1381   : > { %v7885_v9 = vpop.eup %7884  ;;  %v5973_v58 = vadd.f32 1.0, %v7883_v20  ;;  %v5047_v20 = vmul.f32 0.5, %v5046_v42  ;;  %v7478_v59 = vld [vmem:[%s12081_s13 + $0x98] sm:$0xff]  ;;  %v5726_v11 = vmul.f32 %v5662_v16, %v11202_v4  ;;  %v5852_v0 = vmul.f32 0.7978846, %v5788_v34  ;;  %v11323_v31 = vpop.f32.mrf.mxu1  ;;  %v7461_v16 = vld [vmem:[%s12081_s13 + $0x10] sm:$0xff] }
0x1382   : > { %v7887_v46 = vpop.eup %7886  ;;  %v5978_v56 = vadd.f32 1.0, %v7885_v9  ;;  %v11295_v42 = vmul.f32 %v5972_v62, %v11190_v21  ;;  %v5792_v21 = vadd.f32 %v5728_v5, %v11163_v41  ;;  %6396 = vmatpush.bf16.msra.mxu2 %v7462_v26  ;;  %vm5051_vm15 = vweird.f32 %v11187_v30 }
0x1383   : > { %v7889_v13 = vpop.eup %7888  ;;  %v5977_v60 = vadd.f32 1.0, %v7887_v46  ;;  %v5729_v46 = vmul.f32 %v5665_v24, %v11193_v28  ;;  %v11305_v39 = vmul.f32 %v5973_v58, %v11215_v14  ;;  %v11314_v24 = vmul.f32 %v5975_v38, %v11181_v35  ;;  %v5447_v58 = vpop.f32.mrf.mxu0  ;;  %6445 = vmatpush.bf16.msrb.mxu3 %v7470_v15  ;;  %vm11369_vm2 = vmor %vm5050_vm1, %vm5051_vm15 }
0x1384   : > { %v4871_v2 = vpop.xlane.xlu2 %4870  ;;  %v5979_v62 = vadd.f32 1.0, %v7889_v13  ;;  %v5048_v53 = vsub.f32 1.5, %v5047_v20  ;;  %v11321_v14 = vmul.f32 %v5978_v56, %v11222_v52  ;;  %v5730_v38 = vmul.f32 %v5666_v6, %v11219_v43 }
0x1385   : > { %v4887_v23 = vmul.f32 %v4871_v2, %v12220_v3  ;;  %v7479_v3 = vld [vmem:[%s12081_s13 + $0xa0] sm:$0xff]  ;;  %v5727_v35 = vmul.f32 %v5663_v48, %v11205_v29  ;;  %v11332_v56 = vmul.f32 0.5, %v11159_v55  ;;  %v5856_v34 = vmul.f32 0.7978846, %v5792_v21  ;;  %v7469_v48 = vld [vmem:[%s12081_s13 + $0x50] sm:$0xff] }
0x1386   : > { %v7487_v2 = vld [vmem:[%s12081_s13 + $0xe0] sm:$0xff]  ;;  %6493 = vmatpush.bf16.msrb.mxu0 %v7479_v3  ;;  %v11318_v3 = vmul.f32 %v5977_v60, %v5529_v36  ;;  %v11329_v60 = vmul.f32 %v5979_v62, %v11225_v44  ;;  %v5731_v52 = vmul.f32 %v5667_v54, %v11232_v22  ;;  %v7477_v55 = vld [vmem:[%s12081_s13 + $0x90] sm:$0xff]  ;;  %v11348_v44 = vmul.f32 0.5, %v11163_v41  ;;  %6397 = vmatpush.bf16.msra.mxu2 %v7461_v16 }
0x1387   : > { %v11278_v49 = vadd.f32 1e-05, %v4887_v23  ;;  %6542 = vmatpush.bf16.msrb.mxu1 %v7487_v2  ;;  %v5789_v23 = vadd.f32 %v5725_v37, %v11166_v12  ;;  %v5793_v2 = vadd.f32 %v5729_v46, %v11193_v28  ;;  %v5790_v13 = vadd.f32 %v5726_v11, %v11202_v4  ;;  %v7485_v54 = vld [vmem:[%s12081_s13 + $0xd0] sm:$0xff]  ;;  %6446 = vmatpush.bf16.msrb.mxu3 %v7469_v48  ;;  %v7468_v11 = vld [vmem:[%s12081_s13 + $0x48] sm:$0xff] }
0x1388   : > { %v11352_v6 = vadd.f32 %v5447_v58, %v11091_v10  ;;  %v5049_v37 = vmul.f32 %v11187_v30, %v5048_v53  ;;  %v5349_v26 = vpop.f32.mrf.mxu2  ;;  %v5794_v15 = vadd.f32 %v5730_v38, %v11219_v43  ;;  %v5791_v46 = vadd.f32 %v5727_v35, %v11205_v29  ;;  %v7476_v53 = vld [vmem:[%s12081_s13 + $0x88] sm:$0xff] }
0x1389   : > { %7890 = vrsqrt.f32 %v11278_v49  ;;  %v5853_v5 = vmul.f32 0.7978846, %v5789_v23  ;;  %v5857_v41 = vmul.f32 0.7978846, %v5793_v2  ;;  %v5795_v21 = vadd.f32 %v5731_v52, %v11232_v22 }
0x138a   : > { %6494 = vmatpush.bf16.msrb.mxu0 %v7478_v59  ;;  %7892 = vtanh.f32 %v5852_v0  ;;  %v11365_v59 = vadd.f32 %v11253_v19, %v11091_v10  ;;  %v11377_v23 = vadd.f32 %v11276_v32, %v11095_v57  ;;  %v7460_v19 = vld [vmem:[%s12081_s13 + $0x8] sm:$0xff]  ;;  %v5854_v58 = vmul.f32 0.7978846, %v5790_v13 }
0x138b   : > { %6543 = vmatpush.bf16.msrb.mxu1 %v7486_v8  ;;  %v5398_v8 = vpop.f32.mrf.mxu3  ;;  %7894 = vtanh.f32 %v5856_v34  ;;  %v11392_v32 = vadd.f32 %v11283_v7, %v11100_v1  ;;  %v5610_v2 = vmul.f32 0.044715, %v11352_v6  ;;  %v5053_v38 = vsel %vm11369_vm2, %v11187_v30, %v5049_v37  ;;  %v7484_v34 = vld [vmem:[%s12081_s13 + $0xc8] sm:$0xff]  ;;  %6398 = vmatpush.bf16.msra.mxu2 %v7460_v19  ;;  %v5496_v37 = vpop.f32.mrf.mxu1 }
0x138c   : > { %7896 = vtanh.f32 %v5853_v5  ;;  %v11402_v52 = vadd.f32 %v5349_v26, %v11095_v57  ;;  %6447 = vmatpush.bf16.msrb.mxu3 %v7468_v11  ;;  %v5858_v16 = vmul.f32 0.7978846, %v5794_v15  ;;  %v5855_v7 = vmul.f32 0.7978846, %v5791_v46  ;;  %v7467_v26 = vld [vmem:[%s12081_s13 + $0x40] sm:$0xff] }
0x138d   : > { %7898 = vtanh.f32 %v5857_v41  ;;  %v5859_v30 = vmul.f32 0.7978846, %v5795_v21  ;;  %v5604_v13 = vmul.f32 0.044715, %v11377_v23  ;;  %v7475_v41 = vld [vmem:[%s12081_s13 + $0x80] sm:$0xff]  ;;  %vm5060_vm4 = vweird.f32 %v11278_v49 }
0x138e   : > { %6495 = vmatpush.bf16.msrb.mxu0 %v7477_v55  ;;  %v5606_v55 = vmul.f32 0.044715, %v11365_v59  ;;  %7900 = vtanh.f32 %v5854_v58  ;;  %v5605_v62 = vmul.f32 0.044715, %v11392_v32  ;;  %v7483_v21 = vld [vmem:[%s12081_s13 + $0xc0] sm:$0xff]  ;;  %v12255_v50 = vpack.c.bf16 %v11329_v60, %v11314_v24 }
0x138f   : > { %v11335_v36 = vpop.eup %7890  ;;  %6544 = vmatpush.bf16.msrb.mxu1 %v7485_v54  ;;  %v7459_v54 = vld [vmem:[%s12081_s13] sm:$0xff]  ;;  %v5608_v11 = vmul.f32 0.044715, %v11402_v52  ;;  %7902 = vtanh.f32 %v5858_v16 }
0x1390   : > { %v5055_v20 = vmul.f32 %v11335_v36, %v11278_v49  ;;  %v7893_v48 = vpop.eup %7892  ;;  %vm5061_vm3 = vweird.f32 %v11335_v36  ;;  %6399 = vmatpush.bf16.msra.mxu2 %v7459_v54  ;;  %6448 = vmatpush.bf16.msrb.mxu3 %v7467_v26  ;;  %v5533_v49 = vmul.f32 0.5, %v11166_v12  ;;  %7904 = vtanh.f32 %v5859_v30  ;;  %v5352_v12 = vpop.f32.mrf.mxu2 }
0x1391   : > { %v7895_v46 = vpop.eup %7894  ;;  %vm11429_vm5 = vmor %vm5060_vm4, %vm5061_vm3  ;;  %v11445_v54 = vadd.f32 %v5398_v8, %v11100_v1  ;;  %v5669_v26 = vmul.f32 %v5605_v62, %v11392_v32  ;;  %7906 = vtanh.f32 %v5855_v7  ;;  %v5672_v8 = vmul.f32 %v5608_v11, %v11402_v52 }
0x1392   : > { %v5056_v61 = vmul.f32 %v11335_v36, %v5055_v20  ;;  %6496 = vmatpush.bf16.msrb.mxu0 %v7476_v53  ;;  %v5078_v20 = vmul.f32 %v5053_v38, %v11054_v18  ;;  %v5674_v18 = vmul.f32 %v5610_v2, %v11352_v6  ;;  %v7897_v19 = vpop.eup %7896  ;;  %v5670_v2 = vmul.f32 %v5606_v55, %v11365_v59  ;;  %v8010_v55 = vld [vmem:[%s12077_s9] ss:$0 sm:$0xff]  ;;  %v11458_v53 = vpop.f32.mrf.mxu0 }
0x1393   : > { %6545 = vmatpush.bf16.msrb.mxu1 %v7484_v34  ;;  %v7899_v34 = vpop.eup %7898  ;;  %v5539_v62 = vmul.f32 0.5, %v11232_v22  ;;  %v5609_v7 = vmul.f32 0.044715, %v11445_v54  ;;  %v5733_v22 = vmul.f32 %v5669_v26, %v11392_v32  ;;  %v11477_v15 = vpop.f32.mrf.mxu1 }
0x1394   : > { %v5057_v35 = vmul.f32 0.5, %v5056_v61  ;;  %v5738_v30 = vmul.f32 %v5674_v18, %v11352_v6  ;;  %v5734_v58 = vmul.f32 %v5670_v2, %v11365_v59  ;;  %v8011_v18 = vld [vmem:[%s12078_s10] ss:$0 sm:$0xff] }
0x1395   : > { %v5673_v26 = vmul.f32 %v5609_v7, %v11445_v54 }
0x1396   : > { %v5058_v5 = vsub.f32 1.5, %v5057_v35  ;;  %6497 = vmatpush.bf16.msrb.mxu0 %v7475_v41  ;;  %v11441_v35 = vmul.f32 0.5, %v11193_v28  ;;  %v11452_v41 = vpop.f32.mrf.mxu3  ;;  %v5534_v28 = vmul.f32 0.5, %v11202_v4  ;;  %v5802_v2 = vadd.f32 %v5738_v30, %v11352_v6 }
0x1397   : > { %6546 = vmatpush.bf16.msrb.mxu1 %v7483_v21  ;;  %v5984_v21 = vadd.f32 1.0, %v7895_v46 }
0x1398   : > { %v5059_v61 = vmul.f32 %v11335_v36, %v5058_v5  ;;  %v5668_v5 = vmul.f32 %v5604_v13, %v11377_v23  ;;  %v7901_v13 = vpop.eup %7900 }
0x1399   : > { %v7903_v4 = vpop.eup %7902 }
0x139a   : > { %v5063_v38 = vsel %vm11429_vm5, %v11335_v36, %v5059_v61  ;;  %v5097_v36 = vmul.f32 %v8010_v55, %v5078_v20  ;;  %v5535_v20 = vmul.f32 0.5, %v11205_v29  ;;  %v5981_v29 = vadd.f32 1.0, %v7897_v19 }
0x139b   : > { %v5079_v16 = vmul.f32 %v5063_v38, %v11061_v63  ;;  %v5538_v63 = vmul.f32 0.5, %v11219_v43  ;;  %v5980_v38 = vadd.f32 1.0, %v7893_v48  ;;  %v5732_v43 = vmul.f32 %v5668_v5, %v11377_v23 }
0x139c   : > { %v5116_v11 = vadd.f32 %v8011_v18, %v5097_v36  ;;  %v11470_v48 = vadd.f32 %v11323_v31, %v11093_v27  ;;  %v11480_v36 = vmul.f32 %v5984_v21, %v11348_v44  ;;  %v5736_v5 = vmul.f32 %v5672_v8, %v11402_v52  ;;  %v5354_v21 = vpop.f32.mrf.mxu2 }
0x139d   : > { %v5098_v61 = vmul.f32 %v8010_v55, %v5079_v16  ;;  %v7905_v16 = vpop.eup %7904  ;;  %v11475_v55 = vadd.f32 %v5496_v37, %v11093_v27  ;;  %v5982_v31 = vadd.f32 1.0, %v7901_v13  ;;  %v5986_v9 = vadd.f32 1.0, %v7903_v4 }
0x139e   : > { %v5798_v19 = vadd.f32 %v5734_v58, %v11365_v59  ;;  %v11486_v37 = vmul.f32 %v5980_v38, %v11332_v56  ;;  %v5987_v30 = vadd.f32 1.0, %v7905_v16  ;;  %v5607_v44 = vmul.f32 0.044715, %v11470_v48  ;;  %v5403_v7 = vpop.f32.mrf.mxu3 }
0x139f   : > { %v5117_v46 = vadd.f32 %v8011_v18, %v5098_v61  ;;  %v7907_v61 = vpop.eup %7906  ;;  %v5985_v18 = vadd.f32 1.0, %v7899_v34  ;;  %v11490_v8 = vmul.f32 %v5981_v29, %v5533_v49  ;;  %v5797_v34 = vadd.f32 %v5733_v22, %v11392_v32 }
0x13a0   : > { %v5866_v13 = vmul.f32 0.7978846, %v5802_v2  ;;  %v5611_v58 = vmul.f32 0.044715, %v11475_v55  ;;  %v5983_v56 = vadd.f32 1.0, %v7907_v61  ;;  %v5800_v38 = vadd.f32 %v5736_v5, %v11402_v52  ;;  %v5452_v5 = vpop.f32.mrf.mxu0 }
0x13a1   : > { %v5125_v0 = vpack.c.bf16 %v5117_v46, %v5116_v11  ;;  %v5796_v11 = vadd.f32 %v5732_v43, %v11377_v23  ;;  %v11498_v46 = vmul.f32 %v5985_v18, %v11441_v35  ;;  %v11500_v43 = vmul.f32 %v5982_v31, %v5534_v28 }
0x13a2   : > { %v5862_v49 = vmul.f32 0.7978846, %v5798_v19  ;;  %v11505_v16 = vadd.f32 %v5352_v12, %v11095_v57  ;;  %v11507_v29 = vmul.f32 %v5987_v30, %v5539_v62  ;;  %v5737_v2 = vmul.f32 %v5673_v26, %v11445_v54  ;;  %v5501_v26 = vpop.f32.mrf.mxu1 }
0x13a3   : > { %5371 = vmatmul.bf16.gmra.mxu2 %v5125_v0  ;;  %5420 = vmatmul.bf16.gmra.mxu3 %v5125_v0  ;;  %v5860_v22 = vmul.f32 0.7978846, %v5796_v11  ;;  %v5671_v61 = vmul.f32 %v5607_v44, %v11470_v48  ;;  %v11512_v4 = vadd.f32 %v5354_v21, %v11095_v57  ;;  %v5861_v35 = vmul.f32 0.7978846, %v5797_v34 }
0x13a4   : > { %5469 = vmatmul.bf16.gmra.mxu0 %v5125_v0  ;;  %5518 = vmatmul.bf16.gmra.mxu1 %v5125_v0  ;;  %v11502_v0 = vmul.f32 %v5986_v9, %v5538_v63  ;;  %7908 = vtanh.f32 %v5866_v13  ;;  %v5675_v9 = vmul.f32 %v5611_v58, %v11475_v55  ;;  %v11516_v28 = vadd.f32 %v5403_v7, %v11100_v1 }
0x13a5   : > { %v11518_v12 = vmul.f32 %v5983_v56, %v5535_v20  ;;  %v5864_v63 = vmul.f32 0.7978846, %v5800_v38  ;;  %v11522_v62 = vadd.f32 %v11452_v41, %v11100_v1  ;;  %7910 = vtanh.f32 %v5862_v49 }
0x13a6   : > { %v5612_v19 = vmul.f32 0.044715, %v11505_v16  ;;  %7912 = vtanh.f32 %v5860_v22  ;;  %v5801_v20 = vadd.f32 %v5737_v2, %v11445_v54  ;;  %v5616_v11 = vmul.f32 0.044715, %v11512_v4 }
0x13a7   : > { %7914 = vtanh.f32 %v5861_v35  ;;  %v5542_v41 = vmul.f32 0.5, %v11365_v59  ;;  %v5735_v44 = vmul.f32 %v5671_v61, %v11470_v48  ;;  %v5617_v34 = vmul.f32 0.044715, %v11516_v28 }
0x13a8   : > { %7916 = vtanh.f32 %v5864_v63  ;;  %v11537_v13 = vmul.f32 0.5, %v11470_v48  ;;  %v5739_v58 = vmul.f32 %v5675_v9, %v11475_v55  ;;  %v11542_v56 = vadd.f32 %v11458_v53, %v11091_v10 }
0x13a9   : > { %v11546_v38 = vadd.f32 %v11477_v15, %v11093_v27  ;;  %v5613_v59 = vmul.f32 0.044715, %v11522_v62  ;;  %v5540_v7 = vmul.f32 0.5, %v11377_v23  ;;  %v5676_v49 = vmul.f32 %v5612_v19, %v11505_v16  ;;  %v5455_v15 = vpop.f32.mrf.mxu0 }
0x13aa   : > { %v7909_v21 = vpop.eup %7908  ;;  %v11552_v22 = vadd.f32 %v5452_v5, %v11091_v10  ;;  %v5541_v2 = vmul.f32 0.5, %v11392_v32  ;;  %v5865_v61 = vmul.f32 0.7978846, %v5801_v20  ;;  %v11556_v53 = vadd.f32 %v5501_v26, %v11093_v27 }
0x13ab   : > { %v7911_v35 = vpop.eup %7910  ;;  %v5680_v9 = vmul.f32 %v5616_v11, %v11512_v4  ;;  %v5546_v63 = vmul.f32 0.5, %v11352_v6  ;;  %v5799_v30 = vadd.f32 %v5735_v44, %v11470_v48  ;;  %v5681_v19 = vmul.f32 %v5617_v34, %v11516_v28  ;;  %v5504_v44 = vpop.f32.mrf.mxu1 }
0x13ac   : > { %v7913_v23 = vpop.eup %7912  ;;  %v5994_v31 = vadd.f32 1.0, %v7909_v21  ;;  %v11563_v5 = vmul.f32 0.5, %v11475_v55  ;;  %v5803_v32 = vadd.f32 %v5739_v58, %v11475_v55  ;;  %v5614_v26 = vmul.f32 0.044715, %v11542_v56 }
0x13ad   : > { %v7915_v20 = vpop.eup %7914  ;;  %v5615_v18 = vmul.f32 0.044715, %v11546_v38  ;;  %v5677_v11 = vmul.f32 %v5613_v59, %v11522_v62  ;;  %v5544_v6 = vmul.f32 0.5, %v11402_v52  ;;  %v5618_v48 = vmul.f32 0.044715, %v11552_v22  ;;  %v5357_v45 = vpop.f32.mrf.mxu2 }
0x13ae   : > { %v7917_v33 = vpop.eup %7916  ;;  %v12252_v34 = vpack.c.bf16 %v11280_v40, %v11295_v42  ;;  %v12253_v55 = vpack.c.bf16 %v11318_v3, %v11305_v39  ;;  %7918 = vtanh.f32 %v5865_v61  ;;  %v5990_v58 = vadd.f32 1.0, %v7911_v35 }
0x13af   : > { %v5740_v21 = vmul.f32 %v5676_v49, %v11505_v16  ;;  %v5619_v59 = vmul.f32 0.044715, %v11556_v53  ;;  %v12254_v52 = vpack.c.bf16 %v11321_v14, %v11308_v17  ;;  %v5988_v40 = vadd.f32 1.0, %v7913_v23 }
0x13b0   : > { %v5863_v42 = vmul.f32 0.7978846, %v5799_v30  ;;  %v5744_v39 = vmul.f32 %v5680_v9, %v11512_v4  ;;  %v5989_v3 = vadd.f32 1.0, %v7915_v20  ;;  %v11586_v61 = vmul.f32 %v5994_v31, %v5546_v63 }
0x13b1   : > { %v5867_v35 = vmul.f32 0.7978846, %v5803_v32  ;;  %v5745_v49 = vmul.f32 %v5681_v19, %v11516_v28  ;;  %v5992_v51 = vadd.f32 1.0, %v7917_v33  ;;  %v11591_v17 = vmul.f32 0.5, %v11445_v54 }
0x13b2   : > { %v5741_v24 = vmul.f32 %v5677_v11, %v11522_v62  ;;  %v5682_v14 = vmul.f32 %v5618_v48, %v11552_v22  ;;  %v11596_v60 = vmul.f32 %v5990_v58, %v5542_v41  ;;  %v5804_v31 = vadd.f32 %v5740_v21, %v11505_v16  ;;  %v5457_v41 = vpop.f32.mrf.mxu0 }
0x13b3   : > { %6400 = vmatmul.bf16.vlgmr.msra.gmra.mxu2 %v12252_v34  ;;  %6449 = vmatmul.bf16.vlgmr.msrb.gmra.mxu3 %v12253_v55  ;;  %v5678_v34 = vmul.f32 %v5614_v26, %v11542_v56  ;;  %v5406_v55 = vpop.f32.mrf.mxu3  ;;  %v5683_v30 = vmul.f32 %v5619_v59, %v11556_v53  ;;  %v11600_v9 = vmul.f32 %v5988_v40, %v5540_v7  ;;  %7920 = vtanh.f32 %v5863_v42  ;;  %v5506_v59 = vpop.f32.mrf.mxu1 }
0x13b4   : > { %6498 = vmatmul.bf16.vlgmr.msrb.gmra.mxu0 %v12254_v52  ;;  %6547 = vmatmul.bf16.vlgmr.msrb.gmra.mxu1 %v12255_v50  ;;  %v5679_v50 = vmul.f32 %v5615_v18, %v11546_v38  ;;  %v5808_v33 = vadd.f32 %v5744_v39, %v11512_v4  ;;  %v7919_v63 = vpop.eup %7918  ;;  %v11603_v54 = vmul.f32 %v5989_v3, %v5541_v2  ;;  %7922 = vtanh.f32 %v5867_v35 }
0x13b5   : > { %v6110_v23 = vpack.c.bf16 %v11586_v61, %v11596_v60  ;;  %v5809_v18 = vadd.f32 %v5745_v49, %v11516_v28  ;;  %v11608_v19 = vmul.f32 %v5992_v51, %v5544_v6  ;;  %v11611_v32 = vmul.f32 0.5, %v11505_v16 }
0x13b6   : > { %v5805_v7 = vadd.f32 %v5741_v24, %v11522_v62  ;;  %v5742_v20 = vmul.f32 %v5678_v34, %v11542_v56  ;;  %v11616_v26 = vadd.f32 %v5455_v15, %v11091_v10  ;;  %v11619_v2 = vmul.f32 0.5, %v11512_v4 }
0x13b7   : > { %v5868_v11 = vmul.f32 0.7978846, %v5804_v31  ;;  %v5746_v48 = vmul.f32 %v5682_v14, %v11552_v22  ;;  %v11623_v58 = vadd.f32 %v5504_v44, %v11093_v27  ;;  %v5993_v51 = vadd.f32 1.0, %v7919_v63  ;;  %v5359_v44 = vpop.f32.mrf.mxu2 }
0x13b8   : > { %v5872_v6 = vmul.f32 0.7978846, %v5808_v33  ;;  %v5743_v16 = vmul.f32 %v5679_v50, %v11546_v38  ;;  %v11627_v21 = vadd.f32 %v5457_v41, %v11091_v10  ;;  %v11630_v15 = vmul.f32 0.5, %v11522_v62 }
0x13b9   : > { %v5873_v52 = vmul.f32 0.7978846, %v5809_v18  ;;  %v5747_v4 = vmul.f32 %v5683_v30, %v11556_v53  ;;  %v7921_v40 = vpop.eup %7920  ;;  %v11634_v42 = vadd.f32 %v5357_v45, %v11095_v57  ;;  %v6108_v39 = vpack.c.bf16 %v11608_v19, %v11600_v9 }
0x13ba   : > { %v5869_v3 = vmul.f32 0.7978846, %v5805_v7  ;;  %v5806_v35 = vadd.f32 %v5742_v20, %v11542_v56  ;;  %v7923_v49 = vpop.eup %7922  ;;  %v5622_v34 = vmul.f32 0.044715, %v11616_v26  ;;  %v11641_v62 = vadd.f32 %v5406_v55, %v11100_v1 }
0x13bb   : > { %7924 = vtanh.f32 %v5868_v11  ;;  %v5810_v24 = vadd.f32 %v5746_v48, %v11552_v22  ;;  %v5623_v50 = vmul.f32 0.044715, %v11623_v58  ;;  %v11646_v45 = vadd.f32 %v5506_v59, %v11093_v27  ;;  %v5408_v14 = vpop.f32.mrf.mxu3 }
0x13bc   : > { %7926 = vtanh.f32 %v5872_v6  ;;  %v5807_v31 = vadd.f32 %v5743_v16, %v11546_v38  ;;  %v5626_v30 = vmul.f32 0.044715, %v11627_v21  ;;  %v11651_v33 = vadd.f32 %v5359_v44, %v11095_v57 }
0x13bd   : > { %7928 = vtanh.f32 %v5873_v52  ;;  %v5811_v55 = vadd.f32 %v5747_v4, %v11556_v53  ;;  %v5620_v63 = vmul.f32 0.044715, %v11634_v42  ;;  %v11656_v18 = vmul.f32 0.5, %v11516_v28 }
0x13be   : > { %7930 = vtanh.f32 %v5869_v3  ;;  %v5870_v41 = vmul.f32 0.7978846, %v5806_v35  ;;  %v5686_v7 = vmul.f32 %v5622_v34, %v11616_v26  ;;  %v5621_v20 = vmul.f32 0.044715, %v11641_v62 }
0x13bf   : > { %v11661_v11 = vadd.f32 %v5408_v14, %v11100_v1  ;;  %v12256_v48 = vpack.c.bf16 %v11480_v36, %v11486_v37  ;;  %v12257_v6 = vpack.c.bf16 %v11498_v46, %v11490_v8  ;;  %v5874_v16 = vmul.f32 0.7978846, %v5810_v24  ;;  %v11690_v14 = vpop.f32.mrf.mxu0 }
0x13c0   : > { %v5687_v28 = vmul.f32 %v5623_v50, %v11623_v58  ;;  %v5627_v59 = vmul.f32 0.044715, %v11646_v45  ;;  %v12258_v52 = vpack.c.bf16 %v11502_v0, %v11500_v43  ;;  %v12259_v4 = vpack.c.bf16 %v11507_v29, %v11518_v12 }
0x13c1   : > { %v11678_v36 = vmul.f32 %v5993_v51, %v11591_v17  ;;  %v5871_v37 = vmul.f32 0.7978846, %v5807_v31  ;;  %v7925_v44 = vpop.eup %7924  ;;  %v5690_v8 = vmul.f32 %v5626_v30, %v11627_v21  ;;  %v5624_v46 = vmul.f32 0.044715, %v11651_v33 }
0x13c2   : > { %v5991_v3 = vadd.f32 1.0, %v7921_v40  ;;  %v5875_v35 = vmul.f32 0.7978846, %v5811_v55  ;;  %v7927_v34 = vpop.eup %7926  ;;  %v5684_v24 = vmul.f32 %v5620_v63, %v11634_v42  ;;  %v5995_v43 = vadd.f32 1.0, %v7923_v49  ;;  %v11697_v63 = vpop.f32.mrf.mxu1 }
0x13c3   : > { %6405 = vmatmul.bf16.gmra.mxu2 %v12256_v48  ;;  %6454 = vmatmul.bf16.gmra.mxu3 %v12257_v6  ;;  %v11684_v0 = vmul.f32 0.5, %v11542_v56  ;;  %7932 = vtanh.f32 %v5870_v41  ;;  %v7929_v29 = vpop.eup %7928  ;;  %v5685_v12 = vmul.f32 %v5621_v20, %v11641_v62  ;;  %v5625_v17 = vmul.f32 0.044715, %v11661_v11  ;;  %v5362_v41 = vpop.f32.mrf.mxu2 }
0x13c4   : > { %6503 = vmatmul.bf16.gmra.mxu0 %v12258_v52  ;;  %6552 = vmatmul.bf16.gmra.mxu1 %v12259_v4  ;;  %7934 = vtanh.f32 %v5874_v16  ;;  %v5750_v51 = vmul.f32 %v5686_v7, %v11616_v26  ;;  %v7931_v50 = vpop.eup %7930  ;;  %v5691_v40 = vmul.f32 %v5627_v59, %v11646_v45  ;;  %v6109_v49 = vpack.c.bf16 %v11678_v36, %v11603_v54  ;;  %v5411_v16 = vpop.f32.mrf.mxu3 }
0x13c5   : > { %7936 = vtanh.f32 %v5871_v37  ;;  %v5751_v56 = vmul.f32 %v5687_v28, %v11623_v58  ;;  %v5688_v31 = vmul.f32 %v5624_v46, %v11651_v33  ;;  %v6000_v30 = vadd.f32 1.0, %v7927_v34 }
0x13c6   : > { %7938 = vtanh.f32 %v5875_v35  ;;  %v5754_v55 = vmul.f32 %v5690_v8, %v11627_v21  ;;  %v6055_v7 = vmul.f32 %v5991_v3, %v11537_v13  ;;  %v6059_v20 = vmul.f32 %v5995_v43, %v11563_v5 }
0x13c7   : > { %v6001_v48 = vadd.f32 1.0, %v7929_v29  ;;  %v5748_v6 = vmul.f32 %v5684_v24, %v11634_v42  ;;  %v5689_v54 = vmul.f32 %v5625_v17, %v11661_v11  ;;  %v5996_v28 = vadd.f32 1.0, %v7925_v44 }
0x13c8   : > { %v5749_v59 = vmul.f32 %v5685_v12, %v11641_v62  ;;  %v5814_v52 = vadd.f32 %v5750_v51, %v11616_v26  ;;  %v5997_v36 = vadd.f32 1.0, %v7931_v50  ;;  %v5554_v37 = vmul.f32 0.5, %v11552_v22 }
0x13c9   : > { %v7933_v4 = vpop.eup %7932  ;;  %v5755_v8 = vmul.f32 %v5691_v40, %v11646_v45  ;;  %v5815_v13 = vadd.f32 %v5751_v56, %v11623_v58  ;;  %v11709_v46 = vmul.f32 %v6000_v30, %v11619_v2  ;;  %v5551_v3 = vmul.f32 0.5, %v11546_v38 }
0x13ca   : > { %v7935_v5 = vpop.eup %7934  ;;  %v5752_v44 = vmul.f32 %v5688_v31, %v11651_v33  ;;  %v5818_v35 = vadd.f32 %v5754_v55, %v11627_v21  ;;  %v6111_v24 = vpack.c.bf16 %v6059_v20, %v6055_v7  ;;  %v11715_v43 = vmul.f32 %v6001_v48, %v11656_v18  ;;  %v5462_v55 = vpop.f32.mrf.mxu0 }
0x13cb   : > { %v7937_v34 = vpop.eup %7936  ;;  %v5555_v22 = vmul.f32 0.5, %v11556_v53  ;;  %v5812_v29 = vadd.f32 %v5748_v6, %v11634_v42  ;;  %v11720_v17 = vmul.f32 %v5996_v28, %v11611_v32  ;;  %v5753_v2 = vmul.f32 %v5689_v54, %v11661_v11 }
0x13cc   : > { %v7939_v12 = vpop.eup %7938  ;;  %v5813_v38 = vadd.f32 %v5749_v59, %v11641_v62  ;;  %v5878_v51 = vmul.f32 0.7978846, %v5814_v52  ;;  %v11725_v50 = vmul.f32 %v5997_v36, %v11630_v15  ;;  %v5998_v40 = vadd.f32 1.0, %v7933_v4  ;;  %v5511_v52 = vpop.f32.mrf.mxu1 }
0x13cd   : > { %v5819_v18 = vadd.f32 %v5755_v8, %v11646_v45  ;;  %v5879_v56 = vmul.f32 0.7978846, %v5815_v13  ;;  %v6112_v53 = vpack.c.bf16 %v11709_v46, %v11720_v17  ;;  %v6002_v31 = vadd.f32 1.0, %v7935_v5  ;;  %v5364_v4 = vpop.f32.mrf.mxu2 }
0x13ce   : > { %v5816_v30 = vadd.f32 %v5752_v44, %v11651_v33  ;;  %v5882_v32 = vmul.f32 0.7978846, %v5818_v35  ;;  %v6113_v7 = vpack.c.bf16 %v11715_v43, %v11725_v50  ;;  %v5999_v20 = vadd.f32 1.0, %v7937_v34 }
0x13cf   : > { %v6003_v48 = vadd.f32 1.0, %v7939_v12  ;;  %v5876_v6 = vmul.f32 0.7978846, %v5812_v29  ;;  %v11734_v15 = vadd.f32 %v5362_v41, %v11095_v57  ;;  %v5817_v54 = vadd.f32 %v5753_v2, %v11661_v11 }
0x13d0   : > { %v5877_v28 = vmul.f32 0.7978846, %v5813_v38  ;;  %7940 = vtanh.f32 %v5878_v51  ;;  %v11741_v59 = vadd.f32 %v5411_v16, %v11100_v1  ;;  %v11747_v41 = vmul.f32 %v5998_v40, %v11684_v0 }
0x13d1   : > { %v5883_v9 = vmul.f32 0.7978846, %v5819_v18  ;;  %7942 = vtanh.f32 %v5879_v56  ;;  %v11750_v19 = vadd.f32 %v5462_v55, %v11091_v10  ;;  %v5880_v16 = vmul.f32 0.7978846, %v5816_v30 }
0x13d2   : > { %7944 = vtanh.f32 %v5882_v32  ;;  %v11756_v36 = vadd.f32 %v11690_v14, %v11091_v10  ;;  %v11758_v61 = vmul.f32 %v5999_v20, %v5551_v3  ;;  %v11760_v60 = vmul.f32 %v6003_v48, %v5555_v22 }
0x13d3   : > { %6410 = vmatmul.bf16.gmra.mxu2 %v6108_v39  ;;  %6459 = vmatmul.bf16.gmra.mxu3 %v6109_v49  ;;  %v5413_v39 = vpop.f32.mrf.mxu3  ;;  %v11752_v49 = vmul.f32 %v6002_v31, %v5554_v37  ;;  %7946 = vtanh.f32 %v5876_v6  ;;  %v11764_v0 = vadd.f32 %v5364_v4, %v11095_v57  ;;  %v5881_v8 = vmul.f32 0.7978846, %v5817_v54 }
0x13d4   : > { %6508 = vmatmul.bf16.gmra.mxu0 %v6110_v23  ;;  %6557 = vmatmul.bf16.gmra.mxu1 %v6111_v24  ;;  %v5628_v23 = vmul.f32 0.044715, %v11734_v15  ;;  %7948 = vtanh.f32 %v5877_v28  ;;  %v11768_v37 = vadd.f32 %v11697_v63, %v11093_v27  ;;  %v5629_v13 = vmul.f32 0.044715, %v11741_v59 }
0x13d5   : > { %v11772_v14 = vadd.f32 %v5413_v39, %v11100_v1  ;;  %7950 = vtanh.f32 %v5883_v9  ;;  %v5634_v3 = vmul.f32 0.044715, %v11750_v19  ;;  %v11776_v44 = vadd.f32 %v5511_v52, %v11093_v27 }
0x13d6   : > { %v7941_v5 = vpop.eup %7940  ;;  %v6114_v35 = vpack.c.bf16 %v11752_v49, %v11747_v41  ;;  %7952 = vtanh.f32 %v5880_v16  ;;  %v5630_v63 = vmul.f32 0.044715, %v11756_v36  ;;  %v6115_v24 = vpack.c.bf16 %v11760_v60, %v11758_v61 }
0x13d7   : > { %v7943_v34 = vpop.eup %7942  ;;  %v5558_v22 = vmul.f32 0.5, %v11616_v26  ;;  %v5559_v29 = vmul.f32 0.5, %v11623_v58  ;;  %v5692_v2 = vmul.f32 %v5628_v23, %v11734_v15  ;;  %v5632_v38 = vmul.f32 0.044715, %v11764_v0 }
0x13d8   : > { %v7945_v12 = vpop.eup %7944  ;;  %v5556_v51 = vmul.f32 0.5, %v11634_v42  ;;  %7954 = vtanh.f32 %v5881_v8  ;;  %v5631_v18 = vmul.f32 0.044715, %v11768_v37  ;;  %v5693_v56 = vmul.f32 %v5629_v13, %v11741_v59 }
0x13d9   : > { %v7947_v40 = vpop.eup %7946  ;;  %v5633_v31 = vmul.f32 0.044715, %v11772_v14  ;;  %v6006_v26 = vadd.f32 1.0, %v7941_v5  ;;  %v5698_v55 = vmul.f32 %v5634_v3, %v11750_v19  ;;  %v5635_v20 = vmul.f32 0.044715, %v11776_v44 }
0x13da   : > { %v7949_v58 = vpop.eup %7948  ;;  %v5557_v48 = vmul.f32 0.5, %v11641_v62  ;;  %v6007_v42 = vadd.f32 1.0, %v7943_v34  ;;  %v5694_v54 = vmul.f32 %v5630_v63, %v11756_v36  ;;  %v5562_v28 = vmul.f32 0.5, %v11627_v21 }
0x13db   : > { %v5465_v30 = vpop.f32.mrf.mxu0  ;;  %v11791_v32 = vpop.f32.mrf.mxu1  ;;  %v6010_v52 = vadd.f32 1.0, %v7945_v12  ;;  %v5563_v4 = vmul.f32 0.5, %v11646_v45  ;;  %v5696_v9 = vmul.f32 %v5632_v38, %v11764_v0  ;;  %v5560_v39 = vmul.f32 0.5, %v11651_v33 }
0x13dc   : > { %v7951_v6 = vpop.eup %7950  ;;  %v6004_v49 = vadd.f32 1.0, %v7947_v40  ;;  %v5756_v16 = vmul.f32 %v5692_v2, %v11734_v15  ;;  %v5695_v61 = vmul.f32 %v5631_v18, %v11768_v37  ;;  %v5697_v62 = vmul.f32 %v5633_v31, %v11772_v14 }
0x13dd   : > { %v7953_v41 = vpop.eup %7952  ;;  %v11804_v60 = vmul.f32 %v6006_v26, %v5558_v22  ;;  %v5757_v23 = vmul.f32 %v5693_v56, %v11741_v59  ;;  %v5699_v8 = vmul.f32 %v5635_v20, %v11776_v44  ;;  %v6005_v5 = vadd.f32 1.0, %v7949_v58 }
0x13de   : > { %v7955_v21 = vpop.eup %7954  ;;  %v11808_v3 = vmul.f32 %v6007_v42, %v5559_v29  ;;  %v5762_v33 = vmul.f32 %v5698_v55, %v11750_v19  ;;  %v6008_v34 = vadd.f32 1.0, %v7953_v41  ;;  %v11811_v63 = vmul.f32 %v6010_v52, %v5562_v28 }
0x13df   : > { %v6011_v12 = vadd.f32 1.0, %v7951_v6  ;;  %v5758_v2 = vmul.f32 %v5694_v54, %v11756_v36  ;;  %v11820_v22 = vmul.f32 %v6004_v49, %v5556_v51  ;;  %v5561_v29 = vmul.f32 0.5, %v11661_v11 }
0x13e0   : > { %v5367_v45 = vpop.f32.mrf.mxu2  ;;  %v5416_v13 = vpop.f32.mrf.mxu3  ;;  %v5760_v38 = vmul.f32 %v5696_v9, %v11764_v0  ;;  %v5820_v40 = vadd.f32 %v5756_v16, %v11734_v15  ;;  %v11826_v18 = vadd.f32 %v5465_v30, %v11091_v10  ;;  %v6009_v46 = vadd.f32 1.0, %v7955_v21 }
0x13e1   : > { %v5761_v17 = vmul.f32 %v5697_v62, %v11772_v14  ;;  %v5821_v43 = vadd.f32 %v5757_v23, %v11741_v59  ;;  %v11831_v50 = vadd.f32 %v5367_v45, %v11095_v57  ;;  %v5826_v11 = vadd.f32 %v5762_v33, %v11750_v19 }
0x13e2   : > { %v6072_v30 = vmul.f32 %v6008_v34, %v5560_v39  ;;  %v5824_v26 = vadd.f32 %v5760_v38, %v11764_v0  ;;  %v5884_v58 = vmul.f32 0.7978846, %v5820_v40  ;;  %v5822_v55 = vadd.f32 %v5758_v2, %v11756_v36 }
0x13e3   : > { %6415 = vmatmul.bf16.gmra.mxu2 %v6112_v53  ;;  %6464 = vmatmul.bf16.gmra.mxu3 %v6113_v7  ;;  %v5467_v56 = vpop.f32.mrf.mxu0  ;;  %v6069_v53 = vmul.f32 %v6005_v5, %v5557_v48  ;;  %v5763_v7 = vmul.f32 %v5699_v8, %v11776_v44  ;;  %v5516_v31 = vpop.f32.mrf.mxu1  ;;  %v5759_v20 = vmul.f32 %v5695_v61, %v11768_v37  ;;  %v5638_v48 = vmul.f32 0.044715, %v11826_v18 }
0x13e4   : > { %6513 = vmatmul.bf16.gmra.mxu0 %v6114_v35  ;;  %6562 = vmatmul.bf16.gmra.mxu1 %v6115_v24  ;;  %v11836_v51 = vadd.f32 %v5467_v56, %v11091_v10  ;;  %v6118_v35 = vpack.c.bf16 %v11811_v63, %v11804_v60  ;;  %v6075_v24 = vmul.f32 %v6011_v12, %v5563_v4  ;;  %v5885_v54 = vmul.f32 0.7978846, %v5821_v43 }
0x13e5   : > { %v6073_v42 = vmul.f32 %v6009_v46, %v5561_v29  ;;  %v5825_v6 = vadd.f32 %v5761_v17, %v11772_v14  ;;  %v5636_v28 = vmul.f32 0.044715, %v11831_v50  ;;  %v11847_v52 = vadd.f32 %v5516_v31, %v11093_v27 }
0x13e6   : > { %v5890_v9 = vmul.f32 0.7978846, %v5826_v11  ;;  %v5827_v39 = vadd.f32 %v5763_v7, %v11776_v44  ;;  %v11851_v49 = vadd.f32 %v5416_v13, %v11100_v1  ;;  %v5642_v16 = vmul.f32 0.044715, %v11836_v51 }
0x13e7   : > { %v11862_v60 = vadd.f32 %v11791_v32, %v11093_v27  ;;  %v5888_v23 = vmul.f32 0.7978846, %v5824_v26  ;;  %7956 = vtanh.f32 %v5884_v58  ;;  %v5823_v21 = vadd.f32 %v5759_v20, %v11768_v37 }
0x13e8   : > { %v5369_v41 = vpop.f32.mrf.mxu2  ;;  %v5418_v4 = vpop.f32.mrf.mxu3  ;;  %v5702_v8 = vmul.f32 %v5638_v48, %v11826_v18  ;;  %v5889_v5 = vmul.f32 0.7978846, %v5825_v6  ;;  %v5700_v33 = vmul.f32 %v5636_v28, %v11831_v50  ;;  %v5643_v34 = vmul.f32 0.044715, %v11847_v52 }
0x13e9   : > { %v11855_v61 = vadd.f32 %v5369_v41, %v11095_v57  ;;  %v11858_v62 = vadd.f32 %v5418_v4, %v11100_v1  ;;  %7958 = vtanh.f32 %v5885_v54  ;;  %v5891_v63 = vmul.f32 0.7978846, %v5827_v39 }
0x13ea   : > { %v5637_v32 = vmul.f32 0.044715, %v11851_v49  ;;  %v5706_v12 = vmul.f32 %v5642_v16, %v11836_v51  ;;  %v5886_v2 = vmul.f32 0.7978846, %v5822_v55  ;;  %7960 = vtanh.f32 %v5890_v9 }
0x13eb   : > { %v5640_v45 = vmul.f32 0.044715, %v11855_v61  ;;  %v5641_v13 = vmul.f32 0.044715, %v11858_v62  ;;  %v5639_v29 = vmul.f32 0.044715, %v11862_v60  ;;  %7962 = vtanh.f32 %v5888_v23 }
0x13ec   : > { %v5887_v40 = vmul.f32 0.7978846, %v5823_v21  ;;  %v6116_v46 = vpack.c.bf16 %v6072_v30, %v11820_v22  ;;  %7964 = vtanh.f32 %v5889_v5  ;;  %v5766_v17 = vmul.f32 %v5702_v8, %v11826_v18 }
0x13ed   : > { %v5704_v38 = vmul.f32 %v5640_v45, %v11855_v61  ;;  %v5705_v56 = vmul.f32 %v5641_v13, %v11858_v62  ;;  %v7957_v43 = vpop.eup %7956  ;;  %v5707_v11 = vmul.f32 %v5643_v34, %v11847_v52  ;;  %v6117_v7 = vpack.c.bf16 %v6073_v42, %v6069_v53 }
0x13ee   : > { %7966 = vtanh.f32 %v5891_v63  ;;  %v5764_v31 = vmul.f32 %v5700_v33, %v11831_v50  ;;  %v5701_v26 = vmul.f32 %v5637_v32, %v11851_v49  ;;  %v6119_v58 = vpack.c.bf16 %v6075_v24, %v11808_v3 }
0x13ef   : > { %7968 = vtanh.f32 %v5886_v2  ;;  %v5770_v55 = vmul.f32 %v5706_v12, %v11836_v51  ;;  %v7959_v20 = vpop.eup %7958  ;;  %v5703_v22 = vmul.f32 %v5639_v29, %v11862_v60  ;;  %v5768_v30 = vmul.f32 %v5704_v38, %v11855_v61 }
0x13f0   : > { %7970 = vtanh.f32 %v5887_v40  ;;  %v7961_v48 = vpop.eup %7960  ;;  %v5769_v53 = vmul.f32 %v5705_v56, %v11858_v62  ;;  %v5830_v42 = vadd.f32 %v5766_v17, %v11826_v18  ;;  %v5566_v3 = vmul.f32 0.5, %v11756_v36 }
0x13f1   : > { %v7963_v6 = vpop.eup %7962  ;;  %v5567_v24 = vmul.f32 0.5, %v11768_v37  ;;  %v5828_v54 = vadd.f32 %v5764_v31, %v11831_v50  ;;  %v5771_v28 = vmul.f32 %v5707_v11, %v11847_v52  ;;  %v5564_v4 = vmul.f32 0.5, %v11734_v15 }
0x13f2   : > { %v7965_v41 = vpop.eup %7964  ;;  %v5565_v9 = vmul.f32 0.5, %v11741_v59  ;;  %v5834_v39 = vadd.f32 %v5770_v55, %v11836_v51  ;;  %v5568_v23 = vmul.f32 0.5, %v11764_v0  ;;  %v5570_v36 = vmul.f32 0.5, %v11750_v19 }
0x13f3   : > { %6420 = vmatmul.bf16.gmra.mxu2 %v6116_v46  ;;  %6469 = vmatmul.bf16.gmra.mxu3 %v6117_v7  ;;  %v5832_v37 = vadd.f32 %v5768_v30, %v11855_v61  ;;  %v5767_v21 = vmul.f32 %v5703_v22, %v11862_v60  ;;  %v5569_v45 = vmul.f32 0.5, %v11772_v14  ;;  %v5571_v15 = vmul.f32 0.5, %v11776_v44 }
0x13f4   : > { %6518 = vmatmul.bf16.gmra.mxu0 %v6118_v35  ;;  %6567 = vmatmul.bf16.gmra.mxu1 %v6119_v58  ;;  %v5765_v35 = vmul.f32 %v5701_v26, %v11851_v49  ;;  %v7967_v16 = vpop.eup %7966  ;;  %v5833_v59 = vadd.f32 %v5769_v53, %v11858_v62  ;;  %v5894_v13 = vmul.f32 0.7978846, %v5830_v42  ;;  %v6016_v33 = vadd.f32 1.0, %v7963_v6 }
0x13f5   : > { %v7969_v8 = vpop.eup %7968  ;;  %v6017_v34 = vadd.f32 1.0, %v7965_v41  ;;  %v5892_v63 = vmul.f32 0.7978846, %v5828_v54  ;;  %v5835_v0 = vadd.f32 %v5771_v28, %v11847_v52  ;;  %v6018_v32 = vadd.f32 1.0, %v7961_v48 }
0x13f6   : > { %v7971_v5 = vpop.eup %7970  ;;  %v6019_v19 = vadd.f32 1.0, %v7967_v16  ;;  %v5829_v12 = vadd.f32 %v5765_v35, %v11851_v49  ;;  %v5898_v2 = vmul.f32 0.7978846, %v5834_v39  ;;  %v6012_v29 = vadd.f32 1.0, %v7957_v43 }
0x13f7   : > { %v6013_v38 = vadd.f32 1.0, %v7959_v20  ;;  %v5896_v40 = vmul.f32 0.7978846, %v5832_v37  ;;  %v5831_v14 = vadd.f32 %v5767_v21, %v11862_v60  ;;  %v6014_v44 = vadd.f32 1.0, %v7969_v8 }
0x13f8   : > { %v6015_v56 = vadd.f32 1.0, %v7971_v5  ;;  %v5897_v46 = vmul.f32 0.7978846, %v5833_v59  ;;  %7972 = vtanh.f32 %v5894_v13  ;;  %v6080_v17 = vmul.f32 %v6016_v33, %v5568_v23 }
0x13f9   : > { %v6081_v11 = vmul.f32 %v6017_v34, %v5569_v45  ;;  %7974 = vtanh.f32 %v5892_v63  ;;  %v5899_v7 = vmul.f32 0.7978846, %v5835_v0  ;;  %v6082_v31 = vmul.f32 %v6018_v32, %v5570_v36 }
0x13fa   : > { %v6083_v26 = vmul.f32 %v6019_v19, %v5571_v15  ;;  %v5893_v58 = vmul.f32 0.7978846, %v5829_v12  ;;  %7976 = vtanh.f32 %v5898_v2  ;;  %v6076_v55 = vmul.f32 %v6012_v29, %v5564_v4 }
0x13fb   : > { %v6077_v22 = vmul.f32 %v6013_v38, %v5565_v9  ;;  %7978 = vtanh.f32 %v5896_v40  ;;  %v5895_v43 = vmul.f32 0.7978846, %v5831_v14  ;;  %v6078_v20 = vmul.f32 %v6014_v44, %v5566_v3 }
0x13fc   : > { %v6079_v30 = vmul.f32 %v6015_v56, %v5567_v24  ;;  %7980 = vtanh.f32 %v5897_v46  ;;  %v6120_v48 = vpack.c.bf16 %v6080_v17, %v6076_v55  ;;  %v5576_v37 = vmul.f32 0.5, %v11855_v61 }
0x13fd   : > { %v6121_v53 = vpack.c.bf16 %v6081_v11, %v6077_v22  ;;  %7982 = vtanh.f32 %v5899_v7  ;;  %v6122_v6 = vpack.c.bf16 %v6082_v31, %v6078_v20  ;;  %v5577_v8 = vmul.f32 0.5, %v11858_v62 }
0x13fe   : > { %v7973_v42 = vpop.eup %7972  ;;  %v6123_v54 = vpack.c.bf16 %v6083_v26, %v6079_v30  ;;  %7984 = vtanh.f32 %v5893_v58  ;;  %v5578_v15 = vmul.f32 0.5, %v11836_v51  ;;  %v5579_v13 = vmul.f32 0.5, %v11847_v52 }
0x13ff   : > { %v7975_v28 = vpop.eup %7974  ;;  %7986 = vtanh.f32 %v5895_v43  ;;  %v6022_v59 = vadd.f32 1.0, %v7973_v42  ;;  %v5572_v33 = vmul.f32 0.5, %v11831_v50  ;;  %v5573_v63 = vmul.f32 0.5, %v11851_v49 }
0x1400   : > { %v7977_v41 = vpop.eup %7976  ;;  %v6020_v21 = vadd.f32 1.0, %v7975_v28  ;;  %v5574_v32 = vmul.f32 0.5, %v11826_v18  ;;  %v5575_v61 = vmul.f32 0.5, %v11862_v60 }
0x1401   : > { %v7979_v4 = vpop.eup %7978  ;;  %v6026_v23 = vadd.f32 1.0, %v7977_v41 }
0x1402   : > { %v7981_v9 = vpop.eup %7980  ;;  %v6024_v39 = vadd.f32 1.0, %v7979_v4  ;;  %v6084_v62 = vmul.f32 %v6020_v21, %v5572_v33  ;;  %v6086_v29 = vmul.f32 %v6022_v59, %v5574_v32 }
0x1403   : > { %6425 = vmatmul.bf16.gmra.mxu2 %v6120_v48  ;;  %6474 = vmatmul.bf16.gmra.mxu3 %v6121_v53  ;;  %v7983_v35 = vpop.eup %7982  ;;  %v6025_v16 = vadd.f32 1.0, %v7981_v9  ;;  %v6090_v19 = vmul.f32 %v6026_v23, %v5578_v15 }
0x1404   : > { %6523 = vmatmul.bf16.gmra.mxu0 %v6122_v6  ;;  %6572 = vmatmul.bf16.gmra.mxu1 %v6123_v54  ;;  %v7985_v3 = vpop.eup %7984  ;;  %v6027_v36 = vadd.f32 1.0, %v7983_v35  ;;  %v6088_v34 = vmul.f32 %v6024_v39, %v5576_v37 }
0x1405   : > { %v7987_v24 = vpop.eup %7986  ;;  %v6021_v45 = vadd.f32 1.0, %v7985_v3  ;;  %v6089_v0 = vmul.f32 %v6025_v16, %v5577_v8  ;;  %v6126_v52 = vpack.c.bf16 %v6090_v19, %v6086_v29 }
0x1406   : > { %v6023_v5 = vadd.f32 1.0, %v7987_v24  ;;  %v6091_v12 = vmul.f32 %v6027_v36, %v5579_v13  ;;  %v6124_v38 = vpack.c.bf16 %v6088_v34, %v6084_v62 }
0x1407   : > { %v6085_v2 = vmul.f32 %v6021_v45, %v5573_v63 }
0x1408   : > { %v6087_v51 = vmul.f32 %v6023_v5, %v5575_v61 }
0x1409   : > { %v6125_v40 = vpack.c.bf16 %v6089_v0, %v6085_v2  ;;  %v11967_v0 = vld [vmem:[%s12082_s14] ss:$0 sm:$0xff] }
0x140a   : > { %v6127_v14 = vpack.c.bf16 %v6091_v12, %v6087_v51 }
0x1413   : > { %6430 = vmatmul.bf16.gmra.mxu2 %v6124_v38  ;;  %6479 = vmatmul.bf16.gmra.mxu3 %v6125_v40 }
0x1414   : > { %6528 = vmatmul.bf16.gmra.mxu0 %v6126_v52  ;;  %6577 = vmatmul.bf16.gmra.mxu1 %v6127_v14 }
0x1421   : > { %v5470_v50 = vpop.f32.mrf.mxu0  ;;  %v5519_v49 = vpop.f32.mrf.mxu1 }
0x1422   : > { %v11913_v18 = vadd.f32 %v5470_v50, %v11091_v10  ;;  %v11916_v60 = vadd.f32 %v5519_v49, %v11093_v27 }
0x1424   : > { %v5646_v44 = vmul.f32 0.044715, %v11913_v18  ;;  %v5647_v56 = vmul.f32 0.044715, %v11916_v60 }
0x1426   : > { %v5710_v46 = vmul.f32 %v5646_v44, %v11913_v18  ;;  %v5711_v17 = vmul.f32 %v5647_v56, %v11916_v60  ;;  %v5372_v11 = vpop.f32.mrf.mxu2  ;;  %v5421_v7 = vpop.f32.mrf.mxu3 }
0x1427   : > { %v11923_v31 = vadd.f32 %v5372_v11, %v11095_v57  ;;  %v11926_v26 = vadd.f32 %v5421_v7, %v11100_v1 }
0x1428   : > { %v5774_v58 = vmul.f32 %v5710_v46, %v11913_v18  ;;  %v5775_v55 = vmul.f32 %v5711_v17, %v11916_v60 }
0x1429   : > { %v5644_v22 = vmul.f32 0.044715, %v11923_v31  ;;  %v5645_v43 = vmul.f32 0.044715, %v11926_v26  ;;  %v5472_v20 = vpop.f32.mrf.mxu0  ;;  %v5521_v30 = vpop.f32.mrf.mxu1 }
0x142a   : > { %v11933_v48 = vadd.f32 %v5472_v20, %v11091_v10  ;;  %v11936_v53 = vadd.f32 %v5521_v30, %v11093_v27  ;;  %v5838_v42 = vadd.f32 %v5774_v58, %v11913_v18  ;;  %v5839_v28 = vadd.f32 %v5775_v55, %v11916_v60 }
0x142b   : > { %v5708_v6 = vmul.f32 %v5644_v22, %v11923_v31  ;;  %v5709_v54 = vmul.f32 %v5645_v43, %v11926_v26  ;;  %v5582_v20 = vmul.f32 0.5, %v11913_v18 }
0x142c   : > { %v5650_v41 = vmul.f32 0.044715, %v11933_v48  ;;  %v5651_v4 = vmul.f32 0.044715, %v11936_v53  ;;  %v5902_v39 = vmul.f32 0.7978846, %v5838_v42 }
0x142d   : > { %v5772_v9 = vmul.f32 %v5708_v6, %v11923_v31  ;;  %v5773_v10 = vmul.f32 %v5709_v54, %v11926_v26  ;;  %v5903_v36 = vmul.f32 0.7978846, %v5839_v28  ;;  %v5586_v30 = vmul.f32 0.5, %v11933_v48 }
0x142e   : > { %v5714_v35 = vmul.f32 %v5650_v41, %v11933_v48  ;;  %v5715_v27 = vmul.f32 %v5651_v4, %v11936_v53  ;;  %v5374_v3 = vpop.f32.mrf.mxu2  ;;  %v5423_v24 = vpop.f32.mrf.mxu3  ;;  %7988 = vtanh.f32 %v5902_v39  ;;  %v5583_v41 = vmul.f32 0.5, %v11916_v60 }
0x142f   : > { %v11949_v16 = vadd.f32 %v5374_v3, %v11095_v57  ;;  %v11952_v23 = vadd.f32 %v5423_v24, %v11100_v1  ;;  %v5836_v37 = vadd.f32 %v5772_v9, %v11923_v31  ;;  %v5837_v45 = vadd.f32 %v5773_v10, %v11926_v26 }
0x1430   : > { %v5778_v21 = vmul.f32 %v5714_v35, %v11933_v48  ;;  %v5779_v8 = vmul.f32 %v5715_v27, %v11936_v53  ;;  %7990 = vtanh.f32 %v5903_v36  ;;  %v5587_v4 = vmul.f32 0.5, %v11936_v53 }
0x1431   : > { %v5648_v15 = vmul.f32 0.044715, %v11949_v16  ;;  %v5649_v59 = vmul.f32 0.044715, %v11952_v23  ;;  %v6499_v13 = vpop.f32.mrf.mxu0  ;;  %v6548_v5 = vpop.f32.mrf.mxu1  ;;  %v5900_v33 = vmul.f32 0.7978846, %v5836_v37 }
0x1432   : > { %v5842_v57 = vadd.f32 %v5778_v21, %v11933_v48  ;;  %v5843_v1 = vadd.f32 %v5779_v8, %v11936_v53  ;;  %v5901_v61 = vmul.f32 0.7978846, %v5837_v45 }
0x1433   : > { %v5712_v34 = vmul.f32 %v5648_v15, %v11949_v16  ;;  %v5713_v63 = vmul.f32 %v5649_v59, %v11952_v23  ;;  %7992 = vtanh.f32 %v5900_v33  ;;  %v5584_v15 = vmul.f32 0.5, %v11949_v16 }
0x1434   : > { %v5906_v32 = vmul.f32 0.7978846, %v5842_v57  ;;  %v5907_v19 = vmul.f32 0.7978846, %v5843_v1  ;;  %v7989_v40 = vpop.eup %7988  ;;  %v5585_v57 = vmul.f32 0.5, %v11952_v23 }
0x1435   : > { %v5776_v12 = vmul.f32 %v5712_v34, %v11949_v16  ;;  %v5777_v62 = vmul.f32 %v5713_v63, %v11952_v23  ;;  %v6030_v7 = vadd.f32 1.0, %v7989_v40 }
0x1436   : > { %v6401_v2 = vpop.f32.mrf.mxu2  ;;  %v6450_v29 = vpop.f32.mrf.mxu3  ;;  %7994 = vtanh.f32 %v5906_v32 }
0x1437   : > { %v6402_v51 = vadd.f32 %v11967_v0, %v6401_v2  ;;  %7996 = vtanh.f32 %v5907_v19  ;;  %v5840_v38 = vadd.f32 %v5776_v12, %v11949_v16  ;;  %v5841_v52 = vadd.f32 %v5777_v62, %v11952_v23  ;;  %v7991_v14 = vpop.eup %7990 }
0x1438   : > { %7998 = vtanh.f32 %v5901_v61  ;;  %v6031_v55 = vadd.f32 1.0, %v7991_v14  ;;  %v6094_v27 = vmul.f32 %v6030_v7, %v5582_v20  ;;  %v12260_v14 = vld [vmem:[#allocation14_spill] sm:$0xff] }
0x1439   : > { %v6451_v50 = vadd.f32 %v6450_v29, %v6402_v51  ;;  %v6501_v49 = vpop.f32.mrf.mxu0  ;;  %v6550_v44 = vpop.f32.mrf.mxu1  ;;  %v5904_v56 = vmul.f32 0.7978846, %v5840_v38  ;;  %v5905_v46 = vmul.f32 0.7978846, %v5841_v52 }
0x143a   : > { %v7993_v17 = vpop.eup %7992  ;;  %v6095_v24 = vmul.f32 %v6031_v55, %v5583_v41  ;;  %v12262_v41 = vld [vmem:[#allocation21_spill] sm:$0xff] }
0x143b   : > { %v6500_v11 = vadd.f32 %v6499_v13, %v6451_v50  ;;  %8000 = vtanh.f32 %v5904_v56  ;;  %v6028_v18 = vadd.f32 1.0, %v7993_v17 }
0x143c   : > { %v7995_v58 = vpop.eup %7994  ;;  %8002 = vtanh.f32 %v5905_v46 }
0x143d   : > { %v7997_v22 = vpop.eup %7996  ;;  %v6549_v43 = vadd.f32 %v6548_v5, %v6500_v11  ;;  %v6034_v42 = vadd.f32 1.0, %v7995_v58  ;;  %v5581_v5 = vmul.f32 0.5, %v11926_v26  ;;  %v12261_v58 = vld [vmem:[#allocation30_spill] sm:$0xff] }
0x143e   : > { %v7999_v6 = vpop.eup %7998  ;;  %v6403_v54 = vpop.f32.mrf.mxu2  ;;  %v6035_v9 = vadd.f32 1.0, %v7997_v22 }
0x143f   : > { %v6452_v28 = vpop.f32.mrf.mxu3  ;;  %v6588_v10 = vadd.f32 %v6549_v43, %v10569_v47  ;;  %v6404_v35 = vadd.f32 %v11967_v0, %v6403_v54  ;;  %v6098_v3 = vmul.f32 %v6034_v42, %v5586_v30  ;;  %v6029_v53 = vadd.f32 1.0, %v7999_v6 }
0x1440   : > { %v6099_v39 = vmul.f32 %v6035_v9, %v5587_v4  ;;  %v5580_v47 = vmul.f32 0.5, %v11923_v31 }
0x1441   : > { %v8001_v36 = vpop.eup %8000  ;;  %6604 = vst [vmem:[%s11983_s30] sm:$0xff] %v6588_v10  ;;  %v6453_v48 = vadd.f32 %v6452_v28, %v6404_v35  ;;  %v6504_v37 = vpop.f32.mrf.mxu0  ;;  %v6130_v21 = vpack.c.bf16 %v6098_v3, %v6094_v27  ;;  %v6093_v32 = vmul.f32 %v6029_v53, %v5581_v5 }
0x1442   : > { %v6553_v60 = vpop.f32.mrf.mxu1  ;;  %v8003_v8 = vpop.eup %8002  ;;  %v6131_v45 = vpack.c.bf16 %v6099_v39, %v6095_v24  ;;  %v6032_v59 = vadd.f32 1.0, %v8001_v36  ;;  %v6092_v33 = vmul.f32 %v6028_v18, %v5580_v47  ;;  %v12263_v36 = vld [vmem:[#allocation18_spill] sm:$0xff] }
0x1443   : > { %v6502_v13 = vadd.f32 %v6501_v49, %v6453_v48  ;;  %6533 = vmatmul.bf16.gmra.mxu0 %v6130_v21  ;;  %v6033_v1 = vadd.f32 1.0, %v8003_v8 }
0x1444   : > { %6582 = vmatmul.bf16.gmra.mxu1 %v6131_v45  ;;  %v6096_v34 = vmul.f32 %v6032_v59, %v5584_v15  ;;  %v12264_v59 = vld [vmem:[#allocation27_spill] sm:$0xff] }
0x1445   : > { %v6551_v63 = vadd.f32 %v6550_v44, %v6502_v13  ;;  %v6097_v19 = vmul.f32 %v6033_v1, %v5585_v57 }
0x1446   : > { %v6406_v61 = vpop.f32.mrf.mxu2  ;;  %v6128_v31 = vpack.c.bf16 %v6096_v34, %v6092_v33 }
0x1447   : > { %v6455_v12 = vpop.f32.mrf.mxu3  ;;  %v6589_v16 = vadd.f32 %v6551_v63, %v10585_v25  ;;  %v6407_v62 = vadd.f32 %v11967_v0, %v6406_v61  ;;  %v6129_v2 = vpack.c.bf16 %v6097_v19, %v6093_v32  ;;  %v12265_v61 = vld [vmem:[#allocation31_spill] sm:$0xff] }
0x1448   : > { %6435 = vmatmul.bf16.gmra.mxu2 %v6128_v31 }
0x1449   : > { %6605 = vst [vmem:[%s11983_s30 + $0x8] sm:$0xff] %v6589_v16  ;;  %v6456_v26 = vadd.f32 %v6455_v12, %v6407_v62  ;;  %6484 = vmatmul.bf16.gmra.mxu3 %v6129_v2  ;;  %v6506_v23 = vpop.f32.mrf.mxu0 }
0x144a   : > { %v6555_v29 = vpop.f32.mrf.mxu1 }
0x144b   : > { %v6505_v51 = vadd.f32 %v6504_v37, %v6456_v26 }
0x144d   : > { %v6554_v38 = vadd.f32 %v6553_v60, %v6505_v51 }
0x144e   : > { %v6408_v40 = vpop.f32.mrf.mxu2 }
0x144f   : > { %v6457_v52 = vpop.f32.mrf.mxu3  ;;  %v6590_v50 = vadd.f32 %v6554_v38, %v12260_v14  ;;  %v6409_v49 = vadd.f32 %v11967_v0, %v6408_v40  ;;  %v12266_v38 = vld [vmem:[#allocation33_spill] sm:$0xff] }
0x1451   : > { %6606 = vst [vmem:[%s11983_s30 + $0x10] sm:$0xff] %v6590_v50  ;;  %v6458_v25 = vadd.f32 %v6457_v52, %v6409_v49  ;;  %v6509_v44 = vpop.f32.mrf.mxu0 }
0x1452   : > { %v6558_v56 = vpop.f32.mrf.mxu1 }
0x1453   : > { %v6507_v46 = vadd.f32 %v6506_v23, %v6458_v25 }
0x1455   : > { %v6556_v17 = vadd.f32 %v6555_v29, %v6507_v46 }
0x1456   : > { %v6411_v11 = vpop.f32.mrf.mxu2 }
0x1457   : > { %v6460_v7 = vpop.f32.mrf.mxu3  ;;  %v6591_v55 = vadd.f32 %v6556_v17, %v12261_v58  ;;  %v6412_v22 = vadd.f32 %v11967_v0, %v6411_v11  ;;  %v12267_v17 = vld [vmem:[#allocation34_spill] sm:$0xff] }
0x1459   : > { %6607 = vst [vmem:[%s11983_s30 + $0x18] sm:$0xff] %v6591_v55  ;;  %v6461_v43 = vadd.f32 %v6460_v7, %v6412_v22  ;;  %v6511_v20 = vpop.f32.mrf.mxu0 }
0x145a   : > { %v6560_v30 = vpop.f32.mrf.mxu1 }
0x145b   : > { %v6510_v42 = vadd.f32 %v6509_v44, %v6461_v43 }
0x145d   : > { %v6559_v6 = vadd.f32 %v6558_v56, %v6510_v42  ;;  %v12268_v42 = vld [vmem:[#allocation20_spill] sm:$0xff] }
0x145e   : > { %v6413_v54 = vpop.f32.mrf.mxu2 }
0x145f   : > { %v6462_v28 = vpop.f32.mrf.mxu3  ;;  %v6592_v4 = vadd.f32 %v6559_v6, %v12262_v41  ;;  %v6414_v9 = vadd.f32 %v11967_v0, %v6413_v54 }
0x1461   : > { %6608 = vst [vmem:[%s11983_s30 + $0x20] sm:$0xff] %v6592_v4  ;;  %v6463_v10 = vadd.f32 %v6462_v28, %v6414_v9  ;;  %v6514_v35 = vpop.f32.mrf.mxu0 }
0x1462   : > { %v6563_v27 = vpop.f32.mrf.mxu1 }
0x1463   : > { %v6512_v3 = vadd.f32 %v6511_v20, %v6463_v10 }
0x1465   : > { %v6561_v24 = vadd.f32 %v6560_v30, %v6512_v3 }
0x1466   : > { %v6416_v39 = vpop.f32.mrf.mxu2 }
0x1467   : > { %v6465_v18 = vpop.f32.mrf.mxu3  ;;  %v6593_v48 = vadd.f32 %v6561_v24, %v12263_v36  ;;  %v6417_v37 = vadd.f32 %v11967_v0, %v6416_v39 }
0x1469   : > { %6609 = vst [vmem:[%s11983_s30 + $0x28] sm:$0xff] %v6593_v48  ;;  %v6466_v60 = vadd.f32 %v6465_v18, %v6417_v37  ;;  %v6516_v21 = vpop.f32.mrf.mxu0 }
0x146a   : > { %v6565_v53 = vpop.f32.mrf.mxu1 }
0x146b   : > { %v6515_v8 = vadd.f32 %v6514_v35, %v6466_v60 }
0x146d   : > { %v6564_v45 = vadd.f32 %v6563_v27, %v6515_v8  ;;  %v12269_v27 = vld [vmem:[#allocation22_spill] sm:$0xff] }
0x146e   : > { %v6418_v47 = vpop.f32.mrf.mxu2 }
0x146f   : > { %v6467_v15 = vpop.f32.mrf.mxu3  ;;  %v6594_v13 = vadd.f32 %v6564_v45, %v12264_v59  ;;  %v6419_v5 = vadd.f32 %v11967_v0, %v6418_v47 }
0x1471   : > { %6610 = vst [vmem:[%s11983_s30 + $0x30] sm:$0xff] %v6594_v13  ;;  %v6468_v57 = vadd.f32 %v6467_v15, %v6419_v5  ;;  %v6519_v1 = vpop.f32.mrf.mxu0 }
0x1472   : > { %v6568_v33 = vpop.f32.mrf.mxu1 }
0x1473   : > { %v6517_v34 = vadd.f32 %v6516_v21, %v6468_v57  ;;  %v12270_v21 = vld [vmem:[#allocation23_spill] sm:$0xff]  ;;  %v12271_v57 = vld [vmem:[#allocation24_spill] sm:$0xff] }
0x1475   : > { %v6566_v63 = vadd.f32 %v6565_v53, %v6517_v34 }
0x1476   : > { %v6421_v32 = vpop.f32.mrf.mxu2 }
0x1477   : > { %v6470_v19 = vpop.f32.mrf.mxu3  ;;  %v6595_v12 = vadd.f32 %v6566_v63, %v12265_v61  ;;  %v6422_v31 = vadd.f32 %v11967_v0, %v6421_v32 }
0x1479   : > { %6611 = vst [vmem:[%s11983_s30 + $0x38] sm:$0xff] %v6595_v12  ;;  %v6471_v16 = vadd.f32 %v6470_v19, %v6422_v31  ;;  %v6521_v62 = vpop.f32.mrf.mxu0 }
0x147a   : > { %v6570_v26 = vpop.f32.mrf.mxu1 }
0x147b   : > { %v6520_v2 = vadd.f32 %v6519_v1, %v6471_v16 }
0x147d   : > { %v6569_v23 = vadd.f32 %v6568_v33, %v6520_v2 }
0x147e   : > { %v6423_v29 = vpop.f32.mrf.mxu2 }
0x147f   : > { %v6472_v51 = vpop.f32.mrf.mxu3  ;;  %v6596_v40 = vadd.f32 %v6569_v23, %v12266_v38  ;;  %v6424_v52 = vadd.f32 %v11967_v0, %v6423_v29 }
0x1481   : > { %7380 = vst [vmem:[%s11983_s30 + $0x40] sm:$0xff] %v6596_v40  ;;  %v6473_v14 = vadd.f32 %v6472_v51, %v6424_v52  ;;  %v6524_v49 = vpop.f32.mrf.mxu0 }
0x1482   : > { %v6573_v44 = vpop.f32.mrf.mxu1 }
0x1483   : > { %v6522_v50 = vadd.f32 %v6521_v62, %v6473_v14  ;;  %v12272_v62 = vld [vmem:[#allocation15_spill] sm:$0xff]  ;;  %v12273_v14 = vld [vmem:[#allocation5_spill] sm:$0xff] }
0x1485   : > { %v6571_v25 = vadd.f32 %v6570_v26, %v6522_v50 }
0x1486   : > { %v6426_v56 = vpop.f32.mrf.mxu2 }
0x1487   : > { %v6475_v46 = vpop.f32.mrf.mxu3  ;;  %v6597_v11 = vadd.f32 %v6571_v25, %v12267_v17  ;;  %v6427_v7 = vadd.f32 %v11967_v0, %v6426_v56 }
0x1489   : > { %7381 = vst [vmem:[%s11983_s30 + $0x48] sm:$0xff] %v6597_v11  ;;  %v6476_v58 = vadd.f32 %v6475_v46, %v6427_v7  ;;  %v6526_v43 = vpop.f32.mrf.mxu0 }
0x148a   : > { %v6575_v28 = vpop.f32.mrf.mxu1 }
0x148b   : > { %v6525_v55 = vadd.f32 %v6524_v49, %v6476_v58 }
0x148d   : > { %v6574_v22 = vadd.f32 %v6573_v44, %v6525_v55 }
0x148e   : > { %v6428_v20 = vpop.f32.mrf.mxu2 }
0x148f   : > { %v6477_v30 = vpop.f32.mrf.mxu3  ;;  %v6598_v6 = vadd.f32 %v6574_v22, %v12268_v42  ;;  %v6429_v54 = vadd.f32 %v11967_v0, %v6428_v20 }
0x1491   : > { %7382 = vst [vmem:[%s11983_s30 + $0x50] sm:$0xff] %v6598_v6  ;;  %v6478_v41 = vadd.f32 %v6477_v30, %v6429_v54  ;;  %v6529_v39 = vpop.f32.mrf.mxu0 }
0x1492   : > { %v6578_v36 = vpop.f32.mrf.mxu1 }
0x1493   : > { %v6527_v4 = vadd.f32 %v6526_v43, %v6478_v41 }
0x1495   : > { %v6576_v9 = vadd.f32 %v6575_v28, %v6527_v4 }
0x1496   : > { %v6431_v10 = vpop.f32.mrf.mxu2 }
0x1497   : > { %v6480_v35 = vpop.f32.mrf.mxu3  ;;  %v6599_v3 = vadd.f32 %v6576_v9, %v12269_v27  ;;  %v6432_v24 = vadd.f32 %v11967_v0, %v6431_v10 }
0x1499   : > { %7383 = vst [vmem:[%s11983_s30 + $0x58] sm:$0xff] %v6599_v3  ;;  %v6481_v18 = vadd.f32 %v6480_v35, %v6432_v24  ;;  %v6531_v15 = vpop.f32.mrf.mxu0 }
0x149a   : > { %v6580_v13 = vpop.f32.mrf.mxu1 }
0x149b   : > { %v6530_v48 = vadd.f32 %v6529_v39, %v6481_v18 }
0x149d   : > { %v6579_v37 = vadd.f32 %v6578_v36, %v6530_v48 }
0x149e   : > { %v6433_v60 = vpop.f32.mrf.mxu2 }
0x149f   : > { %v6600_v53 = vadd.f32 %v6579_v37, %v12270_v21  ;;  %v6434_v8 = vadd.f32 %v11967_v0, %v6433_v60  ;;  %v6482_v45 = vpop.f32.mrf.mxu3 }
0x14a1   : > { %7384 = vst [vmem:[%s11983_s30 + $0x60] sm:$0xff] %v6600_v53  ;;  %v6483_v47 = vadd.f32 %v6482_v45, %v6434_v8 }
0x14a3   : > { %v6532_v59 = vadd.f32 %v6531_v15, %v6483_v47 }
0x14a5   : > { %v6581_v5 = vadd.f32 %v6580_v13, %v6532_v59 }
0x14a7   : > { %v6601_v1 = vadd.f32 %v6581_v5, %v12271_v57 }
0x14a9   : > { %7385 = vst [vmem:[%s11983_s30 + $0x68] sm:$0xff] %v6601_v1 }
0x14c0   : > { %v6534_v32 = vpop.f32.mrf.mxu0 }
0x14c1   : > { %v6583_v61 = vpop.f32.mrf.mxu1 }
0x14c8   : > { %v6536_v51 = vpop.f32.mrf.mxu0 }
0x14c9   : > { %v6585_v40 = vpop.f32.mrf.mxu1 }
0x14cb   : > { %v6436_v33 = vpop.f32.mrf.mxu2 }
0x14cc   : > { %v6437_v34 = vadd.f32 %v11967_v0, %v6436_v33  ;;  %v6485_v63 = vpop.f32.mrf.mxu3 }
0x14ce   : > { %v6486_v19 = vadd.f32 %v6485_v63, %v6437_v34 }
0x14d0   : > { %v6535_v12 = vadd.f32 %v6534_v32, %v6486_v19 }
0x14d2   : > { %v6584_v31 = vadd.f32 %v6583_v61, %v6535_v12 }
0x14d3   : > { %v6438_v16 = vpop.f32.mrf.mxu2 }
0x14d4   : > { %v6602_v2 = vadd.f32 %v6584_v31, %v12272_v62  ;;  %v6439_v26 = vadd.f32 %v11967_v0, %v6438_v16  ;;  %v6487_v23 = vpop.f32.mrf.mxu3 }
0x14d6   : > { %7386 = vst [vmem:[%s11983_s30 + $0x70] sm:$0xff] %v6602_v2  ;;  %v6488_v29 = vadd.f32 %v6487_v23, %v6439_v26 }
0x14d8   : > { %v6537_v38 = vadd.f32 %v6536_v51, %v6488_v29 }
0x14da   : > { %v6586_v52 = vadd.f32 %v6585_v40, %v6537_v38 }
0x14dc   : > { %v6603_v50 = vadd.f32 %v6586_v52, %v12273_v14 }
0x14de   : > { %7387 = vst [vmem:[%s11983_s30 + $0x78] sm:$0xff] %v6603_v50 }
0x14df   : > { %8039 = shalt.err (!%p8036_p3)
}
0x14e0   : > { %s8080_s3 = smov 128   ;;  %s8081_s30 = smov 8  }
0x14e1   : > { %7501 = dma.vmem_to_hbm [thread:$0]  (%p8200_p5), %s6636_s0, 2048, %s6638_s23, %s6622_s22, %s8080_s3, %s8080_s3, %s8081_s30  }
0x14e2 PF: > { %p7507_p4 = scmp.ge.s32.totalorder %s8074_s21, 2  ;;  %s6652_s26 = sand.u32 1, %s8062_s18  }
0x14e3   : > { %s6653_s2 = scalar_lea.sflag [#allocation3], %s6652_s26 }
0x14e4   : > { %p7504_p7 = pnand %p7507_p4, %p8204_p6 }
0x14e6   : > { %p7505_p8 = pneg %p7504_p7 }
0x14e8   : > { %8057 = dma.done.wait (%p7505_p8), %s6653_s2, 2048  }
0x14e9   : > { %8059 = vsyncadd (%p7505_p8), %s6653_s2, 4294965248  ;;  %p25_p9 = scmp.ge.s32.totalorder %s8187_s24, 4   ;;  %s12274_s18 = smov %s8066_s19 }
0x14ea   : > { %s12275_s19 = smov %s8070_s20  ;;  %s12276_s20 = smov %s8198_s27 }
0x14eb   : > { %s12277_s21 = smov %s8187_s24  ;;  %27 = sbr.rel (!%p25_p9) target bundleno = 9 (0x9), region = 117 }
0x14f0   :  { %6659 = vsyncpa [#allocation3], 1 }
0x14f1   :  { %6661 = vsyncpa [#allocation3 + $0x1], 1 }

</bundles_post_ra>
